<compile_context>
chip_gen: v6e
topology: v6e:2x2x1
jax: 0.10.0
libtpu: 0.0.40
codegen_flags: <defaults>
</compile_context>

<pallas_src>
import functools

import jax
import jax.numpy as jnp
import numpy as np
from jax import lax
from jax.experimental import pallas as pl
from jax.experimental.pallas import tpu as pltpu

# Internal layout constants: channel dims are zero-padded to a lane-dense 128.
# Input channels are padded to 32 so the space-to-depth stem transform
# (x4 channels) lands exactly on 128.
CIN_PAD = 32
CPAD = 128


def _vmem_limit_bytes():
    """Scoped-VMEM cap: ~half of physical VMEM (64 MiB on v5e/v6e, 32 MiB on v7x)."""
    try:
        cap = int(pltpu.get_tpu_info().vmem_capacity_bytes)
        return int(min(96 << 20, max(32 << 20, cap // 2)))
    except Exception:
        return 32 << 20


_VMEM_LIMIT = _vmem_limit_bytes()


# --------------------------------------------------------------------------
# Stride-1 KxK conv as kh*kw shifted sub-matmuls (no HBM im2col)
# --------------------------------------------------------------------------
def _conv_taps_kernel(x_ref, w_ref, b_ref, o_ref, *, taps, relu):
    # x_ref : (1, ROWS, Cin) flattened padded input (row r = h*WP + w)
    # taps  : static row offsets (i*WP + j), one per kernel tap
    # Accumulate in a LOCAL f32 value (init = first tap's dot), store once.
    pg = o_ref.shape[1]
    acc = jnp.dot(x_ref[0, taps[0]:taps[0] + pg, :], w_ref[0],
                  preferred_element_type=jnp.float32)
    for t in range(1, len(taps)):
        off = taps[t]
        acc = acc + jnp.dot(x_ref[0, off:off + pg, :], w_ref[t],
                            preferred_element_type=jnp.float32)
    out = acc + b_ref[...]
    if relu:
        out = jnp.maximum(out, 0.0)
    o_ref[0] = out.astype(o_ref.dtype)


def conv_taps(xp, w_taps, bias, *, kh, kw, relu, out_dtype=jnp.bfloat16):
    """Stride-1 KxK conv + fused bias(+ReLU) over a pre-padded NHWC input.

    xp: (N, HP, WP, Cin); w_taps: (kh*kw, Cin, Cout) (BN-scale folded);
    bias: (Cout,) f32.  Returns (N, HP, WP, Cout) on the padded grid; the
    valid output is out[:, :HP-kh+1, :WP-kw+1, :].
    """
    N, HP, WP, Cin = xp.shape
    T, Cin2, Cout = w_taps.shape
    assert T == kh * kw and Cin2 == Cin
    pg = HP * WP
    rows_needed = pg + (kh - 1) * WP + (kw - 1)
    rows = ((rows_needed + 7) // 8) * 8
    xf = jnp.pad(xp.reshape(N, pg, Cin), ((0, 0), (0, rows - pg), (0, 0)))
    taps = tuple(i * WP + j for i in range(kh) for j in range(kw))
    bias2 = bias.reshape(1, Cout).astype(jnp.float32)
    out = pl.pallas_call(
        functools.partial(_conv_taps_kernel, taps=taps, relu=relu),
        grid=(N,),
        in_specs=[
            pl.BlockSpec((1, rows, Cin), lambda n: (n, 0, 0)),
            pl.BlockSpec((T, Cin, Cout), lambda n: (0, 0, 0)),
            pl.BlockSpec((1, Cout), lambda n: (0, 0)),
        ],
        out_specs=pl.BlockSpec((1, pg, Cout), lambda n: (n, 0, 0)),
        out_shape=jax.ShapeDtypeStruct((N, pg, Cout), out_dtype),
        compiler_params=pltpu.CompilerParams(
            dimension_semantics=("parallel",),
            vmem_limit_bytes=_VMEM_LIMIT),
    )(xf, w_taps, bias2)
    return out.reshape(N, HP, WP, Cout)


# --------------------------------------------------------------------------
# Maxpool 3x3 / stride 2 / pad 1 (stride handled by cheap space-to-depth)
# --------------------------------------------------------------------------
def _maxpool_kernel(x_ref, o_ref, *, oh, ow, k):
    r = None
    for di in range(k):
        for dj in range(k):
            ph = (di % 2) * 2 + (dj % 2)
            tap = x_ref[0, ph, di // 2:di // 2 + oh, dj // 2:dj // 2 + ow, :]
            r = tap if r is None else jnp.maximum(r, tap)
    o_ref[0] = r.astype(o_ref.dtype)


def maxpool_3x3_s2(y):
    """9-tap max over contiguous VMEM slices of a phase-major space-to-depth
    view (plain-JAX s2d is ~1x HBM traffic; no 9x im2col blow-up)."""
    N, H, W, C = y.shape
    OH, OW = H // 2, W // 2
    yp = jnp.pad(y, ((0, 0), (1, 1), (1, 1), (0, 0)), constant_values=-jnp.inf)
    z = yp.reshape(N, OH + 1, 2, OW + 1, 2, C).transpose(0, 2, 4, 1, 3, 5)
    z = z.reshape(N, 4, OH + 1, OW + 1, C)
    return pl.pallas_call(
        functools.partial(_maxpool_kernel, oh=OH, ow=OW, k=3),
        grid=(N,),
        in_specs=[pl.BlockSpec((1, 4, OH + 1, OW + 1, C),
                               lambda n: (n, 0, 0, 0, 0))],
        out_specs=pl.BlockSpec((1, OH, OW, C), lambda n: (n, 0, 0, 0)),
        out_shape=jax.ShapeDtypeStruct((N, OH, OW, C), y.dtype),
        compiler_params=pltpu.CompilerParams(
            dimension_semantics=("parallel",),
            vmem_limit_bytes=_VMEM_LIMIT),
    )(z)


# --------------------------------------------------------------------------
# Fully fused bottleneck block + AdaptiveAvgPool2d((1,1)) + flatten + Linear
# --------------------------------------------------------------------------
def _bottleneck_kernel(x_ref, m_ref, w1wd_ref, b1bd_ref, w2_ref, b2_ref,
                       w3_ref, b3_ref, fcw_ref, fcb_ref, o_ref,
                       *, wp, pg, taps, inv_pool):
    # x_ref : (1, rows, 128) bf16 -- spatially padded, flattened, row-padded y
    # m_ref : (rows, 1) f32 -- 1.0 on interior (valid y) rows of the padded grid
    # out   : (1, 1, 128) f32 -- pooled features @ fc
    f32 = jnp.float32
    bf16 = jnp.bfloat16

    # (a) merged 1x1 convs: one 256-wide MXU pass yields both h1 and the
    #     downsample identity branch; padding rows of h1 are zeroed via mask.
    xw = (jnp.dot(x_ref[0], w1wd_ref[...], preferred_element_type=f32)
          + b1bd_ref[...])
    h1p = (jnp.maximum(xw[:, :CPAD], 0.0) * m_ref[...]).astype(bf16)
    ident = xw[wp + 1:wp + 1 + pg, CPAD:].astype(bf16)

    # (b) 3x3 conv as 9 shifted sub-matmuls accumulated in a local f32 value.
    acc = jnp.dot(h1p[taps[0]:taps[0] + pg, :], w2_ref[0],
                  preferred_element_type=f32)
    for t in range(1, len(taps)):
        off = taps[t]
        acc = acc + jnp.dot(h1p[off:off + pg, :], w2_ref[t],
                            preferred_element_type=f32)
    h2 = jnp.maximum(acc + b2_ref[...], 0.0).astype(bf16)

    # (c) final 1x1 conv + residual add + ReLU.
    out = jnp.dot(h2, w3_ref[...], preferred_element_type=f32) + b3_ref[...]
    out = jnp.maximum(out + ident.astype(f32), 0.0).astype(bf16)

    # (d) masked global average pool over the valid (ph, pw) pixels, then fc.
    pool_mask = m_ref[wp + 1:wp + 1 + pg, :]
    pooled = (jnp.sum(out.astype(f32) * pool_mask, axis=0, keepdims=True)
              * inv_pool).astype(bf16)
    o_ref[0] = (jnp.dot(pooled, fcw_ref[...], preferred_element_type=f32)
                + fcb_ref[...]).astype(o_ref.dtype)


def bottleneck_pool_fc(y, fw):
    """Bottleneck (merged 1x1 -> 3x3 -> 1x1 + downsample residual) + global
    average pool + fc, fused into ONE pallas_call (grid over batch)."""
    N, ph, pw, C = y.shape
    assert C == CPAD
    wp = pw + 2
    pg = (ph + 2) * wp
    rows = ((pg + 2 * wp + 2 + 7) // 8) * 8
    taps = tuple(i * wp + j for i in range(3) for j in range(3))

    # Spatial zero-pad of the block input (replaces the former h1 pad + all
    # intermediate HBM round trips); flatten rows and pad to a sublane multiple.
    yp = jnp.pad(y, ((0, 0), (1, 1), (1, 1), (0, 0)))
    xf = jnp.pad(yp.reshape(N, pg, C), ((0, 0), (0, rows - pg), (0, 0)))

    # Interior-row mask of the padded grid (also doubles, shifted, as the
    # valid-output mask for the average pool).  Trace-time constant.
    r = np.arange(rows)
    hh, ww = r // wp, r % wp
    mask = ((r < pg) & (hh >= 1) & (hh <= ph) & (ww >= 1) & (ww <= pw))
    mask = jnp.asarray(mask.reshape(rows, 1).astype(np.float32))

    b1bd = fw["b1bd"].reshape(1, 2 * C)
    b2 = fw["b2"].reshape(1, C)
    b3 = fw["b3"].reshape(1, C)
    fcb = fw["fc_b"].reshape(1, C)

    out = pl.pallas_call(
        functools.partial(_bottleneck_kernel, wp=wp, pg=pg, taps=taps,
                          inv_pool=1.0 / (ph * pw)),
        grid=(N,),
        in_specs=[
            pl.BlockSpec((1, rows, C), lambda n: (n, 0, 0)),
            pl.BlockSpec((rows, 1), lambda n: (0, 0)),
            pl.BlockSpec((C, 2 * C), lambda n: (0, 0)),
            pl.BlockSpec((1, 2 * C), lambda n: (0, 0)),
            pl.BlockSpec((9, C, C), lambda n: (0, 0, 0)),
            pl.BlockSpec((1, C), lambda n: (0, 0)),
            pl.BlockSpec((C, C), lambda n: (0, 0)),
            pl.BlockSpec((1, C), lambda n: (0, 0)),
            pl.BlockSpec((C, C), lambda n: (0, 0)),
            pl.BlockSpec((1, C), lambda n: (0, 0)),
        ],
        out_specs=pl.BlockSpec((1, 1, C), lambda n: (n, 0, 0)),
        out_shape=jax.ShapeDtypeStruct((N, 1, C), jnp.float32),
        compiler_params=pltpu.CompilerParams(
            dimension_semantics=("parallel",),
            vmem_limit_bytes=_VMEM_LIMIT),
    )(xf, mask, fw["w1wd"], b1bd, fw["w2_taps"], b2, fw["w3"], b3,
      fw["fc_w"], fcb)
    return out.reshape(N, C)


# --------------------------------------------------------------------------
# Host-side weight prep: fold BN, pad channels to 128, bf16 cast, stem rewrite
# --------------------------------------------------------------------------
def _pad_to(a, axis, size):
    pad = [(0, 0)] * a.ndim
    pad[axis] = (0, size - a.shape[axis])
    return jnp.pad(a, pad)


def prepare_weights(p, *, eps=1e-5):
    bf16 = jnp.bfloat16

    def fold(w, bn):
        gamma, beta, mean, var = bn
        scale = gamma / jnp.sqrt(var + eps)
        return w * scale, (beta - mean * scale).astype(jnp.float32)

    def pad_io(w, cin_to, cout_to):
        return _pad_to(_pad_to(w, 2, cin_to), 3, cout_to)

    fw = {}

    # --- stem: conv7x7/s2/pad3 + BN + ReLU, re-expressed as a 4x4/s1 conv over
    #     a space-to-depth input (channel order: (pi, pj, c)).
    w, b = fold(p["conv1_w"], p["bn1"])
    w = pad_io(w, CIN_PAD, CPAD).astype(bf16)                 # (7,7,32,128)
    fw["stem_w7"] = w                                         # reference only
    w8 = jnp.pad(w, ((0, 1), (0, 1), (0, 0), (0, 0)))         # (8,8,32,128)
    fw["stem_taps"] = (w8.reshape(4, 2, 4, 2, CIN_PAD, CPAD)
                       .transpose(0, 2, 1, 3, 4, 5)
                       .reshape(16, 4 * CIN_PAD, CPAD))       # (16,128,128)
    fw["stem_b"] = _pad_to(b, 0, CPAD)

    # --- bottleneck (BN folded, channel-padded, bf16)
    blk = p["block"]
    folded = {}
    for name in ("w1", "w2", "w3", "wd"):
        w, b = fold(blk[name], blk["bn" + name[1:]])
        w = pad_io(w, CPAD, CPAD).astype(bf16)
        folded[name] = w
        fw[name + "_hwio"] = w                                # reference only
        fw["b" + name[1:]] = _pad_to(b, 0, CPAD)

    # merged 1x1 weights: [w1 | wd] -> (128, 256) feeds the 256-wide MXU
    fw["w1wd"] = jnp.concatenate([folded["w1"].reshape(CPAD, CPAD),
                                  folded["wd"].reshape(CPAD, CPAD)], axis=1)
    fw["b1bd"] = jnp.concatenate([fw["b1"], fw["bd"]])
    fw["w2_taps"] = folded["w2"].reshape(9, CPAD, CPAD)
    fw["w3"] = folded["w3"].reshape(CPAD, CPAD)

    # --- new fc: Linear(in_features, feature_size)
    fw["fc_w"] = _pad_to(_pad_to(p["fc_w"], 0, CPAD), 1, CPAD).astype(bf16)
    fw["fc_b"] = _pad_to(p["fc_b"], 0, CPAD).astype(jnp.float32)
    return fw


# --------------------------------------------------------------------------
# ModifiedResNet.forward: features(x) -> flatten -> fc (Pallas path)
# --------------------------------------------------------------------------
def modified_resnet_forward(x_nchw, fw):
    """Returns (N, CPAD) f32; caller slices [:, :feature_size]."""
    N, _, H, W = x_nchw.shape
    # layout-only plain JAX: NCHW -> NHWC, lane padding, bf16
    x = jnp.transpose(x_nchw, (0, 2, 3, 1))
    x = _pad_to(x, 3, CIN_PAD).astype(jnp.bfloat16)

    # conv1 7x7/s2/pad3 (+BN+ReLU) as 4x4/s1 on space-to-depth input
    oh, ow = H // 2, W // 2
    xp = jnp.pad(x, ((0, 0), (3, 3), (3, 3), (0, 0)))
    hh, hw = xp.shape[1] // 2, xp.shape[2] // 2
    z = (xp.reshape(N, hh, 2, hw, 2, CIN_PAD)
         .transpose(0, 1, 3, 2, 4, 5)
         .reshape(N, hh, hw, 4 * CIN_PAD))
    stem = conv_taps(z, fw["stem_taps"], fw["stem_b"], kh=4, kw=4, relu=True)
    stem = stem[:, :oh, :ow, :]                      # drop padded-grid rows/cols

    # maxpool 3x3/s2/pad1
    y = maxpool_3x3_s2(stem)                         # (N, oh//2, ow//2, 128)

    # bottleneck + AdaptiveAvgPool2d((1,1)) + flatten + fc, one kernel
    return bottleneck_pool_fc(y, fw)


# --------------------------------------------------------------------------
# Deterministic parameter construction (synthetic, mirrors shapes in __init__)
# --------------------------------------------------------------------------
def init_params(key, cin=3, stem=8, planes=8, expansion=4, feature_size=16):
    ks = list(jax.random.split(key, 16))

    def conv_w(k, kh, kw, ci, co):
        return (jax.random.normal(k, (kh, kw, ci, co), jnp.float32)
                * (0.2 / np.sqrt(kh * kw * ci)))

    def bn(k, c):
        k1, k2, k3, k4 = jax.random.split(k, 4)
        gamma = jax.random.uniform(k1, (c,), jnp.float32, 0.5, 1.5)
        beta = 0.1 * jax.random.normal(k2, (c,), jnp.float32)
        mean = 0.1 * jax.random.normal(k3, (c,), jnp.float32)
        var = jax.random.uniform(k4, (c,), jnp.float32, 0.5, 1.5)
        return (gamma, beta, mean, var)

    cexp = planes * expansion
    return {
        "conv1_w": conv_w(ks[0], 7, 7, cin, stem),
        "bn1": bn(ks[1], stem),
        "block": {
            "w1": conv_w(ks[2], 1, 1, stem, planes),
            "bn1": bn(ks[3], planes),
            "w2": conv_w(ks[4], 3, 3, planes, planes),
            "bn2": bn(ks[5], planes),
            "w3": conv_w(ks[6], 1, 1, planes, cexp),
            "bn3": bn(ks[7], cexp),
            "wd": conv_w(ks[8], 1, 1, stem, cexp),
            "bnd": bn(ks[9], cexp),
        },
        # self.fc = nn.Linear(original_resnet.fc.in_features, feature_size)
        "fc_w": jax.random.normal(ks[10], (cexp, feature_size), jnp.float32)
                / np.sqrt(cexp),
        "fc_b": 0.1 * jax.random.normal(ks[11], (feature_size,), jnp.float32),
    }


# --------------------------------------------------------------------------
# Pure-JAX reference: same bf16 weights and same bf16 activation boundaries
# --------------------------------------------------------------------------
def _ref_forward(x_nchw, fw):
    f32 = jnp.float32
    bf = lambda a: a.astype(jnp.bfloat16).astype(f32)

    def conv(x, w, stride, pad):
        return lax.conv_general_dilated(
            x, w.astype(f32), (stride, stride), ((pad, pad), (pad, pad)),
            dimension_numbers=("NHWC", "HWIO", "NHWC"),
            precision=lax.Precision.HIGHEST)

    x = jnp.transpose(x_nchw, (0, 2, 3, 1)).astype(f32)
    x = bf(_pad_to(x, 3, CIN_PAD))
    y = bf(jnp.maximum(conv(x, fw["stem_w7"], 2, 3) + fw["stem_b"], 0.0))
    y = lax.reduce_window(y, -jnp.inf, lax.max, (1, 3, 3, 1), (1, 2, 2, 1),
                          ((0, 0), (1, 1), (1, 1), (0, 0)))
    h1 = bf(jnp.maximum(conv(y, fw["w1_hwio"], 1, 0) + fw["b1"], 0.0))
    h2 = bf(jnp.maximum(conv(h1, fw["w2_hwio"], 1, 1) + fw["b2"], 0.0))
    ident = bf(conv(y, fw["wd_hwio"], 1, 0) + fw["bd"])
    out = bf(jnp.maximum(conv(h2, fw["w3_hwio"], 1, 0) + fw["b3"] + ident, 0.0))
    pooled = bf(jnp.mean(out, axis=(1, 2)))
    return jnp.dot(pooled, fw["fc_w"].astype(f32),
                   precision=lax.Precision.HIGHEST) + fw["fc_b"]


# --------------------------------------------------------------------------
if __name__ == "__main__":
    key = jax.random.PRNGKey(0)
    k_param, k_x = jax.random.split(key)

    params = init_params(k_param, cin=3, stem=8, planes=8, expansion=4,
                         feature_size=16)
    fw = prepare_weights(params)
    x = jax.random.normal(k_x, (2, 3, 32, 32), jnp.float32)  # NCHW, PyTorch-style

    fwd = jax.jit(modified_resnet_forward)
    out_pad = jax.block_until_ready(fwd(x, fw))

    feat = params["fc_b"].shape[0]
    out = np.asarray(out_pad)[:, :feat]
    assert out.shape == (2, feat), out.shape

    ref = np.asarray(jax.block_until_ready(_ref_forward(x, fw)))[:, :feat]
    np.testing.assert_allclose(out, ref, rtol=1e-2, atol=1e-2)

    print("KERNEL_OK")
</pallas_src>

<mosaic_0001>
module attributes {stable_mosaic.version = 11 : i64} {
  func.func @_conv_taps_kernel(%arg0: i32, %arg1: memref<1x424x128xbf16, #tpu.memory_space<vmem>>, %arg2: memref<16x128x128xbf16, #tpu.memory_space<vmem>>, %arg3: memref<1x128xf32, #tpu.memory_space<vmem>>, %arg4: memref<1x361x128xbf16, #tpu.memory_space<vmem>>) attributes {dimension_semantics = [#tpu.dimension_semantics<parallel>], iteration_bounds = array<i64: 2>, scalar_prefetch = 0 : i64, scratch_operands = 0 : i64, tpu.core_type = #tpu.core_type<tc>, window_params = [{transform_indices = @transform_0, window_bounds = array<i64: 1, 424, 128>}, {pipeline_mode = #tpu.pipeline_mode<synchronous>, transform_indices = @transform_1, window_bounds = array<i64: 16, 128, 128>}, {pipeline_mode = #tpu.pipeline_mode<synchronous>, transform_indices = @transform_2, window_bounds = array<i64: 1, 128>}, {transform_indices = @transform_3, window_bounds = array<i64: 1, 361, 128>}]} {
    %c0 = arith.constant 0 : index
    %c0_0 = arith.constant 0 : index
    %c0_1 = arith.constant 0 : index
    %0 = vector.load %arg1[%c0, %c0_0, %c0_1] : memref<1x424x128xbf16, #tpu.memory_space<vmem>>, vector<1x361x128xbf16>
    %1 = vector.shape_cast %0 : vector<1x361x128xbf16> to vector<361x128xbf16>
    %c0_2 = arith.constant 0 : index
    %c0_3 = arith.constant 0 : index
    %c0_4 = arith.constant 0 : index
    %2 = vector.load %arg2[%c0_2, %c0_3, %c0_4] : memref<16x128x128xbf16, #tpu.memory_space<vmem>>, vector<1x128x128xbf16>
    %3 = vector.shape_cast %2 : vector<1x128x128xbf16> to vector<128x128xbf16>
    %cst = arith.constant dense<0.000000e+00> : vector<361x128xf32>
    %4 = tpu.matmul %1, %3, %cst {dimension_numbers = #tpu.dot_dimension_numbers<[1], [0], [0], [1], [0, 0, 1, 1], [], []>} : vector<361x128xbf16>, vector<128x128xbf16>, vector<361x128xf32> -> vector<361x128xf32>
    %c0_5 = arith.constant 0 : index
    %c1 = arith.constant 1 : index
    %c0_6 = arith.constant 0 : index
    %5 = vector.load %arg1[%c0_5, %c1, %c0_6] : memref<1x424x128xbf16, #tpu.memory_space<vmem>>, vector<1x361x128xbf16>
    %6 = vector.shape_cast %5 : vector<1x361x128xbf16> to vector<361x128xbf16>
    %c1_7 = arith.constant 1 : index
    %c0_8 = arith.constant 0 : index
    %c0_9 = arith.constant 0 : index
    %7 = vector.load %arg2[%c1_7, %c0_8, %c0_9] : memref<16x128x128xbf16, #tpu.memory_space<vmem>>, vector<1x128x128xbf16>
    %8 = vector.shape_cast %7 : vector<1x128x128xbf16> to vector<128x128xbf16>
    %cst_10 = arith.constant dense<0.000000e+00> : vector<361x128xf32>
    %9 = tpu.matmul %6, %8, %cst_10 {dimension_numbers = #tpu.dot_dimension_numbers<[1], [0], [0], [1], [0, 0, 1, 1], [], []>} : vector<361x128xbf16>, vector<128x128xbf16>, vector<361x128xf32> -> vector<361x128xf32>
    %10 = arith.addf %4, %9 : vector<361x128xf32>
    %c0_11 = arith.constant 0 : index
    %c2 = arith.constant 2 : index
    %c0_12 = arith.constant 0 : index
    %11 = vector.load %arg1[%c0_11, %c2, %c0_12] : memref<1x424x128xbf16, #tpu.memory_space<vmem>>, vector<1x361x128xbf16>
    %12 = vector.shape_cast %11 : vector<1x361x128xbf16> to vector<361x128xbf16>
    %c2_13 = arith.constant 2 : index
    %c0_14 = arith.constant 0 : index
    %c0_15 = arith.constant 0 : index
    %13 = vector.load %arg2[%c2_13, %c0_14, %c0_15] : memref<16x128x128xbf16, #tpu.memory_space<vmem>>, vector<1x128x128xbf16>
    %14 = vector.shape_cast %13 : vector<1x128x128xbf16> to vector<128x128xbf16>
    %cst_16 = arith.constant dense<0.000000e+00> : vector<361x128xf32>
    %15 = tpu.matmul %12, %14, %cst_16 {dimension_numbers = #tpu.dot_dimension_numbers<[1], [0], [0], [1], [0, 0, 1, 1], [], []>} : vector<361x128xbf16>, vector<128x128xbf16>, vector<361x128xf32> -> vector<361x128xf32>
    %16 = arith.addf %10, %15 : vector<361x128xf32>
    %c0_17 = arith.constant 0 : index
    %c3 = arith.constant 3 : index
    %c0_18 = arith.constant 0 : index
    %17 = vector.load %arg1[%c0_17, %c3, %c0_18] : memref<1x424x128xbf16, #tpu.memory_space<vmem>>, vector<1x361x128xbf16>
    %18 = vector.shape_cast %17 : vector<1x361x128xbf16> to vector<361x128xbf16>
    %c3_19 = arith.constant 3 : index
    %c0_20 = arith.constant 0 : index
    %c0_21 = arith.constant 0 : index
    %19 = vector.load %arg2[%c3_19, %c0_20, %c0_21] : memref<16x128x128xbf16, #tpu.memory_space<vmem>>, vector<1x128x128xbf16>
    %20 = vector.shape_cast %19 : vector<1x128x128xbf16> to vector<128x128xbf16>
    %cst_22 = arith.constant dense<0.000000e+00> : vector<361x128xf32>
    %21 = tpu.matmul %18, %20, %cst_22 {dimension_numbers = #tpu.dot_dimension_numbers<[1], [0], [0], [1], [0, 0, 1, 1], [], []>} : vector<361x128xbf16>, vector<128x128xbf16>, vector<361x128xf32> -> vector<361x128xf32>
    %22 = arith.addf %16, %21 : vector<361x128xf32>
    %c0_23 = arith.constant 0 : index
    %c19 = arith.constant 19 : index
    %c0_24 = arith.constant 0 : index
    %23 = vector.load %arg1[%c0_23, %c19, %c0_24] : memref<1x424x128xbf16, #tpu.memory_space<vmem>>, vector<1x361x128xbf16>
    %24 = vector.shape_cast %23 : vector<1x361x128xbf16> to vector<361x128xbf16>
    %c4 = arith.constant 4 : index
    %c0_25 = arith.constant 0 : index
    %c0_26 = arith.constant 0 : index
    %25 = vector.load %arg2[%c4, %c0_25, %c0_26] : memref<16x128x128xbf16, #tpu.memory_space<vmem>>, vector<1x128x128xbf16>
    %26 = vector.shape_cast %25 : vector<1x128x128xbf16> to vector<128x128xbf16>
    %cst_27 = arith.constant dense<0.000000e+00> : vector<361x128xf32>
    %27 = tpu.matmul %24, %26, %cst_27 {dimension_numbers = #tpu.dot_dimension_numbers<[1], [0], [0], [1], [0, 0, 1, 1], [], []>} : vector<361x128xbf16>, vector<128x128xbf16>, vector<361x128xf32> -> vector<361x128xf32>
    %28 = arith.addf %22, %27 : vector<361x128xf32>
    %c0_28 = arith.constant 0 : index
    %c20 = arith.constant 20 : index
    %c0_29 = arith.constant 0 : index
    %29 = vector.load %arg1[%c0_28, %c20, %c0_29] : memref<1x424x128xbf16, #tpu.memory_space<vmem>>, vector<1x361x128xbf16>
    %30 = vector.shape_cast %29 : vector<1x361x128xbf16> to vector<361x128xbf16>
    %c5 = arith.constant 5 : index
    %c0_30 = arith.constant 0 : index
    %c0_31 = arith.constant 0 : index
    %31 = vector.load %arg2[%c5, %c0_30, %c0_31] : memref<16x128x128xbf16, #tpu.memory_space<vmem>>, vector<1x128x128xbf16>
    %32 = vector.shape_cast %31 : vector<1x128x128xbf16> to vector<128x128xbf16>
    %cst_32 = arith.constant dense<0.000000e+00> : vector<361x128xf32>
    %33 = tpu.matmul %30, %32, %cst_32 {dimension_numbers = #tpu.dot_dimension_numbers<[1], [0], [0], [1], [0, 0, 1, 1], [], []>} : vector<361x128xbf16>, vector<128x128xbf16>, vector<361x128xf32> -> vector<361x128xf32>
    %34 = arith.addf %28, %33 : vector<361x128xf32>
    %c0_33 = arith.constant 0 : index
    %c21 = arith.constant 21 : index
    %c0_34 = arith.constant 0 : index
    %35 = vector.load %arg1[%c0_33, %c21, %c0_34] : memref<1x424x128xbf16, #tpu.memory_space<vmem>>, vector<1x361x128xbf16>
    %36 = vector.shape_cast %35 : vector<1x361x128xbf16> to vector<361x128xbf16>
    %c6 = arith.constant 6 : index
    %c0_35 = arith.constant 0 : index
    %c0_36 = arith.constant 0 : index
    %37 = vector.load %arg2[%c6, %c0_35, %c0_36] : memref<16x128x128xbf16, #tpu.memory_space<vmem>>, vector<1x128x128xbf16>
    %38 = vector.shape_cast %37 : vector<1x128x128xbf16> to vector<128x128xbf16>
    %cst_37 = arith.constant dense<0.000000e+00> : vector<361x128xf32>
    %39 = tpu.matmul %36, %38, %cst_37 {dimension_numbers = #tpu.dot_dimension_numbers<[1], [0], [0], [1], [0, 0, 1, 1], [], []>} : vector<361x128xbf16>, vector<128x128xbf16>, vector<361x128xf32> -> vector<361x128xf32>
    %40 = arith.addf %34, %39 : vector<361x128xf32>
    %c0_38 = arith.constant 0 : index
    %c22 = arith.constant 22 : index
    %c0_39 = arith.constant 0 : index
    %41 = vector.load %arg1[%c0_38, %c22, %c0_39] : memref<1x424x128xbf16, #tpu.memory_space<vmem>>, vector<1x361x128xbf16>
    %42 = vector.shape_cast %41 : vector<1x361x128xbf16> to vector<361x128xbf16>
    %c7 = arith.constant 7 : index
    %c0_40 = arith.constant 0 : index
    %c0_41 = arith.constant 0 : index
    %43 = vector.load %arg2[%c7, %c0_40, %c0_41] : memref<16x128x128xbf16, #tpu.memory_space<vmem>>, vector<1x128x128xbf16>
    %44 = vector.shape_cast %43 : vector<1x128x128xbf16> to vector<128x128xbf16>
    %cst_42 = arith.constant dense<0.000000e+00> : vector<361x128xf32>
    %45 = tpu.matmul %42, %44, %cst_42 {dimension_numbers = #tpu.dot_dimension_numbers<[1], [0], [0], [1], [0, 0, 1, 1], [], []>} : vector<361x128xbf16>, vector<128x128xbf16>, vector<361x128xf32> -> vector<361x128xf32>
    %46 = arith.addf %40, %45 : vector<361x128xf32>
    %c0_43 = arith.constant 0 : index
    %c38 = arith.constant 38 : index
    %c0_44 = arith.constant 0 : index
    %47 = vector.load %arg1[%c0_43, %c38, %c0_44] : memref<1x424x128xbf16, #tpu.memory_space<vmem>>, vector<1x361x128xbf16>
    %48 = vector.shape_cast %47 : vector<1x361x128xbf16> to vector<361x128xbf16>
    %c8 = arith.constant 8 : index
    %c0_45 = arith.constant 0 : index
    %c0_46 = arith.constant 0 : index
    %49 = vector.load %arg2[%c8, %c0_45, %c0_46] : memref<16x128x128xbf16, #tpu.memory_space<vmem>>, vector<1x128x128xbf16>
    %50 = vector.shape_cast %49 : vector<1x128x128xbf16> to vector<128x128xbf16>
    %cst_47 = arith.constant dense<0.000000e+00> : vector<361x128xf32>
    %51 = tpu.matmul %48, %50, %cst_47 {dimension_numbers = #tpu.dot_dimension_numbers<[1], [0], [0], [1], [0, 0, 1, 1], [], []>} : vector<361x128xbf16>, vector<128x128xbf16>, vector<361x128xf32> -> vector<361x128xf32>
    %52 = arith.addf %46, %51 : vector<361x128xf32>
    %c0_48 = arith.constant 0 : index
    %c39 = arith.constant 39 : index
    %c0_49 = arith.constant 0 : index
    %53 = vector.load %arg1[%c0_48, %c39, %c0_49] : memref<1x424x128xbf16, #tpu.memory_space<vmem>>, vector<1x361x128xbf16>
    %54 = vector.shape_cast %53 : vector<1x361x128xbf16> to vector<361x128xbf16>
    %c9 = arith.constant 9 : index
    %c0_50 = arith.constant 0 : index
    %c0_51 = arith.constant 0 : index
    %55 = vector.load %arg2[%c9, %c0_50, %c0_51] : memref<16x128x128xbf16, #tpu.memory_space<vmem>>, vector<1x128x128xbf16>
    %56 = vector.shape_cast %55 : vector<1x128x128xbf16> to vector<128x128xbf16>
    %cst_52 = arith.constant dense<0.000000e+00> : vector<361x128xf32>
    %57 = tpu.matmul %54, %56, %cst_52 {dimension_numbers = #tpu.dot_dimension_numbers<[1], [0], [0], [1], [0, 0, 1, 1], [], []>} : vector<361x128xbf16>, vector<128x128xbf16>, vector<361x128xf32> -> vector<361x128xf32>
    %58 = arith.addf %52, %57 : vector<361x128xf32>
    %c0_53 = arith.constant 0 : index
    %c40 = arith.constant 40 : index
    %c0_54 = arith.constant 0 : index
    %59 = vector.load %arg1[%c0_53, %c40, %c0_54] : memref<1x424x128xbf16, #tpu.memory_space<vmem>>, vector<1x361x128xbf16>
    %60 = vector.shape_cast %59 : vector<1x361x128xbf16> to vector<361x128xbf16>
    %c10 = arith.constant 10 : index
    %c0_55 = arith.constant 0 : index
    %c0_56 = arith.constant 0 : index
    %61 = vector.load %arg2[%c10, %c0_55, %c0_56] : memref<16x128x128xbf16, #tpu.memory_space<vmem>>, vector<1x128x128xbf16>
    %62 = vector.shape_cast %61 : vector<1x128x128xbf16> to vector<128x128xbf16>
    %cst_57 = arith.constant dense<0.000000e+00> : vector<361x128xf32>
    %63 = tpu.matmul %60, %62, %cst_57 {dimension_numbers = #tpu.dot_dimension_numbers<[1], [0], [0], [1], [0, 0, 1, 1], [], []>} : vector<361x128xbf16>, vector<128x128xbf16>, vector<361x128xf32> -> vector<361x128xf32>
    %64 = arith.addf %58, %63 : vector<361x128xf32>
    %c0_58 = arith.constant 0 : index
    %c41 = arith.constant 41 : index
    %c0_59 = arith.constant 0 : index
    %65 = vector.load %arg1[%c0_58, %c41, %c0_59] : memref<1x424x128xbf16, #tpu.memory_space<vmem>>, vector<1x361x128xbf16>
    %66 = vector.shape_cast %65 : vector<1x361x128xbf16> to vector<361x128xbf16>
    %c11 = arith.constant 11 : index
    %c0_60 = arith.constant 0 : index
    %c0_61 = arith.constant 0 : index
    %67 = vector.load %arg2[%c11, %c0_60, %c0_61] : memref<16x128x128xbf16, #tpu.memory_space<vmem>>, vector<1x128x128xbf16>
    %68 = vector.shape_cast %67 : vector<1x128x128xbf16> to vector<128x128xbf16>
    %cst_62 = arith.constant dense<0.000000e+00> : vector<361x128xf32>
    %69 = tpu.matmul %66, %68, %cst_62 {dimension_numbers = #tpu.dot_dimension_numbers<[1], [0], [0], [1], [0, 0, 1, 1], [], []>} : vector<361x128xbf16>, vector<128x128xbf16>, vector<361x128xf32> -> vector<361x128xf32>
    %70 = arith.addf %64, %69 : vector<361x128xf32>
    %c0_63 = arith.constant 0 : index
    %c57 = arith.constant 57 : index
    %c0_64 = arith.constant 0 : index
    %71 = vector.load %arg1[%c0_63, %c57, %c0_64] : memref<1x424x128xbf16, #tpu.memory_space<vmem>>, vector<1x361x128xbf16>
    %72 = vector.shape_cast %71 : vector<1x361x128xbf16> to vector<361x128xbf16>
    %c12 = arith.constant 12 : index
    %c0_65 = arith.constant 0 : index
    %c0_66 = arith.constant 0 : index
    %73 = vector.load %arg2[%c12, %c0_65, %c0_66] : memref<16x128x128xbf16, #tpu.memory_space<vmem>>, vector<1x128x128xbf16>
    %74 = vector.shape_cast %73 : vector<1x128x128xbf16> to vector<128x128xbf16>
    %cst_67 = arith.constant dense<0.000000e+00> : vector<361x128xf32>
    %75 = tpu.matmul %72, %74, %cst_67 {dimension_numbers = #tpu.dot_dimension_numbers<[1], [0], [0], [1], [0, 0, 1, 1], [], []>} : vector<361x128xbf16>, vector<128x128xbf16>, vector<361x128xf32> -> vector<361x128xf32>
    %76 = arith.addf %70, %75 : vector<361x128xf32>
    %c0_68 = arith.constant 0 : index
    %c58 = arith.constant 58 : index
    %c0_69 = arith.constant 0 : index
    %77 = vector.load %arg1[%c0_68, %c58, %c0_69] : memref<1x424x128xbf16, #tpu.memory_space<vmem>>, vector<1x361x128xbf16>
    %78 = vector.shape_cast %77 : vector<1x361x128xbf16> to vector<361x128xbf16>
    %c13 = arith.constant 13 : index
    %c0_70 = arith.constant 0 : index
    %c0_71 = arith.constant 0 : index
    %79 = vector.load %arg2[%c13, %c0_70, %c0_71] : memref<16x128x128xbf16, #tpu.memory_space<vmem>>, vector<1x128x128xbf16>
    %80 = vector.shape_cast %79 : vector<1x128x128xbf16> to vector<128x128xbf16>
    %cst_72 = arith.constant dense<0.000000e+00> : vector<361x128xf32>
    %81 = tpu.matmul %78, %80, %cst_72 {dimension_numbers = #tpu.dot_dimension_numbers<[1], [0], [0], [1], [0, 0, 1, 1], [], []>} : vector<361x128xbf16>, vector<128x128xbf16>, vector<361x128xf32> -> vector<361x128xf32>
    %82 = arith.addf %76, %81 : vector<361x128xf32>
    %c0_73 = arith.constant 0 : index
    %c59 = arith.constant 59 : index
    %c0_74 = arith.constant 0 : index
    %83 = vector.load %arg1[%c0_73, %c59, %c0_74] : memref<1x424x128xbf16, #tpu.memory_space<vmem>>, vector<1x361x128xbf16>
    %84 = vector.shape_cast %83 : vector<1x361x128xbf16> to vector<361x128xbf16>
    %c14 = arith.constant 14 : index
    %c0_75 = arith.constant 0 : index
    %c0_76 = arith.constant 0 : index
    %85 = vector.load %arg2[%c14, %c0_75, %c0_76] : memref<16x128x128xbf16, #tpu.memory_space<vmem>>, vector<1x128x128xbf16>
    %86 = vector.shape_cast %85 : vector<1x128x128xbf16> to vector<128x128xbf16>
    %cst_77 = arith.constant dense<0.000000e+00> : vector<361x128xf32>
    %87 = tpu.matmul %84, %86, %cst_77 {dimension_numbers = #tpu.dot_dimension_numbers<[1], [0], [0], [1], [0, 0, 1, 1], [], []>} : vector<361x128xbf16>, vector<128x128xbf16>, vector<361x128xf32> -> vector<361x128xf32>
    %88 = arith.addf %82, %87 : vector<361x128xf32>
    %c0_78 = arith.constant 0 : index
    %c60 = arith.constant 60 : index
    %c0_79 = arith.constant 0 : index
    %89 = vector.load %arg1[%c0_78, %c60, %c0_79] : memref<1x424x128xbf16, #tpu.memory_space<vmem>>, vector<1x361x128xbf16>
    %90 = vector.shape_cast %89 : vector<1x361x128xbf16> to vector<361x128xbf16>
    %c15 = arith.constant 15 : index
    %c0_80 = arith.constant 0 : index
    %c0_81 = arith.constant 0 : index
    %91 = vector.load %arg2[%c15, %c0_80, %c0_81] : memref<16x128x128xbf16, #tpu.memory_space<vmem>>, vector<1x128x128xbf16>
    %92 = vector.shape_cast %91 : vector<1x128x128xbf16> to vector<128x128xbf16>
    %cst_82 = arith.constant dense<0.000000e+00> : vector<361x128xf32>
    %93 = tpu.matmul %90, %92, %cst_82 {dimension_numbers = #tpu.dot_dimension_numbers<[1], [0], [0], [1], [0, 0, 1, 1], [], []>} : vector<361x128xbf16>, vector<128x128xbf16>, vector<361x128xf32> -> vector<361x128xf32>
    %94 = arith.addf %88, %93 : vector<361x128xf32>
    %c0_83 = arith.constant 0 : index
    %c0_84 = arith.constant 0 : index
    %95 = vector.load %arg3[%c0_83, %c0_84] : memref<1x128xf32, #tpu.memory_space<vmem>>, vector<1x128xf32>
    %96 = vector.broadcast %95 : vector<1x128xf32> to vector<361x128xf32>
    %97 = arith.addf %94, %96 : vector<361x128xf32>
    %cst_85 = arith.constant 0.000000e+00 : f32
    %98 = vector.broadcast %cst_85 : f32 to vector<361x128xf32>
    %99 = arith.maximumf %97, %98 : vector<361x128xf32>
    %100 = arith.truncf %99 : vector<361x128xf32> to vector<361x128xbf16>
    %c0_86 = arith.constant 0 : index
    %c0_87 = arith.constant 0 : index
    %c0_88 = arith.constant 0 : index
    %101 = vector.load %arg4[%c0_86, %c0_87, %c0_88] : memref<1x361x128xbf16, #tpu.memory_space<vmem>>, vector<1x361x128xbf16>
    %102 = vector.shape_cast %101 : vector<1x361x128xbf16> to vector<361x128xbf16>
    %103 = vector.shape_cast %100 : vector<361x128xbf16> to vector<1x361x128xbf16>
    tpu.vector_store %arg4[%c0_86, %c0_87, %c0_88], %103 {strides = array<i32>} : memref<1x361x128xbf16, #tpu.memory_space<vmem>>, vector<1x361x128xbf16>,
    return
  }
  func.func @transform_0(%arg0: i32) -> (i32, i32, i32) {
    %c0_i32 = arith.constant 0 : i32
    %c0_i32_0 = arith.constant 0 : i32
    %c0_i32_1 = arith.constant 0 : i32
    return %arg0, %c0_i32, %c0_i32_0 : i32, i32, i32
  }
  func.func @transform_1(%arg0: i32) -> (i32, i32, i32) {
    %c0_i32 = arith.constant 0 : i32
    %c0_i32_0 = arith.constant 0 : i32
    %c0_i32_1 = arith.constant 0 : i32
    %c0_i32_2 = arith.constant 0 : i32
    return %c0_i32, %c0_i32_0, %c0_i32_1 : i32, i32, i32
  }
  func.func @transform_2(%arg0: i32) -> (i32, i32) {
    %c0_i32 = arith.constant 0 : i32
    %c0_i32_0 = arith.constant 0 : i32
    %c0_i32_1 = arith.constant 0 : i32
    return %c0_i32, %c0_i32_0 : i32, i32
  }
  func.func @transform_3(%arg0: i32) -> (i32, i32, i32) {
    %c0_i32 = arith.constant 0 : i32
    %c0_i32_0 = arith.constant 0 : i32
    %c0_i32_1 = arith.constant 0 : i32
    return %arg0, %c0_i32, %c0_i32_0 : i32, i32, i32
  }
}

module attributes {stable_mosaic.version = 11 : i64} {
  func.func @_maxpool_kernel(%arg0: i32, %arg1: memref<1x4x9x9x128xbf16, #tpu.memory_space<vmem>>, %arg2: memref<1x8x8x128xbf16, #tpu.memory_space<vmem>>) attributes {dimension_semantics = [#tpu.dimension_semantics<parallel>], iteration_bounds = array<i64: 2>, scalar_prefetch = 0 : i64, scratch_operands = 0 : i64, tpu.core_type = #tpu.core_type<tc>, window_params = [{transform_indices = @transform_0, window_bounds = array<i64: 1, 4, 9, 9, 128>}, {transform_indices = @transform_1, window_bounds = array<i64: 1, 8, 8, 128>}]} {
    %c0 = arith.constant 0 : index
    %c0_0 = arith.constant 0 : index
    %c0_1 = arith.constant 0 : index
    %c0_2 = arith.constant 0 : index
    %c0_3 = arith.constant 0 : index
    %0 = vector.load %arg1[%c0, %c0_0, %c0_1, %c0_2, %c0_3] : memref<1x4x9x9x128xbf16, #tpu.memory_space<vmem>>, vector<1x1x8x8x128xbf16>
    %1 = vector.shape_cast %0 : vector<1x1x8x8x128xbf16> to vector<8x8x128xbf16>
    %c0_4 = arith.constant 0 : index
    %c1 = arith.constant 1 : index
    %c0_5 = arith.constant 0 : index
    %c0_6 = arith.constant 0 : index
    %c0_7 = arith.constant 0 : index
    %2 = vector.load %arg1[%c0_4, %c1, %c0_5, %c0_6, %c0_7] : memref<1x4x9x9x128xbf16, #tpu.memory_space<vmem>>, vector<1x1x8x8x128xbf16>
    %3 = vector.shape_cast %2 : vector<1x1x8x8x128xbf16> to vector<8x8x128xbf16>
    %4 = arith.maximumf %1, %3 : vector<8x8x128xbf16>
    %c0_8 = arith.constant 0 : index
    %c0_9 = arith.constant 0 : index
    %c0_10 = arith.constant 0 : index
    %c1_11 = arith.constant 1 : index
    %c0_12 = arith.constant 0 : index
    %5 = vector.load %arg1[%c0_8, %c0_9, %c0_10, %c1_11, %c0_12] : memref<1x4x9x9x128xbf16, #tpu.memory_space<vmem>>, vector<1x1x8x8x128xbf16>
    %6 = vector.shape_cast %5 : vector<1x1x8x8x128xbf16> to vector<8x8x128xbf16>
    %7 = arith.maximumf %4, %6 : vector<8x8x128xbf16>
    %c0_13 = arith.constant 0 : index
    %c2 = arith.constant 2 : index
    %c0_14 = arith.constant 0 : index
    %c0_15 = arith.constant 0 : index
    %c0_16 = arith.constant 0 : index
    %8 = vector.load %arg1[%c0_13, %c2, %c0_14, %c0_15, %c0_16] : memref<1x4x9x9x128xbf16, #tpu.memory_space<vmem>>, vector<1x1x8x8x128xbf16>
    %9 = vector.shape_cast %8 : vector<1x1x8x8x128xbf16> to vector<8x8x128xbf16>
    %10 = arith.maximumf %7, %9 : vector<8x8x128xbf16>
    %c0_17 = arith.constant 0 : index
    %c3 = arith.constant 3 : index
    %c0_18 = arith.constant 0 : index
    %c0_19 = arith.constant 0 : index
    %c0_20 = arith.constant 0 : index
    %11 = vector.load %arg1[%c0_17, %c3, %c0_18, %c0_19, %c0_20] : memref<1x4x9x9x128xbf16, #tpu.memory_space<vmem>>, vector<1x1x8x8x128xbf16>
    %12 = vector.shape_cast %11 : vector<1x1x8x8x128xbf16> to vector<8x8x128xbf16>
    %13 = arith.maximumf %10, %12 : vector<8x8x128xbf16>
    %c0_21 = arith.constant 0 : index
    %c2_22 = arith.constant 2 : index
    %c0_23 = arith.constant 0 : index
    %c1_24 = arith.constant 1 : index
    %c0_25 = arith.constant 0 : index
    %14 = vector.load %arg1[%c0_21, %c2_22, %c0_23, %c1_24, %c0_25] : memref<1x4x9x9x128xbf16, #tpu.memory_space<vmem>>, vector<1x1x8x8x128xbf16>
    %15 = vector.shape_cast %14 : vector<1x1x8x8x128xbf16> to vector<8x8x128xbf16>
    %16 = arith.maximumf %13, %15 : vector<8x8x128xbf16>
    %c0_26 = arith.constant 0 : index
    %c0_27 = arith.constant 0 : index
    %c1_28 = arith.constant 1 : index
    %c0_29 = arith.constant 0 : index
    %c0_30 = arith.constant 0 : index
    %17 = vector.load %arg1[%c0_26, %c0_27, %c1_28, %c0_29, %c0_30] : memref<1x4x9x9x128xbf16, #tpu.memory_space<vmem>>, vector<1x1x8x8x128xbf16>
    %18 = vector.shape_cast %17 : vector<1x1x8x8x128xbf16> to vector<8x8x128xbf16>
    %19 = arith.maximumf %16, %18 : vector<8x8x128xbf16>
    %c0_31 = arith.constant 0 : index
    %c1_32 = arith.constant 1 : index
    %c1_33 = arith.constant 1 : index
    %c0_34 = arith.constant 0 : index
    %c0_35 = arith.constant 0 : index
    %20 = vector.load %arg1[%c0_31, %c1_32, %c1_33, %c0_34, %c0_35] : memref<1x4x9x9x128xbf16, #tpu.memory_space<vmem>>, vector<1x1x8x8x128xbf16>
    %21 = vector.shape_cast %20 : vector<1x1x8x8x128xbf16> to vector<8x8x128xbf16>
    %22 = arith.maximumf %19, %21 : vector<8x8x128xbf16>
    %c0_36 = arith.constant 0 : index
    %c0_37 = arith.constant 0 : index
    %c1_38 = arith.constant 1 : index
    %c1_39 = arith.constant 1 : index
    %c0_40 = arith.constant 0 : index
    %23 = vector.load %arg1[%c0_36, %c0_37, %c1_38, %c1_39, %c0_40] : memref<1x4x9x9x128xbf16, #tpu.memory_space<vmem>>, vector<1x1x8x8x128xbf16>
    %24 = vector.shape_cast %23 : vector<1x1x8x8x128xbf16> to vector<8x8x128xbf16>
    %25 = arith.maximumf %22, %24 : vector<8x8x128xbf16>
    %c0_41 = arith.constant 0 : index
    %c0_42 = arith.constant 0 : index
    %c0_43 = arith.constant 0 : index
    %c0_44 = arith.constant 0 : index
    %26 = vector.load %arg2[%c0_41, %c0_42, %c0_43, %c0_44] : memref<1x8x8x128xbf16, #tpu.memory_space<vmem>>, vector<1x8x8x128xbf16>
    %27 = vector.shape_cast %26 : vector<1x8x8x128xbf16> to vector<8x8x128xbf16>
    %28 = vector.shape_cast %25 : vector<8x8x128xbf16> to vector<1x8x8x128xbf16>
    tpu.vector_store %arg2[%c0_41, %c0_42, %c0_43, %c0_44], %28 {strides = array<i32>} : memref<1x8x8x128xbf16, #tpu.memory_space<vmem>>, vector<1x8x8x128xbf16>,
    return
  }
  func.func @transform_0(%arg0: i32) -> (i32, i32, i32, i32, i32) {
    %c0_i32 = arith.constant 0 : i32
    %c0_i32_0 = arith.constant 0 : i32
    %c0_i32_1 = arith.constant 0 : i32
    %c0_i32_2 = arith.constant 0 : i32
    %c0_i32_3 = arith.constant 0 : i32
    return %arg0, %c0_i32, %c0_i32_0, %c0_i32_1, %c0_i32_2 : i32, i32, i32, i32, i32
  }
  func.func @transform_1(%arg0: i32) -> (i32, i32, i32, i32) {
    %c0_i32 = arith.constant 0 : i32
    %c0_i32_0 = arith.constant 0 : i32
    %c0_i32_1 = arith.constant 0 : i32
    %c0_i32_2 = arith.constant 0 : i32
    return %arg0, %c0_i32, %c0_i32_0, %c0_i32_1 : i32, i32, i32, i32
  }
}

module attributes {stable_mosaic.version = 11 : i64} {
  func.func @_bottleneck_kernel(%arg0: i32, %arg1: memref<1x128x128xbf16, #tpu.memory_space<vmem>>, %arg2: memref<128x1xf32, #tpu.memory_space<vmem>>, %arg3: memref<128x256xbf16, #tpu.memory_space<vmem>>, %arg4: memref<1x256xf32, #tpu.memory_space<vmem>>, %arg5: memref<9x128x128xbf16, #tpu.memory_space<vmem>>, %arg6: memref<1x128xf32, #tpu.memory_space<vmem>>, %arg7: memref<128x128xbf16, #tpu.memory_space<vmem>>, %arg8: memref<1x128xf32, #tpu.memory_space<vmem>>, %arg9: memref<128x128xbf16, #tpu.memory_space<vmem>>, %arg10: memref<1x128xf32, #tpu.memory_space<vmem>>, %arg11: memref<1x1x128xf32, #tpu.memory_space<vmem>>) attributes {dimension_semantics = [#tpu.dimension_semantics<parallel>], iteration_bounds = array<i64: 2>, scalar_prefetch = 0 : i64, scratch_operands = 0 : i64, tpu.core_type = #tpu.core_type<tc>, window_params = [{transform_indices = @transform_0, window_bounds = array<i64: 1, 128, 128>}, {pipeline_mode = #tpu.pipeline_mode<synchronous>, transform_indices = @transform_1, window_bounds = array<i64: 128, 1>}, {pipeline_mode = #tpu.pipeline_mode<synchronous>, transform_indices = @transform_2, window_bounds = array<i64: 128, 256>}, {pipeline_mode = #tpu.pipeline_mode<synchronous>, transform_indices = @transform_3, window_bounds = array<i64: 1, 256>}, {pipeline_mode = #tpu.pipeline_mode<synchronous>, transform_indices = @transform_4, window_bounds = array<i64: 9, 128, 128>}, {pipeline_mode = #tpu.pipeline_mode<synchronous>, transform_indices = @transform_5, window_bounds = array<i64: 1, 128>}, {pipeline_mode = #tpu.pipeline_mode<synchronous>, transform_indices = @transform_6, window_bounds = array<i64: 128, 128>}, {pipeline_mode = #tpu.pipeline_mode<synchronous>, transform_indices = @transform_7, window_bounds = array<i64: 1, 128>}, {pipeline_mode = #tpu.pipeline_mode<synchronous>, transform_indices = @transform_8, window_bounds = array<i64: 128, 128>}, {pipeline_mode = #tpu.pipeline_mode<synchronous>, transform_indices = @transform_9, window_bounds = array<i64: 1, 128>}, {transform_indices = @transform_10, window_bounds = array<i64: 1, 1, 128>}]} {
    %c0 = arith.constant 0 : index
    %c0_0 = arith.constant 0 : index
    %c0_1 = arith.constant 0 : index
    %0 = vector.load %arg1[%c0, %c0_0, %c0_1] : memref<1x128x128xbf16, #tpu.memory_space<vmem>>, vector<1x128x128xbf16>
    %1 = vector.shape_cast %0 : vector<1x128x128xbf16> to vector<128x128xbf16>
    %c0_2 = arith.constant 0 : index
    %c0_3 = arith.constant 0 : index
    %2 = vector.load %arg3[%c0_2, %c0_3] : memref<128x256xbf16, #tpu.memory_space<vmem>>, vector<128x256xbf16>
    %cst = arith.constant dense<0.000000e+00> : vector<128x256xf32>
    %3 = tpu.matmul %1, %2, %cst {dimension_numbers = #tpu.dot_dimension_numbers<[1], [0], [0], [1], [0, 0, 1, 1], [], []>} : vector<128x128xbf16>, vector<128x256xbf16>, vector<128x256xf32> -> vector<128x256xf32>
    %c0_4 = arith.constant 0 : index
    %c0_5 = arith.constant 0 : index
    %4 = vector.load %arg4[%c0_4, %c0_5] : memref<1x256xf32, #tpu.memory_space<vmem>>, vector<1x256xf32>
    %5 = vector.broadcast %4 : vector<1x256xf32> to vector<128x256xf32>
    %6 = arith.addf %3, %5 : vector<128x256xf32>
    %7 = vector.extract_strided_slice %6 {offsets = [0, 0], sizes = [128, 128], strides = [1, 1]} : vector<128x256xf32> to vector<128x128xf32>
    %cst_6 = arith.constant 0.000000e+00 : f32
    %8 = vector.broadcast %cst_6 : f32 to vector<128x128xf32>
    %9 = arith.maximumf %7, %8 : vector<128x128xf32>
    %c0_7 = arith.constant 0 : index
    %c0_8 = arith.constant 0 : index
    %10 = vector.load %arg2[%c0_7, %c0_8] : memref<128x1xf32, #tpu.memory_space<vmem>>, vector<128x1xf32>
    %11 = vector.broadcast %10 : vector<128x1xf32> to vector<128x128xf32>
    %12 = arith.mulf %9, %11 : vector<128x128xf32>
    %13 = arith.truncf %12 : vector<128x128xf32> to vector<128x128xbf16>
    %14 = vector.extract_strided_slice %6 {offsets = [11, 128], sizes = [100, 128], strides = [1, 1]} : vector<128x256xf32> to vector<100x128xf32>
    %15 = arith.truncf %14 : vector<100x128xf32> to vector<100x128xbf16>
    %16 = vector.extract_strided_slice %13 {offsets = [0, 0], sizes = [100, 128], strides = [1, 1]} : vector<128x128xbf16> to vector<100x128xbf16>
    %c0_9 = arith.constant 0 : index
    %c0_10 = arith.constant 0 : index
    %c0_11 = arith.constant 0 : index
    %17 = vector.load %arg5[%c0_9, %c0_10, %c0_11] : memref<9x128x128xbf16, #tpu.memory_space<vmem>>, vector<1x128x128xbf16>
    %18 = vector.shape_cast %17 : vector<1x128x128xbf16> to vector<128x128xbf16>
    %cst_12 = arith.constant dense<0.000000e+00> : vector<100x128xf32>
    %19 = tpu.matmul %16, %18, %cst_12 {dimension_numbers = #tpu.dot_dimension_numbers<[1], [0], [0], [1], [0, 0, 1, 1], [], []>} : vector<100x128xbf16>, vector<128x128xbf16>, vector<100x128xf32> -> vector<100x128xf32>
    %20 = vector.extract_strided_slice %13 {offsets = [1, 0], sizes = [100, 128], strides = [1, 1]} : vector<128x128xbf16> to vector<100x128xbf16>
    %c1 = arith.constant 1 : index
    %c0_13 = arith.constant 0 : index
    %c0_14 = arith.constant 0 : index
    %21 = vector.load %arg5[%c1, %c0_13, %c0_14] : memref<9x128x128xbf16, #tpu.memory_space<vmem>>, vector<1x128x128xbf16>
    %22 = vector.shape_cast %21 : vector<1x128x128xbf16> to vector<128x128xbf16>
    %cst_15 = arith.constant dense<0.000000e+00> : vector<100x128xf32>
    %23 = tpu.matmul %20, %22, %cst_15 {dimension_numbers = #tpu.dot_dimension_numbers<[1], [0], [0], [1], [0, 0, 1, 1], [], []>} : vector<100x128xbf16>, vector<128x128xbf16>, vector<100x128xf32> -> vector<100x128xf32>
    %24 = arith.addf %19, %23 : vector<100x128xf32>
    %25 = vector.extract_strided_slice %13 {offsets = [2, 0], sizes = [100, 128], strides = [1, 1]} : vector<128x128xbf16> to vector<100x128xbf16>
    %c2 = arith.constant 2 : index
    %c0_16 = arith.constant 0 : index
    %c0_17 = arith.constant 0 : index
    %26 = vector.load %arg5[%c2, %c0_16, %c0_17] : memref<9x128x128xbf16, #tpu.memory_space<vmem>>, vector<1x128x128xbf16>
    %27 = vector.shape_cast %26 : vector<1x128x128xbf16> to vector<128x128xbf16>
    %cst_18 = arith.constant dense<0.000000e+00> : vector<100x128xf32>
    %28 = tpu.matmul %25, %27, %cst_18 {dimension_numbers = #tpu.dot_dimension_numbers<[1], [0], [0], [1], [0, 0, 1, 1], [], []>} : vector<100x128xbf16>, vector<128x128xbf16>, vector<100x128xf32> -> vector<100x128xf32>
    %29 = arith.addf %24, %28 : vector<100x128xf32>
    %30 = vector.extract_strided_slice %13 {offsets = [10, 0], sizes = [100, 128], strides = [1, 1]} : vector<128x128xbf16> to vector<100x128xbf16>
    %c3 = arith.constant 3 : index
    %c0_19 = arith.constant 0 : index
    %c0_20 = arith.constant 0 : index
    %31 = vector.load %arg5[%c3, %c0_19, %c0_20] : memref<9x128x128xbf16, #tpu.memory_space<vmem>>, vector<1x128x128xbf16>
    %32 = vector.shape_cast %31 : vector<1x128x128xbf16> to vector<128x128xbf16>
    %cst_21 = arith.constant dense<0.000000e+00> : vector<100x128xf32>
    %33 = tpu.matmul %30, %32, %cst_21 {dimension_numbers = #tpu.dot_dimension_numbers<[1], [0], [0], [1], [0, 0, 1, 1], [], []>} : vector<100x128xbf16>, vector<128x128xbf16>, vector<100x128xf32> -> vector<100x128xf32>
    %34 = arith.addf %29, %33 : vector<100x128xf32>
    %35 = vector.extract_strided_slice %13 {offsets = [11, 0], sizes = [100, 128], strides = [1, 1]} : vector<128x128xbf16> to vector<100x128xbf16>
    %c4 = arith.constant 4 : index
    %c0_22 = arith.constant 0 : index
    %c0_23 = arith.constant 0 : index
    %36 = vector.load %arg5[%c4, %c0_22, %c0_23] : memref<9x128x128xbf16, #tpu.memory_space<vmem>>, vector<1x128x128xbf16>
    %37 = vector.shape_cast %36 : vector<1x128x128xbf16> to vector<128x128xbf16>
    %cst_24 = arith.constant dense<0.000000e+00> : vector<100x128xf32>
    %38 = tpu.matmul %35, %37, %cst_24 {dimension_numbers = #tpu.dot_dimension_numbers<[1], [0], [0], [1], [0, 0, 1, 1], [], []>} : vector<100x128xbf16>, vector<128x128xbf16>, vector<100x128xf32> -> vector<100x128xf32>
    %39 = arith.addf %34, %38 : vector<100x128xf32>
    %40 = vector.extract_strided_slice %13 {offsets = [12, 0], sizes = [100, 128], strides = [1, 1]} : vector<128x128xbf16> to vector<100x128xbf16>
    %c5 = arith.constant 5 : index
    %c0_25 = arith.constant 0 : index
    %c0_26 = arith.constant 0 : index
    %41 = vector.load %arg5[%c5, %c0_25, %c0_26] : memref<9x128x128xbf16, #tpu.memory_space<vmem>>, vector<1x128x128xbf16>
    %42 = vector.shape_cast %41 : vector<1x128x128xbf16> to vector<128x128xbf16>
    %cst_27 = arith.constant dense<0.000000e+00> : vector<100x128xf32>
    %43 = tpu.matmul %40, %42, %cst_27 {dimension_numbers = #tpu.dot_dimension_numbers<[1], [0], [0], [1], [0, 0, 1, 1], [], []>} : vector<100x128xbf16>, vector<128x128xbf16>, vector<100x128xf32> -> vector<100x128xf32>
    %44 = arith.addf %39, %43 : vector<100x128xf32>
    %45 = vector.extract_strided_slice %13 {offsets = [20, 0], sizes = [100, 128], strides = [1, 1]} : vector<128x128xbf16> to vector<100x128xbf16>
    %c6 = arith.constant 6 : index
    %c0_28 = arith.constant 0 : index
    %c0_29 = arith.constant 0 : index
    %46 = vector.load %arg5[%c6, %c0_28, %c0_29] : memref<9x128x128xbf16, #tpu.memory_space<vmem>>, vector<1x128x128xbf16>
    %47 = vector.shape_cast %46 : vector<1x128x128xbf16> to vector<128x128xbf16>
    %cst_30 = arith.constant dense<0.000000e+00> : vector<100x128xf32>
    %48 = tpu.matmul %45, %47, %cst_30 {dimension_numbers = #tpu.dot_dimension_numbers<[1], [0], [0], [1], [0, 0, 1, 1], [], []>} : vector<100x128xbf16>, vector<128x128xbf16>, vector<100x128xf32> -> vector<100x128xf32>
    %49 = arith.addf %44, %48 : vector<100x128xf32>
    %50 = vector.extract_strided_slice %13 {offsets = [21, 0], sizes = [100, 128], strides = [1, 1]} : vector<128x128xbf16> to vector<100x128xbf16>
    %c7 = arith.constant 7 : index
    %c0_31 = arith.constant 0 : index
    %c0_32 = arith.constant 0 : index
    %51 = vector.load %arg5[%c7, %c0_31, %c0_32] : memref<9x128x128xbf16, #tpu.memory_space<vmem>>, vector<1x128x128xbf16>
    %52 = vector.shape_cast %51 : vector<1x128x128xbf16> to vector<128x128xbf16>
    %cst_33 = arith.constant dense<0.000000e+00> : vector<100x128xf32>
    %53 = tpu.matmul %50, %52, %cst_33 {dimension_numbers = #tpu.dot_dimension_numbers<[1], [0], [0], [1], [0, 0, 1, 1], [], []>} : vector<100x128xbf16>, vector<128x128xbf16>, vector<100x128xf32> -> vector<100x128xf32>
    %54 = arith.addf %49, %53 : vector<100x128xf32>
    %55 = vector.extract_strided_slice %13 {offsets = [22, 0], sizes = [100, 128], strides = [1, 1]} : vector<128x128xbf16> to vector<100x128xbf16>
    %c8 = arith.constant 8 : index
    %c0_34 = arith.constant 0 : index
    %c0_35 = arith.constant 0 : index
    %56 = vector.load %arg5[%c8, %c0_34, %c0_35] : memref<9x128x128xbf16, #tpu.memory_space<vmem>>, vector<1x128x128xbf16>
    %57 = vector.shape_cast %56 : vector<1x128x128xbf16> to vector<128x128xbf16>
    %cst_36 = arith.constant dense<0.000000e+00> : vector<100x128xf32>
    %58 = tpu.matmul %55, %57, %cst_36 {dimension_numbers = #tpu.dot_dimension_numbers<[1], [0], [0], [1], [0, 0, 1, 1], [], []>} : vector<100x128xbf16>, vector<128x128xbf16>, vector<100x128xf32> -> vector<100x128xf32>
    %59 = arith.addf %54, %58 : vector<100x128xf32>
    %c0_37 = arith.constant 0 : index
    %c0_38 = arith.constant 0 : index
    %60 = vector.load %arg6[%c0_37, %c0_38] : memref<1x128xf32, #tpu.memory_space<vmem>>, vector<1x128xf32>
    %61 = vector.broadcast %60 : vector<1x128xf32> to vector<100x128xf32>
    %62 = arith.addf %59, %61 : vector<100x128xf32>
    %cst_39 = arith.constant 0.000000e+00 : f32
    %63 = vector.broadcast %cst_39 : f32 to vector<100x128xf32>
    %64 = arith.maximumf %62, %63 : vector<100x128xf32>
    %65 = arith.truncf %64 : vector<100x128xf32> to vector<100x128xbf16>
    %c0_40 = arith.constant 0 : index
    %c0_41 = arith.constant 0 : index
    %66 = vector.load %arg7[%c0_40, %c0_41] : memref<128x128xbf16, #tpu.memory_space<vmem>>, vector<128x128xbf16>
    %cst_42 = arith.constant dense<0.000000e+00> : vector<100x128xf32>
    %67 = tpu.matmul %65, %66, %cst_42 {dimension_numbers = #tpu.dot_dimension_numbers<[1], [0], [0], [1], [0, 0, 1, 1], [], []>} : vector<100x128xbf16>, vector<128x128xbf16>, vector<100x128xf32> -> vector<100x128xf32>
    %c0_43 = arith.constant 0 : index
    %c0_44 = arith.constant 0 : index
    %68 = vector.load %arg8[%c0_43, %c0_44] : memref<1x128xf32, #tpu.memory_space<vmem>>, vector<1x128xf32>
    %69 = vector.broadcast %68 : vector<1x128xf32> to vector<100x128xf32>
    %70 = arith.addf %67, %69 : vector<100x128xf32>
    %71 = arith.extf %15 : vector<100x128xbf16> to vector<100x128xf32>
    %72 = arith.addf %70, %71 : vector<100x128xf32>
    %cst_45 = arith.constant 0.000000e+00 : f32
    %73 = vector.broadcast %cst_45 : f32 to vector<100x128xf32>
    %74 = arith.maximumf %72, %73 : vector<100x128xf32>
    %75 = arith.truncf %74 : vector<100x128xf32> to vector<100x128xbf16>
    %c11 = arith.constant 11 : index
    %c0_46 = arith.constant 0 : index
    %76 = vector.load %arg2[%c11, %c0_46] : memref<128x1xf32, #tpu.memory_space<vmem>>, vector<100x1xf32>
    %77 = arith.extf %75 : vector<100x128xbf16> to vector<100x128xf32>
    %78 = vector.broadcast %76 : vector<100x1xf32> to vector<100x128xf32>
    %79 = arith.mulf %77, %78 : vector<100x128xf32>
    %cst_47 = arith.constant dense<0.000000e+00> : vector<128xf32>
    %80 = vector.multi_reduction <add>, %79, %cst_47 [0] : vector<100x128xf32> to vector<128xf32>
    %81 = vector.shape_cast %80 : vector<128xf32> to vector<1x128xf32>
    %cst_48 = arith.constant 1.562500e-02 : f32
    %82 = vector.broadcast %cst_48 : f32 to vector<1x128xf32>
    %83 = arith.mulf %81, %82 : vector<1x128xf32>
    %84 = arith.truncf %83 : vector<1x128xf32> to vector<1x128xbf16>
    %c0_49 = arith.constant 0 : index
    %c0_50 = arith.constant 0 : index
    %85 = vector.load %arg9[%c0_49, %c0_50] : memref<128x128xbf16, #tpu.memory_space<vmem>>, vector<128x128xbf16>
    %cst_51 = arith.constant dense<0.000000e+00> : vector<1x128xf32>
    %86 = tpu.matmul %84, %85, %cst_51 {dimension_numbers = #tpu.dot_dimension_numbers<[1], [0], [0], [1], [0, 0, 1, 1], [], []>} : vector<1x128xbf16>, vector<128x128xbf16>, vector<1x128xf32> -> vector<1x128xf32>
    %c0_52 = arith.constant 0 : index
    %c0_53 = arith.constant 0 : index
    %87 = vector.load %arg10[%c0_52, %c0_53] : memref<1x128xf32, #tpu.memory_space<vmem>>, vector<1x128xf32>
    %88 = arith.addf %86, %87 : vector<1x128xf32>
    %c0_54 = arith.constant 0 : index
    %c0_55 = arith.constant 0 : index
    %c0_56 = arith.constant 0 : index
    %89 = vector.load %arg11[%c0_54, %c0_55, %c0_56] : memref<1x1x128xf32, #tpu.memory_space<vmem>>, vector<1x1x128xf32>
    %90 = vector.shape_cast %89 : vector<1x1x128xf32> to vector<1x128xf32>
    %91 = vector.shape_cast %88 : vector<1x128xf32> to vector<1x1x128xf32>
    tpu.vector_store %arg11[%c0_54, %c0_55, %c0_56], %91 {strides = array<i32>} : memref<1x1x128xf32, #tpu.memory_space<vmem>>, vector<1x1x128xf32>,
    return
  }
  func.func @transform_0(%arg0: i32) -> (i32, i32, i32) {
    %c0_i32 = arith.constant 0 : i32
    %c0_i32_0 = arith.constant 0 : i32
    %c0_i32_1 = arith.constant 0 : i32
    return %arg0, %c0_i32, %c0_i32_0 : i32, i32, i32
  }
  func.func @transform_1(%arg0: i32) -> (i32, i32) {
    %c0_i32 = arith.constant 0 : i32
    %c0_i32_0 = arith.constant 0 : i32
    %c0_i32_1 = arith.constant 0 : i32
    return %c0_i32, %c0_i32_0 : i32, i32
  }
  func.func @transform_2(%arg0: i32) -> (i32, i32) {
    %c0_i32 = arith.constant 0 : i32
    %c0_i32_0 = arith.constant 0 : i32
    %c0_i32_1 = arith.constant 0 : i32
    return %c0_i32, %c0_i32_0 : i32, i32
  }
  func.func @transform_3(%arg0: i32) -> (i32, i32) {
    %c0_i32 = arith.constant 0 : i32
    %c0_i32_0 = arith.constant 0 : i32
    %c0_i32_1 = arith.constant 0 : i32
    return %c0_i32, %c0_i32_0 : i32, i32
  }
  func.func @transform_4(%arg0: i32) -> (i32, i32, i32) {
    %c0_i32 = arith.constant 0 : i32
    %c0_i32_0 = arith.constant 0 : i32
    %c0_i32_1 = arith.constant 0 : i32
    %c0_i32_2 = arith.constant 0 : i32
    return %c0_i32, %c0_i32_0, %c0_i32_1 : i32, i32, i32
  }
  func.func @transform_5(%arg0: i32) -> (i32, i32) {
    %c0_i32 = arith.constant 0 : i32
    %c0_i32_0 = arith.constant 0 : i32
    %c0_i32_1 = arith.constant 0 : i32
    return %c0_i32, %c0_i32_0 : i32, i32
  }
  func.func @transform_6(%arg0: i32) -> (i32, i32) {
    %c0_i32 = arith.constant 0 : i32
    %c0_i32_0 = arith.constant 0 : i32
    %c0_i32_1 = arith.constant 0 : i32
    return %c0_i32, %c0_i32_0 : i32, i32
  }
  func.func @transform_7(%arg0: i32) -> (i32, i32) {
    %c0_i32 = arith.constant 0 : i32
    %c0_i32_0 = arith.constant 0 : i32
    %c0_i32_1 = arith.constant 0 : i32
    return %c0_i32, %c0_i32_0 : i32, i32
  }
  func.func @transform_8(%arg0: i32) -> (i32, i32) {
    %c0_i32 = arith.constant 0 : i32
    %c0_i32_0 = arith.constant 0 : i32
    %c0_i32_1 = arith.constant 0 : i32
    return %c0_i32, %c0_i32_0 : i32, i32
  }
  func.func @transform_9(%arg0: i32) -> (i32, i32) {
    %c0_i32 = arith.constant 0 : i32
    %c0_i32_0 = arith.constant 0 : i32
    %c0_i32_1 = arith.constant 0 : i32
    return %c0_i32, %c0_i32_0 : i32, i32
  }
  func.func @transform_10(%arg0: i32) -> (i32, i32, i32) {
    %c0_i32 = arith.constant 0 : i32
    %c0_i32_0 = arith.constant 0 : i32
    %c0_i32_1 = arith.constant 0 : i32
    return %arg0, %c0_i32, %c0_i32_0 : i32, i32, i32
  }
}

</mosaic_0001>

<bundles_post_ra>
// kernel: modified_resnet_forward.3
= control target key start
LH: loop header
LB: loop body
LE: loop exit
PB: predicated region body
PF: predicated region fallthrough
CT: control target
= control target key end

     0   :  { %s11782_s12 = smov 0   ;;  %s15606_s0 = inlined_call_operand.vmem [shape: bf16[2,424,128], index: 0, kind: input, shape index: {}]   ;;  %s15607_s1 = inlined_call_operand.vmem [shape: bf16[16,128,128], index: 1, kind: input, shape index: {}]   ;;  %s15608_s2 = inlined_call_operand.vmem [shape: f32[1,128], index: 2, kind: input, shape index: {}]   ;;  %s15609_s3 = inlined_call_operand.vmem [shape: bf16[2,361,128], index: 3, kind: output, shape index: {}]  }
   0x1 LB: > { %s8470_s13 = sadd.s32 4294967295, %s11758_s12   ;;  %p8474_p0 = scmp.ge.s32.totalorder %s11758_s12, 1  ;;  %s11758_s12 = sphi %s11782_s12, %s13_s12  }
   0x2   : > { %p137_p1 = scmp.lt.s32.totalorder %s11758_s12, 3 }
   0x4   : > { %p138_p2 = pnand %p8474_p0, %p137_p1 }
   0x6   : > { %141 = sbr.rel (%p138_p2) target bundleno = 1717 (0x6b5), region = 32 }
   0xb   : > { %v11432_v0 = vld [vmem:[%s15607_s1 + $0x78] sm:$0xff]   ;;  %v15623_v1 = vmov 0.0   ;;  %v11434_v3 = vld [vmem:[%s15607_s1 + $0x70] sm:$0xff]   ;;  %vm11761_vm0 = vmmov 0   ;;  %p161_p3 = scmp.lt.s32.totalorder %s8470_s13, 1  ;;  %v11436_v5 = vld [vmem:[%s15607_s1 + $0x68] sm:$0xff]  }
   0xc   : > { %9692 = vmatprep.subr.bf16.mxu0 %v15623_v1  ;;  %9800 = vmatprep.subr.bf16.mxu1 %v15623_v1  ;;  %v11433_v2 = vld [vmem:[%s15607_s1 + $0x38] sm:$0xff]   ;;  %v11435_v4 = vld [vmem:[%s15607_s1 + $0x30] sm:$0xff]   ;;  %v11437_v6 = vld [vmem:[%s15607_s1 + $0x28] sm:$0xff]   ;;  %vm366_vm1 = vsmask.f32 7424  ;;  %vm1151_vm2 = vcmask 1046528  }
   0xd   : > { %9693 = vmatpush3.bf16.msra.mxu0 %v11432_v0  ;;  %9708 = vmatprep.mubr.msk.bf16.mxu0 %vm11761_vm0, %v15623_v1  ;;  %s15986_s13 = smov (!%p161_p3, %s8470_s13), 1  ;;  %v11438_v7 = vld [vmem:[%s15607_s1 + $0x60] sm:$0xff]   ;;  %v11440_v9 = vld [vmem:[%s15607_s1 + $0x58] sm:$0xff]   ;;  %v11442_v13 = vld [vmem:[%s15607_s1 + $0x50] sm:$0xff]   ;;  %vm1548_vm3 = vsmask.f32 6400 }
   0xe   : > { %9801 = vmatpush3.bf16.msra.mxu1 %v11433_v2  ;;  %9694 = vmatprep.subr.bf16.mxu0 %v15623_v1  ;;  %s11420_s26 = smul.u32 212, %s15986_s13  ;;  %v11439_v8 = vld [vmem:[%s15607_s1 + $0x20] sm:$0xff]   ;;  %v11441_v10 = vld [vmem:[%s15607_s1 + $0x18] sm:$0xff]   ;;  %v11443_v16 = vld [vmem:[%s15607_s1 + $0x10] sm:$0xff]   ;;  %vm2727_vm4 = vcmask 1045504   ;;  %vm3585_vm6 = vcmask 1044480  }
   0xf   : > { %9802 = vmatprep.subr.bf16.mxu1 %v15623_v1  ;;  %9816 = vmatprep.mubr.msk.bf16.mxu1 %vm11761_vm0, %v15623_v1  ;;  %v11444_v18 = vld [vmem:[%s15607_s1 + $0x48] sm:$0xff]   ;;  %v11446_v23 = vld [vmem:[%s15607_s1 + $0x40] sm:$0xff]   ;;  %v11450_v28 = vld [vmem:[%s15607_s1 + $0xb8] sm:$0xff]   ;;  %vm3124_vm5 = vsmask.f32 5376  ;;  %s11421_s8 = smul.u32 184, %s15986_s13 }
  0x10   : > { %s11832_s6 = scalar_lea.vmem %s15606_s0, %s11420_s26  ;;  %v11445_v22 = vld [vmem:[%s15607_s1 + $0x8] sm:$0xff]   ;;  %v11447_v24 = vld [vmem:[%s15607_s1] sm:$0xff]   ;;  %v11451_v32 = vld [vmem:[%s15607_s1 + $0xf8] sm:$0xff]   ;;  %vm4539_vm7 = vsmask.f32 4352  ;;  %vm8409_vm8 = vcmask 1040384  }
  0x11   : > { %9695 = vmatpush3.bf16.msra.mxu0 %v11434_v3  ;;  %v172_v11 = vld [vmem:[%s11832_s6] sm:$0xf]  ;;  %v11844_v12 = vld [vmem:[%s11832_s6 + $0x4] sm:$0xf]  ;;  %v11851_v15 = vld [vmem:[%s11832_s6 + $0x8] sm:$0xff]   ;;  %s15489_s11 = scalar_lea.vmem %s15609_s3, %s11421_s8 }
  0x12   : > { %9803 = vmatpush3.bf16.msra.mxu1 %v11435_v4  ;;  %9696 = vmatprep.subr.bf16.mxu0 %v15623_v1  ;;  %v8493_v14 = vcombine.low %v172_v11, %v11844_v12  ;;  %v375_v21 = vshll.u32 %v11851_v15, 16  ;;  %v11876_v27 = vld [vmem:[%s11832_s6 + $0x10] sm:$0xff]   ;;  %v379_v30 = vshrl.u32 %v11851_v15, 16  ;;  %v11892_v33 = vld [vmem:[%s11832_s6 + $0x18] sm:$0xff]   ;;  %v11459_v41 = vld [vmem:[%s15607_s1 + $0xa8] sm:$0xff]  }
  0x13   : > { %9804 = vmatprep.subr.bf16.mxu1 %v15623_v1  ;;  %v383_v31 = vshll.u32 %v11876_v27, 16  ;;  %v11455_v36 = vld [vmem:[%s15607_s1 + $0xb0] sm:$0xff]   ;;  %v387_v39 = vshrl.u32 %v11876_v27, 16  ;;  %v391_v40 = vshll.u32 %v11892_v33, 16  ;;  %v11461_v42 = vld [vmem:[%s15607_s1 + $0xe8] sm:$0xff]   ;;  %v11929_v45 = vld [vmem:[%s11832_s6 + $0x20] sm:$0xff]  }
  0x14   : > { %v370_v17 = vshll.u32 %v8493_v14, 16  ;;  %v368_v19 = vshrl.u32 %v8493_v14, 16  ;;  %v377_v26 = vrot.slane %v375_v21, 1  ;;  %v11456_v37 = vld [vmem:[%s15607_s1 + $0xf0] sm:$0xff]   ;;  %v11464_v46 = vld [vmem:[%s15607_s1 + $0xa0] sm:$0xff]   ;;  %v395_v49 = vshrl.u32 %v11892_v33, 16 }
  0x15   : > { %9697 = vmatpush3.bf16.msra.mxu0 %v11436_v5  ;;  %v385_v35 = vrot.slane %v383_v31, 1  ;;  %v393_v44 = vrot.slane %v391_v40, 1  ;;  %v11466_v47 = vld [vmem:[%s15607_s1 + $0xe0] sm:$0xff]   ;;  %v399_v50 = vshll.u32 %v11929_v45, 16  ;;  %v11469_v51 = vld [vmem:[%s15607_s1 + $0x98] sm:$0xff]   ;;  %v11960_v55 = vld [vmem:[%s11832_s6 + $0x28] sm:$0xff]  }
  0x16   : > { %9805 = vmatpush3.bf16.msra.mxu1 %v11437_v6  ;;  %9698 = vmatprep.subr.bf16.mxu0 %v15623_v1  ;;  %v372_v20 = vrot.slane %v370_v17, 1  ;;  %v381_v34 = vor.u32 %v379_v30, %v377_v26  ;;  %v11470_v52 = vld [vmem:[%s15607_s1 + $0xd8] sm:$0xff]   ;;  %v11474_v56 = vld [vmem:[%s15607_s1 + $0x90] sm:$0xff]   ;;  %v403_v59 = vshrl.u32 %v11929_v45, 16  ;;  %v407_v60 = vshll.u32 %v11960_v55, 16  ;;  %v11479_v61 = vld [vmem:[%s15607_s1 + $0x88] sm:$0xff]  }
  0x17   : > { %9806 = vmatprep.subr.bf16.mxu1 %v15623_v1  ;;  %v389_v43 = vor.u32 %v387_v39, %v385_v35  ;;  %v397_v53 = vor.u32 %v395_v49, %v393_v44  ;;  %v401_v54 = vrot.slane %v399_v50, 1  ;;  %v11475_v57 = vld [vmem:[%s15607_s1 + $0xd0] sm:$0xff]   ;;  %v11480_v62 = vld [vmem:[%s15607_s1 + $0xc8] sm:$0xff]   ;;  %v411_v3 = vshrl.u32 %v11960_v55, 16  ;;  %v12001_v6 = vld [vmem:[%s11832_s6 + $0x38] sm:$0xff]  }
  0x18   : > { %v373_v25 = vor.u32 %v372_v20, %v368_v19  ;;  %v386_v38 = vsel %vm366_vm1, %v381_v34, %v385_v35  ;;  %v11983_v63 = vld [vmem:[%s11832_s6 + $0x30] sm:$0xff]   ;;  %v409_v2 = vrot.slane %v407_v60, 1  ;;  %v11485_v11 = vld [vmem:[%s15607_s1 + $0xc0] sm:$0xff]   ;;  %v1557_v19 = vrot.slane %v379_v30, 1 }
  0x19   : > { %9699 = vmatpush3.bf16.msra.mxu0 %v11438_v7  ;;  %v394_v48 = vsel %vm366_vm1, %v389_v43, %v393_v44  ;;  %v402_v58 = vsel %vm366_vm1, %v397_v53, %v401_v54  ;;  %v405_v0 = vor.u32 %v403_v59, %v401_v54  ;;  %v415_v4 = vshll.u32 %v11983_v63, 16 }
  0x1a   : > { %9807 = vmatpush3.bf16.msra.mxu1 %v11439_v8  ;;  %9700 = vmatprep.subr.bf16.mxu0 %v15623_v1  ;;  %v378_v29 = vsel %vm366_vm1, %v373_v25, %v377_v26  ;;  %v413_v7 = vor.u32 %v411_v3, %v409_v2  ;;  %v419_v17 = vshrl.u32 %v11983_v63, 16  ;;  %v12045_v25 = vld [vmem:[%s11832_s6 + $0x48] sm:$0xff]   ;;  %v1126_v26 = vld [vmem:[%s11832_s6] sm:$0xe]  ;;  %vm8410_vm9 = vsmask.f32 256 }
  0x1b   : > { %9808 = vmatprep.subr.bf16.mxu1 %v15623_v1  ;;  %v410_v5 = vsel %vm366_vm1, %v405_v0, %v409_v2  ;;  %v417_v8 = vrot.slane %v415_v4, 1  ;;  %v443_v54 = vshrl.u32 %v12045_v25, 16  ;;  %vm8411_vm10 = vmand %vm8409_vm8, %vm8410_vm9 }
  0x1d   : > { %9701 = vmatpush3.bf16.msra.mxu0 %v11440_v9  ;;  %v12011_v9 = vld [vmem:[%s11832_s6 + $0x40] sm:$0xff]  }
  0x1e   : > { %9809 = vmatpush3.bf16.msra.mxu1 %v11441_v10  ;;  %9702 = vmatprep.subr.bf16.mxu0 %v15623_v1  ;;  %v11484_v10 = vld [vmem:[%s15607_s1 + $0x80] sm:$0xff]   ;;  %v435_v35 = vshrl.u32 %v12011_v9, 16 }
  0x1f   : > { %9810 = vmatprep.subr.bf16.mxu1 %v15623_v1 }
  0x21   : > { %9703 = vmatpush3.bf16.msra.mxu0 %v11442_v13  ;;  %v1558_v13 = vrot.slane %v375_v21, 2  ;;  %v421_v21 = vor.u32 %v419_v17, %v417_v8 }
  0x22   : > { %9811 = vmatpush3.bf16.msra.mxu1 %v11443_v16  ;;  %9704 = vmatprep.subr.bf16.mxu0 %v15623_v1  ;;  %v418_v16 = vsel %vm366_vm1, %v413_v7, %v417_v8 }
  0x23   : > { %9812 = vmatprep.subr.bf16.mxu1 %v15623_v1  ;;  %v12068_v44 = vor.u32 %v1558_v13, %v1557_v19 }
  0x25   : > { %9705 = vmatpush3.bf16.msra.mxu0 %v11444_v18  ;;  %v431_v18 = vshll.u32 %v12011_v9, 16 }
  0x26   : > { %9813 = vmatpush3.bf16.msra.mxu1 %v11445_v22  ;;  %9706 = vmatprep.subr.bf16.mxu0 %v15623_v1  ;;  %v427_v22 = vshrl.u32 %v12001_v6, 16 }
  0x27   : > { %9814 = vmatprep.subr.bf16.mxu1 %v15623_v1 }
  0x29   : > { %9707 = vmatpush3.bf16.msra.mxu0 %v11446_v23  ;;  %v433_v23 = vrot.slane %v431_v18, 1 }
  0x2a   : > { %9815 = vmatpush3.bf16.msra.mxu1 %v11447_v24  ;;  %9908 = vmatprep.subr.bf16.mxu0 %v15623_v1 }
  0x2b   : > { %10016 = vmatprep.subr.bf16.mxu1 %v15623_v1 }
  0x2c   : > { %9709 = vmatmul.mubr.bf16.vlgmr.msra.gmra.mxu0 %v378_v29 }
  0x2d   : > { %9817 = vmatmul.mubr.bf16.vlgmr.msra.gmra.mxu1 %v8493_v14  ;;  %9909 = vmatpush3.bf16.msra.mxu0 %v11450_v28  ;;  %v423_v14 = vshll.u32 %v12001_v6, 16  ;;  %v8548_v28 = vcombine.low %v1126_v26, %v11844_v12  ;;  %v439_v12 = vshll.u32 %v12045_v25, 16 }
  0x2e   : > { %10017 = vmatpush3.bf16.msra.mxu1 %v11451_v32  ;;  %9712 = vmatprep.mubr.msk.bf16.mxu0 %vm11761_vm0, %v15623_v1  ;;  %v1153_v32 = vrot.slane %v11851_v15, 1 }
  0x2f   : > { %9820 = vmatprep.mubr.msk.bf16.mxu1 %vm11761_vm0, %v15623_v1  ;;  %9910 = vmatprep.subr.bf16.mxu0 %v15623_v1  ;;  %v425_v20 = vrot.slane %v423_v14, 1  ;;  %v1152_v30 = vrot.slane %v8548_v28, 1  ;;  %v1550_v34 = vshrl.u32 %v8548_v28, 16 }
  0x30   : > { %10018 = vmatprep.subr.bf16.mxu1 %v15623_v1 }
  0x31   : > { %9911 = vmatpush3.bf16.msra.mxu0 %v11455_v36  ;;  %v426_v24 = vsel %vm366_vm1, %v421_v21, %v425_v20  ;;  %v429_v29 = vor.u32 %v427_v22, %v425_v20  ;;  %v1553_v36 = vshll.u32 %v8548_v28, 16  ;;  %v12130_v21 = vld [vmem:[%s11832_s6 + $0x70] sm:$0xff]  }
  0x32   : > { %10019 = vmatpush3.bf16.msra.mxu1 %v11456_v37  ;;  %9912 = vmatprep.subr.bf16.mxu0 %v15623_v1  ;;  %v12062_v37 = vsel %vm1151_vm2, %v1152_v30, %v1153_v32  ;;  %v479_v28 = vshll.u32 %v12130_v21, 16 }
  0x33   : > { %10020 = vmatprep.subr.bf16.mxu1 %v15623_v1  ;;  %v1555_v43 = vrot.slane %v1553_v36, 2 }
  0x34   : > { %9713 = vmatmul.mubr.bf16.gmra.mxu0 %v386_v38  ;;  %v1552_v38 = vrot.slane %v1550_v34, 1 }
  0x35   : > { %9821 = vmatmul.mubr.bf16.gmra.mxu1 %v11851_v15  ;;  %9716 = vmatprep.mubr.msk.bf16.mxu0 %vm11761_vm0, %v15623_v1  ;;  %v11492_v15 = vld [vmem:[%s15607_s1 + $0x128] sm:$0xff]  }
  0x36   : > { %9824 = vmatprep.mubr.msk.bf16.mxu1 %vm11761_vm0, %v15623_v1  ;;  %9913 = vmatpush3.bf16.msra.mxu0 %v11459_v41  ;;  %v434_v41 = vsel %vm366_vm1, %v429_v29, %v433_v23  ;;  %v12138_v29 = vld [vmem:[%s11832_s6 + $0x78] sm:$0xff]  }
  0x37   : > { %10021 = vmatpush3.bf16.msra.mxu1 %v11461_v42  ;;  %9914 = vmatprep.subr.bf16.mxu0 %v15623_v1  ;;  %v12066_v42 = vld [vmem:[%s11832_s6 + $0x50] sm:$0xff]  }
  0x38   : > { %10022 = vmatprep.subr.bf16.mxu1 %v15623_v1  ;;  %v451_v0 = vshrl.u32 %v12066_v42, 16 }
  0x3a   : > { %9915 = vmatpush3.bf16.msra.mxu0 %v11464_v46  ;;  %v1556_v46 = vor.u32 %v1555_v43, %v1552_v38  ;;  %v481_v38 = vrot.slane %v479_v28, 1 }
  0x3b   : > { %10023 = vmatpush3.bf16.msra.mxu1 %v11466_v47  ;;  %9916 = vmatprep.subr.bf16.mxu0 %v15623_v1  ;;  %v437_v47 = vor.u32 %v435_v35, %v433_v23 }
  0x3c   : > { %9717 = vmatmul.mubr.bf16.gmra.mxu0 %v394_v48  ;;  %10024 = vmatprep.subr.bf16.mxu1 %v15623_v1  ;;  %v441_v48 = vrot.slane %v439_v12, 1  ;;  %v12083_v53 = vsel %vm1548_vm3, %v1556_v46, %v12068_v44  ;;  %v483_v46 = vshrl.u32 %v12130_v21, 16 }
  0x3d   : > { %9825 = vmatmul.mubr.bf16.gmra.mxu1 %v11876_v27  ;;  %9720 = vmatprep.mubr.msk.bf16.mxu0 %vm11761_vm0, %v15623_v1  ;;  %v11491_v27 = vld [vmem:[%s15607_s1 + $0x170] sm:$0xff]  }
  0x3e   : > { %9828 = vmatprep.mubr.msk.bf16.mxu1 %vm11761_vm0, %v15623_v1  ;;  %9917 = vmatpush3.bf16.msra.mxu0 %v11469_v51  ;;  %v447_v51 = vshll.u32 %v12066_v42, 16 }
  0x3f   : > { %10025 = vmatpush3.bf16.msra.mxu1 %v11470_v52  ;;  %9918 = vmatprep.subr.bf16.mxu0 %v15623_v1  ;;  %v12079_v52 = vld [vmem:[%s11832_s6 + $0x58] sm:$0xff]  }
  0x40   : > { %10026 = vmatprep.subr.bf16.mxu1 %v15623_v1 }
  0x42   : > { %9919 = vmatpush3.bf16.msra.mxu0 %v11474_v56  ;;  %v442_v56 = vsel %vm366_vm1, %v437_v47, %v441_v48 }
  0x43   : > { %10027 = vmatpush3.bf16.msra.mxu1 %v11475_v57  ;;  %9920 = vmatprep.subr.bf16.mxu0 %v15623_v1  ;;  %v449_v57 = vrot.slane %v447_v51, 1 }
  0x44   : > { %9721 = vmatmul.mubr.bf16.gmra.mxu0 %v402_v58  ;;  %10028 = vmatprep.subr.bf16.mxu1 %v15623_v1  ;;  %v455_v58 = vshll.u32 %v12079_v52, 16 }
  0x45   : > { %9829 = vmatmul.mubr.bf16.gmra.mxu1 %v11892_v33  ;;  %9724 = vmatprep.mubr.msk.bf16.mxu0 %vm11761_vm0, %v15623_v1  ;;  %v453_v8 = vor.u32 %v451_v0, %v449_v57  ;;  %v11686_v33 = vld [vmem:[%s11832_s6 + $0x18] sm:$0xff]  }
  0x46   : > { %9832 = vmatprep.mubr.msk.bf16.mxu1 %vm11761_vm0, %v15623_v1  ;;  %9921 = vmatpush3.bf16.msra.mxu0 %v11479_v61  ;;  %v12093_v61 = vld [vmem:[%s11832_s6 + $0x60] sm:$0xff]  }
  0x47   : > { %10029 = vmatpush3.bf16.msra.mxu1 %v11480_v62  ;;  %9922 = vmatprep.subr.bf16.mxu0 %v15623_v1  ;;  %v445_v62 = vor.u32 %v443_v54, %v441_v48  ;;  %v463_v7 = vshll.u32 %v12093_v61, 16  ;;  %v467_v23 = vshrl.u32 %v12093_v61, 16  ;;  %v12162_v48 = vld [vmem:[%s11832_s6 + $0x80] sm:$0xff]  }
  0x48   : > { %10030 = vmatprep.subr.bf16.mxu1 %v15623_v1 }
  0x49   : > { %v450_v2 = vsel %vm366_vm1, %v445_v62, %v449_v57  ;;  %v465_v13 = vrot.slane %v463_v7, 1  ;;  %v485_v57 = vor.u32 %v483_v46, %v481_v38  ;;  %v15612_v62 = vshll.u32 %v12162_v48, 16 }
  0x4a   : > { %9923 = vmatpush3.bf16.msra.mxu0 %v11484_v10  ;;  %v459_v10 = vshrl.u32 %v12079_v52, 16 }
  0x4b   : > { %10031 = vmatpush3.bf16.msra.mxu1 %v11485_v11  ;;  %10124 = vmatprep.subr.bf16.mxu0 %v15623_v1  ;;  %v469_v30 = vor.u32 %v467_v23, %v465_v13 }
  0x4c   : > { %9725 = vmatmul.mubr.bf16.gmra.mxu0 %v410_v5  ;;  %10232 = vmatprep.subr.bf16.mxu1 %v15623_v1  ;;  %v457_v5 = vrot.slane %v455_v58, 1 }
  0x4d   : > { %9833 = vmatmul.mubr.bf16.gmra.mxu1 %v11929_v45  ;;  %9728 = vmatprep.mubr.msk.bf16.mxu0 %vm11761_vm0, %v15623_v1  ;;  %v11687_v45 = vld [vmem:[%s11832_s6 + $0x20] sm:$0xff]  }
  0x4e   : > { %9836 = vmatprep.mubr.msk.bf16.mxu1 %vm11761_vm0, %v15623_v1  ;;  %v458_v11 = vsel %vm366_vm1, %v453_v8, %v457_v5  ;;  %v461_v19 = vor.u32 %v459_v10, %v457_v5  ;;  %v15619_v5 = vshrl.u32 %v12138_v29, 16 }
  0x54   : > { %9729 = vmatmul.mubr.bf16.gmra.mxu0 %v418_v16  ;;  %v12119_v16 = vld [vmem:[%s11832_s6 + $0x68] sm:$0xff]  }
  0x55   : > { %9837 = vmatmul.mubr.bf16.gmra.mxu1 %v11960_v55  ;;  %9732 = vmatprep.mubr.msk.bf16.mxu0 %vm11761_vm0, %v15623_v1  ;;  %v471_v20 = vshll.u32 %v12119_v16, 16  ;;  %v475_v34 = vshrl.u32 %v12119_v16, 16  ;;  %v11688_v55 = vld [vmem:[%s11832_s6 + $0x28] sm:$0xff]  }
  0x56   : > { %9840 = vmatprep.mubr.msk.bf16.mxu1 %vm11761_vm0, %v15623_v1 }
  0x57   : > { %v473_v26 = vrot.slane %v471_v20, 1 }
  0x59   : > { %v474_v36 = vsel %vm366_vm1, %v469_v30, %v473_v26  ;;  %v477_v43 = vor.u32 %v475_v34, %v473_v26  ;;  %v15613_v26 = vshrl.u32 %v12162_v48, 16 }
  0x5b   : > { %v482_v47 = vsel %vm366_vm1, %v477_v43, %v481_v38 }
  0x5c   : > { %9733 = vmatmul.mubr.bf16.gmra.mxu0 %v426_v24  ;;  %v466_v24 = vsel %vm366_vm1, %v461_v19, %v465_v13  ;;  %v12183_v19 = vld [vmem:[%s11832_s6 + $0x90] sm:$0xff]  }
  0x5d   : > { %9841 = vmatmul.mubr.bf16.gmra.mxu1 %v11983_v63  ;;  %9736 = vmatprep.mubr.msk.bf16.mxu0 %vm11761_vm0, %v15623_v1  ;;  %v15610_v38 = vshll.u32 %v12183_v19, 16  ;;  %v11502_v63 = vld [vmem:[%s15607_s1 + $0x100] sm:$0xff]  }
  0x5e   : > { %9844 = vmatprep.mubr.msk.bf16.mxu1 %vm11761_vm0, %v15623_v1 }
  0x64   : > { %9737 = vmatmul.mubr.bf16.gmra.mxu0 %v434_v41  ;;  %v15616_v41 = vshll.u32 %v12138_v29, 16 }
  0x65   : > { %9845 = vmatmul.mubr.bf16.gmra.mxu1 %v12001_v6  ;;  %9740 = vmatprep.mubr.msk.bf16.mxu0 %vm11761_vm0, %v15623_v1 }
  0x66   : > { %9848 = vmatprep.mubr.msk.bf16.mxu1 %vm11761_vm0, %v15623_v1 }
  0x6c   : > { %9741 = vmatmul.mubr.bf16.gmra.mxu0 %v442_v56  ;;  %v489_v56 = vrot.slane %v15616_v41, 1  ;;  %v216_v41 = vld [vmem:[%s11832_s6 + $0xb0] sm:$0xf] }
  0x6d   : > { %9849 = vmatmul.mubr.bf16.gmra.mxu1 %v12011_v9  ;;  %9744 = vmatprep.mubr.msk.bf16.mxu0 %vm11761_vm0, %v15623_v1 }
  0x6e   : > { %9852 = vmatprep.mubr.msk.bf16.mxu1 %vm11761_vm0, %v15623_v1  ;;  %v490_v8 = vsel %vm366_vm1, %v485_v57, %v489_v56  ;;  %v12207_v57 = vld [vmem:[%s11832_s6 + $0x98] sm:$0xff]  }
  0x74   : > { %9745 = vmatmul.mubr.bf16.gmra.mxu0 %v450_v2  ;;  %v12175_v2 = vld [vmem:[%s11832_s6 + $0x88] sm:$0xff]  }
  0x75   : > { %9853 = vmatmul.mubr.bf16.gmra.mxu1 %v12045_v25  ;;  %9748 = vmatprep.mubr.msk.bf16.mxu0 %vm11761_vm0, %v15623_v1  ;;  %v15611_v13 = vshll.u32 %v12175_v2, 16 }
  0x76   : > { %9856 = vmatprep.mubr.msk.bf16.mxu1 %vm11761_vm0, %v15623_v1 }
  0x7c   : > { %9749 = vmatmul.mubr.bf16.gmra.mxu0 %v458_v11  ;;  %v497_v11 = vrot.slane %v15612_v62, 1 }
  0x7d   : > { %9857 = vmatmul.mubr.bf16.gmra.mxu1 %v12066_v42  ;;  %9752 = vmatprep.mubr.msk.bf16.mxu0 %vm11761_vm0, %v15623_v1 }
  0x7e   : > { %9860 = vmatprep.mubr.msk.bf16.mxu1 %vm11761_vm0, %v15623_v1  ;;  %v501_v43 = vor.u32 %v15613_v26, %v497_v11  ;;  %v12229_v26 = vld [vmem:[%s11832_s6 + $0xa8] sm:$0xff]  }
  0x84   : > { %9753 = vmatmul.mubr.bf16.gmra.mxu0 %v466_v24  ;;  %v493_v24 = vor.u32 %v15619_v5, %v489_v56 }
  0x85   : > { %9861 = vmatmul.mubr.bf16.gmra.mxu1 %v12079_v52  ;;  %9756 = vmatprep.mubr.msk.bf16.mxu0 %vm11761_vm0, %v15623_v1 }
  0x86   : > { %9864 = vmatprep.mubr.msk.bf16.mxu1 %vm11761_vm0, %v15623_v1  ;;  %v498_v30 = vsel %vm366_vm1, %v493_v24, %v497_v11  ;;  %v12212_v24 = vld [vmem:[%s11832_s6 + $0xa0] sm:$0xff]  }
  0x8c   : > { %9757 = vmatmul.mubr.bf16.gmra.mxu0 %v474_v36  ;;  %v505_v36 = vrot.slane %v15611_v13, 1 }
  0x8d   : > { %9865 = vmatmul.mubr.bf16.gmra.mxu1 %v12093_v61  ;;  %9760 = vmatprep.mubr.msk.bf16.mxu0 %vm11761_vm0, %v15623_v1 }
  0x8e   : > { %9868 = vmatprep.mubr.msk.bf16.mxu1 %vm11761_vm0, %v15623_v1  ;;  %v506_v56 = vsel %vm366_vm1, %v501_v43, %v505_v36  ;;  %v15615_v43 = vshll.u32 %v12207_v57, 16 }
  0x90   : > { %v521_v62 = vrot.slane %v15615_v43, 1 }
  0x94   : > { %9761 = vmatmul.mubr.bf16.gmra.mxu0 %v482_v47  ;;  %v15614_v47 = vshrl.u32 %v12175_v2, 16 }
  0x95   : > { %9869 = vmatmul.mubr.bf16.gmra.mxu1 %v12119_v16  ;;  %9764 = vmatprep.mubr.msk.bf16.mxu0 %vm11761_vm0, %v15623_v1 }
  0x96   : > { %9872 = vmatprep.mubr.msk.bf16.mxu1 %vm11761_vm0, %v15623_v1  ;;  %v509_v11 = vor.u32 %v15614_v47, %v505_v36  ;;  %v15620_v47 = vshll.u32 %v12229_v26, 16 }
  0x9c   : > { %9765 = vmatmul.mubr.bf16.gmra.mxu0 %v490_v8  ;;  %v513_v8 = vrot.slane %v15610_v38, 1  ;;  %v523_v38 = vshrl.u32 %v12207_v57, 16 }
  0x9d   : > { %9873 = vmatmul.mubr.bf16.gmra.mxu1 %v12130_v21  ;;  %9768 = vmatprep.mubr.msk.bf16.mxu0 %vm11761_vm0, %v15623_v1 }
  0x9e   : > { %9876 = vmatprep.mubr.msk.bf16.mxu1 %vm11761_vm0, %v15623_v1  ;;  %v514_v13 = vsel %vm366_vm1, %v509_v11, %v513_v8 }
  0xa4   : > { %9769 = vmatmul.mubr.bf16.gmra.mxu0 %v498_v30  ;;  %v15617_v30 = vshrl.u32 %v12183_v19, 16 }
  0xa5   : > { %9877 = vmatmul.mubr.bf16.gmra.mxu1 %v12138_v29  ;;  %9772 = vmatprep.mubr.msk.bf16.mxu0 %vm11761_vm0, %v15623_v1 }
  0xa6   : > { %9880 = vmatprep.mubr.msk.bf16.mxu1 %vm11761_vm0, %v15623_v1  ;;  %v517_v36 = vor.u32 %v15617_v30, %v513_v8  ;;  %v525_v8 = vor.u32 %v523_v38, %v521_v62 }
  0xa8   : > { %v522_v43 = vsel %vm366_vm1, %v517_v36, %v521_v62  ;;  %v537_v36 = vrot.slane %v15620_v47, 1 }
  0xac   : > { %9773 = vmatmul.mubr.bf16.gmra.mxu0 %v506_v56  ;;  %v15618_v56 = vshll.u32 %v12212_v24, 16 }
  0xad   : > { %9881 = vmatmul.mubr.bf16.gmra.mxu1 %v12162_v48  ;;  %9776 = vmatprep.mubr.msk.bf16.mxu0 %vm11761_vm0, %v15623_v1 }
  0xae   : > { %9884 = vmatprep.mubr.msk.bf16.mxu1 %vm11761_vm0, %v15623_v1  ;;  %v529_v11 = vrot.slane %v15618_v56, 1  ;;  %v531_v56 = vshrl.u32 %v12212_v24, 16 }
  0xb0   : > { %v530_v5 = vsel %vm366_vm1, %v525_v8, %v529_v11  ;;  %v533_v62 = vor.u32 %v531_v56, %v529_v11 }
  0xb4   : > { %9777 = vmatmul.mubr.bf16.gmra.mxu0 %v514_v13  ;;  %v217_v13 = vld [vmem:[%s11832_s6 + $0xb4] sm:$0x1] }
  0xb5   : > { %9885 = vmatmul.mubr.bf16.gmra.mxu1 %v12175_v2  ;;  %9780 = vmatprep.mubr.msk.bf16.mxu0 %vm11761_vm0, %v15623_v1  ;;  %v8515_v30 = vcombine.low %v216_v41, %v217_v13  ;;  %v539_v41 = vshrl.u32 %v12229_v26, 16  ;;  %v538_v13 = vsel %vm366_vm1, %v533_v62, %v537_v36  ;;  %v11489_v62 = vld [vmem:[%s15607_s1 + $0x178] sm:$0xff]  }
  0xb6   : > { %9888 = vmatprep.mubr.msk.bf16.mxu1 %vm11761_vm0, %v15623_v1 }
  0xb7   : > { %v547_v47 = vshrl.u32 %v8515_v30, 16 }
  0xbc   : > { %9781 = vmatmul.mubr.bf16.gmra.mxu0 %v522_v43  ;;  %v543_v43 = vshll.u32 %v8515_v30, 16 }
  0xbd   : > { %9889 = vmatmul.mubr.bf16.gmra.mxu1 %v12183_v19  ;;  %9784 = vmatprep.mubr.msk.bf16.mxu0 %vm11761_vm0, %v15623_v1 }
  0xbe   : > { %9892 = vmatprep.mubr.msk.bf16.mxu1 %vm11761_vm0, %v15623_v1  ;;  %v545_v8 = vrot.slane %v543_v43, 1 }
  0xc0   : > { %v549_v43 = vor.u32 %v547_v47, %v545_v8  ;;  %v1562_v47 = vrot.slane %v383_v31, 2 }
  0xc4   : > { %9785 = vmatmul.mubr.bf16.gmra.mxu0 %v530_v5  ;;  %v541_v5 = vor.u32 %v539_v41, %v537_v36  ;;  %v11488_v36 = vld [vmem:[%s15607_s1 + $0x138] sm:$0xff]  }
  0xc5   : > { %9893 = vmatmul.mubr.bf16.gmra.mxu1 %v12207_v57  ;;  %9788 = vmatprep.mubr.msk.bf16.mxu0 %vm11761_vm0, %v15623_v1 }
  0xc6   : > { %9896 = vmatprep.mubr.msk.bf16.mxu1 %vm11761_vm0, %v15623_v1  ;;  %v546_v11 = vsel %vm366_vm1, %v541_v5, %v545_v8  ;;  %v11490_v5 = vld [vmem:[%s15607_s1 + $0x130] sm:$0xff]  }
  0xcc   : > { %9789 = vmatmul.mubr.bf16.gmra.mxu0 %v538_v13  ;;  %v1561_v13 = vrot.slane %v387_v39, 1 }
  0xcd   : > { %9897 = vmatmul.mubr.bf16.gmra.mxu1 %v12212_v24  ;;  %9792 = vmatprep.mubr.msk.bf16.mxu0 %vm11761_vm0, %v15623_v1 }
  0xce   : > { %9900 = vmatprep.mubr.msk.bf16.mxu1 %vm11761_vm0, %v15623_v1 }
  0xd4   : > { %9793 = vmatmul.mubr.bf16.gmra.mxu0 %v546_v11  ;;  %v1563_v11 = vor.u32 %v1562_v47, %v1561_v13  ;;  %v11494_v13 = vld [vmem:[%s15607_s1 + $0x120] sm:$0xff]  }
  0xd5   : > { %9901 = vmatmul.mubr.bf16.gmra.mxu1 %v12229_v26  ;;  %9796 = vmatprep.mubr.msk.bf16.mxu0 %vm11761_vm0, %v15623_v1 }
  0xd6   : > { %9904 = vmatprep.mubr.msk.bf16.mxu1 %vm11761_vm0, %v15623_v1  ;;  %v1564_v39 = vsel %vm1548_vm3, %v12068_v44, %v1563_v11 }
  0xdc   : > { %9797 = vmatmul.mubr.bf16.gmra.mxu0 %v549_v43 }
  0xdd   : > { %9905 = vmatmul.mubr.bf16.gmra.mxu1 %v8515_v30  ;;  %9924 = vmatprep.mubr.msk.bf16.mxu0 %vm11761_vm0, %v15623_v1  ;;  %v11685_v30 = vld [vmem:[%s11832_s6 + $0x10] sm:$0xff]  }
  0xde   : > { %10032 = vmatprep.mubr.msk.bf16.mxu1 %vm11761_vm0, %v15623_v1  ;;  %v1155_v8 = vrot.slane %v11685_v30, 1  ;;  %v11495_v30 = vld [vmem:[%s15607_s1 + $0x160] sm:$0xff]  }
  0xe0   : > { %v1156_v31 = vsel %vm1151_vm2, %v1153_v32, %v1155_v8  ;;  %v11493_v32 = vld [vmem:[%s15607_s1 + $0x168] sm:$0xff]  }
  0xe4   : > { %9925 = vmatmul.mubr.bf16.vlgmr.msra.gmra.mxu0 %v12062_v37  ;;  %v1565_v37 = vrot.slane %v395_v49, 1 }
  0xe5   : > { %10033 = vmatmul.mubr.bf16.vlgmr.msra.gmra.mxu1 %v12083_v53  ;;  %10125 = vmatpush3.bf16.msra.mxu0 %v11488_v36  ;;  %v1566_v53 = vrot.slane %v391_v40, 2  ;;  %v1157_v40 = vrot.slane %v11686_v33, 1 }
  0xe6   : > { %10233 = vmatpush3.bf16.msra.mxu1 %v11489_v62  ;;  %9928 = vmatprep.mubr.msk.bf16.mxu0 %vm11761_vm0, %v15623_v1 }
  0xe7   : > { %10036 = vmatprep.mubr.msk.bf16.mxu1 %vm11761_vm0, %v15623_v1  ;;  %10126 = vmatprep.subr.bf16.mxu0 %v15623_v1  ;;  %v1567_v62 = vor.u32 %v1566_v53, %v1565_v37 }
  0xe8   : > { %10234 = vmatprep.subr.bf16.mxu1 %v15623_v1 }
  0xe9   : > { %10127 = vmatpush3.bf16.msra.mxu0 %v11490_v5  ;;  %v1568_v53 = vsel %vm1548_vm3, %v1563_v11, %v1567_v62 }
  0xea   : > { %10235 = vmatpush3.bf16.msra.mxu1 %v11491_v27  ;;  %10128 = vmatprep.subr.bf16.mxu0 %v15623_v1 }
  0xeb   : > { %10236 = vmatprep.subr.bf16.mxu1 %v15623_v1 }
  0xec   : > { %v655_v44 = vpop.f32.mrf.mxu0  ;;  %9929 = vmatmul.mubr.bf16.gmra.mxu0 %v1156_v31  ;;  %v1158_v31 = vsel %vm1151_vm2, %v1155_v8, %v1157_v40  ;;  %v11497_v8 = vld [vmem:[%s15607_s1 + $0x158] sm:$0xff]  }
  0xed   : > { %v943_v43 = vpop.f32.mrf.mxu1  ;;  %10037 = vmatmul.mubr.bf16.gmra.mxu1 %v1564_v39  ;;  %9932 = vmatprep.mubr.msk.bf16.mxu0 %vm11761_vm0, %v15623_v1 }
  0xee   : > { %v12326_v49 = vadd.f32 %v943_v43, %v655_v44  ;;  %v9710_v36 = vpop.f32.mrf.mxu0  ;;  %10040 = vmatprep.mubr.msk.bf16.mxu1 %vm11761_vm0, %v15623_v1  ;;  %10129 = vmatpush3.bf16.msra.mxu0 %v11492_v15  ;;  %v1569_v15 = vrot.slane %v403_v59, 1  ;;  %v11496_v44 = vld [vmem:[%s15607_s1 + $0x118] sm:$0xff]  }
  0xef   : > { %v9818_v47 = vpop.f32.mrf.mxu1  ;;  %10237 = vmatpush3.bf16.msra.mxu1 %v11493_v32  ;;  %10130 = vmatprep.subr.bf16.mxu0 %v15623_v1  ;;  %v1570_v32 = vrot.slane %v399_v50, 2  ;;  %v1159_v50 = vrot.slane %v11687_v45, 1 }
  0xf0   : > { %v658_v5 = vpop.f32.mrf.mxu0  ;;  %10238 = vmatprep.subr.bf16.mxu1 %v15623_v1  ;;  %v11498_v47 = vld [vmem:[%s15607_s1 + $0x110] sm:$0xff]  }
  0xf1   : > { %v946_v27 = vpop.f32.mrf.mxu1 }
  0xf2   : > { %v12339_v39 = vadd.f32 %v946_v27, %v658_v5  ;;  %v9711_v37 = vpop.f32.mrf.mxu0  ;;  %10131 = vmatpush3.bf16.msra.mxu0 %v11494_v13  ;;  %v1571_v13 = vor.u32 %v1570_v32, %v1569_v15  ;;  %v11499_v5 = vld [vmem:[%s15607_s1 + $0x150] sm:$0xff]  }
  0xf3   : > { %v9819_v43 = vpop.f32.mrf.mxu1  ;;  %10239 = vmatpush3.bf16.msra.mxu1 %v11495_v30  ;;  %10132 = vmatprep.subr.bf16.mxu0 %v15623_v1  ;;  %v1160_v37 = vsel %vm1151_vm2, %v1157_v40, %v1159_v50  ;;  %v11501_v40 = vld [vmem:[%s15607_s1 + $0x148] sm:$0xff]  }
  0xf4   : > { %v663_v11 = vpop.f32.mrf.mxu0  ;;  %9933 = vmatmul.mubr.bf16.gmra.mxu0 %v1158_v31  ;;  %10240 = vmatprep.subr.bf16.mxu1 %v15623_v1  ;;  %v1572_v32 = vsel %vm1548_vm3, %v1567_v62, %v1571_v13  ;;  %v1574_v43 = vrot.slane %v407_v60, 2  ;;  %v1161_v60 = vrot.slane %v11688_v55, 1 }
  0xf5   : > { %v951_v59 = vpop.f32.mrf.mxu1  ;;  %10041 = vmatmul.mubr.bf16.gmra.mxu1 %v1568_v53  ;;  %9936 = vmatprep.mubr.msk.bf16.mxu0 %vm11761_vm0, %v15623_v1 }
  0xf6   : > { %v12357_v33 = vadd.f32 %v951_v59, %v663_v11  ;;  %v9714_v36 = vpop.f32.mrf.mxu0  ;;  %10044 = vmatprep.mubr.msk.bf16.mxu1 %vm11761_vm0, %v15623_v1  ;;  %10133 = vmatpush3.bf16.msra.mxu0 %v11496_v44  ;;  %v1573_v44 = vrot.slane %v411_v3, 1 }
  0xf7   : > { %v9822_v30 = vpop.f32.mrf.mxu1  ;;  %10241 = vmatpush3.bf16.msra.mxu1 %v11497_v8  ;;  %10134 = vmatprep.subr.bf16.mxu0 %v15623_v1  ;;  %v11500_v8 = vld [vmem:[%s15607_s1 + $0x108] sm:$0xff]  }
  0xf8   : > { %v666_v27 = vpop.f32.mrf.mxu0  ;;  %10242 = vmatprep.subr.bf16.mxu1 %v15623_v1  ;;  %v1575_v36 = vor.u32 %v1574_v43, %v1573_v44  ;;  %v1578_v44 = vrot.slane %v415_v4, 2 }
  0xf9   : > { %v954_v31 = vpop.f32.mrf.mxu1 }
  0xfa   : > { %v12370_v53 = vadd.f32 %v954_v31, %v666_v27  ;;  %v9715_v15 = vpop.f32.mrf.mxu0  ;;  %10135 = vmatpush3.bf16.msra.mxu0 %v11498_v47  ;;  %v1162_v27 = vsel %vm1151_vm2, %v1159_v50, %v1161_v60  ;;  %v11689_v50 = vld [vmem:[%s11832_s6 + $0x30] sm:$0xff]  }
  0xfb   : > { %v9823_v11 = vpop.f32.mrf.mxu1  ;;  %10243 = vmatpush3.bf16.msra.mxu1 %v11499_v5  ;;  %10136 = vmatprep.subr.bf16.mxu0 %v15623_v1  ;;  %v1576_v15 = vsel %vm1548_vm3, %v1571_v13, %v1575_v36 }
  0xfc   : > { %v671_v62 = vpop.f32.mrf.mxu0  ;;  %9937 = vmatmul.mubr.bf16.gmra.mxu0 %v1160_v37  ;;  %10244 = vmatprep.subr.bf16.mxu1 %v15623_v1 }
  0xfd   : > { %v959_v3 = vpop.f32.mrf.mxu1  ;;  %10045 = vmatmul.mubr.bf16.gmra.mxu1 %v1572_v32  ;;  %9940 = vmatprep.mubr.msk.bf16.mxu0 %vm11761_vm0, %v15623_v1  ;;  %v1577_v32 = vrot.slane %v419_v17, 1 }
  0xfe   : > { %v12388_v59 = vadd.f32 %v959_v3, %v671_v62  ;;  %v9718_v45 = vpop.f32.mrf.mxu0  ;;  %10048 = vmatprep.mubr.msk.bf16.mxu1 %vm11761_vm0, %v15623_v1  ;;  %10137 = vmatpush3.bf16.msra.mxu0 %v11500_v8 }
  0xff   : > { %v9826_v47 = vpop.f32.mrf.mxu1  ;;  %10245 = vmatpush3.bf16.msra.mxu1 %v11501_v40  ;;  %10138 = vmatprep.subr.bf16.mxu0 %v15623_v1  ;;  %v1163_v40 = vrot.slane %v11689_v50, 1  ;;  %v1579_v17 = vor.u32 %v1578_v44, %v1577_v32 }
 0x100   : > { %v674_v30 = vpop.f32.mrf.mxu0  ;;  %10246 = vmatprep.subr.bf16.mxu1 %v15623_v1 }
 0x101   : > { %v962_v5 = vpop.f32.mrf.mxu1  ;;  %v1164_v45 = vsel %vm1151_vm2, %v1161_v60, %v1163_v40 }
 0x102   : > { %v12395_v31 = vadd.f32 %v962_v5, %v674_v30  ;;  %v9719_v37 = vpop.f32.mrf.mxu0  ;;  %10139 = vmatpush3.bf16.msra.mxu0 %v11502_v63  ;;  %v1580_v5 = vsel %vm1548_vm3, %v1575_v36, %v1579_v17  ;;  %v11690_v36 = vld [vmem:[%s11832_s6 + $0x38] sm:$0xff]  }
 0x103   : > { %v9827_v43 = vpop.f32.mrf.mxu1  ;;  %v1582_v37 = vrot.slane %v423_v14, 2  ;;  %10340 = vmatprep.subr.bf16.mxu0 %v15623_v1 }
 0x104   : > { %v679_v8 = vpop.f32.mrf.mxu0  ;;  %9941 = vmatmul.mubr.bf16.gmra.mxu0 %v1162_v27  ;;  %v1581_v27 = vrot.slane %v427_v22, 1  ;;  %v1165_v22 = vrot.slane %v11690_v36, 1 }
 0x105   : > { %v967_v11 = vpop.f32.mrf.mxu1  ;;  %10049 = vmatmul.mubr.bf16.gmra.mxu1 %v1576_v15  ;;  %9944 = vmatprep.mubr.msk.bf16.mxu0 %vm11761_vm0, %v15623_v1  ;;  %v11503_v15 = vld [vmem:[%s15607_s1 + $0x140] sm:$0xff]  }
 0x106   : > { %v12405_v62 = vadd.f32 %v967_v11, %v679_v8  ;;  %v9722_v3 = vpop.f32.mrf.mxu0  ;;  %10052 = vmatprep.mubr.msk.bf16.mxu1 %vm11761_vm0, %v15623_v1  ;;  %10247 = vmatpush3.bf16.msra.mxu1 %v11503_v15  ;;  %v1583_v14 = vor.u32 %v1582_v37, %v1581_v27 }
 0x107   : > { %v9830_v13 = vpop.f32.mrf.mxu1  ;;  %10448 = vmatprep.subr.bf16.mxu1 %v15623_v1  ;;  %v1166_v3 = vsel %vm1151_vm2, %v1163_v40, %v1165_v22  ;;  %v11691_v40 = vld [vmem:[%s11832_s6 + $0x40] sm:$0xff]  }
 0x108   : > { %v682_v4 = vpop.f32.mrf.mxu0  ;;  %v1167_v37 = vrot.slane %v11691_v40, 1 }
 0x109   : > { %v970_v55 = vpop.f32.mrf.mxu1 }
 0x10a   : > { %v12413_v47 = vadd.f32 %v970_v55, %v682_v4  ;;  %v9723_v30 = vpop.f32.mrf.mxu0  ;;  %v1584_v4 = vsel %vm1548_vm3, %v1579_v17, %v1583_v14  ;;  %v1585_v55 = vrot.slane %v435_v35, 1 }
 0x10b   : > { %v9831_v60 = vpop.f32.mrf.mxu1 }
 0x10c   : > { %v687_v32 = vpop.f32.mrf.mxu0  ;;  %9945 = vmatmul.mubr.bf16.gmra.mxu0 %v1164_v45  ;;  %v1586_v45 = vrot.slane %v431_v18, 2 }
 0x10d   : > { %v975_v44 = vpop.f32.mrf.mxu1  ;;  %10053 = vmatmul.mubr.bf16.gmra.mxu1 %v1580_v5  ;;  %9948 = vmatprep.mubr.msk.bf16.mxu0 %vm11761_vm0, %v15623_v1 }
 0x10e   : > { %v12427_v43 = vadd.f32 %v975_v44, %v687_v32  ;;  %v9726_v6 = vpop.f32.mrf.mxu0  ;;  %10056 = vmatprep.mubr.msk.bf16.mxu1 %vm11761_vm0, %v15623_v1  ;;  %v1587_v35 = vor.u32 %v1586_v45, %v1585_v55  ;;  %v1168_v32 = vsel %vm1151_vm2, %v1165_v22, %v1167_v37  ;;  %v11692_v22 = vld [vmem:[%s11832_s6 + $0x48] sm:$0xff]  }
 0x10f   : > { %v9834_v8 = vpop.f32.mrf.mxu1 }
 0x110   : > { %v690_v11 = vpop.f32.mrf.mxu0  ;;  %v1588_v6 = vsel %vm1548_vm3, %v1583_v14, %v1587_v35  ;;  %v1589_v8 = vrot.slane %v443_v54, 1 }
 0x111   : > { %v978_v50 = vpop.f32.mrf.mxu1 }
 0x112   : > { %v12433_v13 = vadd.f32 %v978_v50, %v690_v11  ;;  %v9727_v63 = vpop.f32.mrf.mxu0  ;;  %v1590_v11 = vrot.slane %v439_v12, 2 }
 0x113   : > { %v9835_v30 = vpop.f32.mrf.mxu1 }
 0x114   : > { %v695_v5 = vpop.f32.mrf.mxu0  ;;  %9949 = vmatmul.mubr.bf16.gmra.mxu0 %v1166_v3  ;;  %v1591_v54 = vor.u32 %v1590_v11, %v1589_v8 }
 0x115   : > { %v983_v27 = vpop.f32.mrf.mxu1  ;;  %10057 = vmatmul.mubr.bf16.gmra.mxu1 %v1584_v4  ;;  %9952 = vmatprep.mubr.msk.bf16.mxu0 %vm11761_vm0, %v15623_v1  ;;  %v1169_v4 = vrot.slane %v11692_v22, 1  ;;  %v1597_v22 = vrot.slane %v459_v10, 1 }
 0x116   : > { %v12443_v15 = vadd.f32 %v983_v27, %v695_v5  ;;  %v9730_v60 = vpop.f32.mrf.mxu0  ;;  %10060 = vmatprep.mubr.msk.bf16.mxu1 %vm11761_vm0, %v15623_v1  ;;  %v1592_v40 = vsel %vm1548_vm3, %v1587_v35, %v1591_v54 }
 0x117   : > { %v9838_v9 = vpop.f32.mrf.mxu1  ;;  %v1170_v30 = vsel %vm1151_vm2, %v1167_v37, %v1169_v4  ;;  %v1593_v60 = vrot.slane %v451_v0, 1  ;;  %v11693_v37 = vld [vmem:[%s11832_s6 + $0x50] sm:$0xff]  }
 0x118   : > { %v698_v18 = vpop.f32.mrf.mxu0  ;;  %v1594_v9 = vrot.slane %v447_v51, 2 }
 0x119   : > { %v986_v17 = vpop.f32.mrf.mxu1 }
 0x11a   : > { %v12448_v44 = vadd.f32 %v986_v17, %v698_v18  ;;  %v9731_v36 = vpop.f32.mrf.mxu0  ;;  %v1595_v0 = vor.u32 %v1594_v9, %v1593_v60 }
 0x11b   : > { %v9839_v50 = vpop.f32.mrf.mxu1  ;;  %v1171_v36 = vrot.slane %v11693_v37, 1  ;;  %v1602_v37 = vrot.slane %v463_v7, 2 }
 0x11c   : > { %v703_v3 = vpop.f32.mrf.mxu0  ;;  %9953 = vmatmul.mubr.bf16.gmra.mxu0 %v1168_v32 }
 0x11d   : > { %v991_v63 = vpop.f32.mrf.mxu1  ;;  %10061 = vmatmul.mubr.bf16.gmra.mxu1 %v1588_v6  ;;  %9956 = vmatprep.mubr.msk.bf16.mxu0 %vm11761_vm0, %v15623_v1  ;;  %v1172_v11 = vsel %vm1151_vm2, %v1169_v4, %v1171_v36  ;;  %v11694_v4 = vld [vmem:[%s11832_s6 + $0x58] sm:$0xff]  }
 0x11e   : > { %v12458_v55 = vadd.f32 %v991_v63, %v703_v3  ;;  %v9734_v45 = vpop.f32.mrf.mxu0  ;;  %10064 = vmatprep.mubr.msk.bf16.mxu1 %vm11761_vm0, %v15623_v1  ;;  %v1596_v63 = vsel %vm1548_vm3, %v1591_v54, %v1595_v0 }
 0x11f   : > { %v9842_v25 = vpop.f32.mrf.mxu1  ;;  %v1598_v45 = vrot.slane %v455_v58, 2 }
 0x120   : > { %v706_v12 = vpop.f32.mrf.mxu0 }
 0x121   : > { %v994_v14 = vpop.f32.mrf.mxu1  ;;  %v1599_v10 = vor.u32 %v1598_v45, %v1597_v22 }
 0x122   : > { %v12463_v5 = vadd.f32 %v994_v14, %v706_v12  ;;  %v9735_v27 = vpop.f32.mrf.mxu0 }
 0x123   : > { %v9843_v18 = vpop.f32.mrf.mxu1 }
 0x124   : > { %v711_v17 = vpop.f32.mrf.mxu0  ;;  %9957 = vmatmul.mubr.bf16.gmra.mxu0 %v1170_v30  ;;  %v1173_v30 = vrot.slane %v11694_v4, 1 }
 0x125   : > { %v999_v32 = vpop.f32.mrf.mxu1  ;;  %10065 = vmatmul.mubr.bf16.gmra.mxu1 %v1592_v40  ;;  %9960 = vmatprep.mubr.msk.bf16.mxu0 %vm11761_vm0, %v15623_v1 }
 0x126   : > { %v12473_v6 = vadd.f32 %v999_v32, %v711_v17  ;;  %v9738_v8 = vpop.f32.mrf.mxu0  ;;  %10068 = vmatprep.mubr.msk.bf16.mxu1 %vm11761_vm0, %v15623_v1  ;;  %v1174_v60 = vsel %vm1151_vm2, %v1171_v36, %v1173_v30  ;;  %v1600_v17 = vsel %vm1548_vm3, %v1595_v0, %v1599_v10  ;;  %v1601_v32 = vrot.slane %v467_v23, 1  ;;  %v11695_v36 = vld [vmem:[%s11832_s6 + $0x60] sm:$0xff]  }
 0x127   : > { %v9846_v42 = vpop.f32.mrf.mxu1 }
 0x128   : > { %v714_v51 = vpop.f32.mrf.mxu0  ;;  %v1603_v23 = vor.u32 %v1602_v37, %v1601_v32 }
 0x129   : > { %v1002_v35 = vpop.f32.mrf.mxu1 }
 0x12a   : > { %v12478_v50 = vadd.f32 %v1002_v35, %v714_v51  ;;  %v9739_v3 = vpop.f32.mrf.mxu0  ;;  %v1175_v35 = vrot.slane %v11695_v36, 1 }
 0x12b   : > { %v9847_v25 = vpop.f32.mrf.mxu1 }
 0x12c   : > { %v719_v12 = vpop.f32.mrf.mxu0  ;;  %9961 = vmatmul.mubr.bf16.gmra.mxu0 %v1172_v11  ;;  %v1604_v25 = vsel %vm1548_vm3, %v1599_v10, %v1603_v23 }
 0x12d   : > { %v1007_v14 = vpop.f32.mrf.mxu1  ;;  %10069 = vmatmul.mubr.bf16.gmra.mxu1 %v1596_v63  ;;  %9964 = vmatprep.mubr.msk.bf16.mxu0 %vm11761_vm0, %v15623_v1  ;;  %v1176_v63 = vsel %vm1151_vm2, %v1173_v30, %v1175_v35  ;;  %v11696_v30 = vld [vmem:[%s11832_s6 + $0x68] sm:$0xff]  }
 0x12e   : > { %v12488_v27 = vadd.f32 %v1007_v14, %v719_v12  ;;  %v9742_v40 = vpop.f32.mrf.mxu0  ;;  %10072 = vmatprep.mubr.msk.bf16.mxu1 %vm11761_vm0, %v15623_v1  ;;  %v1605_v12 = vrot.slane %v475_v34, 1  ;;  %v1606_v14 = vrot.slane %v471_v20, 2 }
 0x12f   : > { %v9850_v52 = vpop.f32.mrf.mxu1 }
 0x130   : > { %v722_v58 = vpop.f32.mrf.mxu0  ;;  %v1607_v34 = vor.u32 %v1606_v14, %v1605_v12  ;;  %v15745_v14 = vshrl.u32 %v12138_v29, 16 }
 0x131   : > { %v1010_v54 = vpop.f32.mrf.mxu1 }
 0x132   : > { %v12493_v9 = vadd.f32 %v1010_v54, %v722_v58  ;;  %v9743_v18 = vpop.f32.mrf.mxu0  ;;  %v1177_v58 = vrot.slane %v11696_v30, 1  ;;  %v1608_v37 = vsel %vm1548_vm3, %v1603_v23, %v1607_v34 }
 0x133   : > { %v9851_v8 = vpop.f32.mrf.mxu1 }
 0x134   : > { %v727_v42 = vpop.f32.mrf.mxu0  ;;  %9965 = vmatmul.mubr.bf16.gmra.mxu0 %v1174_v60  ;;  %v1178_v18 = vsel %vm1151_vm2, %v1175_v35, %v1177_v58  ;;  %v1609_v8 = vrot.slane %v483_v46, 1  ;;  %v11697_v35 = vld [vmem:[%s11832_s6 + $0x70] sm:$0xff]  }
 0x135   : > { %v1015_v51 = vpop.f32.mrf.mxu1  ;;  %10073 = vmatmul.mubr.bf16.gmra.mxu1 %v1600_v17  ;;  %9968 = vmatprep.mubr.msk.bf16.mxu0 %vm11761_vm0, %v15623_v1 }
 0x136   : > { %v12503_v11 = vadd.f32 %v1015_v51, %v727_v42  ;;  %v9746_v3 = vpop.f32.mrf.mxu0  ;;  %10076 = vmatprep.mubr.msk.bf16.mxu1 %vm11761_vm0, %v15623_v1  ;;  %v1610_v42 = vrot.slane %v479_v28, 2 }
 0x137   : > { %v9854_v61 = vpop.f32.mrf.mxu1 }
 0x138   : > { %v730_v7 = vpop.f32.mrf.mxu0  ;;  %v1179_v61 = vrot.slane %v11697_v35, 1  ;;  %v1611_v46 = vor.u32 %v1610_v42, %v1609_v8 }
 0x139   : > { %v1018_v0 = vpop.f32.mrf.mxu1 }
 0x13a   : > { %v12508_v22 = vadd.f32 %v1018_v0, %v730_v7  ;;  %v9747_v45 = vpop.f32.mrf.mxu0  ;;  %v1612_v12 = vsel %vm1548_vm3, %v1607_v34, %v1611_v46 }
 0x13b   : > { %v9855_v4 = vpop.f32.mrf.mxu1 }
 0x13c   : > { %v735_v40 = vpop.f32.mrf.mxu0  ;;  %9969 = vmatmul.mubr.bf16.gmra.mxu0 %v1176_v63  ;;  %v1180_v63 = vsel %vm1151_vm2, %v1177_v58, %v1179_v61  ;;  %v1613_v4 = vrot.slane %v15745_v14, 1  ;;  %v11698_v58 = vld [vmem:[%s11832_s6 + $0x78] sm:$0xff]  }
 0x13d   : > { %v1023_v52 = vpop.f32.mrf.mxu1  ;;  %10077 = vmatmul.mubr.bf16.gmra.mxu1 %v1604_v25  ;;  %9972 = vmatprep.mubr.msk.bf16.mxu0 %vm11761_vm0, %v15623_v1 }
 0x13e   : > { %v12518_v54 = vadd.f32 %v1023_v52, %v735_v40  ;;  %v9750_v60 = vpop.f32.mrf.mxu0  ;;  %10080 = vmatprep.mubr.msk.bf16.mxu1 %vm11761_vm0, %v15623_v1  ;;  %v15746_v40 = vshll.u32 %v12138_v29, 16 }
 0x13f   : > { %v9858_v16 = vpop.f32.mrf.mxu1 }
 0x140   : > { %v738_v20 = vpop.f32.mrf.mxu0  ;;  %v1614_v52 = vrot.slane %v15746_v40, 2 }
 0x141   : > { %v1026_v10 = vpop.f32.mrf.mxu1 }
 0x142   : > { %v12523_v17 = vadd.f32 %v1026_v10, %v738_v20  ;;  %v9751_v32 = vpop.f32.mrf.mxu0  ;;  %v1181_v20 = vrot.slane %v11698_v58, 1  ;;  %v1615_v34 = vor.u32 %v1614_v52, %v1613_v4  ;;  %v15749_v58 = vshrl.u32 %v12175_v2, 16 }
 0x143   : > { %v9859_v51 = vpop.f32.mrf.mxu1 }
 0x144   : > { %v743_v36 = vpop.f32.mrf.mxu0  ;;  %9973 = vmatmul.mubr.bf16.gmra.mxu0 %v1178_v18  ;;  %v1182_v8 = vsel %vm1151_vm2, %v1179_v61, %v1181_v20  ;;  %v11699_v61 = vld [vmem:[%s11832_s6 + $0x80] sm:$0xff]  }
 0x145   : > { %v1031_v3 = vpop.f32.mrf.mxu1  ;;  %10081 = vmatmul.mubr.bf16.gmra.mxu1 %v1608_v37  ;;  %9976 = vmatprep.mubr.msk.bf16.mxu0 %vm11761_vm0, %v15623_v1 }
 0x146   : > { %v12533_v7 = vadd.f32 %v1031_v3, %v743_v36  ;;  %v9754_v0 = vpop.f32.mrf.mxu0  ;;  %10084 = vmatprep.mubr.msk.bf16.mxu1 %vm11761_vm0, %v15623_v1  ;;  %v1616_v36 = vsel %vm1548_vm3, %v1611_v46, %v1615_v34  ;;  %v15747_v3 = vshrl.u32 %v12162_v48, 16 }
 0x147   : > { %v9862_v21 = vpop.f32.mrf.mxu1  ;;  %v15748_v0 = vshll.u32 %v12162_v48, 16 }
 0x148   : > { %v746_v28 = vpop.f32.mrf.mxu0  ;;  %v1617_v35 = vrot.slane %v15747_v3, 1 }
 0x149   : > { %v1034_v23 = vpop.f32.mrf.mxu1  ;;  %v1618_v21 = vrot.slane %v15748_v0, 2 }
 0x14a   : > { %v12538_v45 = vadd.f32 %v1034_v23, %v746_v28  ;;  %v9755_v25 = vpop.f32.mrf.mxu0 }
 0x14b   : > { %v9863_v30 = vpop.f32.mrf.mxu1  ;;  %v1183_v25 = vrot.slane %v11699_v61, 1  ;;  %v1619_v46 = vor.u32 %v1618_v21, %v1617_v35 }
 0x14c   : > { %v751_v60 = vpop.f32.mrf.mxu0  ;;  %9977 = vmatmul.mubr.bf16.gmra.mxu0 %v1180_v63 }
 0x14d   : > { %v1039_v16 = vpop.f32.mrf.mxu1  ;;  %10085 = vmatmul.mubr.bf16.gmra.mxu1 %v1612_v12  ;;  %9980 = vmatprep.mubr.msk.bf16.mxu0 %vm11761_vm0, %v15623_v1  ;;  %v1184_v52 = vsel %vm1151_vm2, %v1181_v20, %v1183_v25  ;;  %v11700_v20 = vld [vmem:[%s11832_s6 + $0x88] sm:$0xff]  }
 0x14e   : > { %v12548_v10 = vadd.f32 %v1039_v16, %v751_v60  ;;  %v9758_v18 = vpop.f32.mrf.mxu0  ;;  %10088 = vmatprep.mubr.msk.bf16.mxu1 %vm11761_vm0, %v15623_v1  ;;  %v1620_v16 = vsel %vm1548_vm3, %v1615_v34, %v1619_v46 }
 0x14f   : > { %v9866_v29 = vpop.f32.mrf.mxu1  ;;  %v1621_v18 = vrot.slane %v15749_v58, 1 }
 0x150   : > { %v754_v32 = vpop.f32.mrf.mxu0  ;;  %v15750_v29 = vshll.u32 %v12175_v2, 16 }
 0x151   : > { %v1042_v37 = vpop.f32.mrf.mxu1 }
 0x152   : > { %v12553_v42 = vadd.f32 %v1042_v37, %v754_v32  ;;  %v9759_v51 = vpop.f32.mrf.mxu0  ;;  %v1622_v32 = vrot.slane %v15750_v29, 2 }
 0x153   : > { %v9867_v28 = vpop.f32.mrf.mxu1 }
 0x154   : > { %v759_v23 = vpop.f32.mrf.mxu0  ;;  %9981 = vmatmul.mubr.bf16.gmra.mxu0 %v1182_v8  ;;  %v1623_v34 = vor.u32 %v1622_v32, %v1621_v18 }
 0x155   : > { %v1047_v63 = vpop.f32.mrf.mxu1  ;;  %10089 = vmatmul.mubr.bf16.gmra.mxu1 %v1616_v36  ;;  %9984 = vmatprep.mubr.msk.bf16.mxu0 %vm11761_vm0, %v15623_v1  ;;  %v1185_v36 = vrot.slane %v11700_v20, 1 }
 0x156   : > { %v12563_v12 = vadd.f32 %v1047_v63, %v759_v23  ;;  %v9762_v14 = vpop.f32.mrf.mxu0  ;;  %10092 = vmatprep.mubr.msk.bf16.mxu1 %vm11761_vm0, %v15623_v1  ;;  %v1624_v61 = vsel %vm1548_vm3, %v1619_v46, %v1623_v34 }
 0x157   : > { %v9870_v48 = vpop.f32.mrf.mxu1  ;;  %v1186_v28 = vsel %vm1151_vm2, %v1183_v25, %v1185_v36  ;;  %v15751_v14 = vshrl.u32 %v12183_v19, 16  ;;  %v11701_v25 = vld [vmem:[%s11832_s6 + $0x90] sm:$0xff]  }
 0x158   : > { %v762_v4 = vpop.f32.mrf.mxu0  ;;  %v1187_v58 = vrot.slane %v11701_v25, 1 }
 0x159   : > { %v1050_v40 = vpop.f32.mrf.mxu1  ;;  %v1625_v48 = vrot.slane %v15751_v14, 1 }
 0x15a   : > { %v12568_v30 = vadd.f32 %v1050_v40, %v762_v4  ;;  %v9763_v60 = vpop.f32.mrf.mxu0  ;;  %v15752_v4 = vshll.u32 %v12183_v19, 16 }
 0x15b   : > { %v9871_v37 = vpop.f32.mrf.mxu1 }
 0x15c   : > { %v767_v8 = vpop.f32.mrf.mxu0  ;;  %9985 = vmatmul.mubr.bf16.gmra.mxu0 %v1184_v52  ;;  %v1626_v40 = vrot.slane %v15752_v4, 2 }
 0x15d   : > { %v1055_v51 = vpop.f32.mrf.mxu1  ;;  %10093 = vmatmul.mubr.bf16.gmra.mxu1 %v1620_v16  ;;  %9988 = vmatprep.mubr.msk.bf16.mxu0 %vm11761_vm0, %v15623_v1 }
 0x15e   : > { %v12578_v3 = vadd.f32 %v1055_v51, %v767_v8  ;;  %v9766_v35 = vpop.f32.mrf.mxu0  ;;  %10096 = vmatprep.mubr.msk.bf16.mxu1 %vm11761_vm0, %v15623_v1  ;;  %v1627_v46 = vor.u32 %v1626_v40, %v1625_v48  ;;  %v1188_v8 = vsel %vm1151_vm2, %v1185_v36, %v1187_v58  ;;  %v11702_v36 = vld [vmem:[%s11832_s6 + $0x98] sm:$0xff]  }
 0x15f   : > { %v9874_v2 = vpop.f32.mrf.mxu1  ;;  %v1189_v14 = vrot.slane %v11702_v36, 1 }
 0x160   : > { %v770_v0 = vpop.f32.mrf.mxu0  ;;  %v1628_v35 = vsel %vm1548_vm3, %v1623_v34, %v1627_v46  ;;  %v1629_v2 = vrot.slane %v523_v38, 1 }
 0x161   : > { %v1058_v21 = vpop.f32.mrf.mxu1 }
 0x162   : > { %v12583_v23 = vadd.f32 %v1058_v21, %v770_v0  ;;  %v9767_v63 = vpop.f32.mrf.mxu0  ;;  %v15753_v0 = vshll.u32 %v12207_v57, 16 }
 0x163   : > { %v9875_v52 = vpop.f32.mrf.mxu1 }
 0x164   : > { %v775_v60 = vpop.f32.mrf.mxu0  ;;  %9989 = vmatmul.mubr.bf16.gmra.mxu0 %v1186_v28  ;;  %v1630_v21 = vrot.slane %v15753_v0, 2  ;;  %v1190_v52 = vsel %vm1151_vm2, %v1187_v58, %v1189_v14  ;;  %v11703_v58 = vld [vmem:[%s11832_s6 + $0xa0] sm:$0xff]  }
 0x165   : > { %v1063_v16 = vpop.f32.mrf.mxu1  ;;  %10097 = vmatmul.mubr.bf16.gmra.mxu1 %v1624_v61  ;;  %9992 = vmatprep.mubr.msk.bf16.mxu0 %vm11761_vm0, %v15623_v1 }
 0x166   : > { %v12593_v18 = vadd.f32 %v1063_v16, %v775_v60  ;;  %v9770_v29 = vpop.f32.mrf.mxu0  ;;  %10100 = vmatprep.mubr.msk.bf16.mxu1 %vm11761_vm0, %v15623_v1  ;;  %v1631_v38 = vor.u32 %v1630_v21, %v1629_v2  ;;  %v1633_v60 = vrot.slane %v531_v56, 1  ;;  %v15754_v16 = vshll.u32 %v12212_v24, 16 }
 0x167   : > { %v9878_v19 = vpop.f32.mrf.mxu1  ;;  %v1191_v56 = vrot.slane %v11703_v58, 1 }
 0x168   : > { %v778_v32 = vpop.f32.mrf.mxu0  ;;  %v1634_v25 = vrot.slane %v15754_v16, 2 }
 0x169   : > { %v1066_v37 = vpop.f32.mrf.mxu1 }
 0x16a   : > { %v12598_v51 = vadd.f32 %v1066_v37, %v778_v32  ;;  %v9771_v20 = vpop.f32.mrf.mxu0  ;;  %v1632_v32 = vsel %vm1548_vm3, %v1627_v46, %v1631_v38  ;;  %v1127_v46 = vld [vmem:[%s11832_s6 + $0xb4] sm:$0x3] }
 0x16b   : > { %v9879_v28 = vpop.f32.mrf.mxu1 }
 0x16c   : > { %v783_v63 = vpop.f32.mrf.mxu0  ;;  %9993 = vmatmul.mubr.bf16.gmra.mxu0 %v1188_v8 }
 0x16d   : > { %v1071_v61 = vpop.f32.mrf.mxu1  ;;  %10101 = vmatmul.mubr.bf16.gmra.mxu1 %v1628_v35  ;;  %9996 = vmatprep.mubr.msk.bf16.mxu0 %vm11761_vm0, %v15623_v1  ;;  %v1635_v35 = vor.u32 %v1634_v25, %v1633_v60 }
 0x16e   : > { %v12608_v48 = vadd.f32 %v1071_v61, %v783_v63  ;;  %v9774_v4 = vpop.f32.mrf.mxu0  ;;  %10104 = vmatprep.mubr.msk.bf16.mxu1 %vm11761_vm0, %v15623_v1  ;;  %v1192_v63 = vsel %vm1151_vm2, %v1189_v14, %v1191_v56  ;;  %v11705_v14 = vld [vmem:[%s11832_s6 + $0xa8] sm:$0xff]  }
 0x16f   : > { %v9882_v57 = vpop.f32.mrf.mxu1  ;;  %v1636_v61 = vsel %vm1548_vm3, %v1631_v38, %v1635_v35  ;;  %v1193_v38 = vrot.slane %v11705_v14, 1 }
 0x170   : > { %v786_v34 = vpop.f32.mrf.mxu0  ;;  %v1637_v57 = vrot.slane %v539_v41, 1 }
 0x171   : > { %v1074_v40 = vpop.f32.mrf.mxu1 }
 0x172   : > { %v12617_v29 = vadd.f32 %v1074_v40, %v786_v34  ;;  %v9775_v19 = vpop.f32.mrf.mxu0  ;;  %v15755_v34 = vshll.u32 %v12229_v26, 16 }
 0x173   : > { %v9883_v37 = vpop.f32.mrf.mxu1 }
 0x174   : > { %v791_v8 = vpop.f32.mrf.mxu0  ;;  %9997 = vmatmul.mubr.bf16.gmra.mxu0 %v1190_v52  ;;  %v1638_v40 = vrot.slane %v15755_v34, 2  ;;  %v11704_v52 = vld [vmem:[%s11832_s6 + $0xb0] sm:$0xf] }
 0x175   : > { %v1079_v20 = vpop.f32.mrf.mxu1  ;;  %10105 = vmatmul.mubr.bf16.gmra.mxu1 %v1632_v32  ;;  %10000 = vmatprep.mubr.msk.bf16.mxu0 %vm11761_vm0, %v15623_v1  ;;  %v12637_v60 = vcombine.low %v11704_v52, %v1127_v46 }
 0x176   : > { %v12623_v24 = vadd.f32 %v1079_v20, %v791_v8  ;;  %v9778_v2 = vpop.f32.mrf.mxu0  ;;  %10108 = vmatprep.mubr.msk.bf16.mxu1 %vm11761_vm0, %v15623_v1  ;;  %v1639_v26 = vor.u32 %v1638_v40, %v1637_v57 }
 0x177   : > { %v9886_v0 = vpop.f32.mrf.mxu1  ;;  %v1642_v41 = vshrl.u32 %v12637_v60, 16  ;;  %v1645_v8 = vshll.u32 %v12637_v60, 16 }
 0x178   : > { %v794_v21 = vpop.f32.mrf.mxu0  ;;  %v1194_v0 = vsel %vm1151_vm2, %v1191_v56, %v1193_v38  ;;  %v1195_v56 = vrot.slane %v12637_v60, 1 }
 0x179   : > { %v1082_v28 = vpop.f32.mrf.mxu1 }
 0x17a   : > { %v12630_v36 = vadd.f32 %v1082_v28, %v794_v21  ;;  %v9779_v4 = vpop.f32.mrf.mxu0  ;;  %v1640_v28 = vsel %vm1548_vm3, %v1635_v35, %v1639_v26 }
 0x17b   : > { %v9887_v16 = vpop.f32.mrf.mxu1 }
 0x17c   : > { %v799_v25 = vpop.f32.mrf.mxu0  ;;  %10001 = vmatmul.mubr.bf16.gmra.mxu0 %v1192_v63  ;;  %v1644_v63 = vrot.slane %v1642_v41, 1  ;;  %v1984_v16 = vld [vmem:[%s11832_s6 + $0x8] sm:$0xe]  ;;  %v1196_v41 = vsel %vm1151_vm2, %v1193_v38, %v1195_v56 }
 0x17d   : > { %v1087_v19 = vpop.f32.mrf.mxu1  ;;  %10109 = vmatmul.mubr.bf16.gmra.mxu1 %v1636_v61  ;;  %10004 = vmatprep.mubr.msk.bf16.mxu0 %vm11761_vm0, %v15623_v1  ;;  %v1647_v61 = vrot.slane %v1645_v8, 2 }
 0x17e   : > { %v12642_v32 = vadd.f32 %v1087_v19, %v799_v25  ;;  %v9782_v37 = vpop.f32.mrf.mxu0  ;;  %10112 = vmatprep.mubr.msk.bf16.mxu1 %vm11761_vm0, %v15623_v1  ;;  %v1985_v25 = vld [vmem:[%s11832_s6 + $0xc] sm:$0xf] }
 0x17f   : > { %v9890_v20 = vpop.f32.mrf.mxu1  ;;  %v1648_v35 = vor.u32 %v1647_v61, %v1644_v63  ;;  %v8598_v8 = vcombine.low %v1984_v16, %v1985_v25 }
 0x180   : > { %v802_v58 = vpop.f32.mrf.mxu0  ;;  %v12663_v20 = vld [vmem:[%s11832_s6 + $0x10] sm:$0xff]  }
 0x181   : > { %v1090_v2 = vpop.f32.mrf.mxu1  ;;  %15756 = vst [vmem:[#allocation2_spill] sm:$0xff] %v12663_v20  ;;  %v2163_v63 = vshrl.u32 %v8598_v8, 16  ;;  %v2166_v38 = vshll.u32 %v8598_v8, 16  ;;  %v15622_v61 = vshrl.u32 %v12663_v20, 16 }
 0x182   : > { %v12649_v46 = vadd.f32 %v1090_v2, %v802_v58  ;;  %v9783_v21 = vpop.f32.mrf.mxu0  ;;  %v1649_v2 = vsel %vm1548_vm3, %v1639_v26, %v1648_v35 }
 0x183   : > { %v9891_v4 = vpop.f32.mrf.mxu1 }
 0x184   : > { %v807_v57 = vpop.f32.mrf.mxu0  ;;  %10005 = vmatmul.mubr.bf16.gmra.mxu0 %v1194_v0  ;;  %v15621_v4 = vshll.u32 %v12663_v20, 16 }
 0x185   : > { %v1095_v34 = vpop.f32.mrf.mxu1  ;;  %10113 = vmatmul.mubr.bf16.gmra.mxu1 %v1640_v28  ;;  %10008 = vmatprep.mubr.msk.bf16.mxu0 %vm11761_vm0, %v15623_v1 }
 0x186   : > { %v12655_v40 = vadd.f32 %v1095_v34, %v807_v57  ;;  %v9786_v52 = vpop.f32.mrf.mxu0  ;;  %10116 = vmatprep.mubr.msk.bf16.mxu1 %vm11761_vm0, %v15623_v1  ;;  %v2176_v8 = vrot.slane %v15621_v4, 2 }
 0x187   : > { %v9894_v19 = vpop.f32.mrf.mxu1  ;;  %v2702_v52 = vld [vmem:[%s11832_s6 + $0x8] sm:$0xc] }
 0x188   : > { %v810_v14 = vpop.f32.mrf.mxu0 }
 0x189   : > { %v1098_v37 = vpop.f32.mrf.mxu1 }
 0x18a   : > { %v12665_v58 = vadd.f32 %v1098_v37, %v810_v14  ;;  %v9787_v60 = vpop.f32.mrf.mxu0  ;;  %v2165_v14 = vrot.slane %v2163_v63, 1  ;;  %v2168_v37 = vrot.slane %v2166_v38, 2 }
 0x18b   : > { %v9895_v0 = vpop.f32.mrf.mxu1  ;;  %v12682_v60 = vld [vmem:[%s11832_s6 + $0x18] sm:$0xff]  }
 0x18c   : > { %v815_v21 = vpop.f32.mrf.mxu0  ;;  %10009 = vmatmul.mubr.bf16.gmra.mxu0 %v1196_v41  ;;  %v2173_v41 = vrot.slane %v15622_v61, 1  ;;  %15757 = vst [vmem:[#allocation3_spill] sm:$0xff] %v12682_v60  ;;  %v2169_v63 = vor.u32 %v2168_v37, %v2165_v14  ;;  %v15625_v4 = vshrl.u32 %v12682_v60, 16  ;;  %v15626_v61 = vshll.u32 %v12682_v60, 16 }
 0x18d   : > { %v1103_v28 = vpop.f32.mrf.mxu1  ;;  %10117 = vmatmul.mubr.bf16.gmra.mxu1 %v1649_v2  ;;  %10012 = vmatprep.mubr.msk.bf16.mxu0 %vm11761_vm0, %v15623_v1 }
 0x18e   : > { %v12672_v57 = vadd.f32 %v1103_v28, %v815_v21  ;;  %v9790_v34 = vpop.f32.mrf.mxu0  ;;  %10120 = vmatprep.mubr.msk.bf16.mxu1 %vm11761_vm0, %v15623_v1  ;;  %v12686_v21 = vcombine.low %v2702_v52, %v1985_v25  ;;  %v2177_v38 = vor.u32 %v2176_v8, %v2173_v41  ;;  %v11508_v41 = vld [vmem:[%s15607_s1 + $0x1b8] sm:$0xff]   ;;  %v2182_v8 = vrot.slane %v15625_v4, 1 }
 0x18f   : > { %v9898_v26 = vpop.f32.mrf.mxu1 }
 0x190   : > { %v818_v16 = vpop.f32.mrf.mxu0  ;;  %v2178_v37 = vsel %vm1548_vm3, %v2169_v63, %v2177_v38  ;;  %v11509_v63 = vld [vmem:[%s15607_s1 + $0x1f8] sm:$0xff]  }
 0x191   : > { %v1106_v19 = vpop.f32.mrf.mxu1 }
 0x192   : > { %v12684_v2 = vadd.f32 %v1106_v19, %v818_v16  ;;  %v9791_v0 = vpop.f32.mrf.mxu0 }
 0x193   : > { %v9899_v28 = vpop.f32.mrf.mxu1  ;;  %v2185_v0 = vrot.slane %v15626_v61, 2 }
 0x194   : > { %v823_v34 = vpop.f32.mrf.mxu0  ;;  %10013 = vmatmul.mubr.bf16.gmra.mxu0 %v1195_v56  ;;  %v2728_v56 = vrot.slane %v12686_v21, 2  ;;  %v12707_v28 = vld [vmem:[%s11832_s6 + $0x20] sm:$0xff]  }
 0x195   : > { %v1111_v26 = vpop.f32.mrf.mxu1  ;;  %10121 = vmatmul.mubr.bf16.gmra.mxu1 %v1648_v35  ;;  %10140 = vmatprep.mubr.msk.bf16.mxu0 %vm11761_vm0, %v15623_v1  ;;  %v2729_v35 = vrot.slane %v12663_v20, 2  ;;  %15759 = vst [vmem:[#allocation5_spill] sm:$0xff] %v12707_v28  ;;  %v2186_v4 = vor.u32 %v2185_v0, %v2182_v8  ;;  %v15632_v61 = vshrl.u32 %v12707_v28, 16  ;;  %v15631_v20 = vshll.u32 %v12707_v28, 16 }
 0x196   : > { %v12692_v16 = vadd.f32 %v1111_v26, %v823_v34  ;;  %v9794_v19 = vpop.f32.mrf.mxu0  ;;  %10248 = vmatprep.mubr.msk.bf16.mxu1 %vm11761_vm0, %v15623_v1 }
 0x197   : > { %v9902_v25 = vpop.f32.mrf.mxu1  ;;  %v2730_v19 = vsel %vm2727_vm4, %v2728_v56, %v2729_v35 }
 0x198   : > { %15758 = vst [vmem:[#allocation4_spill] sm:$0xff] %v12692_v16  ;;  %v826_v52 = vpop.f32.mrf.mxu0 }
 0x199   : > { %v1114_v14 = vpop.f32.mrf.mxu1 }
 0x19a   : > { %v12709_v34 = vadd.f32 %v1114_v14, %v826_v52  ;;  %v9795_v26 = vpop.f32.mrf.mxu0  ;;  %v11513_v52 = vld [vmem:[%s15607_s1 + $0x1b0] sm:$0xff]  }
 0x19b   : > { %v9903_v25 = vpop.f32.mrf.mxu1  ;;  %v15761_v26 = vmov 0.0  }
 0x19c   : > { %v831_v1 = vpop.f32.mrf.mxu0  ;;  %10141 = vmatmul.mubr.bf16.vlgmr.msra.gmra.mxu0 %v2178_v37  ;;  %v2731_v37 = vrot.slane %v12682_v60, 2  ;;  %v12738_v25 = vld [vmem:[%s11832_s6 + $0x28] sm:$0xff]  }
 0x19d   : > { %v1119_v16 = vpop.f32.mrf.mxu1  ;;  %10249 = vmatmul.mubr.bf16.vlgmr.msra.gmra.mxu1 %v2730_v19  ;;  %10341 = vmatpush3.bf16.msra.mxu0 %v11508_v41  ;;  %v11514_v41 = vld [vmem:[%s15607_s1 + $0x1f0] sm:$0xff]   ;;  %v2191_v19 = vrot.slane %v15632_v61, 1  ;;  %v2733_v61 = vrot.slane %v12707_v28, 2  ;;  %v11527_v28 = vld [vmem:[%s15607_s1 + $0x198] sm:$0xff]  }
 0x19e   : > { %v12720_v56 = vadd.f32 %v1119_v16, %v831_v1  ;;  %v9798_v14 = vpop.f32.mrf.mxu0  ;;  %10449 = vmatpush3.bf16.msra.mxu1 %v11509_v63  ;;  %10144 = vmatprep.mubr.msk.bf16.mxu0 %vm11761_vm0, %v15761_v26  ;;  %v2187_v16 = vsel %vm1548_vm3, %v2177_v38, %v2186_v4  ;;  %v2194_v63 = vrot.slane %v15631_v20, 2  ;;  %v11517_v38 = vld [vmem:[%s15607_s1 + $0x1a8] sm:$0xff]  }
 0x19f   : > { %v9906_v8 = vpop.f32.mrf.mxu1  ;;  %10252 = vmatprep.mubr.msk.bf16.mxu1 %vm11761_vm0, %v15761_v26  ;;  %10342 = vmatprep.subr.bf16.mxu0 %v15761_v26  ;;  %v11519_v20 = vld [vmem:[%s15607_s1 + $0x1e8] sm:$0xff]  }
 0x1a0   : > { %15760 = vst [vmem:[#allocation6_spill] sm:$0xff] %v12720_v56  ;;  %v834_v0 = vpop.f32.mrf.mxu0  ;;  %10450 = vmatprep.subr.bf16.mxu1 %v15761_v26  ;;  %v2732_v56 = vsel %vm2727_vm4, %v2729_v35, %v2731_v37  ;;  %v2195_v35 = vor.u32 %v2194_v63, %v2191_v19  ;;  %v11524_v19 = vld [vmem:[%s15607_s1 + $0x1e0] sm:$0xff]  }
 0x1a1   : > { %v1122_v1 = vpop.f32.mrf.mxu1  ;;  %10343 = vmatpush3.bf16.msra.mxu0 %v11513_v52 }
 0x1a2   : > { %v12740_v14 = vadd.f32 %v1122_v1, %v834_v0  ;;  %v9799_v8 = vpop.f32.mrf.mxu0  ;;  %10451 = vmatpush3.bf16.msra.mxu1 %v11514_v41  ;;  %10344 = vmatprep.subr.bf16.mxu0 %v15761_v26  ;;  %v15636_v41 = vshrl.u32 %v12738_v25, 16 }
 0x1a3   : > { %v9907_v60 = vpop.f32.mrf.mxu1  ;;  %10452 = vmatprep.subr.bf16.mxu1 %v15761_v26 }
 0x1a4   : > { %v1302_v52 = vpop.f32.mrf.mxu0  ;;  %10145 = vmatmul.mubr.bf16.gmra.mxu0 %v2187_v16  ;;  %v15635_v60 = vshll.u32 %v12738_v25, 16 }
 0x1a5   : > { %v1485_v0 = vadd.f32 %v1302_v52, %v12326_v49  ;;  %v1755_v1 = vpop.f32.mrf.mxu1  ;;  %10253 = vmatmul.mubr.bf16.gmra.mxu1 %v2732_v56  ;;  %10148 = vmatprep.mubr.msk.bf16.mxu0 %vm11761_vm0, %v15761_v26  ;;  %v11522_v49 = vld [vmem:[%s15607_s1 + $0x1a0] sm:$0xff]  }
 0x1a6   : > { %v9926_v8 = vpop.f32.mrf.mxu0  ;;  %10256 = vmatprep.mubr.msk.bf16.mxu1 %vm11761_vm0, %v15761_v26  ;;  %10345 = vmatpush3.bf16.msra.mxu0 %v11517_v38 }
 0x1a7   : > { %v12762_v56 = vadd.f32 %v1755_v1, %v1485_v0  ;;  %v10034_v16 = vpop.f32.mrf.mxu1  ;;  %10453 = vmatpush3.bf16.msra.mxu1 %v11519_v20  ;;  %10346 = vmatprep.subr.bf16.mxu0 %v15761_v26  ;;  %v2196_v8 = vsel %vm1548_vm3, %v2186_v4, %v2195_v35  ;;  %v2200_v0 = vrot.slane %v15636_v41, 1  ;;  %v2203_v20 = vrot.slane %v15635_v60, 2  ;;  %v12776_v1 = vld [vmem:[%s11832_s6 + $0x30] sm:$0xff]   ;;  %v11528_v4 = vld [vmem:[%s15607_s1 + $0x1d8] sm:$0xff]  }
 0x1a8   : > { %v1305_v63 = vpop.f32.mrf.mxu0  ;;  %10454 = vmatprep.subr.bf16.mxu1 %v15761_v26 }
 0x1a9   : > { %15762 = vst [vmem:[#allocation7_spill] sm:$0xff] %v12762_v56  ;;  %v1486_v52 = vadd.f32 %v1305_v63, %v12339_v39  ;;  %v1758_v38 = vpop.f32.mrf.mxu1  ;;  %v2734_v56 = vsel %vm2727_vm4, %v2731_v37, %v2733_v61 }
 0x1aa   : > { %v9927_v16 = vpop.f32.mrf.mxu0  ;;  %10347 = vmatpush3.bf16.msra.mxu0 %v11522_v49 }
 0x1ab   : > { %v12782_v39 = vadd.f32 %v1758_v38, %v1486_v52  ;;  %v10035_v63 = vpop.f32.mrf.mxu1  ;;  %10455 = vmatpush3.bf16.msra.mxu1 %v11524_v19  ;;  %10348 = vmatprep.subr.bf16.mxu0 %v15761_v26  ;;  %v2204_v52 = vor.u32 %v2203_v20, %v2200_v0  ;;  %v15638_v19 = vshrl.u32 %v12776_v1, 16  ;;  %v15637_v38 = vshll.u32 %v12776_v1, 16  ;;  %v11533_v0 = vld [vmem:[%s15607_s1 + $0x1d0] sm:$0xff]  }
 0x1ac   : > { %v1310_v60 = vpop.f32.mrf.mxu0  ;;  %10149 = vmatmul.mubr.bf16.gmra.mxu0 %v2196_v8  ;;  %10456 = vmatprep.subr.bf16.mxu1 %v15761_v26  ;;  %v2735_v8 = vrot.slane %v12738_v25, 2 }
 0x1ad   : > { %v1487_v37 = vadd.f32 %v1310_v60, %v12357_v33  ;;  %v1763_v49 = vpop.f32.mrf.mxu1  ;;  %10257 = vmatmul.mubr.bf16.gmra.mxu1 %v2734_v56  ;;  %10152 = vmatprep.mubr.msk.bf16.mxu0 %vm11761_vm0, %v15761_v26  ;;  %v11532_v33 = vld [vmem:[%s15607_s1 + $0x190] sm:$0xff]  }
 0x1ae   : > { %v9930_v16 = vpop.f32.mrf.mxu0  ;;  %10260 = vmatprep.mubr.msk.bf16.mxu1 %vm11761_vm0, %v15761_v26  ;;  %10349 = vmatpush3.bf16.msra.mxu0 %v11527_v28  ;;  %v2736_v41 = vsel %vm2727_vm4, %v2733_v61, %v2735_v8 }
 0x1af   : > { %v12800_v60 = vadd.f32 %v1763_v49, %v1487_v37  ;;  %v10038_v56 = vpop.f32.mrf.mxu1  ;;  %10457 = vmatpush3.bf16.msra.mxu1 %v11528_v4  ;;  %10350 = vmatprep.subr.bf16.mxu0 %v15761_v26  ;;  %v2205_v16 = vsel %vm1548_vm3, %v2195_v35, %v2204_v52  ;;  %v2209_v37 = vrot.slane %v15638_v19, 1  ;;  %v2212_v4 = vrot.slane %v15637_v38, 2  ;;  %v12814_v49 = vld [vmem:[%s11832_s6 + $0x38] sm:$0xff]   ;;  %v11538_v35 = vld [vmem:[%s15607_s1 + $0x1c8] sm:$0xff]  }
 0x1b0   : > { %v1313_v20 = vpop.f32.mrf.mxu0  ;;  %10458 = vmatprep.subr.bf16.mxu1 %v15761_v26 }
 0x1b1   : > { %15763 = vst [vmem:[#allocation8_spill] sm:$0xff] %v12800_v60  ;;  %v1488_v63 = vadd.f32 %v1313_v20, %v12370_v53  ;;  %v1766_v28 = vpop.f32.mrf.mxu1  ;;  %v11537_v60 = vld [vmem:[%s15607_s1 + $0x188] sm:$0xff]  }
 0x1b2   : > { %v9931_v56 = vpop.f32.mrf.mxu0  ;;  %10351 = vmatpush3.bf16.msra.mxu0 %v11532_v33 }
 0x1b3   : > { %v12820_v53 = vadd.f32 %v1766_v28, %v1488_v63  ;;  %v10039_v20 = vpop.f32.mrf.mxu1  ;;  %10459 = vmatpush3.bf16.msra.mxu1 %v11533_v0  ;;  %10352 = vmatprep.subr.bf16.mxu0 %v15761_v26  ;;  %v2213_v63 = vor.u32 %v2212_v4, %v2209_v37  ;;  %v15640_v0 = vshrl.u32 %v12814_v49, 16  ;;  %v15639_v28 = vshll.u32 %v12814_v49, 16 }
 0x1b4   : > { %v1318_v38 = vpop.f32.mrf.mxu0  ;;  %10153 = vmatmul.mubr.bf16.gmra.mxu0 %v2205_v16  ;;  %10460 = vmatprep.subr.bf16.mxu1 %v15761_v26  ;;  %v2737_v16 = vrot.slane %v12776_v1, 2 }
 0x1b5   : > { %v1489_v61 = vadd.f32 %v1318_v38, %v12388_v59  ;;  %v1771_v33 = vpop.f32.mrf.mxu1  ;;  %10261 = vmatmul.mubr.bf16.gmra.mxu1 %v2736_v41  ;;  %10156 = vmatprep.mubr.msk.bf16.mxu0 %vm11761_vm0, %v15761_v26  ;;  %v2214_v4 = vsel %vm1548_vm3, %v2204_v52, %v2213_v63 }
 0x1b6   : > { %v9934_v56 = vpop.f32.mrf.mxu0  ;;  %10264 = vmatprep.mubr.msk.bf16.mxu1 %vm11761_vm0, %v15761_v26  ;;  %10353 = vmatpush3.bf16.msra.mxu0 %v11537_v60  ;;  %v2221_v60 = vrot.slane %v15639_v28, 2 }
 0x1b7   : > { %v12835_v20 = vadd.f32 %v1771_v33, %v1489_v61  ;;  %v10042_v59 = vpop.f32.mrf.mxu1  ;;  %10461 = vmatpush3.bf16.msra.mxu1 %v11538_v35  ;;  %10354 = vmatprep.subr.bf16.mxu0 %v15761_v26  ;;  %v2218_v56 = vrot.slane %v15640_v0, 1  ;;  %v12846_v61 = vld [vmem:[%s11832_s6 + $0x40] sm:$0xff]   ;;  %v2738_v35 = vsel %vm2727_vm4, %v2735_v8, %v2737_v16 }
 0x1b8   : > { %v1321_v41 = vpop.f32.mrf.mxu0  ;;  %10462 = vmatprep.subr.bf16.mxu1 %v15761_v26  ;;  %v15641_v28 = vshrl.u32 %v12846_v61, 16 }
 0x1b9   : > { %15764 = vst [vmem:[#allocation9_spill] sm:$0xff] %v12835_v20  ;;  %v1490_v38 = vadd.f32 %v1321_v41, %v12395_v31  ;;  %v1774_v37 = vpop.f32.mrf.mxu1  ;;  %v2222_v52 = vor.u32 %v2221_v60, %v2218_v56 }
 0x1ba   : > { %v9935_v33 = vpop.f32.mrf.mxu0 }
 0x1bb   : > { %v12849_v59 = vadd.f32 %v1774_v37, %v1490_v38  ;;  %v10043_v19 = vpop.f32.mrf.mxu1  ;;  %v15642_v33 = vshll.u32 %v12846_v61, 16  ;;  %v2223_v56 = vsel %vm1548_vm3, %v2213_v63, %v2222_v52  ;;  %v11543_v63 = vld [vmem:[%s15607_s1 + $0x1c0] sm:$0xff]  }
 0x1bc   : > { %v1326_v20 = vpop.f32.mrf.mxu0  ;;  %10157 = vmatmul.mubr.bf16.gmra.mxu0 %v2214_v4  ;;  %v2739_v19 = vrot.slane %v12814_v49, 2  ;;  %10463 = vmatpush3.bf16.msra.mxu1 %v11543_v63 }
 0x1bd   : > { %v1491_v31 = vadd.f32 %v1326_v20, %v12405_v62  ;;  %v1779_v41 = vpop.f32.mrf.mxu1  ;;  %10265 = vmatmul.mubr.bf16.gmra.mxu1 %v2738_v35  ;;  %10160 = vmatprep.mubr.msk.bf16.mxu0 %vm11761_vm0, %v15761_v26  ;;  %v11542_v20 = vld [vmem:[%s15607_s1 + $0x180] sm:$0xff]   ;;  %v2230_v60 = vrot.slane %v15642_v33, 2  ;;  %v12871_v35 = vld [vmem:[%s11832_s6 + $0x48] sm:$0xff]  }
 0x1be   : > { %v9938_v0 = vpop.f32.mrf.mxu0  ;;  %10268 = vmatprep.mubr.msk.bf16.mxu1 %vm11761_vm0, %v15761_v26  ;;  %15765 = vst [vmem:[#allocation10_spill] sm:$0xff] %v12871_v35  ;;  %10355 = vmatpush3.bf16.msra.mxu0 %v11542_v20 }
 0x1bf   : > { %v12859_v8 = vadd.f32 %v1779_v41, %v1491_v31  ;;  %v10046_v62 = vpop.f32.mrf.mxu1  ;;  %v2227_v0 = vrot.slane %v15641_v28, 1  ;;  %v2740_v41 = vsel %vm2727_vm4, %v2737_v16, %v2739_v19  ;;  %10556 = vmatprep.subr.bf16.mxu0 %v15761_v26  ;;  %v15644_v16 = vshrl.u32 %v12871_v35, 16  ;;  %10664 = vmatprep.subr.bf16.mxu1 %v15761_v26 }
 0x1c0   : > { %v1329_v38 = vpop.f32.mrf.mxu0 }
 0x1c1   : > { %v1492_v37 = vadd.f32 %v1329_v38, %v12413_v47  ;;  %v1782_v4 = vpop.f32.mrf.mxu1  ;;  %v2231_v20 = vor.u32 %v2230_v60, %v2227_v0 }
 0x1c2   : > { %v9939_v31 = vpop.f32.mrf.mxu0 }
 0x1c3   : > { %v12875_v62 = vadd.f32 %v1782_v4, %v1492_v37  ;;  %v10047_v47 = vpop.f32.mrf.mxu1  ;;  %v15643_v37 = vshll.u32 %v12871_v35, 16  ;;  %v2741_v31 = vrot.slane %v12846_v61, 2 }
 0x1c4   : > { %v1334_v38 = vpop.f32.mrf.mxu0  ;;  %10161 = vmatmul.mubr.bf16.gmra.mxu0 %v2223_v56  ;;  %v2232_v47 = vsel %vm1548_vm3, %v2222_v52, %v2231_v20 }
 0x1c5   : > { %15766 = vst [vmem:[#allocation11_spill] sm:$0xff] %v12875_v62  ;;  %v1493_v28 = vadd.f32 %v1334_v38, %v12427_v43  ;;  %v1787_v33 = vpop.f32.mrf.mxu1  ;;  %10269 = vmatmul.mubr.bf16.gmra.mxu1 %v2740_v41  ;;  %10164 = vmatprep.mubr.msk.bf16.mxu0 %vm11761_vm0, %v15761_v26  ;;  %v2236_v38 = vrot.slane %v15644_v16, 1  ;;  %v12898_v62 = vld [vmem:[%s11832_s6 + $0x50] sm:$0xff]  }
 0x1c6   : > { %v9942_v4 = vpop.f32.mrf.mxu0  ;;  %10272 = vmatprep.mubr.msk.bf16.mxu1 %vm11761_vm0, %v15761_v26  ;;  %15768 = vst [vmem:[#allocation13_spill] sm:$0xff] %v12898_v62 }
 0x1c7   : > { %v12888_v56 = vadd.f32 %v1787_v33, %v1493_v28  ;;  %v10050_v43 = vpop.f32.mrf.mxu1  ;;  %v2239_v4 = vrot.slane %v15643_v37, 2  ;;  %v2742_v28 = vsel %vm2727_vm4, %v2739_v19, %v2741_v31  ;;  %v15648_v37 = vshrl.u32 %v12898_v62, 16 }
 0x1c8   : > { %v1337_v41 = vpop.f32.mrf.mxu0  ;;  %v2743_v19 = vrot.slane %v12871_v35, 2 }
 0x1c9   : > { %15767 = vst [vmem:[#allocation12_spill] sm:$0xff] %v12888_v56  ;;  %v1494_v0 = vadd.f32 %v1337_v41, %v12433_v13  ;;  %v1790_v60 = vpop.f32.mrf.mxu1  ;;  %v2240_v52 = vor.u32 %v2239_v4, %v2236_v38  ;;  %v2245_v38 = vrot.slane %v15648_v37, 1  ;;  %v12920_v4 = vld [vmem:[%s11832_s6 + $0x58] sm:$0xff]  }
 0x1ca   : > { %v9943_v63 = vpop.f32.mrf.mxu0  ;;  %15769 = vst [vmem:[#allocation14_spill] sm:$0xff] %v12920_v4  ;;  %v2744_v35 = vsel %vm2727_vm4, %v2741_v31, %v2743_v19  ;;  %v2745_v31 = vrot.slane %v12898_v62, 2 }
 0x1cb   : > { %v12901_v33 = vadd.f32 %v1790_v60, %v1494_v0  ;;  %v10051_v43 = vpop.f32.mrf.mxu1  ;;  %v15647_v63 = vshll.u32 %v12898_v62, 16 }
 0x1cc   : > { %v1342_v56 = vpop.f32.mrf.mxu0  ;;  %10165 = vmatmul.mubr.bf16.gmra.mxu0 %v2232_v47  ;;  %v2746_v62 = vsel %vm2727_vm4, %v2743_v19, %v2745_v31  ;;  %v2747_v19 = vrot.slane %v12920_v4, 2 }
 0x1cd   : > { %v1495_v13 = vadd.f32 %v1342_v56, %v12443_v15  ;;  %v1795_v41 = vpop.f32.mrf.mxu1  ;;  %10273 = vmatmul.mubr.bf16.gmra.mxu1 %v2742_v28  ;;  %10168 = vmatprep.mubr.msk.bf16.mxu0 %vm11761_vm0, %v15761_v26  ;;  %v2241_v28 = vsel %vm1548_vm3, %v2231_v20, %v2240_v52 }
 0x1ce   : > { %v9946_v16 = vpop.f32.mrf.mxu0  ;;  %10276 = vmatprep.mubr.msk.bf16.mxu1 %vm11761_vm0, %v15761_v26 }
 0x1cf   : > { %v12911_v0 = vadd.f32 %v1795_v41, %v1495_v13  ;;  %v10054_v15 = vpop.f32.mrf.mxu1  ;;  %v2248_v16 = vrot.slane %v15647_v63, 2  ;;  %v15652_v63 = vshrl.u32 %v12920_v4, 16 }
 0x1d0   : > { %v1345_v56 = vpop.f32.mrf.mxu0 }
 0x1d1   : > { %v1496_v60 = vadd.f32 %v1345_v56, %v12448_v44  ;;  %v1798_v47 = vpop.f32.mrf.mxu1  ;;  %v2249_v20 = vor.u32 %v2248_v16, %v2245_v38  ;;  %v2254_v38 = vrot.slane %v15652_v63, 1  ;;  %v12942_v16 = vld [vmem:[%s11832_s6 + $0x60] sm:$0xff]  }
 0x1d2   : > { %v9947_v43 = vpop.f32.mrf.mxu0  ;;  %15770 = vst [vmem:[#allocation15_spill] sm:$0xff] %v12942_v16 }
 0x1d3   : > { %v12923_v13 = vadd.f32 %v1798_v47, %v1496_v60  ;;  %v10055_v41 = vpop.f32.mrf.mxu1  ;;  %v15651_v43 = vshll.u32 %v12920_v4, 16  ;;  %v2748_v4 = vsel %vm2727_vm4, %v2745_v31, %v2747_v19  ;;  %v2749_v31 = vrot.slane %v12942_v16, 2 }
 0x1d4   : > { %v1350_v15 = vpop.f32.mrf.mxu0  ;;  %10169 = vmatmul.mubr.bf16.gmra.mxu0 %v2241_v28  ;;  %v2250_v41 = vsel %vm1548_vm3, %v2240_v52, %v2249_v20 }
 0x1d5   : > { %v1497_v44 = vadd.f32 %v1350_v15, %v12458_v55  ;;  %v1803_v56 = vpop.f32.mrf.mxu1  ;;  %10277 = vmatmul.mubr.bf16.gmra.mxu1 %v2744_v35  ;;  %10172 = vmatprep.mubr.msk.bf16.mxu0 %vm11761_vm0, %v15761_v26 }
 0x1d6   : > { %v9950_v37 = vpop.f32.mrf.mxu0  ;;  %10280 = vmatprep.mubr.msk.bf16.mxu1 %vm11761_vm0, %v15761_v26 }
 0x1d7   : > { %v12933_v60 = vadd.f32 %v1803_v56, %v1497_v44  ;;  %v10058_v55 = vpop.f32.mrf.mxu1  ;;  %v2257_v37 = vrot.slane %v15651_v43, 2  ;;  %v15656_v43 = vshrl.u32 %v12942_v16, 16 }
 0x1d8   : > { %v1353_v47 = vpop.f32.mrf.mxu0 }
 0x1d9   : > { %v1498_v35 = vadd.f32 %v1353_v47, %v12463_v5  ;;  %v1806_v28 = vpop.f32.mrf.mxu1  ;;  %v2258_v52 = vor.u32 %v2257_v37, %v2254_v38  ;;  %v2263_v38 = vrot.slane %v15656_v43, 1  ;;  %v12964_v37 = vld [vmem:[%s11832_s6 + $0x68] sm:$0xff]  }
 0x1da   : > { %v9951_v15 = vpop.f32.mrf.mxu0  ;;  %15771 = vst [vmem:[#allocation16_spill] sm:$0xff] %v12964_v37 }
 0x1db   : > { %v12945_v44 = vadd.f32 %v1806_v28, %v1498_v35  ;;  %v10059_v56 = vpop.f32.mrf.mxu1  ;;  %v15655_v15 = vshll.u32 %v12942_v16, 16  ;;  %v2750_v16 = vsel %vm2727_vm4, %v2747_v19, %v2749_v31  ;;  %v2751_v19 = vrot.slane %v12964_v37, 2 }
 0x1dc   : > { %v1358_v55 = vpop.f32.mrf.mxu0  ;;  %10173 = vmatmul.mubr.bf16.gmra.mxu0 %v2250_v41  ;;  %v2259_v56 = vsel %vm1548_vm3, %v2249_v20, %v2258_v52 }
 0x1dd   : > { %v1499_v5 = vadd.f32 %v1358_v55, %v12473_v6  ;;  %v1811_v47 = vpop.f32.mrf.mxu1  ;;  %10281 = vmatmul.mubr.bf16.gmra.mxu1 %v2746_v62  ;;  %10176 = vmatprep.mubr.msk.bf16.mxu0 %vm11761_vm0, %v15761_v26 }
 0x1de   : > { %v9954_v63 = vpop.f32.mrf.mxu0  ;;  %10284 = vmatprep.mubr.msk.bf16.mxu1 %vm11761_vm0, %v15761_v26 }
 0x1df   : > { %v12955_v35 = vadd.f32 %v1811_v47, %v1499_v5  ;;  %v10062_v6 = vpop.f32.mrf.mxu1  ;;  %v2266_v63 = vrot.slane %v15655_v15, 2  ;;  %v15660_v15 = vshrl.u32 %v12964_v37, 16 }
 0x1e0   : > { %v1361_v28 = vpop.f32.mrf.mxu0 }
 0x1e1   : > { %v1500_v62 = vadd.f32 %v1361_v28, %v12478_v50  ;;  %v1814_v41 = vpop.f32.mrf.mxu1  ;;  %v2267_v20 = vor.u32 %v2266_v63, %v2263_v38  ;;  %v2272_v38 = vrot.slane %v15660_v15, 1  ;;  %v12986_v63 = vld [vmem:[%s11832_s6 + $0x70] sm:$0xff]  }
 0x1e2   : > { %v9955_v55 = vpop.f32.mrf.mxu0  ;;  %15772 = vst [vmem:[#allocation17_spill] sm:$0xff] %v12986_v63 }
 0x1e3   : > { %v12967_v5 = vadd.f32 %v1814_v41, %v1500_v62  ;;  %v10063_v47 = vpop.f32.mrf.mxu1  ;;  %v15659_v55 = vshll.u32 %v12964_v37, 16  ;;  %v2752_v37 = vsel %vm2727_vm4, %v2749_v31, %v2751_v19  ;;  %v2753_v31 = vrot.slane %v12986_v63, 2 }
 0x1e4   : > { %v1366_v6 = vpop.f32.mrf.mxu0  ;;  %10177 = vmatmul.mubr.bf16.gmra.mxu0 %v2259_v56  ;;  %v2268_v47 = vsel %vm1548_vm3, %v2258_v52, %v2267_v20 }
 0x1e5   : > { %v1501_v50 = vadd.f32 %v1366_v6, %v12488_v27  ;;  %v1819_v28 = vpop.f32.mrf.mxu1  ;;  %10285 = vmatmul.mubr.bf16.gmra.mxu1 %v2748_v4  ;;  %10180 = vmatprep.mubr.msk.bf16.mxu0 %vm11761_vm0, %v15761_v26 }
 0x1e6   : > { %v9958_v43 = vpop.f32.mrf.mxu0  ;;  %10288 = vmatprep.mubr.msk.bf16.mxu1 %vm11761_vm0, %v15761_v26 }
 0x1e7   : > { %v12977_v62 = vadd.f32 %v1819_v28, %v1501_v50  ;;  %v10066_v27 = vpop.f32.mrf.mxu1  ;;  %v2275_v43 = vrot.slane %v15659_v55, 2  ;;  %v15664_v55 = vshrl.u32 %v12986_v63, 16 }
 0x1e8   : > { %v1369_v41 = vpop.f32.mrf.mxu0 }
 0x1e9   : > { %v1502_v4 = vadd.f32 %v1369_v41, %v12493_v9  ;;  %v1822_v56 = vpop.f32.mrf.mxu1  ;;  %v2276_v52 = vor.u32 %v2275_v43, %v2272_v38  ;;  %v2281_v38 = vrot.slane %v15664_v55, 1  ;;  %v13008_v43 = vld [vmem:[%s11832_s6 + $0x78] sm:$0xff]  }
 0x1ea   : > { %v9959_v6 = vpop.f32.mrf.mxu0  ;;  %15773 = vst [vmem:[#allocation18_spill] sm:$0xff] %v13008_v43 }
 0x1eb   : > { %v12989_v50 = vadd.f32 %v1822_v56, %v1502_v4  ;;  %v10067_v28 = vpop.f32.mrf.mxu1  ;;  %v15663_v6 = vshll.u32 %v12986_v63, 16  ;;  %v2754_v63 = vsel %vm2727_vm4, %v2751_v19, %v2753_v31  ;;  %v2755_v19 = vrot.slane %v13008_v43, 2 }
 0x1ec   : > { %v1374_v27 = vpop.f32.mrf.mxu0  ;;  %10181 = vmatmul.mubr.bf16.gmra.mxu0 %v2268_v47  ;;  %v2277_v28 = vsel %vm1548_vm3, %v2267_v20, %v2276_v52 }
 0x1ed   : > { %v1503_v9 = vadd.f32 %v1374_v27, %v12503_v11  ;;  %v1827_v41 = vpop.f32.mrf.mxu1  ;;  %10289 = vmatmul.mubr.bf16.gmra.mxu1 %v2750_v16  ;;  %10184 = vmatprep.mubr.msk.bf16.mxu0 %vm11761_vm0, %v15761_v26 }
 0x1ee   : > { %v9962_v15 = vpop.f32.mrf.mxu0  ;;  %10292 = vmatprep.mubr.msk.bf16.mxu1 %vm11761_vm0, %v15761_v26 }
 0x1ef   : > { %v12999_v4 = vadd.f32 %v1827_v41, %v1503_v9  ;;  %v10070_v11 = vpop.f32.mrf.mxu1  ;;  %v2284_v15 = vrot.slane %v15663_v6, 2  ;;  %v15668_v6 = vshrl.u32 %v13008_v43, 16 }
 0x1f0   : > { %v1377_v56 = vpop.f32.mrf.mxu0 }
 0x1f1   : > { %v1504_v16 = vadd.f32 %v1377_v56, %v12508_v22  ;;  %v1830_v47 = vpop.f32.mrf.mxu1  ;;  %v2285_v20 = vor.u32 %v2284_v15, %v2281_v38  ;;  %v2290_v38 = vrot.slane %v15668_v6, 1  ;;  %v13030_v15 = vld [vmem:[%s11832_s6 + $0x80] sm:$0xff]  }
 0x1f2   : > { %v9963_v27 = vpop.f32.mrf.mxu0  ;;  %15774 = vst [vmem:[#allocation19_spill] sm:$0xff] %v13030_v15 }
 0x1f3   : > { %v13011_v9 = vadd.f32 %v1830_v47, %v1504_v16  ;;  %v10071_v41 = vpop.f32.mrf.mxu1  ;;  %v15667_v27 = vshll.u32 %v13008_v43, 16  ;;  %v2756_v43 = vsel %vm2727_vm4, %v2753_v31, %v2755_v19  ;;  %v2757_v31 = vrot.slane %v13030_v15, 2 }
 0x1f4   : > { %v1382_v11 = vpop.f32.mrf.mxu0  ;;  %10185 = vmatmul.mubr.bf16.gmra.mxu0 %v2277_v28  ;;  %v2286_v41 = vsel %vm1548_vm3, %v2276_v52, %v2285_v20 }
 0x1f5   : > { %v1505_v22 = vadd.f32 %v1382_v11, %v12518_v54  ;;  %v1835_v56 = vpop.f32.mrf.mxu1  ;;  %10293 = vmatmul.mubr.bf16.gmra.mxu1 %v2752_v37  ;;  %10188 = vmatprep.mubr.msk.bf16.mxu0 %vm11761_vm0, %v15761_v26 }
 0x1f6   : > { %v9966_v55 = vpop.f32.mrf.mxu0  ;;  %10296 = vmatprep.mubr.msk.bf16.mxu1 %vm11761_vm0, %v15761_v26 }
 0x1f7   : > { %v13021_v16 = vadd.f32 %v1835_v56, %v1505_v22  ;;  %v10074_v54 = vpop.f32.mrf.mxu1  ;;  %v2293_v55 = vrot.slane %v15667_v27, 2  ;;  %v15672_v27 = vshrl.u32 %v13030_v15, 16 }
 0x1f8   : > { %v1385_v47 = vpop.f32.mrf.mxu0 }
 0x1f9   : > { %v1506_v37 = vadd.f32 %v1385_v47, %v12523_v17  ;;  %v1838_v28 = vpop.f32.mrf.mxu1  ;;  %v2294_v52 = vor.u32 %v2293_v55, %v2290_v38  ;;  %v2299_v38 = vrot.slane %v15672_v27, 1  ;;  %v13052_v55 = vld [vmem:[%s11832_s6 + $0x88] sm:$0xff]  }
 0x1fa   : > { %v9967_v11 = vpop.f32.mrf.mxu0  ;;  %15775 = vst [vmem:[#allocation20_spill] sm:$0xff] %v13052_v55 }
 0x1fb   : > { %v13033_v22 = vadd.f32 %v1838_v28, %v1506_v37  ;;  %v10075_v56 = vpop.f32.mrf.mxu1  ;;  %v15671_v11 = vshll.u32 %v13030_v15, 16  ;;  %v2758_v15 = vsel %vm2727_vm4, %v2755_v19, %v2757_v31  ;;  %v2759_v19 = vrot.slane %v13052_v55, 2 }
 0x1fc   : > { %v1390_v54 = vpop.f32.mrf.mxu0  ;;  %10189 = vmatmul.mubr.bf16.gmra.mxu0 %v2286_v41  ;;  %v2295_v56 = vsel %vm1548_vm3, %v2285_v20, %v2294_v52 }
 0x1fd   : > { %v1507_v17 = vadd.f32 %v1390_v54, %v12533_v7  ;;  %v1843_v47 = vpop.f32.mrf.mxu1  ;;  %10297 = vmatmul.mubr.bf16.gmra.mxu1 %v2754_v63  ;;  %10192 = vmatprep.mubr.msk.bf16.mxu0 %vm11761_vm0, %v15761_v26 }
 0x1fe   : > { %v9970_v6 = vpop.f32.mrf.mxu0  ;;  %10300 = vmatprep.mubr.msk.bf16.mxu1 %vm11761_vm0, %v15761_v26 }
 0x1ff   : > { %v13043_v37 = vadd.f32 %v1843_v47, %v1507_v17  ;;  %v10078_v7 = vpop.f32.mrf.mxu1  ;;  %v2302_v6 = vrot.slane %v15671_v11, 2  ;;  %v15676_v11 = vshrl.u32 %v13052_v55, 16 }
 0x200   : > { %v1393_v28 = vpop.f32.mrf.mxu0 }
 0x201   : > { %v1508_v63 = vadd.f32 %v1393_v28, %v12538_v45  ;;  %v1846_v41 = vpop.f32.mrf.mxu1  ;;  %v2303_v20 = vor.u32 %v2302_v6, %v2299_v38  ;;  %v2308_v38 = vrot.slane %v15676_v11, 1  ;;  %v13074_v6 = vld [vmem:[%s11832_s6 + $0x90] sm:$0xff]  }
 0x202   : > { %v9971_v54 = vpop.f32.mrf.mxu0  ;;  %15776 = vst [vmem:[#allocation21_spill] sm:$0xff] %v13074_v6 }
 0x203   : > { %v13055_v17 = vadd.f32 %v1846_v41, %v1508_v63  ;;  %v10079_v47 = vpop.f32.mrf.mxu1  ;;  %v15675_v54 = vshll.u32 %v13052_v55, 16  ;;  %v2760_v55 = vsel %vm2727_vm4, %v2757_v31, %v2759_v19  ;;  %v2761_v31 = vrot.slane %v13074_v6, 2 }
 0x204   : > { %v1398_v7 = vpop.f32.mrf.mxu0  ;;  %10193 = vmatmul.mubr.bf16.gmra.mxu0 %v2295_v56  ;;  %v2304_v47 = vsel %vm1548_vm3, %v2294_v52, %v2303_v20 }
 0x205   : > { %v1509_v45 = vadd.f32 %v1398_v7, %v12548_v10  ;;  %v1851_v28 = vpop.f32.mrf.mxu1  ;;  %10301 = vmatmul.mubr.bf16.gmra.mxu1 %v2756_v43  ;;  %10196 = vmatprep.mubr.msk.bf16.mxu0 %vm11761_vm0, %v15761_v26 }
 0x206   : > { %v9974_v27 = vpop.f32.mrf.mxu0  ;;  %10304 = vmatprep.mubr.msk.bf16.mxu1 %vm11761_vm0, %v15761_v26 }
 0x207   : > { %v13065_v63 = vadd.f32 %v1851_v28, %v1509_v45  ;;  %v10082_v10 = vpop.f32.mrf.mxu1  ;;  %v2311_v27 = vrot.slane %v15675_v54, 2  ;;  %v15680_v54 = vshrl.u32 %v13074_v6, 16 }
 0x208   : > { %v1401_v41 = vpop.f32.mrf.mxu0 }
 0x209   : > { %v1510_v43 = vadd.f32 %v1401_v41, %v12553_v42  ;;  %v1854_v56 = vpop.f32.mrf.mxu1  ;;  %v2312_v52 = vor.u32 %v2311_v27, %v2308_v38  ;;  %v2317_v38 = vrot.slane %v15680_v54, 1  ;;  %v13096_v27 = vld [vmem:[%s11832_s6 + $0x98] sm:$0xff]  }
 0x20a   : > { %v9975_v7 = vpop.f32.mrf.mxu0  ;;  %15777 = vst [vmem:[#allocation22_spill] sm:$0xff] %v13096_v27 }
 0x20b   : > { %v13077_v45 = vadd.f32 %v1854_v56, %v1510_v43  ;;  %v10083_v28 = vpop.f32.mrf.mxu1  ;;  %v15679_v7 = vshll.u32 %v13074_v6, 16  ;;  %v2762_v6 = vsel %vm2727_vm4, %v2759_v19, %v2761_v31  ;;  %v2763_v19 = vrot.slane %v13096_v27, 2 }
 0x20c   : > { %v1406_v10 = vpop.f32.mrf.mxu0  ;;  %10197 = vmatmul.mubr.bf16.gmra.mxu0 %v2304_v47  ;;  %v2313_v28 = vsel %vm1548_vm3, %v2303_v20, %v2312_v52 }
 0x20d   : > { %v1511_v42 = vadd.f32 %v1406_v10, %v12563_v12  ;;  %v1859_v41 = vpop.f32.mrf.mxu1  ;;  %10305 = vmatmul.mubr.bf16.gmra.mxu1 %v2758_v15  ;;  %10200 = vmatprep.mubr.msk.bf16.mxu0 %vm11761_vm0, %v15761_v26 }
 0x20e   : > { %v9978_v11 = vpop.f32.mrf.mxu0  ;;  %10308 = vmatprep.mubr.msk.bf16.mxu1 %vm11761_vm0, %v15761_v26 }
 0x20f   : > { %v13087_v43 = vadd.f32 %v1859_v41, %v1511_v42  ;;  %v10086_v12 = vpop.f32.mrf.mxu1  ;;  %v2320_v11 = vrot.slane %v15679_v7, 2  ;;  %v15684_v7 = vshrl.u32 %v13096_v27, 16 }
 0x210   : > { %v1409_v56 = vpop.f32.mrf.mxu0 }
 0x211   : > { %v1512_v15 = vadd.f32 %v1409_v56, %v12568_v30  ;;  %v1862_v47 = vpop.f32.mrf.mxu1  ;;  %v2321_v20 = vor.u32 %v2320_v11, %v2317_v38  ;;  %v2326_v38 = vrot.slane %v15684_v7, 1  ;;  %v13118_v11 = vld [vmem:[%s11832_s6 + $0xa0] sm:$0xff]  }
 0x212   : > { %v9979_v10 = vpop.f32.mrf.mxu0  ;;  %15778 = vst [vmem:[#allocation23_spill] sm:$0xff] %v13118_v11 }
 0x213   : > { %v13099_v42 = vadd.f32 %v1862_v47, %v1512_v15  ;;  %v10087_v41 = vpop.f32.mrf.mxu1  ;;  %v15683_v10 = vshll.u32 %v13096_v27, 16  ;;  %v2764_v27 = vsel %vm2727_vm4, %v2761_v31, %v2763_v19  ;;  %v2765_v31 = vrot.slane %v13118_v11, 2 }
 0x214   : > { %v1414_v12 = vpop.f32.mrf.mxu0  ;;  %10201 = vmatmul.mubr.bf16.gmra.mxu0 %v2313_v28  ;;  %v2322_v41 = vsel %vm1548_vm3, %v2312_v52, %v2321_v20 }
 0x215   : > { %v1513_v30 = vadd.f32 %v1414_v12, %v12578_v3  ;;  %v1867_v56 = vpop.f32.mrf.mxu1  ;;  %10309 = vmatmul.mubr.bf16.gmra.mxu1 %v2760_v55  ;;  %10204 = vmatprep.mubr.msk.bf16.mxu0 %vm11761_vm0, %v15761_v26 }
 0x216   : > { %v9982_v54 = vpop.f32.mrf.mxu0  ;;  %10312 = vmatprep.mubr.msk.bf16.mxu1 %vm11761_vm0, %v15761_v26 }
 0x217   : > { %v13109_v15 = vadd.f32 %v1867_v56, %v1513_v30  ;;  %v10090_v3 = vpop.f32.mrf.mxu1  ;;  %v2329_v54 = vrot.slane %v15683_v10, 2  ;;  %v15688_v10 = vshrl.u32 %v13118_v11, 16 }
 0x218   : > { %v1417_v47 = vpop.f32.mrf.mxu0 }
 0x219   : > { %v1514_v55 = vadd.f32 %v1417_v47, %v12583_v23  ;;  %v1870_v28 = vpop.f32.mrf.mxu1  ;;  %v2330_v47 = vor.u32 %v2329_v54, %v2326_v38  ;;  %v2335_v54 = vrot.slane %v15688_v10, 1 }
 0x21a   : > { %v9983_v12 = vpop.f32.mrf.mxu0 }
 0x21b   : > { %v13121_v30 = vadd.f32 %v1870_v28, %v1514_v55  ;;  %v10091_v56 = vpop.f32.mrf.mxu1  ;;  %v15687_v12 = vshll.u32 %v13118_v11, 16  ;;  %v2331_v38 = vsel %vm1548_vm3, %v2321_v20, %v2330_v47 }
 0x21c   : > { %v1422_v3 = vpop.f32.mrf.mxu0  ;;  %10205 = vmatmul.mubr.bf16.gmra.mxu0 %v2322_v41  ;;  %v13134_v41 = vld [vmem:[%s11832_s6 + $0xa8] sm:$0xff]  }
 0x21d   : > { %v1515_v23 = vadd.f32 %v1422_v3, %v12593_v18  ;;  %v1875_v52 = vpop.f32.mrf.mxu1  ;;  %10313 = vmatmul.mubr.bf16.gmra.mxu1 %v2762_v6  ;;  %10208 = vmatprep.mubr.msk.bf16.mxu0 %vm11761_vm0, %v15761_v26  ;;  %15780 = vst [vmem:[#allocation25_spill] sm:$0xff] %v13134_v41 }
 0x21e   : > { %v9986_v7 = vpop.f32.mrf.mxu0  ;;  %10316 = vmatprep.mubr.msk.bf16.mxu1 %vm11761_vm0, %v15761_v26 }
 0x21f   : > { %v13131_v55 = vadd.f32 %v1875_v52, %v1515_v23  ;;  %v10094_v28 = vpop.f32.mrf.mxu1  ;;  %v2338_v7 = vrot.slane %v15687_v12, 2 }
 0x220   : > { %v1425_v18 = vpop.f32.mrf.mxu0 }
 0x221   : > { %15779 = vst [vmem:[#allocation24_spill] sm:$0xff] %v13131_v55  ;;  %v1516_v6 = vadd.f32 %v1425_v18, %v12598_v51  ;;  %v1878_v56 = vpop.f32.mrf.mxu1  ;;  %v15689_v55 = vshrl.u32 %v13134_v41, 16  ;;  %v15690_v51 = vshll.u32 %v13134_v41, 16 }
 0x222   : > { %v9987_v3 = vpop.f32.mrf.mxu0 }
 0x223   : > { %v13143_v23 = vadd.f32 %v1878_v56, %v1516_v6  ;;  %v10095_v52 = vpop.f32.mrf.mxu1  ;;  %v2339_v3 = vor.u32 %v2338_v7, %v2335_v54  ;;  %v13162_v54 = vld [vmem:[%s11832_s6 + $0xb0] sm:$0xff]  }
 0x224   : > { %v1430_v28 = vpop.f32.mrf.mxu0  ;;  %10209 = vmatmul.mubr.bf16.gmra.mxu0 %v2331_v38  ;;  %15782 = vst [vmem:[#allocation27_spill] sm:$0xff] %v13162_v54 }
 0x225   : > { %v1517_v20 = vadd.f32 %v1430_v28, %v12608_v48  ;;  %v1883_v18 = vpop.f32.mrf.mxu1  ;;  %10317 = vmatmul.mubr.bf16.gmra.mxu1 %v2764_v27  ;;  %10212 = vmatprep.mubr.msk.bf16.mxu0 %vm11761_vm0, %v15761_v26  ;;  %v2344_v48 = vrot.slane %v15689_v55, 1  ;;  %v2347_v27 = vrot.slane %v15690_v51, 2 }
 0x226   : > { %v9990_v12 = vpop.f32.mrf.mxu0  ;;  %10320 = vmatprep.mubr.msk.bf16.mxu1 %vm11761_vm0, %v15761_v26 }
 0x227   : > { %v13153_v6 = vadd.f32 %v1883_v18, %v1517_v20  ;;  %v10098_v56 = vpop.f32.mrf.mxu1  ;;  %v2340_v12 = vsel %vm1548_vm3, %v2330_v47, %v2339_v3  ;;  %v2766_v20 = vsel %vm2727_vm4, %v2763_v19, %v2765_v31  ;;  %v2348_v55 = vor.u32 %v2347_v27, %v2344_v48 }
 0x228   : > { %v1433_v38 = vpop.f32.mrf.mxu0  ;;  %v15695_v47 = vshll.u32 %v13162_v54, 16  ;;  %v2767_v19 = vrot.slane %v13134_v41, 2 }
 0x229   : > { %15781 = vst [vmem:[#allocation26_spill] sm:$0xff] %v13153_v6  ;;  %v1518_v52 = vadd.f32 %v1433_v38, %v12617_v29  ;;  %v1886_v28 = vpop.f32.mrf.mxu1  ;;  %v15696_v29 = vshrl.u32 %v13162_v54, 16  ;;  %v2349_v27 = vsel %vm1548_vm3, %v2339_v3, %v2348_v55 }
 0x22a   : > { %v9991_v7 = vpop.f32.mrf.mxu0  ;;  %v2768_v41 = vsel %vm2727_vm4, %v2765_v31, %v2767_v19  ;;  %v2769_v31 = vrot.slane %v13162_v54, 2 }
 0x22b   : > { %v13165_v18 = vadd.f32 %v1886_v28, %v1518_v52  ;;  %v10099_v56 = vpop.f32.mrf.mxu1  ;;  %v2028_v52 = vld [vmem:[%s11832_s6 + $0xb8] sm:$0xf]  ;;  %v2029_v28 = vld [vmem:[%s11832_s6 + $0xbc] sm:$0x3] }
 0x22c   : > { %v1438_v10 = vpop.f32.mrf.mxu0  ;;  %10213 = vmatmul.mubr.bf16.gmra.mxu0 %v2340_v12  ;;  %v2356_v56 = vrot.slane %v15695_v47, 2 }
 0x22d   : > { %15783 = vst [vmem:[#allocation28_spill] sm:$0xff] %v13165_v18  ;;  %v1519_v51 = vadd.f32 %v1438_v10, %v12623_v24  ;;  %v1891_v6 = vpop.f32.mrf.mxu1  ;;  %10321 = vmatmul.mubr.bf16.gmra.mxu1 %v2766_v20  ;;  %10216 = vmatprep.mubr.msk.bf16.mxu0 %vm11761_vm0, %v15761_v26  ;;  %v2353_v20 = vrot.slane %v15696_v29, 1 }
 0x22e   : > { %v9994_v38 = vpop.f32.mrf.mxu0  ;;  %10324 = vmatprep.mubr.msk.bf16.mxu1 %vm11761_vm0, %v15761_v26 }
 0x22f   : > { %v13177_v48 = vadd.f32 %v1891_v6, %v1519_v51  ;;  %v10102_v24 = vpop.f32.mrf.mxu1  ;;  %v8620_v38 = vcombine.low %v2028_v52, %v2029_v28 }
 0x230   : > { %v1441_v10 = vpop.f32.mrf.mxu0  ;;  %v2357_v24 = vor.u32 %v2356_v56, %v2353_v20 }
 0x231   : > { %v1520_v12 = vadd.f32 %v1441_v10, %v12630_v36  ;;  %v1894_v7 = vpop.f32.mrf.mxu1  ;;  %v2360_v10 = vshrl.u32 %v8620_v38, 16  ;;  %v2363_v47 = vshll.u32 %v8620_v38, 16  ;;  %v2770_v38 = vsel %vm2727_vm4, %v2767_v19, %v2769_v31 }
 0x232   : > { %v9995_v18 = vpop.f32.mrf.mxu0 }
 0x233   : > { %v13186_v11 = vadd.f32 %v1894_v7, %v1520_v12  ;;  %v10103_v51 = vpop.f32.mrf.mxu1  ;;  %v2365_v20 = vrot.slane %v2363_v47, 2 }
 0x234   : > { %v1446_v6 = vpop.f32.mrf.mxu0  ;;  %10217 = vmatmul.mubr.bf16.gmra.mxu0 %v2349_v27  ;;  %v2703_v27 = vld [vmem:[%s11832_s6 + $0xbc] sm:$0x7]  ;;  %v2358_v51 = vsel %vm1548_vm3, %v2348_v55, %v2357_v24 }
 0x235   : > { %v1521_v3 = vadd.f32 %v1446_v6, %v12642_v32  ;;  %v1899_v36 = vpop.f32.mrf.mxu1  ;;  %10325 = vmatmul.mubr.bf16.gmra.mxu1 %v2768_v41  ;;  %10220 = vmatprep.mubr.msk.bf16.mxu0 %vm11761_vm0, %v15761_v26  ;;  %v2362_v6 = vrot.slane %v2360_v10, 1 }
 0x236   : > { %v9998_v28 = vpop.f32.mrf.mxu0  ;;  %10328 = vmatprep.mubr.msk.bf16.mxu1 %vm11761_vm0, %v15761_v26 }
 0x237   : > { %v13194_v18 = vadd.f32 %v1899_v36, %v1521_v3  ;;  %v10106_v12 = vpop.f32.mrf.mxu1  ;;  %v13200_v28 = vcombine.low %v2028_v52, %v2703_v27 }
 0x238   : > { %v1449_v7 = vpop.f32.mrf.mxu0 }
 0x239   : > { %v1522_v32 = vadd.f32 %v1449_v7, %v12649_v46  ;;  %v1902_v41 = vpop.f32.mrf.mxu1  ;;  %v2366_v46 = vor.u32 %v2365_v20, %v2362_v6  ;;  %v2771_v47 = vrot.slane %v13200_v28, 2  ;;  %v3126_v20 = vshrl.u32 %v12686_v21, 16 }
 0x23a   : > { %v9999_v56 = vpop.f32.mrf.mxu0 }
 0x23b   : > { %v13202_v29 = vadd.f32 %v1902_v41, %v1522_v32  ;;  %v10107_v54 = vpop.f32.mrf.mxu1  ;;  %v2772_v32 = vsel %vm2727_vm4, %v2769_v31, %v2771_v47 }
 0x23c   : > { %v1454_v3 = vpop.f32.mrf.mxu0  ;;  %10221 = vmatmul.mubr.bf16.gmra.mxu0 %v2358_v51 }
 0x23d   : > { %v1523_v36 = vadd.f32 %v1454_v3, %v12655_v40  ;;  %v1907_v12 = vpop.f32.mrf.mxu1  ;;  %10329 = vmatmul.mubr.bf16.gmra.mxu1 %v2770_v38  ;;  %10224 = vmatprep.mubr.msk.bf16.mxu0 %vm11761_vm0, %v15761_v26  ;;  %v2367_v40 = vsel %vm1548_vm3, %v2357_v24, %v2366_v46 }
 0x23e   : > { %v10002_v55 = vpop.f32.mrf.mxu0  ;;  %10332 = vmatprep.mubr.msk.bf16.mxu1 %vm11761_vm0, %v15761_v26 }
 0x23f   : > { %v13210_v19 = vadd.f32 %v1907_v12, %v1523_v36  ;;  %v10110_v52 = vpop.f32.mrf.mxu1  ;;  %v3560_v36 = vld [vmem:[%s11832_s6 + $0x8] sm:$0x8]  ;;  %v3128_v55 = vrot.slane %v3126_v20, 2  ;;  %v15787_v20 = vld [vmem:[#allocation4_spill] sm:$0xff] }
 0x240   : > { %v1457_v54 = vpop.f32.mrf.mxu0 }
 0x241   : > { %v1524_v10 = vadd.f32 %v1457_v54, %v12665_v58  ;;  %v1910_v27 = vpop.f32.mrf.mxu1  ;;  %v3129_v58 = vshll.u32 %v12686_v21, 16 }
 0x242   : > { %v10003_v7 = vpop.f32.mrf.mxu0 }
 0x243   : > { %v13215_v41 = vadd.f32 %v1910_v27, %v1524_v10  ;;  %v10111_v51 = vpop.f32.mrf.mxu1  ;;  %v3131_v54 = vrot.slane %v3129_v58, 3  ;;  %v15784_v10 = vld [vmem:[#allocation2_spill] sm:$0xff] }
 0x244   : > { %v1462_v6 = vpop.f32.mrf.mxu0  ;;  %10225 = vmatmul.mubr.bf16.gmra.mxu0 %v2367_v40  ;;  %v15785_v27 = vshrl.u32 %v15784_v10, 16  ;;  %v15786_v7 = vshll.u32 %v15784_v10, 16  ;;  %v11706_v51 = vld [vmem:[%s11832_s6 + $0xc] sm:$0xf] }
 0x245   : > { %v1525_v56 = vadd.f32 %v1462_v6, %v12672_v57  ;;  %v1915_v38 = vpop.f32.mrf.mxu1  ;;  %10333 = vmatmul.mubr.bf16.gmra.mxu1 %v2772_v32  ;;  %10228 = vmatprep.mubr.msk.bf16.mxu0 %vm11761_vm0, %v15761_v26  ;;  %v8695_v6 = vcombine.low %v3560_v36, %v11706_v51  ;;  %v3132_v58 = vor.u32 %v3131_v54, %v3128_v55  ;;  %v11547_v55 = vld [vmem:[%s15607_s1 + $0x238] sm:$0xff]   ;;  %v15788_v54 = vld [vmem:[#allocation3_spill] sm:$0xff] }
 0x246   : > { %v10006_v24 = vpop.f32.mrf.mxu0  ;;  %10336 = vmatprep.mubr.msk.bf16.mxu1 %vm11761_vm0, %v15761_v26  ;;  %v3133_v40 = vrot.slane %v15785_v27, 2  ;;  %v3134_v21 = vrot.slane %v15786_v7, 3 }
 0x247   : > { %v13224_v31 = vadd.f32 %v1915_v38, %v1525_v56  ;;  %v10114_v3 = vpop.f32.mrf.mxu1  ;;  %v3586_v36 = vrot.slane %v8695_v6, 3  ;;  %v15790_v6 = vshll.u32 %v15788_v54, 16 }
 0x248   : > { %v1465_v12 = vpop.f32.mrf.mxu0 }
 0x249   : > { %v1526_v57 = vadd.f32 %v1465_v12, %v12684_v2  ;;  %v1918_v52 = vpop.f32.mrf.mxu1  ;;  %v3135_v12 = vor.u32 %v3134_v21, %v3133_v40  ;;  %v15789_v40 = vshrl.u32 %v15788_v54, 16  ;;  %v11549_v54 = vld [vmem:[%s15607_s1 + $0x230] sm:$0xff]  }
 0x24a   : > { %v10007_v32 = vpop.f32.mrf.mxu0 }
 0x24b   : > { %v13233_v56 = vadd.f32 %v1918_v52, %v1526_v57  ;;  %v10115_v38 = vpop.f32.mrf.mxu1  ;;  %v11707_v57 = vld [vmem:[%s11832_s6 + $0x10] sm:$0xff]   ;;  %v3136_v51 = vsel %vm3124_vm5, %v3132_v58, %v3135_v12  ;;  %v3137_v21 = vrot.slane %v15789_v40, 2 }
 0x24c   : > { %v1470_v24 = vpop.f32.mrf.mxu0  ;;  %10229 = vmatmul.mubr.bf16.gmra.mxu0 %v2366_v46  ;;  %v3587_v52 = vrot.slane %v11707_v57, 3  ;;  %v3138_v38 = vrot.slane %v15790_v6, 3 }
 0x24d   : > { %v1527_v3 = vadd.f32 %v1470_v24, %v15787_v20  ;;  %v1923_v2 = vpop.f32.mrf.mxu1  ;;  %10337 = vmatmul.mubr.bf16.gmra.mxu1 %v2771_v47  ;;  %10356 = vmatprep.mubr.msk.bf16.mxu0 %vm11761_vm0, %v15761_v26 }
 0x24e   : > { %v10010_v10 = vpop.f32.mrf.mxu0  ;;  %10464 = vmatprep.mubr.msk.bf16.mxu1 %vm11761_vm0, %v15761_v26  ;;  %v3588_v20 = vsel %vm3585_vm6, %v3586_v36, %v3587_v52 }
 0x24f   : > { %v13241_v27 = vadd.f32 %v1923_v2, %v1527_v3  ;;  %v10118_v46 = vpop.f32.mrf.mxu1  ;;  %v15791_v10 = vld [vmem:[#allocation6_spill] sm:$0xff] }
 0x250   : > { %v1473_v7 = vpop.f32.mrf.mxu0 }
 0x251   : > { %v1528_v47 = vadd.f32 %v1473_v7, %v12709_v34  ;;  %v1926_v32 = vpop.f32.mrf.mxu1  ;;  %v11548_v34 = vld [vmem:[%s15607_s1 + $0x278] sm:$0xff]   ;;  %v3139_v7 = vor.u32 %v3138_v38, %v3137_v21 }
 0x252   : > { %v10011_v24 = vpop.f32.mrf.mxu0 }
 0x253   : > { %v13256_v3 = vadd.f32 %v1926_v32, %v1528_v47  ;;  %v10119_v2 = vpop.f32.mrf.mxu1  ;;  %v11708_v47 = vld [vmem:[%s11832_s6 + $0x18] sm:$0xff]   ;;  %v3140_v24 = vsel %vm3124_vm5, %v3135_v12, %v3139_v7 }
 0x254   : > { %v1478_v58 = vpop.f32.mrf.mxu0  ;;  %10357 = vmatmul.mubr.bf16.vlgmr.msra.gmra.mxu0 %v3136_v51  ;;  %v3589_v32 = vrot.slane %v11708_v47, 3  ;;  %v11550_v51 = vld [vmem:[%s15607_s1 + $0x270] sm:$0xff]  }
 0x255   : > { %v1529_v57 = vadd.f32 %v1478_v58, %v15791_v10  ;;  %v1931_v46 = vpop.f32.mrf.mxu1  ;;  %10465 = vmatmul.mubr.bf16.vlgmr.msra.gmra.mxu1 %v3588_v20  ;;  %10557 = vmatpush3.bf16.msra.mxu0 %v11547_v55  ;;  %v15792_v20 = vld [vmem:[#allocation5_spill] sm:$0xff] }
 0x256   : > { %v10014_v36 = vpop.f32.mrf.mxu0  ;;  %10665 = vmatpush3.bf16.msra.mxu1 %v11548_v34  ;;  %10360 = vmatprep.mubr.msk.bf16.mxu0 %vm11761_vm0, %v15761_v26  ;;  %v15793_v34 = vshrl.u32 %v15792_v20, 16  ;;  %v15794_v58 = vshll.u32 %v15792_v20, 16 }
 0x257   : > { %v13268_v40 = vadd.f32 %v1931_v46, %v1529_v57  ;;  %v10122_v6 = vpop.f32.mrf.mxu1  ;;  %10468 = vmatprep.mubr.msk.bf16.mxu1 %vm11761_vm0, %v15761_v26  ;;  %10558 = vmatprep.subr.bf16.mxu0 %v15761_v26  ;;  %v3590_v46 = vsel %vm3585_vm6, %v3587_v52, %v3589_v32  ;;  %v15795_v52 = vld [vmem:[#allocation7_spill] sm:$0xff] }
 0x258   : > { %v1481_v55 = vpop.f32.mrf.mxu0  ;;  %10666 = vmatprep.subr.bf16.mxu1 %v15761_v26  ;;  %v3141_v2 = vrot.slane %v15793_v34, 2  ;;  %v3142_v10 = vrot.slane %v15794_v58, 3  ;;  %v11553_v34 = vld [vmem:[%s15607_s1 + $0x220] sm:$0xff]  }
 0x259   : > { %v1530_v21 = vadd.f32 %v1481_v55, %v12740_v14  ;;  %v1934_v38 = vpop.f32.mrf.mxu1  ;;  %10559 = vmatpush3.bf16.msra.mxu0 %v11549_v54  ;;  %v11551_v14 = vld [vmem:[%s15607_s1 + $0x228] sm:$0xff]  }
 0x25a   : > { %v10015_v57 = vpop.f32.mrf.mxu0  ;;  %10667 = vmatpush3.bf16.msra.mxu1 %v11550_v51  ;;  %10560 = vmatprep.subr.bf16.mxu0 %v15761_v26  ;;  %v11552_v54 = vld [vmem:[%s15607_s1 + $0x268] sm:$0xff]   ;;  %v3143_v55 = vor.u32 %v3142_v10, %v3141_v2  ;;  %v11554_v2 = vld [vmem:[%s15607_s1 + $0x260] sm:$0xff]  }
 0x25b   : > { %v13285_v36 = vadd.f32 %v1934_v38, %v1530_v21  ;;  %v10123_v12 = vpop.f32.mrf.mxu1  ;;  %10668 = vmatprep.subr.bf16.mxu1 %v15761_v26  ;;  %v11709_v21 = vld [vmem:[%s11832_s6 + $0x20] sm:$0xff]  }
 0x25c   : > { %v2473_v47 = vpop.f32.mrf.mxu0  ;;  %10361 = vmatmul.mubr.bf16.gmra.mxu0 %v3140_v24  ;;  %v3591_v38 = vrot.slane %v11709_v21, 3  ;;  %v15796_v12 = vshrl.u32 %v12738_v25, 16 }
 0x25d   : > { %v2656_v51 = vadd.f32 %v2473_v47, %v15795_v52  ;;  %v2878_v6 = vpop.f32.mrf.mxu1  ;;  %10469 = vmatmul.mubr.bf16.gmra.mxu1 %v3590_v46  ;;  %10364 = vmatprep.mubr.msk.bf16.mxu0 %vm11761_vm0, %v15761_v26  ;;  %v15797_v52 = vshll.u32 %v12738_v25, 16  ;;  %v11556_v25 = vld [vmem:[%s15607_s1 + $0x258] sm:$0xff]  }
 0x25e   : > { %v10142_v20 = vpop.f32.mrf.mxu0  ;;  %10472 = vmatprep.mubr.msk.bf16.mxu1 %vm11761_vm0, %v15761_v26  ;;  %10561 = vmatpush3.bf16.msra.mxu0 %v11551_v14  ;;  %v3144_v14 = vsel %vm3124_vm5, %v3139_v7, %v3143_v55  ;;  %v3145_v47 = vrot.slane %v15796_v12, 2 }
 0x25f   : > { %v13300_v24 = vadd.f32 %v2878_v6, %v2656_v51  ;;  %v10250_v58 = vpop.f32.mrf.mxu1  ;;  %10669 = vmatpush3.bf16.msra.mxu1 %v11552_v54  ;;  %10562 = vmatprep.subr.bf16.mxu0 %v15761_v26  ;;  %v3146_v54 = vrot.slane %v15797_v52, 3  ;;  %v3592_v6 = vsel %vm3585_vm6, %v3589_v32, %v3591_v38  ;;  %v11555_v20 = vld [vmem:[%s15607_s1 + $0x218] sm:$0xff]   ;;  %v15798_v32 = vld [vmem:[#allocation8_spill] sm:$0xff] }
 0x260   : > { %v2476_v10 = vpop.f32.mrf.mxu0  ;;  %10670 = vmatprep.subr.bf16.mxu1 %v15761_v26 }
 0x261   : > { %v2657_v57 = vadd.f32 %v2476_v10, %v12782_v39  ;;  %v2881_v46 = vpop.f32.mrf.mxu1  ;;  %v3147_v10 = vor.u32 %v3146_v54, %v3145_v47  ;;  %v11558_v47 = vld [vmem:[%s15607_s1 + $0x250] sm:$0xff]  }
 0x262   : > { %v10143_v51 = vpop.f32.mrf.mxu0  ;;  %10563 = vmatpush3.bf16.msra.mxu0 %v11553_v34 }
 0x263   : > { %v13317_v21 = vadd.f32 %v2881_v46, %v2657_v57  ;;  %v10251_v39 = vpop.f32.mrf.mxu1  ;;  %10671 = vmatpush3.bf16.msra.mxu1 %v11554_v2  ;;  %10564 = vmatprep.subr.bf16.mxu0 %v15761_v26  ;;  %v11710_v2 = vld [vmem:[%s11832_s6 + $0x28] sm:$0xff]  }
 0x264   : > { %v2481_v7 = vpop.f32.mrf.mxu0  ;;  %10365 = vmatmul.mubr.bf16.gmra.mxu0 %v3144_v14  ;;  %10672 = vmatprep.subr.bf16.mxu1 %v15761_v26  ;;  %v3593_v46 = vrot.slane %v11710_v2, 3  ;;  %v11557_v14 = vld [vmem:[%s15607_s1 + $0x210] sm:$0xff]   ;;  %v15799_v39 = vshrl.u32 %v12776_v1, 16 }
 0x265   : > { %v2658_v34 = vadd.f32 %v2481_v7, %v15798_v32  ;;  %v2886_v58 = vpop.f32.mrf.mxu1  ;;  %10473 = vmatmul.mubr.bf16.gmra.mxu1 %v3592_v6  ;;  %10368 = vmatprep.mubr.msk.bf16.mxu0 %vm11761_vm0, %v15761_v26  ;;  %v15800_v32 = vshll.u32 %v12776_v1, 16  ;;  %v11560_v1 = vld [vmem:[%s15607_s1 + $0x248] sm:$0xff]  }
 0x266   : > { %v10146_v57 = vpop.f32.mrf.mxu0  ;;  %10476 = vmatprep.mubr.msk.bf16.mxu1 %vm11761_vm0, %v15761_v26  ;;  %10565 = vmatpush3.bf16.msra.mxu0 %v11555_v20  ;;  %v3148_v20 = vsel %vm3124_vm5, %v3143_v55, %v3147_v10  ;;  %v3149_v7 = vrot.slane %v15799_v39, 2 }
 0x267   : > { %v13333_v12 = vadd.f32 %v2886_v58, %v2658_v34  ;;  %v10254_v52 = vpop.f32.mrf.mxu1  ;;  %10673 = vmatpush3.bf16.msra.mxu1 %v11556_v25  ;;  %10566 = vmatprep.subr.bf16.mxu0 %v15761_v26  ;;  %v3150_v25 = vrot.slane %v15800_v32, 3  ;;  %v3594_v58 = vsel %vm3585_vm6, %v3591_v38, %v3593_v46  ;;  %v11559_v57 = vld [vmem:[%s15607_s1 + $0x208] sm:$0xff]   ;;  %v15801_v38 = vld [vmem:[#allocation9_spill] sm:$0xff] }
 0x268   : > { %v2484_v54 = vpop.f32.mrf.mxu0  ;;  %10674 = vmatprep.subr.bf16.mxu1 %v15761_v26 }
 0x269   : > { %v2659_v51 = vadd.f32 %v2484_v54, %v12820_v53  ;;  %v2889_v6 = vpop.f32.mrf.mxu1  ;;  %v3151_v54 = vor.u32 %v3150_v25, %v3149_v7  ;;  %v15802_v25 = vshrl.u32 %v12814_v49, 16 }
 0x26a   : > { %v10147_v34 = vpop.f32.mrf.mxu0  ;;  %10567 = vmatpush3.bf16.msra.mxu0 %v11557_v14 }
 0x26b   : > { %v13350_v2 = vadd.f32 %v2889_v6, %v2659_v51  ;;  %v10255_v53 = vpop.f32.mrf.mxu1  ;;  %10675 = vmatpush3.bf16.msra.mxu1 %v11558_v47  ;;  %10568 = vmatprep.subr.bf16.mxu0 %v15761_v26  ;;  %v11711_v47 = vld [vmem:[%s11832_s6 + $0x30] sm:$0xff]   ;;  %v3152_v7 = vsel %vm3124_vm5, %v3147_v10, %v3151_v54 }
 0x26c   : > { %v2489_v55 = vpop.f32.mrf.mxu0  ;;  %10369 = vmatmul.mubr.bf16.gmra.mxu0 %v3148_v20  ;;  %10676 = vmatprep.subr.bf16.mxu1 %v15761_v26  ;;  %v3595_v6 = vrot.slane %v11711_v47, 3  ;;  %v3153_v53 = vrot.slane %v15802_v25, 2 }
 0x26d   : > { %v2660_v14 = vadd.f32 %v2489_v55, %v15801_v38  ;;  %v2894_v52 = vpop.f32.mrf.mxu1  ;;  %10477 = vmatmul.mubr.bf16.gmra.mxu1 %v3594_v58  ;;  %10372 = vmatprep.mubr.msk.bf16.mxu0 %vm11761_vm0, %v15761_v26 }
 0x26e   : > { %v10150_v51 = vpop.f32.mrf.mxu0  ;;  %10480 = vmatprep.mubr.msk.bf16.mxu1 %vm11761_vm0, %v15761_v26  ;;  %10569 = vmatpush3.bf16.msra.mxu0 %v11559_v57  ;;  %v15803_v57 = vshll.u32 %v12814_v49, 16  ;;  %v11712_v49 = vld [vmem:[%s11832_s6 + $0x38] sm:$0xff]  }
 0x26f   : > { %v13363_v39 = vadd.f32 %v2894_v52, %v2660_v14  ;;  %v10258_v20 = vpop.f32.mrf.mxu1  ;;  %10677 = vmatpush3.bf16.msra.mxu1 %v11560_v1  ;;  %10570 = vmatprep.subr.bf16.mxu0 %v15761_v26  ;;  %v3596_v1 = vsel %vm3585_vm6, %v3593_v46, %v3595_v6 }
 0x270   : > { %v2492_v32 = vpop.f32.mrf.mxu0  ;;  %10678 = vmatprep.subr.bf16.mxu1 %v15761_v26  ;;  %v3154_v55 = vrot.slane %v15803_v57, 3 }
 0x271   : > { %v2661_v34 = vadd.f32 %v2492_v32, %v12849_v59  ;;  %v2897_v58 = vpop.f32.mrf.mxu1  ;;  %v3597_v32 = vrot.slane %v11712_v49, 3 }
 0x272   : > { %v10151_v38 = vpop.f32.mrf.mxu0  ;;  %v3155_v10 = vor.u32 %v3154_v55, %v3153_v53  ;;  %v15805_v53 = vshrl.u32 %v12846_v61, 16 }
 0x273   : > { %v13374_v14 = vadd.f32 %v2897_v58, %v2661_v34  ;;  %v10259_v52 = vpop.f32.mrf.mxu1  ;;  %v11561_v58 = vld [vmem:[%s15607_s1 + $0x200] sm:$0xff]  }
 0x274   : > { %v2497_v51 = vpop.f32.mrf.mxu0  ;;  %10373 = vmatmul.mubr.bf16.gmra.mxu0 %v3152_v7  ;;  %v15804_v7 = vld [vmem:[#allocation11_spill] sm:$0xff]  ;;  %v3156_v38 = vsel %vm3124_vm5, %v3151_v54, %v3155_v10  ;;  %v3157_v55 = vrot.slane %v15805_v53, 2  ;;  %v11562_v54 = vld [vmem:[%s15607_s1 + $0x240] sm:$0xff]  }
 0x275   : > { %v2662_v59 = vadd.f32 %v2497_v51, %v12859_v8  ;;  %v2902_v47 = vpop.f32.mrf.mxu1  ;;  %10481 = vmatmul.mubr.bf16.gmra.mxu1 %v3596_v1  ;;  %10376 = vmatprep.mubr.msk.bf16.mxu0 %vm11761_vm0, %v15761_v26  ;;  %v15806_v1 = vshll.u32 %v12846_v61, 16 }
 0x276   : > { %v10154_v20 = vpop.f32.mrf.mxu0  ;;  %10484 = vmatprep.mubr.msk.bf16.mxu1 %vm11761_vm0, %v15761_v26  ;;  %10571 = vmatpush3.bf16.msra.mxu0 %v11561_v58 }
 0x277   : > { %v13382_v46 = vadd.f32 %v2902_v47, %v2662_v59  ;;  %v10262_v34 = vpop.f32.mrf.mxu1  ;;  %v3158_v52 = vrot.slane %v15806_v1, 3  ;;  %v3598_v59 = vsel %vm3585_vm6, %v3595_v6, %v3597_v32  ;;  %10772 = vmatprep.subr.bf16.mxu0 %v15761_v26  ;;  %10679 = vmatpush3.bf16.msra.mxu1 %v11562_v54 }
 0x278   : > { %v2500_v8 = vpop.f32.mrf.mxu0  ;;  %v15807_v34 = vld [vmem:[#allocation12_spill] sm:$0xff]  ;;  %10880 = vmatprep.subr.bf16.mxu1 %v15761_v26 }
 0x279   : > { %v2663_v25 = vadd.f32 %v2500_v8, %v15804_v7  ;;  %v2905_v57 = vpop.f32.mrf.mxu1  ;;  %v3159_v58 = vor.u32 %v3158_v52, %v3157_v55  ;;  %v11713_v7 = vld [vmem:[%s11832_s6 + $0x40] sm:$0xff]  }
 0x27a   : > { %v10155_v51 = vpop.f32.mrf.mxu0 }
 0x27b   : > { %v13395_v47 = vadd.f32 %v2905_v57, %v2663_v25  ;;  %v10263_v20 = vpop.f32.mrf.mxu1  ;;  %v3599_v25 = vrot.slane %v11713_v7, 3 }
 0x27c   : > { %v2505_v49 = vpop.f32.mrf.mxu0  ;;  %10377 = vmatmul.mubr.bf16.gmra.mxu0 %v3156_v38  ;;  %v15808_v20 = vld [vmem:[#allocation10_spill] sm:$0xff] }
 0x27d   : > { %v2664_v8 = vadd.f32 %v2505_v49, %v15807_v34  ;;  %v2910_v61 = vpop.f32.mrf.mxu1  ;;  %10485 = vmatmul.mubr.bf16.gmra.mxu1 %v3598_v59  ;;  %10380 = vmatprep.mubr.msk.bf16.mxu0 %vm11761_vm0, %v15761_v26  ;;  %v3160_v59 = vsel %vm3124_vm5, %v3155_v10, %v3159_v58  ;;  %v15809_v55 = vshrl.u32 %v15808_v20, 16  ;;  %v15810_v49 = vshll.u32 %v15808_v20, 16  ;;  %v11714_v20 = vld [vmem:[%s11832_s6 + $0x48] sm:$0xff]  }
 0x27e   : > { %v10158_v6 = vpop.f32.mrf.mxu0  ;;  %10488 = vmatprep.mubr.msk.bf16.mxu1 %vm11761_vm0, %v15761_v26  ;;  %v3600_v54 = vsel %vm3585_vm6, %v3597_v32, %v3599_v25 }
 0x27f   : > { %v13406_v57 = vadd.f32 %v2910_v61, %v2664_v8  ;;  %v10266_v53 = vpop.f32.mrf.mxu1  ;;  %v3161_v52 = vrot.slane %v15809_v55, 2  ;;  %v3162_v34 = vrot.slane %v15810_v49, 3  ;;  %v3601_v55 = vrot.slane %v11714_v20, 3 }
 0x280   : > { %v2508_v38 = vpop.f32.mrf.mxu0 }
 0x281   : > { %v2665_v1 = vadd.f32 %v2508_v38, %v12901_v33  ;;  %v2913_v51 = vpop.f32.mrf.mxu1  ;;  %v3163_v10 = vor.u32 %v3162_v34, %v3161_v52 }
 0x282   : > { %v10159_v6 = vpop.f32.mrf.mxu0 }
 0x283   : > { %v13416_v8 = vadd.f32 %v2913_v51, %v2665_v1  ;;  %v10267_v61 = vpop.f32.mrf.mxu1  ;;  %v15811_v6 = vld [vmem:[#allocation13_spill] sm:$0xff] }
 0x284   : > { %v2513_v7 = vpop.f32.mrf.mxu0  ;;  %10381 = vmatmul.mubr.bf16.gmra.mxu0 %v3160_v59  ;;  %v15813_v52 = vshll.u32 %v15811_v6, 16 }
 0x285   : > { %v2666_v33 = vadd.f32 %v2513_v7, %v12911_v0  ;;  %v2918_v53 = vpop.f32.mrf.mxu1  ;;  %10489 = vmatmul.mubr.bf16.gmra.mxu1 %v3600_v54  ;;  %10384 = vmatprep.mubr.msk.bf16.mxu0 %vm11761_vm0, %v15761_v26  ;;  %v3164_v0 = vsel %vm3124_vm5, %v3159_v58, %v3163_v10  ;;  %v15812_v54 = vshrl.u32 %v15811_v6, 16  ;;  %v11715_v6 = vld [vmem:[%s11832_s6 + $0x50] sm:$0xff]  }
 0x286   : > { %v10162_v38 = vpop.f32.mrf.mxu0  ;;  %10492 = vmatprep.mubr.msk.bf16.mxu1 %vm11761_vm0, %v15761_v26  ;;  %v3166_v34 = vrot.slane %v15813_v52, 3 }
 0x287   : > { %v13424_v32 = vadd.f32 %v2918_v53, %v2666_v33  ;;  %v10270_v1 = vpop.f32.mrf.mxu1  ;;  %v3165_v61 = vrot.slane %v15812_v54, 2  ;;  %v3602_v38 = vsel %vm3585_vm6, %v3599_v25, %v3601_v55  ;;  %v3603_v54 = vrot.slane %v11715_v6, 3 }
 0x288   : > { %v2516_v51 = vpop.f32.mrf.mxu0 }
 0x289   : > { %v2667_v59 = vadd.f32 %v2516_v51, %v12923_v13  ;;  %v2921_v49 = vpop.f32.mrf.mxu1  ;;  %v3167_v58 = vor.u32 %v3166_v34, %v3165_v61 }
 0x28a   : > { %v10163_v7 = vpop.f32.mrf.mxu0 }
 0x28b   : > { %v13433_v20 = vadd.f32 %v2921_v49, %v2667_v59  ;;  %v10271_v33 = vpop.f32.mrf.mxu1  ;;  %v15814_v7 = vld [vmem:[#allocation14_spill] sm:$0xff] }
 0x28c   : > { %v2521_v53 = vpop.f32.mrf.mxu0  ;;  %10385 = vmatmul.mubr.bf16.gmra.mxu0 %v3164_v0  ;;  %v15816_v61 = vshll.u32 %v15814_v7, 16 }
 0x28d   : > { %v2668_v13 = vadd.f32 %v2521_v53, %v12933_v60  ;;  %v2926_v1 = vpop.f32.mrf.mxu1  ;;  %10493 = vmatmul.mubr.bf16.gmra.mxu1 %v3602_v38  ;;  %10388 = vmatprep.mubr.msk.bf16.mxu0 %vm11761_vm0, %v15761_v26  ;;  %v3168_v60 = vsel %vm3124_vm5, %v3163_v10, %v3167_v58  ;;  %v15815_v38 = vshrl.u32 %v15814_v7, 16  ;;  %v11716_v7 = vld [vmem:[%s11832_s6 + $0x58] sm:$0xff]  }
 0x28e   : > { %v10166_v51 = vpop.f32.mrf.mxu0  ;;  %10496 = vmatprep.mubr.msk.bf16.mxu1 %vm11761_vm0, %v15761_v26  ;;  %v3170_v34 = vrot.slane %v15816_v61, 3 }
 0x28f   : > { %v13441_v25 = vadd.f32 %v2926_v1, %v2668_v13  ;;  %v10274_v59 = vpop.f32.mrf.mxu1  ;;  %v3169_v33 = vrot.slane %v15815_v38, 2  ;;  %v3604_v51 = vsel %vm3585_vm6, %v3601_v55, %v3603_v54  ;;  %v3605_v38 = vrot.slane %v11716_v7, 3 }
 0x290   : > { %v2524_v49 = vpop.f32.mrf.mxu0 }
 0x291   : > { %v2669_v0 = vadd.f32 %v2524_v49, %v12945_v44  ;;  %v2929_v52 = vpop.f32.mrf.mxu1  ;;  %v3171_v10 = vor.u32 %v3170_v34, %v3169_v33 }
 0x292   : > { %v10167_v53 = vpop.f32.mrf.mxu0 }
 0x293   : > { %v13450_v6 = vadd.f32 %v2929_v52, %v2669_v0  ;;  %v10275_v13 = vpop.f32.mrf.mxu1  ;;  %v15817_v53 = vld [vmem:[#allocation15_spill] sm:$0xff] }
 0x294   : > { %v2529_v1 = vpop.f32.mrf.mxu0  ;;  %10389 = vmatmul.mubr.bf16.gmra.mxu0 %v3168_v60  ;;  %v15819_v33 = vshll.u32 %v15817_v53, 16 }
 0x295   : > { %v2670_v44 = vadd.f32 %v2529_v1, %v12955_v35  ;;  %v2934_v59 = vpop.f32.mrf.mxu1  ;;  %10497 = vmatmul.mubr.bf16.gmra.mxu1 %v3604_v51  ;;  %10392 = vmatprep.mubr.msk.bf16.mxu0 %vm11761_vm0, %v15761_v26  ;;  %v3172_v35 = vsel %vm3124_vm5, %v3167_v58, %v3171_v10  ;;  %v15818_v51 = vshrl.u32 %v15817_v53, 16  ;;  %v11717_v53 = vld [vmem:[%s11832_s6 + $0x60] sm:$0xff]  }
 0x296   : > { %v10170_v49 = vpop.f32.mrf.mxu0  ;;  %10500 = vmatprep.mubr.msk.bf16.mxu1 %vm11761_vm0, %v15761_v26  ;;  %v3174_v34 = vrot.slane %v15819_v33, 3 }
 0x297   : > { %v13458_v55 = vadd.f32 %v2934_v59, %v2670_v44  ;;  %v10278_v0 = vpop.f32.mrf.mxu1  ;;  %v3173_v13 = vrot.slane %v15818_v51, 2  ;;  %v3606_v49 = vsel %vm3585_vm6, %v3603_v54, %v3605_v38  ;;  %v3607_v51 = vrot.slane %v11717_v53, 3 }
 0x298   : > { %v2532_v52 = vpop.f32.mrf.mxu0 }
 0x299   : > { %v2671_v60 = vadd.f32 %v2532_v52, %v12967_v5  ;;  %v2937_v61 = vpop.f32.mrf.mxu1  ;;  %v3175_v58 = vor.u32 %v3174_v34, %v3173_v13 }
 0x29a   : > { %v10171_v1 = vpop.f32.mrf.mxu0 }
 0x29b   : > { %v13467_v7 = vadd.f32 %v2937_v61, %v2671_v60  ;;  %v10279_v44 = vpop.f32.mrf.mxu1  ;;  %v15820_v1 = vld [vmem:[#allocation16_spill] sm:$0xff] }
 0x29c   : > { %v2537_v59 = vpop.f32.mrf.mxu0  ;;  %10393 = vmatmul.mubr.bf16.gmra.mxu0 %v3172_v35  ;;  %v15822_v13 = vshll.u32 %v15820_v1, 16 }
 0x29d   : > { %v2672_v5 = vadd.f32 %v2537_v59, %v12977_v62  ;;  %v2942_v0 = vpop.f32.mrf.mxu1  ;;  %10501 = vmatmul.mubr.bf16.gmra.mxu1 %v3606_v49  ;;  %10396 = vmatprep.mubr.msk.bf16.mxu0 %vm11761_vm0, %v15761_v26  ;;  %v3176_v62 = vsel %vm3124_vm5, %v3171_v10, %v3175_v58  ;;  %v15821_v49 = vshrl.u32 %v15820_v1, 16  ;;  %v11718_v1 = vld [vmem:[%s11832_s6 + $0x68] sm:$0xff]  }
 0x29e   : > { %v10174_v52 = vpop.f32.mrf.mxu0  ;;  %10504 = vmatprep.mubr.msk.bf16.mxu1 %vm11761_vm0, %v15761_v26  ;;  %v3178_v34 = vrot.slane %v15822_v13, 3 }
 0x29f   : > { %v13475_v54 = vadd.f32 %v2942_v0, %v2672_v5  ;;  %v10282_v60 = vpop.f32.mrf.mxu1  ;;  %v3177_v44 = vrot.slane %v15821_v49, 2  ;;  %v3608_v52 = vsel %vm3585_vm6, %v3605_v38, %v3607_v51  ;;  %v3609_v49 = vrot.slane %v11718_v1, 3 }
 0x2a0   : > { %v2540_v61 = vpop.f32.mrf.mxu0 }
 0x2a1   : > { %v2673_v35 = vadd.f32 %v2540_v61, %v12989_v50  ;;  %v2945_v33 = vpop.f32.mrf.mxu1  ;;  %v3179_v10 = vor.u32 %v3178_v34, %v3177_v44 }
 0x2a2   : > { %v10175_v59 = vpop.f32.mrf.mxu0 }
 0x2a3   : > { %v13484_v53 = vadd.f32 %v2945_v33, %v2673_v35  ;;  %v10283_v5 = vpop.f32.mrf.mxu1  ;;  %v15823_v59 = vld [vmem:[#allocation17_spill] sm:$0xff] }
 0x2a4   : > { %v2545_v0 = vpop.f32.mrf.mxu0  ;;  %10397 = vmatmul.mubr.bf16.gmra.mxu0 %v3176_v62  ;;  %v15825_v44 = vshll.u32 %v15823_v59, 16 }
 0x2a5   : > { %v2674_v50 = vadd.f32 %v2545_v0, %v12999_v4  ;;  %v2950_v60 = vpop.f32.mrf.mxu1  ;;  %10505 = vmatmul.mubr.bf16.gmra.mxu1 %v3608_v52  ;;  %10400 = vmatprep.mubr.msk.bf16.mxu0 %vm11761_vm0, %v15761_v26  ;;  %v3180_v4 = vsel %vm3124_vm5, %v3175_v58, %v3179_v10  ;;  %v15824_v52 = vshrl.u32 %v15823_v59, 16  ;;  %v11719_v59 = vld [vmem:[%s11832_s6 + $0x70] sm:$0xff]  }
 0x2a6   : > { %v10178_v61 = vpop.f32.mrf.mxu0  ;;  %10508 = vmatprep.mubr.msk.bf16.mxu1 %vm11761_vm0, %v15761_v26  ;;  %v3182_v34 = vrot.slane %v15825_v44, 3 }
 0x2a7   : > { %v13492_v38 = vadd.f32 %v2950_v60, %v2674_v50  ;;  %v10286_v35 = vpop.f32.mrf.mxu1  ;;  %v3181_v5 = vrot.slane %v15824_v52, 2  ;;  %v3610_v61 = vsel %vm3585_vm6, %v3607_v51, %v3609_v49  ;;  %v3611_v52 = vrot.slane %v11719_v59, 3 }
 0x2a8   : > { %v2548_v33 = vpop.f32.mrf.mxu0 }
 0x2a9   : > { %v2675_v62 = vadd.f32 %v2548_v33, %v13011_v9  ;;  %v2953_v13 = vpop.f32.mrf.mxu1  ;;  %v3183_v58 = vor.u32 %v3182_v34, %v3181_v5 }
 0x2aa   : > { %v10179_v0 = vpop.f32.mrf.mxu0 }
 0x2ab   : > { %v13501_v1 = vadd.f32 %v2953_v13, %v2675_v62  ;;  %v10287_v50 = vpop.f32.mrf.mxu1  ;;  %v15826_v0 = vld [vmem:[#allocation18_spill] sm:$0xff] }
 0x2ac   : > { %v2553_v60 = vpop.f32.mrf.mxu0  ;;  %10401 = vmatmul.mubr.bf16.gmra.mxu0 %v3180_v4  ;;  %v15828_v5 = vshll.u32 %v15826_v0, 16 }
 0x2ad   : > { %v2676_v9 = vadd.f32 %v2553_v60, %v13021_v16  ;;  %v2958_v35 = vpop.f32.mrf.mxu1  ;;  %10509 = vmatmul.mubr.bf16.gmra.mxu1 %v3610_v61  ;;  %10404 = vmatprep.mubr.msk.bf16.mxu0 %vm11761_vm0, %v15761_v26  ;;  %v3184_v16 = vsel %vm3124_vm5, %v3179_v10, %v3183_v58  ;;  %v15827_v61 = vshrl.u32 %v15826_v0, 16  ;;  %v11720_v0 = vld [vmem:[%s11832_s6 + $0x78] sm:$0xff]  }
 0x2ae   : > { %v10182_v33 = vpop.f32.mrf.mxu0  ;;  %10512 = vmatprep.mubr.msk.bf16.mxu1 %vm11761_vm0, %v15761_v26  ;;  %v3186_v34 = vrot.slane %v15828_v5, 3 }
 0x2af   : > { %v13509_v51 = vadd.f32 %v2958_v35, %v2676_v9  ;;  %v10290_v62 = vpop.f32.mrf.mxu1  ;;  %v3185_v50 = vrot.slane %v15827_v61, 2  ;;  %v3612_v33 = vsel %vm3585_vm6, %v3609_v49, %v3611_v52  ;;  %v3613_v61 = vrot.slane %v11720_v0, 3 }
 0x2b0   : > { %v2556_v13 = vpop.f32.mrf.mxu0 }
 0x2b1   : > { %v2677_v4 = vadd.f32 %v2556_v13, %v13033_v22  ;;  %v2961_v44 = vpop.f32.mrf.mxu1  ;;  %v3187_v10 = vor.u32 %v3186_v34, %v3185_v50 }
 0x2b2   : > { %v10183_v60 = vpop.f32.mrf.mxu0 }
 0x2b3   : > { %v13518_v59 = vadd.f32 %v2961_v44, %v2677_v4  ;;  %v10291_v9 = vpop.f32.mrf.mxu1  ;;  %v15829_v60 = vld [vmem:[#allocation19_spill] sm:$0xff] }
 0x2b4   : > { %v2561_v35 = vpop.f32.mrf.mxu0  ;;  %10405 = vmatmul.mubr.bf16.gmra.mxu0 %v3184_v16  ;;  %v15831_v50 = vshll.u32 %v15829_v60, 16 }
 0x2b5   : > { %v2678_v22 = vadd.f32 %v2561_v35, %v13043_v37  ;;  %v2966_v62 = vpop.f32.mrf.mxu1  ;;  %10513 = vmatmul.mubr.bf16.gmra.mxu1 %v3612_v33  ;;  %10408 = vmatprep.mubr.msk.bf16.mxu0 %vm11761_vm0, %v15761_v26  ;;  %v3188_v37 = vsel %vm3124_vm5, %v3183_v58, %v3187_v10  ;;  %v15830_v33 = vshrl.u32 %v15829_v60, 16  ;;  %v11721_v60 = vld [vmem:[%s11832_s6 + $0x80] sm:$0xff]  }
 0x2b6   : > { %v10186_v13 = vpop.f32.mrf.mxu0  ;;  %10516 = vmatprep.mubr.msk.bf16.mxu1 %vm11761_vm0, %v15761_v26  ;;  %v3190_v34 = vrot.slane %v15831_v50, 3 }
 0x2b7   : > { %v13526_v49 = vadd.f32 %v2966_v62, %v2678_v22  ;;  %v10294_v4 = vpop.f32.mrf.mxu1  ;;  %v3189_v9 = vrot.slane %v15830_v33, 2  ;;  %v3614_v13 = vsel %vm3585_vm6, %v3611_v52, %v3613_v61  ;;  %v3615_v33 = vrot.slane %v11721_v60, 3 }
 0x2b8   : > { %v2564_v44 = vpop.f32.mrf.mxu0 }
 0x2b9   : > { %v2679_v16 = vadd.f32 %v2564_v44, %v13055_v17  ;;  %v2969_v5 = vpop.f32.mrf.mxu1  ;;  %v3191_v58 = vor.u32 %v3190_v34, %v3189_v9 }
 0x2ba   : > { %v10187_v35 = vpop.f32.mrf.mxu0 }
 0x2bb   : > { %v13535_v0 = vadd.f32 %v2969_v5, %v2679_v16  ;;  %v10295_v22 = vpop.f32.mrf.mxu1  ;;  %v15832_v35 = vld [vmem:[#allocation20_spill] sm:$0xff] }
 0x2bc   : > { %v2569_v62 = vpop.f32.mrf.mxu0  ;;  %10409 = vmatmul.mubr.bf16.gmra.mxu0 %v3188_v37  ;;  %v15834_v9 = vshll.u32 %v15832_v35, 16 }
 0x2bd   : > { %v2680_v17 = vadd.f32 %v2569_v62, %v13065_v63  ;;  %v2974_v4 = vpop.f32.mrf.mxu1  ;;  %10517 = vmatmul.mubr.bf16.gmra.mxu1 %v3614_v13  ;;  %10412 = vmatprep.mubr.msk.bf16.mxu0 %vm11761_vm0, %v15761_v26  ;;  %v3192_v63 = vsel %vm3124_vm5, %v3187_v10, %v3191_v58  ;;  %v15833_v13 = vshrl.u32 %v15832_v35, 16  ;;  %v11722_v35 = vld [vmem:[%s11832_s6 + $0x88] sm:$0xff]  }
 0x2be   : > { %v10190_v44 = vpop.f32.mrf.mxu0  ;;  %10520 = vmatprep.mubr.msk.bf16.mxu1 %vm11761_vm0, %v15761_v26  ;;  %v3194_v34 = vrot.slane %v15834_v9, 3 }
 0x2bf   : > { %v13543_v52 = vadd.f32 %v2974_v4, %v2680_v17  ;;  %v10298_v16 = vpop.f32.mrf.mxu1  ;;  %v3193_v22 = vrot.slane %v15833_v13, 2  ;;  %v3616_v44 = vsel %vm3585_vm6, %v3613_v61, %v3615_v33  ;;  %v3617_v13 = vrot.slane %v11722_v35, 3 }
 0x2c0   : > { %v2572_v5 = vpop.f32.mrf.mxu0 }
 0x2c1   : > { %v2681_v37 = vadd.f32 %v2572_v5, %v13077_v45  ;;  %v2977_v50 = vpop.f32.mrf.mxu1  ;;  %v3195_v10 = vor.u32 %v3194_v34, %v3193_v22 }
 0x2c2   : > { %v10191_v62 = vpop.f32.mrf.mxu0 }
 0x2c3   : > { %v13552_v60 = vadd.f32 %v2977_v50, %v2681_v37  ;;  %v10299_v17 = vpop.f32.mrf.mxu1  ;;  %v15835_v62 = vld [vmem:[#allocation21_spill] sm:$0xff] }
 0x2c4   : > { %v2577_v4 = vpop.f32.mrf.mxu0  ;;  %10413 = vmatmul.mubr.bf16.gmra.mxu0 %v3192_v63  ;;  %v15837_v22 = vshll.u32 %v15835_v62, 16 }
 0x2c5   : > { %v2682_v45 = vadd.f32 %v2577_v4, %v13087_v43  ;;  %v2982_v16 = vpop.f32.mrf.mxu1  ;;  %10521 = vmatmul.mubr.bf16.gmra.mxu1 %v3616_v44  ;;  %10416 = vmatprep.mubr.msk.bf16.mxu0 %vm11761_vm0, %v15761_v26  ;;  %v3196_v43 = vsel %vm3124_vm5, %v3191_v58, %v3195_v10  ;;  %v15836_v44 = vshrl.u32 %v15835_v62, 16  ;;  %v11723_v62 = vld [vmem:[%s11832_s6 + $0x90] sm:$0xff]  }
 0x2c6   : > { %v10194_v5 = vpop.f32.mrf.mxu0  ;;  %10524 = vmatprep.mubr.msk.bf16.mxu1 %vm11761_vm0, %v15761_v26  ;;  %v3198_v34 = vrot.slane %v15837_v22, 3 }
 0x2c7   : > { %v13560_v61 = vadd.f32 %v2982_v16, %v2682_v45  ;;  %v10302_v37 = vpop.f32.mrf.mxu1  ;;  %v3197_v17 = vrot.slane %v15836_v44, 2  ;;  %v3618_v5 = vsel %vm3585_vm6, %v3615_v33, %v3617_v13  ;;  %v3619_v44 = vrot.slane %v11723_v62, 3 }
 0x2c8   : > { %v2580_v50 = vpop.f32.mrf.mxu0 }
 0x2c9   : > { %v2683_v63 = vadd.f32 %v2580_v50, %v13099_v42  ;;  %v2985_v9 = vpop.f32.mrf.mxu1  ;;  %v3199_v58 = vor.u32 %v3198_v34, %v3197_v17 }
 0x2ca   : > { %v10195_v4 = vpop.f32.mrf.mxu0 }
 0x2cb   : > { %v13569_v35 = vadd.f32 %v2985_v9, %v2683_v63  ;;  %v10303_v45 = vpop.f32.mrf.mxu1  ;;  %v15838_v4 = vld [vmem:[#allocation22_spill] sm:$0xff] }
 0x2cc   : > { %v2585_v16 = vpop.f32.mrf.mxu0  ;;  %10417 = vmatmul.mubr.bf16.gmra.mxu0 %v3196_v43  ;;  %v15840_v17 = vshll.u32 %v15838_v4, 16 }
 0x2cd   : > { %v2684_v42 = vadd.f32 %v2585_v16, %v13109_v15  ;;  %v2990_v37 = vpop.f32.mrf.mxu1  ;;  %10525 = vmatmul.mubr.bf16.gmra.mxu1 %v3618_v5  ;;  %10420 = vmatprep.mubr.msk.bf16.mxu0 %vm11761_vm0, %v15761_v26  ;;  %v3200_v15 = vsel %vm3124_vm5, %v3195_v10, %v3199_v58  ;;  %v15839_v5 = vshrl.u32 %v15838_v4, 16  ;;  %v11724_v4 = vld [vmem:[%s11832_s6 + $0x98] sm:$0xff]  }
 0x2ce   : > { %v10198_v50 = vpop.f32.mrf.mxu0  ;;  %10528 = vmatprep.mubr.msk.bf16.mxu1 %vm11761_vm0, %v15761_v26  ;;  %v3202_v34 = vrot.slane %v15840_v17, 3  ;;  %v3621_v17 = vrot.slane %v11724_v4, 3 }
 0x2cf   : > { %v13577_v33 = vadd.f32 %v2990_v37, %v2684_v42  ;;  %v10306_v63 = vpop.f32.mrf.mxu1  ;;  %v3201_v45 = vrot.slane %v15839_v5, 2  ;;  %v3620_v50 = vsel %vm3585_vm6, %v3617_v13, %v3619_v44 }
 0x2d0   : > { %v2588_v9 = vpop.f32.mrf.mxu0  ;;  %v15842_v63 = vld [vmem:[#allocation24_spill] sm:$0xff] }
 0x2d1   : > { %v2685_v43 = vadd.f32 %v2588_v9, %v13121_v30  ;;  %v2993_v22 = vpop.f32.mrf.mxu1  ;;  %v3203_v10 = vor.u32 %v3202_v34, %v3201_v45 }
 0x2d2   : > { %v10199_v16 = vpop.f32.mrf.mxu0 }
 0x2d3   : > { %v13586_v62 = vadd.f32 %v2993_v22, %v2685_v43  ;;  %v10307_v42 = vpop.f32.mrf.mxu1 }
 0x2d4   : > { %v2593_v37 = vpop.f32.mrf.mxu0  ;;  %10421 = vmatmul.mubr.bf16.gmra.mxu0 %v3200_v15  ;;  %v3204_v42 = vsel %vm3124_vm5, %v3199_v58, %v3203_v10 }
 0x2d5   : > { %15841 = vst [vmem:[#allocation2_spill] sm:$0xff] %v13586_v62  ;;  %v2686_v30 = vadd.f32 %v2593_v37, %v15842_v63  ;;  %v2998_v9 = vpop.f32.mrf.mxu1  ;;  %10529 = vmatmul.mubr.bf16.gmra.mxu1 %v3620_v50  ;;  %10424 = vmatprep.mubr.msk.bf16.mxu0 %vm11761_vm0, %v15761_v26  ;;  %v15844_v50 = vld [vmem:[#allocation23_spill] sm:$0xff]  ;;  %v3622_v62 = vsel %vm3585_vm6, %v3619_v44, %v3621_v17 }
 0x2d6   : > { %v10202_v5 = vpop.f32.mrf.mxu0  ;;  %10532 = vmatprep.mubr.msk.bf16.mxu1 %vm11761_vm0, %v15761_v26  ;;  %v15845_v37 = vshrl.u32 %v15844_v50, 16  ;;  %v15846_v45 = vshll.u32 %v15844_v50, 16  ;;  %v11725_v50 = vld [vmem:[%s11832_s6 + $0xa0] sm:$0xff]  }
 0x2d7   : > { %v13594_v13 = vadd.f32 %v2998_v9, %v2686_v30  ;;  %v10310_v43 = vpop.f32.mrf.mxu1 }
 0x2d8   : > { %v2596_v22 = vpop.f32.mrf.mxu0  ;;  %v3205_v63 = vrot.slane %v15845_v37, 2  ;;  %v3206_v34 = vrot.slane %v15846_v45, 3  ;;  %v15848_v43 = vld [vmem:[#allocation26_spill] sm:$0xff]  ;;  %v3623_v45 = vrot.slane %v11725_v50, 3 }
 0x2d9   : > { %15843 = vst [vmem:[#allocation4_spill] sm:$0xff] %v13594_v13  ;;  %v2687_v15 = vadd.f32 %v2596_v22, %v13143_v23  ;;  %v3001_v16 = vpop.f32.mrf.mxu1 }
 0x2da   : > { %v10203_v5 = vpop.f32.mrf.mxu0  ;;  %v3207_v58 = vor.u32 %v3206_v34, %v3205_v63  ;;  %v3624_v13 = vsel %vm3585_vm6, %v3621_v17, %v3623_v45 }
 0x2db   : > { %v13603_v4 = vadd.f32 %v3001_v16, %v2687_v15  ;;  %v10311_v30 = vpop.f32.mrf.mxu1  ;;  %v15849_v5 = vld [vmem:[#allocation28_spill] sm:$0xff] }
 0x2dc   : > { %v2601_v9 = vpop.f32.mrf.mxu0  ;;  %10425 = vmatmul.mubr.bf16.gmra.mxu0 %v3204_v42 }
 0x2dd   : > { %15847 = vst [vmem:[#allocation3_spill] sm:$0xff] %v13603_v4  ;;  %v2688_v23 = vadd.f32 %v2601_v9, %v15848_v43  ;;  %v3006_v22 = vpop.f32.mrf.mxu1  ;;  %10533 = vmatmul.mubr.bf16.gmra.mxu1 %v3622_v62  ;;  %10428 = vmatprep.mubr.msk.bf16.mxu0 %vm11761_vm0, %v15761_v26  ;;  %v3208_v9 = vsel %vm3124_vm5, %v3203_v10, %v3207_v58  ;;  %v15850_v62 = vld [vmem:[#allocation25_spill] sm:$0xff] }
 0x2de   : > { %v10206_v37 = vpop.f32.mrf.mxu0  ;;  %10536 = vmatprep.mubr.msk.bf16.mxu1 %vm11761_vm0, %v15761_v26  ;;  %v15851_v43 = vshrl.u32 %v15850_v62, 16  ;;  %v15852_v63 = vshll.u32 %v15850_v62, 16  ;;  %v11726_v62 = vld [vmem:[%s11832_s6 + $0xa8] sm:$0xff]  }
 0x2df   : > { %v13611_v44 = vadd.f32 %v3006_v22, %v2688_v23  ;;  %v10314_v15 = vpop.f32.mrf.mxu1 }
 0x2e0   : > { %v2604_v16 = vpop.f32.mrf.mxu0  ;;  %v3209_v4 = vrot.slane %v15851_v43, 2  ;;  %v3210_v34 = vrot.slane %v15852_v63, 3  ;;  %v3625_v43 = vrot.slane %v11726_v62, 3 }
 0x2e1   : > { %v2689_v42 = vadd.f32 %v2604_v16, %v15849_v5  ;;  %v3009_v30 = vpop.f32.mrf.mxu1 }
 0x2e2   : > { %v10207_v37 = vpop.f32.mrf.mxu0  ;;  %v3211_v10 = vor.u32 %v3210_v34, %v3209_v4 }
 0x2e3   : > { %v13620_v50 = vadd.f32 %v3009_v30, %v2689_v42  ;;  %v10315_v23 = vpop.f32.mrf.mxu1 }
 0x2e4   : > { %v2609_v22 = vpop.f32.mrf.mxu0  ;;  %10429 = vmatmul.mubr.bf16.gmra.mxu0 %v3208_v9 }
 0x2e5   : > { %v2690_v15 = vadd.f32 %v2609_v22, %v13177_v48  ;;  %v3014_v16 = vpop.f32.mrf.mxu1  ;;  %10537 = vmatmul.mubr.bf16.gmra.mxu1 %v3624_v13  ;;  %10432 = vmatprep.mubr.msk.bf16.mxu0 %vm11761_vm0, %v15761_v26  ;;  %v3212_v48 = vsel %vm3124_vm5, %v3207_v58, %v3211_v10  ;;  %v15854_v13 = vld [vmem:[#allocation27_spill] sm:$0xff] }
 0x2e6   : > { %v10210_v5 = vpop.f32.mrf.mxu0  ;;  %10540 = vmatprep.mubr.msk.bf16.mxu1 %vm11761_vm0, %v15761_v26  ;;  %v15855_v37 = vshrl.u32 %v15854_v13, 16  ;;  %v15856_v4 = vshll.u32 %v15854_v13, 16  ;;  %v3221_v13 = vshll.u32 %v13200_v28, 16 }
 0x2e7   : > { %v13628_v17 = vadd.f32 %v3014_v16, %v2690_v15  ;;  %v10318_v42 = vpop.f32.mrf.mxu1  ;;  %v3626_v5 = vsel %vm3585_vm6, %v3623_v45, %v3625_v43 }
 0x2e8   : > { %v2612_v30 = vpop.f32.mrf.mxu0  ;;  %v3213_v23 = vrot.slane %v15855_v37, 2  ;;  %v3214_v34 = vrot.slane %v15856_v4, 3  ;;  %v3561_v37 = vld [vmem:[%s11832_s6 + $0xbc] sm:$0xf] }
 0x2e9   : > { %15853 = vst [vmem:[#allocation6_spill] sm:$0xff] %v13628_v17  ;;  %v2691_v9 = vadd.f32 %v2612_v30, %v13186_v11  ;;  %v3017_v63 = vpop.f32.mrf.mxu1  ;;  %v3218_v30 = vshrl.u32 %v13200_v28, 16 }
 0x2ea   : > { %v10211_v22 = vpop.f32.mrf.mxu0  ;;  %v3215_v58 = vor.u32 %v3214_v34, %v3213_v23 }
 0x2eb   : > { %v13637_v62 = vadd.f32 %v3017_v63, %v2691_v9  ;;  %v10319_v15 = vpop.f32.mrf.mxu1  ;;  %v11727_v9 = vld [vmem:[%s11832_s6 + $0xb0] sm:$0xff]   ;;  %v3220_v34 = vrot.slane %v3218_v30, 2 }
 0x2ec   : > { %v2617_v16 = vpop.f32.mrf.mxu0  ;;  %10433 = vmatmul.mubr.bf16.gmra.mxu0 %v3212_v48  ;;  %v3627_v63 = vrot.slane %v11727_v9, 3  ;;  %v3216_v23 = vsel %vm3124_vm5, %v3211_v10, %v3215_v58  ;;  %v3223_v15 = vrot.slane %v3221_v13, 3 }
 0x2ed   : > { %15857 = vst [vmem:[#allocation5_spill] sm:$0xff] %v13637_v62  ;;  %v2692_v11 = vadd.f32 %v2617_v16, %v13194_v18  ;;  %v3022_v42 = vpop.f32.mrf.mxu1  ;;  %10541 = vmatmul.mubr.bf16.gmra.mxu1 %v3626_v5  ;;  %10436 = vmatprep.mubr.msk.bf16.mxu0 %vm11761_vm0, %v15761_v26 }
 0x2ee   : > { %v10214_v45 = vpop.f32.mrf.mxu0  ;;  %10544 = vmatprep.mubr.msk.bf16.mxu1 %vm11761_vm0, %v15761_v26  ;;  %v3628_v16 = vsel %vm3585_vm6, %v3625_v43, %v3627_v63 }
 0x2ef   : > { %v13647_v48 = vadd.f32 %v3022_v42, %v2692_v11  ;;  %v10322_v18 = vpop.f32.mrf.mxu1  ;;  %v11728_v45 = vld [vmem:[%s11832_s6 + $0xb8] sm:$0xf] }
 0x2f0   : > { %v2620_v4 = vpop.f32.mrf.mxu0  ;;  %v8696_v62 = vcombine.low %v11728_v45, %v3561_v37 }
 0x2f1   : > { %v2693_v22 = vadd.f32 %v2620_v4, %v13202_v29  ;;  %v3025_v5 = vpop.f32.mrf.mxu1  ;;  %v3224_v29 = vor.u32 %v3223_v15, %v3220_v34 }
 0x2f2   : > { %v10215_v28 = vpop.f32.mrf.mxu0  ;;  %v3629_v43 = vrot.slane %v8696_v62, 3 }
 0x2f3   : > { %v13654_v17 = vadd.f32 %v3025_v5, %v2693_v22  ;;  %v10323_v9 = vpop.f32.mrf.mxu1  ;;  %v3225_v22 = vsel %vm3124_vm5, %v3215_v58, %v3224_v29  ;;  %v11564_v28 = vld [vmem:[%s11832_s6 + $0x10] sm:$0xf8]  }
 0x2f4   : > { %v2625_v11 = vpop.f32.mrf.mxu0  ;;  %10437 = vmatmul.mubr.bf16.gmra.mxu0 %v3216_v23  ;;  %v3630_v23 = vsel %vm3585_vm6, %v3627_v63, %v3629_v43  ;;  %v4541_v58 = vshrl.u32 %v11564_v28, 16  ;;  %v4544_v63 = vshll.u32 %v11564_v28, 16 }
 0x2f5   : > { %v2694_v42 = vadd.f32 %v2625_v11, %v13210_v19  ;;  %v3030_v18 = vpop.f32.mrf.mxu1  ;;  %10545 = vmatmul.mubr.bf16.gmra.mxu1 %v3628_v16  ;;  %10440 = vmatprep.mubr.msk.bf16.mxu0 %vm11761_vm0, %v15761_v26  ;;  %v13668_v16 = vld [vmem:[%s11832_s6 + $0x18] sm:$0xff]  }
 0x2f6   : > { %v10218_v10 = vpop.f32.mrf.mxu0  ;;  %10548 = vmatprep.mubr.msk.bf16.mxu1 %vm11761_vm0, %v15761_v26  ;;  %v4549_v11 = vshrl.u32 %v13668_v16, 16 }
 0x2f7   : > { %v13661_v30 = vadd.f32 %v3030_v18, %v2694_v42  ;;  %v10326_v13 = vpop.f32.mrf.mxu1  ;;  %v4552_v42 = vshll.u32 %v13668_v16, 16 }
 0x2f8   : > { %v2628_v37 = vpop.f32.mrf.mxu0 }
 0x2f9   : > { %v2695_v4 = vadd.f32 %v2628_v37, %v13215_v41  ;;  %v3033_v19 = vpop.f32.mrf.mxu1 }
 0x2fa   : > { %v10219_v5 = vpop.f32.mrf.mxu0 }
 0x2fb   : > { %v13670_v34 = vadd.f32 %v3033_v19, %v2695_v4  ;;  %v10327_v15 = vpop.f32.mrf.mxu1  ;;  %v4543_v19 = vrot.slane %v4541_v58, 3  ;;  %v4551_v5 = vrot.slane %v4549_v11, 3  ;;  %v4144_v58 = vrot.slane %v13668_v16, 3 }
 0x2fc   : > { %v2633_v45 = vpop.f32.mrf.mxu0  ;;  %10441 = vmatmul.mubr.bf16.gmra.mxu0 %v3225_v22  ;;  %v4546_v22 = vrot.slane %v4544_v63, 4  ;;  %v13683_v15 = vld [vmem:[%s11832_s6 + $0x20] sm:$0xff]  }
 0x2fd   : > { %15858 = vst [vmem:[#allocation7_spill] sm:$0xff] %v13670_v34  ;;  %v2696_v62 = vadd.f32 %v2633_v45, %v13224_v31  ;;  %v3038_v9 = vpop.f32.mrf.mxu1  ;;  %10549 = vmatmul.mubr.bf16.gmra.mxu1 %v3630_v23  ;;  %10444 = vmatprep.mubr.msk.bf16.mxu0 %vm11761_vm0, %v15761_v26  ;;  %v4554_v23 = vrot.slane %v4552_v42, 4 }
 0x2fe   : > { %v10222_v41 = vpop.f32.mrf.mxu0  ;;  %10552 = vmatprep.mubr.msk.bf16.mxu1 %vm11761_vm0, %v15761_v26  ;;  %v4547_v11 = vor.u32 %v4546_v22, %v4543_v19  ;;  %v11567_v19 = vld [vmem:[%s15607_s1 + $0x2f8] sm:$0xff]  }
 0x2ff   : > { %v13679_v18 = vadd.f32 %v3038_v9, %v2696_v62  ;;  %v10330_v10 = vpop.f32.mrf.mxu1  ;;  %v4555_v42 = vor.u32 %v4554_v23, %v4551_v5  ;;  %v13707_v23 = vld [vmem:[%s11832_s6 + $0x28] sm:$0xff]  }
 0x300   : > { %v2636_v31 = vpop.f32.mrf.mxu0  ;;  %v4558_v10 = vshrl.u32 %v13683_v15, 16 }
 0x301   : > { %v2697_v13 = vadd.f32 %v2636_v31, %v13233_v56  ;;  %v3041_v37 = vpop.f32.mrf.mxu1  ;;  %v4143_v56 = vrot.slane %v11564_v28, 3 }
 0x302   : > { %v10223_v4 = vpop.f32.mrf.mxu0  ;;  %v4560_v22 = vrot.slane %v4558_v10, 3 }
 0x303   : > { %v13685_v45 = vadd.f32 %v3041_v37, %v2697_v13  ;;  %v10331_v41 = vpop.f32.mrf.mxu1  ;;  %v4145_v16 = vsel %vm3585_vm6, %v4143_v56, %v4144_v58  ;;  %v11566_v13 = vld [vmem:[%s15607_s1 + $0x2b8] sm:$0xff]   ;;  %v4556_v4 = vsel %vm4539_vm7, %v4547_v11, %v4555_v42  ;;  %v11571_v11 = vld [vmem:[%s15607_s1 + $0x2b0] sm:$0xff]  }
 0x304   : > { %v2641_v34 = vpop.f32.mrf.mxu0  ;;  %10445 = vmatmul.mubr.bf16.gmra.mxu0 %v3224_v29  ;;  %v4561_v29 = vshll.u32 %v13683_v15, 16 }
 0x305   : > { %v2698_v62 = vadd.f32 %v2641_v34, %v13241_v27  ;;  %v3046_v9 = vpop.f32.mrf.mxu1  ;;  %10553 = vmatmul.mubr.bf16.gmra.mxu1 %v3629_v43  ;;  %10572 = vmatprep.mubr.msk.bf16.mxu0 %vm11761_vm0, %v15761_v26 }
 0x306   : > { %v10226_v63 = vpop.f32.mrf.mxu0  ;;  %10680 = vmatprep.mubr.msk.bf16.mxu1 %vm11761_vm0, %v15761_v26  ;;  %v4563_v5 = vrot.slane %v4561_v29, 4 }
 0x307   : > { %v13695_v27 = vadd.f32 %v3046_v9, %v2698_v62  ;;  %v10334_v43 = vpop.f32.mrf.mxu1  ;;  %v4146_v63 = vrot.slane %v13683_v15, 3 }
 0x308   : > { %v2644_v34 = vpop.f32.mrf.mxu0  ;;  %v4564_v29 = vor.u32 %v4563_v5, %v4560_v22  ;;  %v4567_v43 = vshrl.u32 %v13707_v23, 16 }
 0x309   : > { %v2699_v28 = vadd.f32 %v2644_v34, %v13256_v3  ;;  %v3049_v31 = vpop.f32.mrf.mxu1  ;;  %v4570_v34 = vshll.u32 %v13707_v23, 16 }
 0x30a   : > { %v10227_v37 = vpop.f32.mrf.mxu0  ;;  %v4569_v22 = vrot.slane %v4567_v43, 3 }
 0x30b   : > { %v13709_v41 = vadd.f32 %v3049_v31, %v2699_v28  ;;  %v10335_v3 = vpop.f32.mrf.mxu1  ;;  %v4147_v37 = vsel %vm3585_vm6, %v4144_v58, %v4146_v63  ;;  %v4572_v5 = vrot.slane %v4570_v34, 4  ;;  %v11577_v58 = vld [vmem:[%s15607_s1 + $0x2e8] sm:$0xff]  }
 0x30c   : > { %v2649_v62 = vpop.f32.mrf.mxu0  ;;  %10573 = vmatmul.mubr.bf16.vlgmr.msra.gmra.mxu0 %v4145_v16  ;;  %v13733_v3 = vld [vmem:[%s11832_s6 + $0x30] sm:$0xff]  }
 0x30d   : > { %v2700_v9 = vadd.f32 %v2649_v62, %v13268_v40  ;;  %v3054_v56 = vpop.f32.mrf.mxu1  ;;  %10681 = vmatmul.mubr.bf16.vlgmr.msra.gmra.mxu1 %v4556_v4  ;;  %10773 = vmatpush3.bf16.msra.mxu0 %v11566_v13  ;;  %v11572_v40 = vld [vmem:[%s15607_s1 + $0x2f0] sm:$0xff]   ;;  %v11575_v62 = vld [vmem:[%s15607_s1 + $0x2a8] sm:$0xff]   ;;  %v4573_v34 = vor.u32 %v4572_v5, %v4569_v22 }
 0x30e   : > { %v10230_v10 = vpop.f32.mrf.mxu0  ;;  %10881 = vmatpush3.bf16.msra.mxu1 %v11567_v19  ;;  %10576 = vmatprep.mubr.msk.bf16.mxu0 %vm11761_vm0, %v15761_v26  ;;  %v4565_v19 = vsel %vm4539_vm7, %v4555_v42, %v4564_v29 }
 0x30f   : > { %v13723_v15 = vadd.f32 %v3054_v56, %v2700_v9  ;;  %v10338_v28 = vpop.f32.mrf.mxu1  ;;  %10684 = vmatprep.mubr.msk.bf16.mxu1 %vm11761_vm0, %v15761_v26  ;;  %10774 = vmatprep.subr.bf16.mxu0 %v15761_v26  ;;  %v4148_v10 = vrot.slane %v13707_v23, 3  ;;  %v11582_v23 = vld [vmem:[%s15607_s1 + $0x2e0] sm:$0xff]   ;;  %v4574_v5 = vsel %vm4539_vm7, %v4564_v29, %v4573_v34 }
 0x310   : > { %v2652_v31 = vpop.f32.mrf.mxu0  ;;  %10882 = vmatprep.subr.bf16.mxu1 %v15761_v26  ;;  %v4579_v28 = vshll.u32 %v13733_v3, 16 }
 0x311   : > { %v2701_v16 = vadd.f32 %v2652_v31, %v13285_v36  ;;  %v3057_v13 = vpop.f32.mrf.mxu1  ;;  %10775 = vmatpush3.bf16.msra.mxu0 %v11571_v11 }
 0x312   : > { %v10231_v4 = vpop.f32.mrf.mxu0  ;;  %10883 = vmatpush3.bf16.msra.mxu1 %v11572_v40  ;;  %10776 = vmatprep.subr.bf16.mxu0 %v15761_v26  ;;  %v4576_v40 = vshrl.u32 %v13733_v3, 16 }
 0x313   : > { %v13739_v9 = vadd.f32 %v3057_v13, %v2701_v16  ;;  %v10339_v36 = vpop.f32.mrf.mxu1  ;;  %10884 = vmatprep.subr.bf16.mxu1 %v15761_v26 }
 0x314   : > { %v3331_v42 = vpop.f32.mrf.mxu0  ;;  %10577 = vmatmul.mubr.bf16.gmra.mxu0 %v4147_v37  ;;  %v4581_v36 = vrot.slane %v4579_v28, 4 }
 0x315   : > { %v3514_v56 = vadd.f32 %v3331_v42, %v13300_v24  ;;  %v3736_v11 = vpop.f32.mrf.mxu1  ;;  %10685 = vmatmul.mubr.bf16.gmra.mxu1 %v4565_v19  ;;  %10580 = vmatprep.mubr.msk.bf16.mxu0 %vm11761_vm0, %v15761_v26  ;;  %v11580_v24 = vld [vmem:[%s15607_s1 + $0x2a0] sm:$0xff]   ;;  %v4149_v19 = vsel %vm3585_vm6, %v4146_v63, %v4148_v10  ;;  %v11585_v42 = vld [vmem:[%s15607_s1 + $0x298] sm:$0xff]  }
 0x316   : > { %v10358_v43 = vpop.f32.mrf.mxu0  ;;  %10688 = vmatprep.mubr.msk.bf16.mxu1 %vm11761_vm0, %v15761_v26  ;;  %10777 = vmatpush3.bf16.msra.mxu0 %v11575_v62  ;;  %v4578_v62 = vrot.slane %v4576_v40, 3  ;;  %v4150_v40 = vrot.slane %v13733_v3, 3  ;;  %v11591_v3 = vld [vmem:[%s15607_s1 + $0x2d0] sm:$0xff]  }
 0x317   : > { %v13756_v31 = vadd.f32 %v3736_v11, %v3514_v56  ;;  %v10466_v16 = vpop.f32.mrf.mxu1  ;;  %10885 = vmatpush3.bf16.msra.mxu1 %v11577_v58  ;;  %10778 = vmatprep.subr.bf16.mxu0 %v15761_v26  ;;  %v13767_v58 = vld [vmem:[%s11832_s6 + $0x38] sm:$0xff]  }
 0x318   : > { %v3334_v13 = vpop.f32.mrf.mxu0  ;;  %10886 = vmatprep.subr.bf16.mxu1 %v15761_v26  ;;  %v4585_v16 = vshrl.u32 %v13767_v58, 16 }
 0x319   : > { %v3515_v37 = vadd.f32 %v3334_v13, %v13317_v21  ;;  %v3739_v4 = vpop.f32.mrf.mxu1  ;;  %v11586_v21 = vld [vmem:[%s15607_s1 + $0x2d8] sm:$0xff]  }
 0x31a   : > { %v10359_v22 = vpop.f32.mrf.mxu0  ;;  %10779 = vmatpush3.bf16.msra.mxu0 %v11580_v24  ;;  %v4582_v24 = vor.u32 %v4581_v36, %v4578_v62 }
 0x31b   : > { %v13772_v56 = vadd.f32 %v3739_v4, %v3515_v37  ;;  %v10467_v11 = vpop.f32.mrf.mxu1  ;;  %10887 = vmatpush3.bf16.msra.mxu1 %v11582_v23  ;;  %10780 = vmatprep.subr.bf16.mxu0 %v15761_v26  ;;  %v4588_v23 = vshll.u32 %v13767_v58, 16 }
 0x31c   : > { %v3339_v63 = vpop.f32.mrf.mxu0  ;;  %10581 = vmatmul.mubr.bf16.gmra.mxu0 %v4149_v19  ;;  %10888 = vmatprep.subr.bf16.mxu1 %v15761_v26  ;;  %v4583_v36 = vsel %vm4539_vm7, %v4573_v34, %v4582_v24 }
 0x31d   : > { %v3516_v29 = vadd.f32 %v3339_v63, %v13333_v12  ;;  %v3744_v43 = vpop.f32.mrf.mxu1  ;;  %10689 = vmatmul.mubr.bf16.gmra.mxu1 %v4574_v5  ;;  %10584 = vmatprep.mubr.msk.bf16.mxu0 %vm11761_vm0, %v15761_v26  ;;  %v11590_v12 = vld [vmem:[%s15607_s1 + $0x290] sm:$0xff]   ;;  %v4151_v5 = vsel %vm3585_vm6, %v4148_v10, %v4150_v40  ;;  %v4590_v11 = vrot.slane %v4588_v23, 4  ;;  %v11595_v63 = vld [vmem:[%s15607_s1 + $0x288] sm:$0xff]  }
 0x31e   : > { %v10362_v28 = vpop.f32.mrf.mxu0  ;;  %10692 = vmatprep.mubr.msk.bf16.mxu1 %vm11761_vm0, %v15761_v26  ;;  %10781 = vmatpush3.bf16.msra.mxu0 %v11585_v42  ;;  %v4587_v42 = vrot.slane %v4585_v16, 3  ;;  %v4152_v16 = vrot.slane %v13767_v58, 3 }
 0x31f   : > { %v13790_v13 = vadd.f32 %v3744_v43, %v3516_v29  ;;  %v10470_v37 = vpop.f32.mrf.mxu1  ;;  %10889 = vmatpush3.bf16.msra.mxu1 %v11586_v21  ;;  %10782 = vmatprep.subr.bf16.mxu0 %v15761_v26  ;;  %v13801_v21 = vld [vmem:[%s11832_s6 + $0x40] sm:$0xff]  }
 0x320   : > { %v3342_v4 = vpop.f32.mrf.mxu0  ;;  %10890 = vmatprep.subr.bf16.mxu1 %v15761_v26  ;;  %v4594_v37 = vshrl.u32 %v13801_v21, 16 }
 0x321   : > { %v3517_v19 = vadd.f32 %v3342_v4, %v13350_v2  ;;  %v3747_v22 = vpop.f32.mrf.mxu1  ;;  %v11596_v2 = vld [vmem:[%s15607_s1 + $0x2c8] sm:$0xff]  }
 0x322   : > { %v10363_v62 = vpop.f32.mrf.mxu0  ;;  %10783 = vmatpush3.bf16.msra.mxu0 %v11590_v12  ;;  %v4591_v12 = vor.u32 %v4590_v11, %v4587_v42  ;;  %v4596_v42 = vrot.slane %v4594_v37, 3 }
 0x323   : > { %v13806_v29 = vadd.f32 %v3747_v22, %v3517_v19  ;;  %v10471_v43 = vpop.f32.mrf.mxu1  ;;  %10891 = vmatpush3.bf16.msra.mxu1 %v11591_v3  ;;  %10784 = vmatprep.subr.bf16.mxu0 %v15761_v26  ;;  %v4597_v3 = vshll.u32 %v13801_v21, 16 }
 0x324   : > { %v3347_v10 = vpop.f32.mrf.mxu0  ;;  %10585 = vmatmul.mubr.bf16.gmra.mxu0 %v4151_v5  ;;  %10892 = vmatprep.subr.bf16.mxu1 %v15761_v26  ;;  %v4153_v5 = vsel %vm3585_vm6, %v4150_v40, %v4152_v16 }
 0x325   : > { %v3518_v34 = vadd.f32 %v3347_v10, %v13363_v39  ;;  %v3752_v28 = vpop.f32.mrf.mxu1  ;;  %10693 = vmatmul.mubr.bf16.gmra.mxu1 %v4583_v36  ;;  %10588 = vmatprep.mubr.msk.bf16.mxu0 %vm11761_vm0, %v15761_v26  ;;  %v4592_v36 = vsel %vm4539_vm7, %v4582_v24, %v4591_v12  ;;  %v4599_v11 = vrot.slane %v4597_v3, 4 }
 0x326   : > { %v10366_v23 = vpop.f32.mrf.mxu0  ;;  %10696 = vmatprep.mubr.msk.bf16.mxu1 %vm11761_vm0, %v15761_v26  ;;  %10785 = vmatpush3.bf16.msra.mxu0 %v11595_v63  ;;  %v13829_v63 = vld [vmem:[%s11832_s6 + $0x48] sm:$0xff]  }
 0x327   : > { %v13821_v4 = vadd.f32 %v3752_v28, %v3518_v34  ;;  %v10474_v39 = vpop.f32.mrf.mxu1  ;;  %10893 = vmatpush3.bf16.msra.mxu1 %v11596_v2  ;;  %10786 = vmatprep.subr.bf16.mxu0 %v15761_v26  ;;  %v4600_v24 = vor.u32 %v4599_v11, %v4596_v42  ;;  %v4603_v23 = vshrl.u32 %v13829_v63, 16  ;;  %v4606_v37 = vshll.u32 %v13829_v63, 16  ;;  %v13850_v11 = vld [vmem:[%s11832_s6 + $0x50] sm:$0xff]  }
 0x328   : > { %v3350_v19 = vpop.f32.mrf.mxu0  ;;  %10894 = vmatprep.subr.bf16.mxu1 %v15761_v26  ;;  %v11600_v39 = vld [vmem:[%s15607_s1 + $0x280] sm:$0xff]  }
 0x329   : > { %v3519_v58 = vadd.f32 %v3350_v19, %v13374_v14  ;;  %v3755_v22 = vpop.f32.mrf.mxu1  ;;  %v4154_v14 = vrot.slane %v13801_v21, 3  ;;  %v4608_v42 = vrot.slane %v4606_v37, 4  ;;  %v4612_v37 = vshrl.u32 %v13850_v11, 16 }
 0x32a   : > { %v10367_v62 = vpop.f32.mrf.mxu0  ;;  %10787 = vmatpush3.bf16.msra.mxu0 %v11600_v39 }
 0x32b   : > { %v13831_v43 = vadd.f32 %v3755_v22, %v3519_v58  ;;  %v10475_v2 = vpop.f32.mrf.mxu1  ;;  %v4155_v22 = vsel %vm3585_vm6, %v4152_v16, %v4154_v14  ;;  %v4601_v62 = vsel %vm4539_vm7, %v4591_v12, %v4600_v24  ;;  %10988 = vmatprep.subr.bf16.mxu0 %v15761_v26  ;;  %v4156_v12 = vrot.slane %v13829_v63, 3 }
 0x32c   : > { %v3355_v10 = vpop.f32.mrf.mxu0  ;;  %10589 = vmatmul.mubr.bf16.gmra.mxu0 %v4153_v5 }
 0x32d   : > { %v3520_v34 = vadd.f32 %v3355_v10, %v13382_v46  ;;  %v3760_v28 = vpop.f32.mrf.mxu1  ;;  %10697 = vmatmul.mubr.bf16.gmra.mxu1 %v4592_v36  ;;  %10592 = vmatprep.mubr.msk.bf16.mxu0 %vm11761_vm0, %v15761_v26  ;;  %v4605_v36 = vrot.slane %v4603_v23, 3 }
 0x32e   : > { %v10370_v40 = vpop.f32.mrf.mxu0  ;;  %10700 = vmatprep.mubr.msk.bf16.mxu1 %vm11761_vm0, %v15761_v26 }
 0x32f   : > { %v13841_v3 = vadd.f32 %v3760_v28, %v3520_v34  ;;  %v10478_v46 = vpop.f32.mrf.mxu1  ;;  %v4609_v23 = vor.u32 %v4608_v42, %v4605_v36  ;;  %v13873_v42 = vld [vmem:[%s11832_s6 + $0x58] sm:$0xff]  }
 0x330   : > { %v3358_v19 = vpop.f32.mrf.mxu0  ;;  %v4615_v46 = vshll.u32 %v13850_v11, 16 }
 0x331   : > { %v3521_v21 = vadd.f32 %v3358_v19, %v13395_v47  ;;  %v3763_v58 = vpop.f32.mrf.mxu1  ;;  %v11601_v47 = vld [vmem:[%s15607_s1 + $0x2c0] sm:$0xff]  }
 0x332   : > { %v10371_v5 = vpop.f32.mrf.mxu0  ;;  %10895 = vmatpush3.bf16.msra.mxu1 %v11601_v47  ;;  %v4617_v36 = vrot.slane %v4615_v46, 4 }
 0x333   : > { %v13853_v2 = vadd.f32 %v3763_v58, %v3521_v21  ;;  %v10479_v10 = vpop.f32.mrf.mxu1  ;;  %11096 = vmatprep.subr.bf16.mxu1 %v15761_v26  ;;  %v4157_v58 = vsel %vm3585_vm6, %v4154_v14, %v4156_v12  ;;  %v4610_v5 = vsel %vm4539_vm7, %v4600_v24, %v4609_v23 }
 0x334   : > { %v3363_v34 = vpop.f32.mrf.mxu0  ;;  %10593 = vmatmul.mubr.bf16.gmra.mxu0 %v4155_v22 }
 0x335   : > { %v3522_v16 = vadd.f32 %v3363_v34, %v13406_v57  ;;  %v3768_v28 = vpop.f32.mrf.mxu1  ;;  %10701 = vmatmul.mubr.bf16.gmra.mxu1 %v4601_v62  ;;  %10596 = vmatprep.mubr.msk.bf16.mxu0 %vm11761_vm0, %v15761_v26  ;;  %v4614_v62 = vrot.slane %v4612_v37, 3  ;;  %v4624_v37 = vshll.u32 %v13873_v42, 16 }
 0x336   : > { %v10374_v40 = vpop.f32.mrf.mxu0  ;;  %10704 = vmatprep.mubr.msk.bf16.mxu1 %vm11761_vm0, %v15761_v26 }
 0x337   : > { %v13866_v39 = vadd.f32 %v3768_v28, %v3522_v16  ;;  %v10482_v57 = vpop.f32.mrf.mxu1  ;;  %v4618_v24 = vor.u32 %v4617_v36, %v4614_v62  ;;  %v4621_v40 = vshrl.u32 %v13873_v42, 16 }
 0x338   : > { %v3366_v19 = vpop.f32.mrf.mxu0 }
 0x339   : > { %v3523_v21 = vadd.f32 %v3366_v19, %v13416_v8  ;;  %v3771_v63 = vpop.f32.mrf.mxu1  ;;  %v4158_v8 = vrot.slane %v13850_v11, 3 }
 0x33a   : > { %v10375_v22 = vpop.f32.mrf.mxu0 }
 0x33b   : > { %v13875_v10 = vadd.f32 %v3771_v63, %v3523_v21  ;;  %v10483_v47 = vpop.f32.mrf.mxu1  ;;  %v4159_v63 = vsel %vm3585_vm6, %v4156_v12, %v4158_v8  ;;  %v4623_v22 = vrot.slane %v4621_v40, 3 }
 0x33c   : > { %v3371_v34 = vpop.f32.mrf.mxu0  ;;  %10597 = vmatmul.mubr.bf16.gmra.mxu0 %v4157_v58  ;;  %v4619_v58 = vsel %vm4539_vm7, %v4609_v23, %v4618_v24  ;;  %v13891_v47 = vld [vmem:[%s11832_s6 + $0x60] sm:$0xff]  }
 0x33d   : > { %v3524_v16 = vadd.f32 %v3371_v34, %v13424_v32  ;;  %v3776_v28 = vpop.f32.mrf.mxu1  ;;  %10705 = vmatmul.mubr.bf16.gmra.mxu1 %v4610_v5  ;;  %10600 = vmatprep.mubr.msk.bf16.mxu0 %vm11761_vm0, %v15761_v26  ;;  %v4626_v5 = vrot.slane %v4624_v37, 4  ;;  %v4633_v40 = vshll.u32 %v13891_v47, 16 }
 0x33e   : > { %v10378_v14 = vpop.f32.mrf.mxu0  ;;  %10708 = vmatprep.mubr.msk.bf16.mxu1 %vm11761_vm0, %v15761_v26 }
 0x33f   : > { %v13885_v46 = vadd.f32 %v3776_v28, %v3524_v16  ;;  %v10486_v32 = vpop.f32.mrf.mxu1  ;;  %v4627_v23 = vor.u32 %v4626_v5, %v4623_v22  ;;  %v4630_v14 = vshrl.u32 %v13891_v47, 16 }
 0x340   : > { %v3374_v57 = vpop.f32.mrf.mxu0 }
 0x341   : > { %v3525_v19 = vadd.f32 %v3374_v57, %v13433_v20  ;;  %v3779_v21 = vpop.f32.mrf.mxu1  ;;  %v4160_v20 = vrot.slane %v13873_v42, 3 }
 0x342   : > { %v10379_v11 = vpop.f32.mrf.mxu0 }
 0x343   : > { %v13893_v62 = vadd.f32 %v3779_v21, %v3525_v19  ;;  %v10487_v36 = vpop.f32.mrf.mxu1  ;;  %v4161_v21 = vsel %vm3585_vm6, %v4158_v8, %v4160_v20  ;;  %v4632_v11 = vrot.slane %v4630_v14, 3 }
 0x344   : > { %v3379_v34 = vpop.f32.mrf.mxu0  ;;  %10601 = vmatmul.mubr.bf16.gmra.mxu0 %v4159_v63  ;;  %v4628_v63 = vsel %vm4539_vm7, %v4618_v24, %v4627_v23  ;;  %v13909_v36 = vld [vmem:[%s11832_s6 + $0x68] sm:$0xff]  }
 0x345   : > { %v3526_v16 = vadd.f32 %v3379_v34, %v13441_v25  ;;  %v3784_v28 = vpop.f32.mrf.mxu1  ;;  %10709 = vmatmul.mubr.bf16.gmra.mxu1 %v4619_v58  ;;  %10604 = vmatprep.mubr.msk.bf16.mxu0 %vm11761_vm0, %v15761_v26  ;;  %v4635_v58 = vrot.slane %v4633_v40, 4  ;;  %v4642_v14 = vshll.u32 %v13909_v36, 16 }
 0x346   : > { %v10382_v12 = vpop.f32.mrf.mxu0  ;;  %10712 = vmatprep.mubr.msk.bf16.mxu1 %vm11761_vm0, %v15761_v26 }
 0x347   : > { %v13903_v37 = vadd.f32 %v3784_v28, %v3526_v16  ;;  %v10490_v25 = vpop.f32.mrf.mxu1  ;;  %v4636_v24 = vor.u32 %v4635_v58, %v4632_v11  ;;  %v4639_v12 = vshrl.u32 %v13909_v36, 16 }
 0x348   : > { %v3382_v32 = vpop.f32.mrf.mxu0 }
 0x349   : > { %v3527_v57 = vadd.f32 %v3382_v32, %v13450_v6  ;;  %v3787_v19 = vpop.f32.mrf.mxu1  ;;  %v4162_v6 = vrot.slane %v13891_v47, 3 }
 0x34a   : > { %v10383_v42 = vpop.f32.mrf.mxu0 }
 0x34b   : > { %v13911_v22 = vadd.f32 %v3787_v19, %v3527_v57  ;;  %v10491_v5 = vpop.f32.mrf.mxu1  ;;  %v4163_v19 = vsel %vm3585_vm6, %v4160_v20, %v4162_v6  ;;  %v4641_v42 = vrot.slane %v4639_v12, 3 }
 0x34c   : > { %v3387_v34 = vpop.f32.mrf.mxu0  ;;  %10605 = vmatmul.mubr.bf16.gmra.mxu0 %v4161_v21  ;;  %v4637_v21 = vsel %vm4539_vm7, %v4627_v23, %v4636_v24  ;;  %v13927_v5 = vld [vmem:[%s11832_s6 + $0x70] sm:$0xff]  }
 0x34d   : > { %v3528_v16 = vadd.f32 %v3387_v34, %v13458_v55  ;;  %v3792_v28 = vpop.f32.mrf.mxu1  ;;  %10713 = vmatmul.mubr.bf16.gmra.mxu1 %v4628_v63  ;;  %10608 = vmatprep.mubr.msk.bf16.mxu0 %vm11761_vm0, %v15761_v26  ;;  %v4644_v63 = vrot.slane %v4642_v14, 4  ;;  %v4651_v12 = vshll.u32 %v13927_v5, 16 }
 0x34e   : > { %v10386_v8 = vpop.f32.mrf.mxu0  ;;  %10716 = vmatprep.mubr.msk.bf16.mxu1 %vm11761_vm0, %v15761_v26 }
 0x34f   : > { %v13921_v40 = vadd.f32 %v3792_v28, %v3528_v16  ;;  %v10494_v55 = vpop.f32.mrf.mxu1  ;;  %v4645_v23 = vor.u32 %v4644_v63, %v4641_v42  ;;  %v4648_v8 = vshrl.u32 %v13927_v5, 16 }
 0x350   : > { %v3390_v25 = vpop.f32.mrf.mxu0 }
 0x351   : > { %v3529_v32 = vadd.f32 %v3390_v25, %v13467_v7  ;;  %v3795_v57 = vpop.f32.mrf.mxu1  ;;  %v4164_v7 = vrot.slane %v13909_v36, 3 }
 0x352   : > { %v10387_v47 = vpop.f32.mrf.mxu0 }
 0x353   : > { %v13929_v11 = vadd.f32 %v3795_v57, %v3529_v32  ;;  %v10495_v58 = vpop.f32.mrf.mxu1  ;;  %v4165_v57 = vsel %vm3585_vm6, %v4162_v6, %v4164_v7  ;;  %v4650_v47 = vrot.slane %v4648_v8, 3 }
 0x354   : > { %v3395_v34 = vpop.f32.mrf.mxu0  ;;  %10609 = vmatmul.mubr.bf16.gmra.mxu0 %v4163_v19  ;;  %v4646_v19 = vsel %vm4539_vm7, %v4636_v24, %v4645_v23  ;;  %v13945_v58 = vld [vmem:[%s11832_s6 + $0x78] sm:$0xff]  }
 0x355   : > { %v3530_v16 = vadd.f32 %v3395_v34, %v13475_v54  ;;  %v3800_v28 = vpop.f32.mrf.mxu1  ;;  %10717 = vmatmul.mubr.bf16.gmra.mxu1 %v4637_v21  ;;  %10612 = vmatprep.mubr.msk.bf16.mxu0 %vm11761_vm0, %v15761_v26  ;;  %v4653_v21 = vrot.slane %v4651_v12, 4  ;;  %v4660_v8 = vshll.u32 %v13945_v58, 16 }
 0x356   : > { %v10390_v20 = vpop.f32.mrf.mxu0  ;;  %10720 = vmatprep.mubr.msk.bf16.mxu1 %vm11761_vm0, %v15761_v26 }
 0x357   : > { %v13939_v14 = vadd.f32 %v3800_v28, %v3530_v16  ;;  %v10498_v54 = vpop.f32.mrf.mxu1  ;;  %v4654_v24 = vor.u32 %v4653_v21, %v4650_v47  ;;  %v4657_v20 = vshrl.u32 %v13945_v58, 16 }
 0x358   : > { %v3398_v55 = vpop.f32.mrf.mxu0 }
 0x359   : > { %v3531_v25 = vadd.f32 %v3398_v55, %v13484_v53  ;;  %v3803_v32 = vpop.f32.mrf.mxu1  ;;  %v4166_v53 = vrot.slane %v13927_v5, 3 }
 0x35a   : > { %v10391_v36 = vpop.f32.mrf.mxu0 }
 0x35b   : > { %v13947_v42 = vadd.f32 %v3803_v32, %v3531_v25  ;;  %v10499_v63 = vpop.f32.mrf.mxu1  ;;  %v4167_v32 = vsel %vm3585_vm6, %v4164_v7, %v4166_v53  ;;  %v4659_v36 = vrot.slane %v4657_v20, 3 }
 0x35c   : > { %v3403_v34 = vpop.f32.mrf.mxu0  ;;  %10613 = vmatmul.mubr.bf16.gmra.mxu0 %v4165_v57  ;;  %v4655_v57 = vsel %vm4539_vm7, %v4645_v23, %v4654_v24  ;;  %v13963_v63 = vld [vmem:[%s11832_s6 + $0x80] sm:$0xff]  }
 0x35d   : > { %v3532_v16 = vadd.f32 %v3403_v34, %v13492_v38  ;;  %v3808_v28 = vpop.f32.mrf.mxu1  ;;  %10721 = vmatmul.mubr.bf16.gmra.mxu1 %v4646_v19  ;;  %10616 = vmatprep.mubr.msk.bf16.mxu0 %vm11761_vm0, %v15761_v26  ;;  %v4662_v19 = vrot.slane %v4660_v8, 4  ;;  %v4669_v20 = vshll.u32 %v13963_v63, 16 }
 0x35e   : > { %v10394_v6 = vpop.f32.mrf.mxu0  ;;  %10724 = vmatprep.mubr.msk.bf16.mxu1 %vm11761_vm0, %v15761_v26 }
 0x35f   : > { %v13957_v12 = vadd.f32 %v3808_v28, %v3532_v16  ;;  %v10502_v38 = vpop.f32.mrf.mxu1  ;;  %v4663_v23 = vor.u32 %v4662_v19, %v4659_v36  ;;  %v4666_v6 = vshrl.u32 %v13963_v63, 16 }
 0x360   : > { %v3406_v54 = vpop.f32.mrf.mxu0 }
 0x361   : > { %v3533_v55 = vadd.f32 %v3406_v54, %v13501_v1  ;;  %v3811_v25 = vpop.f32.mrf.mxu1  ;;  %v4168_v1 = vrot.slane %v13945_v58, 3 }
 0x362   : > { %v10395_v5 = vpop.f32.mrf.mxu0 }
 0x363   : > { %v13965_v47 = vadd.f32 %v3811_v25, %v3533_v55  ;;  %v10503_v21 = vpop.f32.mrf.mxu1  ;;  %v4169_v25 = vsel %vm3585_vm6, %v4166_v53, %v4168_v1  ;;  %v4668_v5 = vrot.slane %v4666_v6, 3 }
 0x364   : > { %v3411_v34 = vpop.f32.mrf.mxu0  ;;  %10617 = vmatmul.mubr.bf16.gmra.mxu0 %v4167_v32  ;;  %v4664_v32 = vsel %vm4539_vm7, %v4654_v24, %v4663_v23  ;;  %v13981_v21 = vld [vmem:[%s11832_s6 + $0x88] sm:$0xff]  }
 0x365   : > { %v3534_v16 = vadd.f32 %v3411_v34, %v13509_v51  ;;  %v3816_v28 = vpop.f32.mrf.mxu1  ;;  %10725 = vmatmul.mubr.bf16.gmra.mxu1 %v4655_v57  ;;  %10620 = vmatprep.mubr.msk.bf16.mxu0 %vm11761_vm0, %v15761_v26  ;;  %v4671_v57 = vrot.slane %v4669_v20, 4  ;;  %v4678_v6 = vshll.u32 %v13981_v21, 16 }
 0x366   : > { %v10398_v7 = vpop.f32.mrf.mxu0  ;;  %10728 = vmatprep.mubr.msk.bf16.mxu1 %vm11761_vm0, %v15761_v26 }
 0x367   : > { %v13975_v8 = vadd.f32 %v3816_v28, %v3534_v16  ;;  %v10506_v51 = vpop.f32.mrf.mxu1  ;;  %v4672_v24 = vor.u32 %v4671_v57, %v4668_v5  ;;  %v4675_v7 = vshrl.u32 %v13981_v21, 16 }
 0x368   : > { %v3414_v38 = vpop.f32.mrf.mxu0 }
 0x369   : > { %v3535_v54 = vadd.f32 %v3414_v38, %v13518_v59  ;;  %v3819_v55 = vpop.f32.mrf.mxu1  ;;  %v4170_v59 = vrot.slane %v13963_v63, 3 }
 0x36a   : > { %v10399_v58 = vpop.f32.mrf.mxu0 }
 0x36b   : > { %v13983_v36 = vadd.f32 %v3819_v55, %v3535_v54  ;;  %v10507_v19 = vpop.f32.mrf.mxu1  ;;  %v4171_v55 = vsel %vm3585_vm6, %v4168_v1, %v4170_v59  ;;  %v4677_v58 = vrot.slane %v4675_v7, 3 }
 0x36c   : > { %v3419_v34 = vpop.f32.mrf.mxu0  ;;  %10621 = vmatmul.mubr.bf16.gmra.mxu0 %v4169_v25  ;;  %v4673_v25 = vsel %vm4539_vm7, %v4663_v23, %v4672_v24  ;;  %v13999_v19 = vld [vmem:[%s11832_s6 + $0x90] sm:$0xff]  }
 0x36d   : > { %v3536_v16 = vadd.f32 %v3419_v34, %v13526_v49  ;;  %v3824_v28 = vpop.f32.mrf.mxu1  ;;  %10729 = vmatmul.mubr.bf16.gmra.mxu1 %v4664_v32  ;;  %10624 = vmatprep.mubr.msk.bf16.mxu0 %vm11761_vm0, %v15761_v26  ;;  %v4680_v32 = vrot.slane %v4678_v6, 4  ;;  %v4687_v7 = vshll.u32 %v13999_v19, 16 }
 0x36e   : > { %v10402_v53 = vpop.f32.mrf.mxu0  ;;  %10732 = vmatprep.mubr.msk.bf16.mxu1 %vm11761_vm0, %v15761_v26 }
 0x36f   : > { %v13993_v20 = vadd.f32 %v3824_v28, %v3536_v16  ;;  %v10510_v49 = vpop.f32.mrf.mxu1  ;;  %v4681_v23 = vor.u32 %v4680_v32, %v4677_v58  ;;  %v4684_v53 = vshrl.u32 %v13999_v19, 16 }
 0x370   : > { %v3422_v51 = vpop.f32.mrf.mxu0 }
 0x371   : > { %v3537_v38 = vadd.f32 %v3422_v51, %v13535_v0  ;;  %v3827_v54 = vpop.f32.mrf.mxu1  ;;  %v4172_v0 = vrot.slane %v13981_v21, 3 }
 0x372   : > { %v10403_v63 = vpop.f32.mrf.mxu0 }
 0x373   : > { %v14001_v5 = vadd.f32 %v3827_v54, %v3537_v38  ;;  %v10511_v57 = vpop.f32.mrf.mxu1  ;;  %v4173_v54 = vsel %vm3585_vm6, %v4170_v59, %v4172_v0  ;;  %v4686_v63 = vrot.slane %v4684_v53, 3 }
 0x374   : > { %v3427_v34 = vpop.f32.mrf.mxu0  ;;  %10625 = vmatmul.mubr.bf16.gmra.mxu0 %v4171_v55  ;;  %v4682_v55 = vsel %vm4539_vm7, %v4672_v24, %v4681_v23  ;;  %v14017_v57 = vld [vmem:[%s11832_s6 + $0x98] sm:$0xff]  }
 0x375   : > { %v3538_v16 = vadd.f32 %v3427_v34, %v13543_v52  ;;  %v3832_v28 = vpop.f32.mrf.mxu1  ;;  %10733 = vmatmul.mubr.bf16.gmra.mxu1 %v4673_v25  ;;  %10628 = vmatprep.mubr.msk.bf16.mxu0 %vm11761_vm0, %v15761_v26  ;;  %v4689_v25 = vrot.slane %v4687_v7, 4  ;;  %v4696_v53 = vshll.u32 %v14017_v57, 16 }
 0x376   : > { %v10406_v1 = vpop.f32.mrf.mxu0  ;;  %10736 = vmatprep.mubr.msk.bf16.mxu1 %vm11761_vm0, %v15761_v26 }
 0x377   : > { %v14011_v6 = vadd.f32 %v3832_v28, %v3538_v16  ;;  %v10514_v52 = vpop.f32.mrf.mxu1  ;;  %v4690_v24 = vor.u32 %v4689_v25, %v4686_v63  ;;  %v4693_v1 = vshrl.u32 %v14017_v57, 16 }
 0x378   : > { %v3430_v49 = vpop.f32.mrf.mxu0 }
 0x379   : > { %v3539_v51 = vadd.f32 %v3430_v49, %v13552_v60  ;;  %v3835_v38 = vpop.f32.mrf.mxu1  ;;  %v4174_v60 = vrot.slane %v13999_v19, 3 }
 0x37a   : > { %v10407_v21 = vpop.f32.mrf.mxu0 }
 0x37b   : > { %v14019_v58 = vadd.f32 %v3835_v38, %v3539_v51  ;;  %v10515_v32 = vpop.f32.mrf.mxu1  ;;  %v4175_v38 = vsel %vm3585_vm6, %v4172_v0, %v4174_v60  ;;  %v4695_v21 = vrot.slane %v4693_v1, 3 }
 0x37c   : > { %v3435_v34 = vpop.f32.mrf.mxu0  ;;  %10629 = vmatmul.mubr.bf16.gmra.mxu0 %v4173_v54  ;;  %v4691_v54 = vsel %vm4539_vm7, %v4681_v23, %v4690_v24  ;;  %v14035_v32 = vld [vmem:[%s11832_s6 + $0xa0] sm:$0xff]  }
 0x37d   : > { %v3540_v16 = vadd.f32 %v3435_v34, %v13560_v61  ;;  %v3840_v28 = vpop.f32.mrf.mxu1  ;;  %10737 = vmatmul.mubr.bf16.gmra.mxu1 %v4682_v55  ;;  %10632 = vmatprep.mubr.msk.bf16.mxu0 %vm11761_vm0, %v15761_v26  ;;  %v4698_v55 = vrot.slane %v4696_v53, 4  ;;  %v4705_v1 = vshll.u32 %v14035_v32, 16 }
 0x37e   : > { %v10410_v59 = vpop.f32.mrf.mxu0  ;;  %10740 = vmatprep.mubr.msk.bf16.mxu1 %vm11761_vm0, %v15761_v26 }
 0x37f   : > { %v14029_v7 = vadd.f32 %v3840_v28, %v3540_v16  ;;  %v10518_v61 = vpop.f32.mrf.mxu1  ;;  %v4699_v23 = vor.u32 %v4698_v55, %v4695_v21  ;;  %v4702_v59 = vshrl.u32 %v14035_v32, 16 }
 0x380   : > { %v3438_v52 = vpop.f32.mrf.mxu0 }
 0x381   : > { %v3541_v49 = vadd.f32 %v3438_v52, %v13569_v35  ;;  %v3843_v51 = vpop.f32.mrf.mxu1  ;;  %v4176_v35 = vrot.slane %v14017_v57, 3  ;;  %v15860_v52 = vld [vmem:[#allocation2_spill] sm:$0xff] }
 0x382   : > { %v10411_v19 = vpop.f32.mrf.mxu0 }
 0x383   : > { %v14037_v63 = vadd.f32 %v3843_v51, %v3541_v49  ;;  %v10519_v25 = vpop.f32.mrf.mxu1  ;;  %v4700_v19 = vsel %vm4539_vm7, %v4690_v24, %v4699_v23 }
 0x384   : > { %v3443_v34 = vpop.f32.mrf.mxu0  ;;  %10633 = vmatmul.mubr.bf16.gmra.mxu0 %v4175_v38  ;;  %v4177_v38 = vsel %vm3585_vm6, %v4174_v60, %v4176_v35  ;;  %v4707_v25 = vrot.slane %v4705_v1, 4  ;;  %v4178_v60 = vrot.slane %v14035_v32, 3 }
 0x385   : > { %v3542_v16 = vadd.f32 %v3443_v34, %v13577_v33  ;;  %v3848_v28 = vpop.f32.mrf.mxu1  ;;  %10741 = vmatmul.mubr.bf16.gmra.mxu1 %v4691_v54  ;;  %10636 = vmatprep.mubr.msk.bf16.mxu0 %vm11761_vm0, %v15761_v26  ;;  %v4704_v54 = vrot.slane %v4702_v59, 3  ;;  %v14053_v34 = vld [vmem:[%s11832_s6 + $0xa8] sm:$0xff]  }
 0x386   : > { %v10414_v0 = vpop.f32.mrf.mxu0  ;;  %10744 = vmatprep.mubr.msk.bf16.mxu1 %vm11761_vm0, %v15761_v26  ;;  %v4711_v1 = vshrl.u32 %v14053_v34, 16 }
 0x387   : > { %v14047_v53 = vadd.f32 %v3848_v28, %v3542_v16  ;;  %v10522_v33 = vpop.f32.mrf.mxu1  ;;  %v15862_v16 = vld [vmem:[#allocation4_spill] sm:$0xff]  ;;  %v4708_v59 = vor.u32 %v4707_v25, %v4704_v54 }
 0x388   : > { %v3446_v61 = vpop.f32.mrf.mxu0 }
 0x389   : > { %15859 = vst [vmem:[#allocation8_spill] sm:$0xff] %v14047_v53  ;;  %v3543_v49 = vadd.f32 %v3446_v61, %v15860_v52  ;;  %v3851_v51 = vpop.f32.mrf.mxu1  ;;  %v4714_v61 = vshll.u32 %v14053_v34, 16 }
 0x38a   : > { %v10415_v57 = vpop.f32.mrf.mxu0 }
 0x38b   : > { %v14055_v21 = vadd.f32 %v3851_v51, %v3543_v49  ;;  %v10523_v55 = vpop.f32.mrf.mxu1 }
 0x38c   : > { %v3451_v0 = vpop.f32.mrf.mxu0  ;;  %10637 = vmatmul.mubr.bf16.gmra.mxu0 %v4177_v38  ;;  %v15863_v38 = vld [vmem:[#allocation3_spill] sm:$0xff]  ;;  %v4179_v55 = vsel %vm3585_vm6, %v4176_v35, %v4178_v60  ;;  %v4180_v35 = vrot.slane %v14053_v34, 3 }
 0x38d   : > { %15861 = vst [vmem:[#allocation9_spill] sm:$0xff] %v14055_v21  ;;  %v3544_v28 = vadd.f32 %v3451_v0, %v15862_v16  ;;  %v3856_v33 = vpop.f32.mrf.mxu1  ;;  %10745 = vmatmul.mubr.bf16.gmra.mxu1 %v4700_v19  ;;  %10640 = vmatprep.mubr.msk.bf16.mxu0 %vm11761_vm0, %v15761_v26  ;;  %v4709_v0 = vsel %vm4539_vm7, %v4699_v23, %v4708_v59  ;;  %v4713_v16 = vrot.slane %v4711_v1, 3  ;;  %v14071_v21 = vld [vmem:[%s11832_s6 + $0xb0] sm:$0xff]  }
 0x38e   : > { %v10418_v24 = vpop.f32.mrf.mxu0  ;;  %10748 = vmatprep.mubr.msk.bf16.mxu1 %vm11761_vm0, %v15761_v26 }
 0x38f   : > { %v14065_v52 = vadd.f32 %v3856_v33, %v3544_v28  ;;  %v10526_v49 = vpop.f32.mrf.mxu1  ;;  %v4716_v24 = vrot.slane %v4714_v61, 4  ;;  %v4720_v61 = vshrl.u32 %v14071_v21, 16 }
 0x390   : > { %v3454_v51 = vpop.f32.mrf.mxu0  ;;  %v4723_v49 = vshll.u32 %v14071_v21, 16 }
 0x391   : > { %v3545_v57 = vadd.f32 %v3454_v51, %v15863_v38  ;;  %v3859_v19 = vpop.f32.mrf.mxu1  ;;  %v4717_v1 = vor.u32 %v4716_v24, %v4713_v16 }
 0x392   : > { %v10419_v32 = vpop.f32.mrf.mxu0 }
 0x393   : > { %v14073_v54 = vadd.f32 %v3859_v19, %v3545_v57  ;;  %v10527_v25 = vpop.f32.mrf.mxu1  ;;  %v4181_v19 = vsel %vm3585_vm6, %v4178_v60, %v4180_v35  ;;  %v4722_v32 = vrot.slane %v4720_v61, 3 }
 0x394   : > { %v3459_v53 = vpop.f32.mrf.mxu0  ;;  %10641 = vmatmul.mubr.bf16.gmra.mxu0 %v4179_v55  ;;  %v4718_v55 = vsel %vm4539_vm7, %v4708_v59, %v4717_v1  ;;  %v14089_v25 = vld [vmem:[%s11832_s6 + $0xb8] sm:$0xff]  }
 0x395   : > { %v3546_v28 = vadd.f32 %v3459_v53, %v13611_v44  ;;  %v3864_v33 = vpop.f32.mrf.mxu1  ;;  %10749 = vmatmul.mubr.bf16.gmra.mxu1 %v4709_v0  ;;  %10644 = vmatprep.mubr.msk.bf16.mxu0 %vm11761_vm0, %v15761_v26  ;;  %v4725_v0 = vrot.slane %v4723_v49, 4  ;;  %v4729_v61 = vshrl.u32 %v14089_v25, 16  ;;  %v4732_v49 = vshll.u32 %v14089_v25, 16 }
 0x396   : > { %v10422_v23 = vpop.f32.mrf.mxu0  ;;  %10752 = vmatprep.mubr.msk.bf16.mxu1 %vm11761_vm0, %v15761_v26 }
 0x397   : > { %v14083_v51 = vadd.f32 %v3864_v33, %v3546_v28  ;;  %v10530_v44 = vpop.f32.mrf.mxu1  ;;  %v15866_v28 = vld [vmem:[#allocation6_spill] sm:$0xff]  ;;  %v4726_v59 = vor.u32 %v4725_v0, %v4722_v32 }
 0x398   : > { %v3462_v53 = vpop.f32.mrf.mxu0 }
 0x399   : > { %15864 = vst [vmem:[#allocation11_spill] sm:$0xff] %v14083_v51  ;;  %v3547_v38 = vadd.f32 %v3462_v53, %v13620_v50  ;;  %v3867_v57 = vpop.f32.mrf.mxu1  ;;  %v4182_v50 = vrot.slane %v14071_v21, 3 }
 0x39a   : > { %v10423_v34 = vpop.f32.mrf.mxu0 }
 0x39b   : > { %v14091_v16 = vadd.f32 %v3867_v57, %v3547_v38  ;;  %v10531_v24 = vpop.f32.mrf.mxu1 }
 0x39c   : > { %v3467_v23 = vpop.f32.mrf.mxu0  ;;  %10645 = vmatmul.mubr.bf16.gmra.mxu0 %v4181_v19  ;;  %v15867_v19 = vld [vmem:[#allocation5_spill] sm:$0xff]  ;;  %v4183_v24 = vsel %vm3585_vm6, %v4180_v35, %v4182_v50  ;;  %v4184_v35 = vrot.slane %v14089_v25, 3 }
 0x39d   : > { %15865 = vst [vmem:[#allocation12_spill] sm:$0xff] %v14091_v16  ;;  %v3548_v33 = vadd.f32 %v3467_v23, %v15866_v28  ;;  %v3872_v44 = vpop.f32.mrf.mxu1  ;;  %10753 = vmatmul.mubr.bf16.gmra.mxu1 %v4718_v55  ;;  %10648 = vmatprep.mubr.msk.bf16.mxu0 %vm11761_vm0, %v15761_v26  ;;  %v4727_v23 = vsel %vm4539_vm7, %v4717_v1, %v4726_v59  ;;  %v4731_v28 = vrot.slane %v4729_v61, 3  ;;  %v14107_v16 = vld [vmem:[%s11832_s6 + $0xc0] sm:$0xff]  }
 0x39e   : > { %v10426_v60 = vpop.f32.mrf.mxu0  ;;  %10756 = vmatprep.mubr.msk.bf16.mxu1 %vm11761_vm0, %v15761_v26  ;;  %v4738_v61 = vshrl.u32 %v14107_v16, 16 }
 0x39f   : > { %v14101_v53 = vadd.f32 %v3872_v44, %v3548_v33  ;;  %v10534_v38 = vpop.f32.mrf.mxu1  ;;  %v4734_v60 = vrot.slane %v4732_v49, 4  ;;  %v4741_v49 = vshll.u32 %v14107_v16, 16 }
 0x3a0   : > { %v3470_v57 = vpop.f32.mrf.mxu0 }
 0x3a1   : > { %v3549_v34 = vadd.f32 %v3470_v57, %v15867_v19  ;;  %v3875_v55 = vpop.f32.mrf.mxu1  ;;  %v4735_v1 = vor.u32 %v4734_v60, %v4731_v28 }
 0x3a2   : > { %v10427_v21 = vpop.f32.mrf.mxu0 }
 0x3a3   : > { %v14109_v32 = vadd.f32 %v3875_v55, %v3549_v34  ;;  %v10535_v0 = vpop.f32.mrf.mxu1  ;;  %v4185_v55 = vsel %vm3585_vm6, %v4182_v50, %v4184_v35  ;;  %v4736_v25 = vsel %vm4539_vm7, %v4726_v59, %v4735_v1  ;;  %v4740_v21 = vrot.slane %v4738_v61, 3 }
 0x3a4   : > { %v3475_v51 = vpop.f32.mrf.mxu0  ;;  %10649 = vmatmul.mubr.bf16.gmra.mxu0 %v4183_v24 }
 0x3a5   : > { %v3550_v33 = vadd.f32 %v3475_v51, %v13647_v48  ;;  %v3880_v44 = vpop.f32.mrf.mxu1  ;;  %10757 = vmatmul.mubr.bf16.gmra.mxu1 %v4727_v23  ;;  %10652 = vmatprep.mubr.msk.bf16.mxu0 %vm11761_vm0, %v15761_v26  ;;  %v4743_v23 = vrot.slane %v4741_v49, 4 }
 0x3a6   : > { %v10430_v38 = vpop.f32.mrf.mxu0  ;;  %10760 = vmatprep.mubr.msk.bf16.mxu1 %vm11761_vm0, %v15761_v26 }
 0x3a7   : > { %v14119_v57 = vadd.f32 %v3880_v44, %v3550_v33  ;;  %v10538_v19 = vpop.f32.mrf.mxu1  ;;  %v4744_v59 = vor.u32 %v4743_v23, %v4740_v21 }
 0x3a8   : > { %v3478_v48 = vpop.f32.mrf.mxu0  ;;  %v15868_v19 = vld [vmem:[#allocation7_spill] sm:$0xff] }
 0x3a9   : > { %v3551_v51 = vadd.f32 %v3478_v48, %v13654_v17  ;;  %v3883_v34 = vpop.f32.mrf.mxu1  ;;  %v4186_v17 = vrot.slane %v14107_v16, 3 }
 0x3aa   : > { %v10431_v24 = vpop.f32.mrf.mxu0 }
 0x3ab   : > { %v14124_v0 = vadd.f32 %v3883_v34, %v3551_v51  ;;  %v10539_v28 = vpop.f32.mrf.mxu1  ;;  %v4187_v51 = vsel %vm3585_vm6, %v4184_v35, %v4186_v17  ;;  %v11603_v24 = vld [vmem:[%s11832_s6 + $0x14] sm:$0xff]   ;;  %v14146_v35 = vld [vmem:[%s11832_s6 + $0x1c] sm:$0xff]  }
 0x3ac   : > { %v3483_v60 = vpop.f32.mrf.mxu0  ;;  %10653 = vmatmul.mubr.bf16.gmra.mxu0 %v4185_v55  ;;  %v4745_v55 = vsel %vm4539_vm7, %v4735_v1, %v4744_v59  ;;  %v5612_v1 = vshll.u32 %v11603_v24, 16 }
 0x3ad   : > { %v3552_v33 = vadd.f32 %v3483_v60, %v13661_v30  ;;  %v3888_v44 = vpop.f32.mrf.mxu1  ;;  %10761 = vmatmul.mubr.bf16.gmra.mxu1 %v4736_v25  ;;  %10656 = vmatprep.mubr.msk.bf16.mxu0 %vm11761_vm0, %v15761_v26 }
 0x3ae   : > { %v10434_v50 = vpop.f32.mrf.mxu0  ;;  %10764 = vmatprep.mubr.msk.bf16.mxu1 %vm11761_vm0, %v15761_v26 }
 0x3af   : > { %v14132_v38 = vadd.f32 %v3888_v44, %v3552_v33  ;;  %v10542_v61 = vpop.f32.mrf.mxu1 }
 0x3b0   : > { %v3486_v49 = vpop.f32.mrf.mxu0 }
 0x3b1   : > { %v3553_v48 = vadd.f32 %v3486_v49, %v15868_v19  ;;  %v3891_v30 = vpop.f32.mrf.mxu1  ;;  %v5610_v19 = vshrl.u32 %v11603_v24, 16 }
 0x3b2   : > { %v10435_v34 = vpop.f32.mrf.mxu0 }
 0x3b3   : > { %v14138_v16 = vadd.f32 %v3891_v30, %v3553_v48  ;;  %v10543_v25 = vpop.f32.mrf.mxu1  ;;  %v5614_v48 = vrot.slane %v5612_v1, 1  ;;  %v5617_v30 = vshll.u32 %v14146_v35, 16 }
 0x3b4   : > { %v3491_v28 = vpop.f32.mrf.mxu0  ;;  %10657 = vmatmul.mubr.bf16.gmra.mxu0 %v4187_v51 }
 0x3b5   : > { %v3554_v21 = vadd.f32 %v3491_v28, %v13679_v18  ;;  %v3896_v23 = vpop.f32.mrf.mxu1  ;;  %10765 = vmatmul.mubr.bf16.gmra.mxu1 %v4745_v55  ;;  %10660 = vmatprep.mubr.msk.bf16.mxu0 %vm11761_vm0, %v15761_v26 }
 0x3b6   : > { %v10438_v60 = vpop.f32.mrf.mxu0  ;;  %10768 = vmatprep.mubr.msk.bf16.mxu1 %vm11761_vm0, %v15761_v26 }
 0x3b7   : > { %v14148_v33 = vadd.f32 %v3896_v23, %v3554_v21  ;;  %v10546_v44 = vpop.f32.mrf.mxu1  ;;  %v5615_v21 = vor.u32 %v5614_v48, %v5610_v19  ;;  %v5619_v23 = vrot.slane %v5617_v30, 1  ;;  %v14160_v60 = vld [vmem:[%s11832_s6 + $0x24] sm:$0xff]   ;;  %v5621_v19 = vshrl.u32 %v14146_v35, 16 }
 0x3b8   : > { %v3494_v50 = vpop.f32.mrf.mxu0  ;;  %v5625_v48 = vshll.u32 %v14160_v60, 16 }
 0x3b9   : > { %v3555_v61 = vadd.f32 %v3494_v50, %v13685_v45  ;;  %v3899_v49 = vpop.f32.mrf.mxu1 }
 0x3ba   : > { %v10439_v18 = vpop.f32.mrf.mxu0 }
 0x3bb   : > { %v14152_v51 = vadd.f32 %v3899_v49, %v3555_v61  ;;  %v10547_v34 = vpop.f32.mrf.mxu1  ;;  %v5620_v49 = vsel %vm366_vm1, %v5615_v21, %v5619_v23  ;;  %v11606_v18 = vld [vmem:[%s15607_s1 + $0x378] sm:$0xff]   ;;  %v5623_v21 = vor.u32 %v5621_v19, %v5619_v23 }
 0x3bc   : > { %v3499_v55 = vpop.f32.mrf.mxu0  ;;  %10661 = vmatmul.mubr.bf16.gmra.mxu0 %v4186_v17 }
 0x3bd   : > { %v3556_v25 = vadd.f32 %v3499_v55, %v13695_v27  ;;  %v3904_v28 = vpop.f32.mrf.mxu1  ;;  %10769 = vmatmul.mubr.bf16.gmra.mxu1 %v4744_v59  ;;  %10788 = vmatprep.mubr.msk.bf16.mxu0 %vm11761_vm0, %v15761_v26  ;;  %v11605_v59 = vld [vmem:[%s15607_s1 + $0x338] sm:$0xff]  }
 0x3be   : > { %v10442_v45 = vpop.f32.mrf.mxu0  ;;  %10896 = vmatprep.mubr.msk.bf16.mxu1 %vm11761_vm0, %v15761_v26 }
 0x3bf   : > { %v14162_v1 = vadd.f32 %v3904_v28, %v3556_v25  ;;  %v10550_v44 = vpop.f32.mrf.mxu1  ;;  %v11610_v28 = vld [vmem:[%s15607_s1 + $0x330] sm:$0xff]  }
 0x3c0   : > { %v3502_v50 = vpop.f32.mrf.mxu0  ;;  %v5627_v44 = vrot.slane %v5625_v48, 1  ;;  %v11614_v48 = vld [vmem:[%s15607_s1 + $0x328] sm:$0xff]  }
 0x3c1   : > { %v3557_v17 = vadd.f32 %v3502_v50, %v13709_v41  ;;  %v3907_v27 = vpop.f32.mrf.mxu1  ;;  %v14183_v50 = vld [vmem:[%s11832_s6 + $0x2c] sm:$0xff]  }
 0x3c2   : > { %v10443_v61 = vpop.f32.mrf.mxu0  ;;  %v5633_v19 = vshll.u32 %v14183_v50, 16 }
 0x3c3   : > { %v14174_v30 = vadd.f32 %v3907_v27, %v3557_v17  ;;  %v10551_v41 = vpop.f32.mrf.mxu1 }
 0x3c4   : > { %v3507_v34 = vpop.f32.mrf.mxu0  ;;  %10789 = vmatmul.mubr.bf16.vlgmr.msra.gmra.mxu0 %v11603_v24 }
 0x3c5   : > { %v3558_v55 = vadd.f32 %v3507_v34, %v13723_v15  ;;  %v3912_v25 = vpop.f32.mrf.mxu1  ;;  %10897 = vmatmul.mubr.bf16.vlgmr.msra.gmra.mxu1 %v5620_v49  ;;  %10989 = vmatpush3.bf16.msra.mxu0 %v11605_v59  ;;  %v11611_v15 = vld [vmem:[%s15607_s1 + $0x370] sm:$0xff]   ;;  %v5628_v49 = vsel %vm366_vm1, %v5623_v21, %v5627_v44  ;;  %v11616_v34 = vld [vmem:[%s15607_s1 + $0x368] sm:$0xff]  }
 0x3c6   : > { %v10446_v45 = vpop.f32.mrf.mxu0  ;;  %11097 = vmatpush3.bf16.msra.mxu1 %v11606_v18  ;;  %10792 = vmatprep.mubr.msk.bf16.mxu0 %vm11761_vm0, %v15761_v26  ;;  %v5629_v18 = vshrl.u32 %v14160_v60, 16 }
 0x3c7   : > { %v14188_v24 = vadd.f32 %v3912_v25, %v3558_v55  ;;  %v10554_v17 = vpop.f32.mrf.mxu1  ;;  %10900 = vmatprep.mubr.msk.bf16.mxu1 %vm11761_vm0, %v15761_v26  ;;  %10990 = vmatprep.subr.bf16.mxu0 %v15761_v26 }
 0x3c8   : > { %v3510_v27 = vpop.f32.mrf.mxu0  ;;  %11098 = vmatprep.subr.bf16.mxu1 %v15761_v26  ;;  %v5631_v21 = vor.u32 %v5629_v18, %v5627_v44  ;;  %v14215_v17 = vld [vmem:[%s11832_s6 + $0x34] sm:$0xff]  }
 0x3c9   : > { %v3559_v23 = vadd.f32 %v3510_v27, %v13739_v9  ;;  %v3915_v59 = vpop.f32.mrf.mxu1  ;;  %10991 = vmatpush3.bf16.msra.mxu0 %v11610_v28 }
 0x3ca   : > { %v10447_v61 = vpop.f32.mrf.mxu0  ;;  %11099 = vmatpush3.bf16.msra.mxu1 %v11611_v15  ;;  %10992 = vmatprep.subr.bf16.mxu0 %v15761_v26  ;;  %v5635_v15 = vrot.slane %v5633_v19, 1  ;;  %v5637_v19 = vshrl.u32 %v14183_v50, 16 }
 0x3cb   : > { %v14202_v41 = vadd.f32 %v3915_v59, %v3559_v23  ;;  %v10555_v9 = vpop.f32.mrf.mxu1  ;;  %11100 = vmatprep.subr.bf16.mxu1 %v15761_v26  ;;  %v11621_v23 = vld [vmem:[%s15607_s1 + $0x360] sm:$0xff]  }
 0x3cc   : > { %v4293_v55 = vpop.f32.mrf.mxu0  ;;  %10793 = vmatmul.mubr.bf16.gmra.mxu0 %v14146_v35  ;;  %v11619_v35 = vld [vmem:[%s15607_s1 + $0x320] sm:$0xff]   ;;  %v5636_v18 = vsel %vm366_vm1, %v5631_v21, %v5635_v15  ;;  %v11624_v9 = vld [vmem:[%s15607_s1 + $0x318] sm:$0xff]  }
 0x3cd   : > { %v4476_v25 = vadd.f32 %v4293_v55, %v13756_v31  ;;  %v4851_v28 = vpop.f32.mrf.mxu1  ;;  %10901 = vmatmul.mubr.bf16.gmra.mxu1 %v5628_v49  ;;  %10796 = vmatprep.mubr.msk.bf16.mxu0 %vm11761_vm0, %v15761_v26 }
 0x3ce   : > { %v10574_v45 = vpop.f32.mrf.mxu0  ;;  %10904 = vmatprep.mubr.msk.bf16.mxu1 %vm11761_vm0, %v15761_v26  ;;  %10993 = vmatpush3.bf16.msra.mxu0 %v11614_v48  ;;  %v5641_v48 = vshll.u32 %v14215_v17, 16 }
 0x3cf   : > { %v14220_v27 = vadd.f32 %v4851_v28, %v4476_v25  ;;  %v10682_v31 = vpop.f32.mrf.mxu1  ;;  %11101 = vmatpush3.bf16.msra.mxu1 %v11616_v34  ;;  %10994 = vmatprep.subr.bf16.mxu0 %v15761_v26 }
 0x3d0   : > { %v4296_v59 = vpop.f32.mrf.mxu0  ;;  %11102 = vmatprep.subr.bf16.mxu1 %v15761_v26  ;;  %v5643_v31 = vrot.slane %v5641_v48, 1  ;;  %v5645_v48 = vshrl.u32 %v14215_v17, 16 }
 0x3d1   : > { %v4477_v44 = vadd.f32 %v4296_v59, %v13772_v56  ;;  %v4854_v61 = vpop.f32.mrf.mxu1  ;;  %v11625_v56 = vld [vmem:[%s15607_s1 + $0x358] sm:$0xff]  }
 0x3d2   : > { %v10575_v49 = vpop.f32.mrf.mxu0  ;;  %10995 = vmatpush3.bf16.msra.mxu0 %v11619_v35  ;;  %v5639_v35 = vor.u32 %v5637_v19, %v5635_v15 }
 0x3d3   : > { %v14234_v34 = vadd.f32 %v4854_v61, %v4477_v44  ;;  %v10683_v55 = vpop.f32.mrf.mxu1  ;;  %11103 = vmatpush3.bf16.msra.mxu1 %v11621_v23  ;;  %10996 = vmatprep.subr.bf16.mxu0 %v15761_v26  ;;  %v14248_v23 = vld [vmem:[%s11832_s6 + $0x3c] sm:$0xff]   ;;  %v11630_v44 = vld [vmem:[%s15607_s1 + $0x350] sm:$0xff]  }
 0x3d4   : > { %v4301_v25 = vpop.f32.mrf.mxu0  ;;  %10797 = vmatmul.mubr.bf16.gmra.mxu0 %v14160_v60  ;;  %11104 = vmatprep.subr.bf16.mxu1 %v15761_v26  ;;  %v11629_v60 = vld [vmem:[%s15607_s1 + $0x310] sm:$0xff]   ;;  %v5644_v19 = vsel %vm366_vm1, %v5639_v35, %v5643_v31  ;;  %v11634_v55 = vld [vmem:[%s15607_s1 + $0x308] sm:$0xff]  }
 0x3d5   : > { %v4478_v28 = vadd.f32 %v4301_v25, %v13790_v13  ;;  %v4859_v45 = vpop.f32.mrf.mxu1  ;;  %10905 = vmatmul.mubr.bf16.gmra.mxu1 %v5636_v18  ;;  %10800 = vmatprep.mubr.msk.bf16.mxu0 %vm11761_vm0, %v15761_v26 }
 0x3d6   : > { %v10578_v21 = vpop.f32.mrf.mxu0  ;;  %10908 = vmatprep.mubr.msk.bf16.mxu1 %vm11761_vm0, %v15761_v26  ;;  %10997 = vmatpush3.bf16.msra.mxu0 %v11624_v9  ;;  %v5649_v9 = vshll.u32 %v14248_v23, 16 }
 0x3d7   : > { %v14253_v59 = vadd.f32 %v4859_v45, %v4478_v28  ;;  %v10686_v13 = vpop.f32.mrf.mxu1  ;;  %11105 = vmatpush3.bf16.msra.mxu1 %v11625_v56  ;;  %10998 = vmatprep.subr.bf16.mxu0 %v15761_v26 }
 0x3d8   : > { %v4304_v61 = vpop.f32.mrf.mxu0  ;;  %11106 = vmatprep.subr.bf16.mxu1 %v15761_v26  ;;  %v5651_v13 = vrot.slane %v5649_v9, 1 }
 0x3d9   : > { %v4479_v15 = vadd.f32 %v4304_v61, %v13806_v29  ;;  %v4862_v49 = vpop.f32.mrf.mxu1  ;;  %v11635_v29 = vld [vmem:[%s15607_s1 + $0x348] sm:$0xff]  }
 0x3da   : > { %v10579_v18 = vpop.f32.mrf.mxu0  ;;  %10999 = vmatpush3.bf16.msra.mxu0 %v11629_v60  ;;  %v5647_v60 = vor.u32 %v5645_v48, %v5643_v31 }
 0x3db   : > { %v14267_v56 = vadd.f32 %v4862_v49, %v4479_v15  ;;  %v10687_v25 = vpop.f32.mrf.mxu1  ;;  %11107 = vmatpush3.bf16.msra.mxu1 %v11630_v44  ;;  %11000 = vmatprep.subr.bf16.mxu0 %v15761_v26  ;;  %v14281_v44 = vld [vmem:[%s11832_s6 + $0x44] sm:$0xff]  }
 0x3dc   : > { %v4309_v28 = vpop.f32.mrf.mxu0  ;;  %10801 = vmatmul.mubr.bf16.gmra.mxu0 %v14183_v50  ;;  %11108 = vmatprep.subr.bf16.mxu1 %v15761_v26  ;;  %v5652_v31 = vsel %vm366_vm1, %v5647_v60, %v5651_v13  ;;  %v5657_v48 = vshll.u32 %v14281_v44, 16 }
 0x3dd   : > { %v4480_v45 = vadd.f32 %v4309_v28, %v13821_v4  ;;  %v4867_v21 = vpop.f32.mrf.mxu1  ;;  %10909 = vmatmul.mubr.bf16.gmra.mxu1 %v5644_v19  ;;  %10804 = vmatprep.mubr.msk.bf16.mxu0 %vm11761_vm0, %v15761_v26  ;;  %v5653_v19 = vshrl.u32 %v14248_v23, 16 }
 0x3de   : > { %v10582_v35 = vpop.f32.mrf.mxu0  ;;  %10912 = vmatprep.mubr.msk.bf16.mxu1 %vm11761_vm0, %v15761_v26  ;;  %11001 = vmatpush3.bf16.msra.mxu0 %v11634_v55 }
 0x3df   : > { %v14283_v61 = vadd.f32 %v4867_v21, %v4480_v45  ;;  %v10690_v50 = vpop.f32.mrf.mxu1  ;;  %11109 = vmatpush3.bf16.msra.mxu1 %v11635_v29  ;;  %11002 = vmatprep.subr.bf16.mxu0 %v15761_v26  ;;  %v5655_v45 = vor.u32 %v5653_v19, %v5651_v13  ;;  %v5659_v21 = vrot.slane %v5657_v48, 1  ;;  %v11615_v35 = vld [vmem:[%s11832_s6 + $0x4c] sm:$0xff]  }
 0x3e0   : > { %v4312_v4 = vpop.f32.mrf.mxu0  ;;  %11110 = vmatprep.subr.bf16.mxu1 %v15761_v26  ;;  %v5665_v13 = vshll.u32 %v11615_v35, 16 }
 0x3e1   : > { %v4481_v15 = vadd.f32 %v4312_v4, %v13831_v43  ;;  %v4870_v49 = vpop.f32.mrf.mxu1 }
 0x3e2   : > { %v10583_v18 = vpop.f32.mrf.mxu0 }
 0x3e3   : > { %v14291_v9 = vadd.f32 %v4870_v49, %v4481_v15  ;;  %v10691_v55 = vpop.f32.mrf.mxu1  ;;  %v5660_v18 = vsel %vm366_vm1, %v5655_v45, %v5659_v21  ;;  %v5667_v45 = vrot.slane %v5665_v13, 1 }
 0x3e4   : > { %v4317_v25 = vpop.f32.mrf.mxu0  ;;  %10805 = vmatmul.mubr.bf16.gmra.mxu0 %v14215_v17  ;;  %v11639_v17 = vld [vmem:[%s15607_s1 + $0x300] sm:$0xff]  }
 0x3e5   : > { %v4482_v29 = vadd.f32 %v4317_v25, %v13841_v3  ;;  %v4875_v28 = vpop.f32.mrf.mxu1  ;;  %10913 = vmatmul.mubr.bf16.gmra.mxu1 %v5652_v31  ;;  %10808 = vmatprep.mubr.msk.bf16.mxu0 %vm11761_vm0, %v15761_v26  ;;  %v5661_v31 = vshrl.u32 %v14281_v44, 16  ;;  %v11640_v55 = vld [vmem:[%s15607_s1 + $0x340] sm:$0xff]  }
 0x3e6   : > { %v10586_v43 = vpop.f32.mrf.mxu0  ;;  %10916 = vmatprep.mubr.msk.bf16.mxu1 %vm11761_vm0, %v15761_v26  ;;  %11003 = vmatpush3.bf16.msra.mxu0 %v11639_v17 }
 0x3e7   : > { %v14300_v60 = vadd.f32 %v4875_v28, %v4482_v29  ;;  %v10694_v50 = vpop.f32.mrf.mxu1  ;;  %11204 = vmatprep.subr.bf16.mxu0 %v15761_v26  ;;  %v5663_v43 = vor.u32 %v5661_v31, %v5659_v21  ;;  %11111 = vmatpush3.bf16.msra.mxu1 %v11640_v55 }
 0x3e8   : > { %v4320_v3 = vpop.f32.mrf.mxu0  ;;  %v11617_v50 = vld [vmem:[%s11832_s6 + $0x54] sm:$0xff]   ;;  %11312 = vmatprep.subr.bf16.mxu1 %v15761_v26 }
 0x3e9   : > { %v4483_v4 = vadd.f32 %v4320_v3, %v13853_v2  ;;  %v4878_v15 = vpop.f32.mrf.mxu1 }
 0x3ea   : > { %v10587_v49 = vpop.f32.mrf.mxu0 }
 0x3eb   : > { %v14309_v19 = vadd.f32 %v4878_v15, %v4483_v4  ;;  %v10695_v48 = vpop.f32.mrf.mxu1  ;;  %v5668_v49 = vsel %vm366_vm1, %v5663_v43, %v5667_v45 }
 0x3ec   : > { %v4325_v25 = vpop.f32.mrf.mxu0  ;;  %10809 = vmatmul.mubr.bf16.gmra.mxu0 %v14248_v23  ;;  %v5673_v48 = vshll.u32 %v11617_v50, 16 }
 0x3ed   : > { %v4484_v2 = vadd.f32 %v4325_v25, %v13866_v39  ;;  %v4883_v29 = vpop.f32.mrf.mxu1  ;;  %10917 = vmatmul.mubr.bf16.gmra.mxu1 %v5660_v18  ;;  %10812 = vmatprep.mubr.msk.bf16.mxu0 %vm11761_vm0, %v15761_v26  ;;  %v5669_v18 = vshrl.u32 %v11615_v35, 16 }
 0x3ee   : > { %v10590_v28 = vpop.f32.mrf.mxu0  ;;  %10920 = vmatprep.mubr.msk.bf16.mxu1 %vm11761_vm0, %v15761_v26 }
 0x3ef   : > { %v14321_v17 = vadd.f32 %v4883_v29, %v4484_v2  ;;  %v10698_v3 = vpop.f32.mrf.mxu1  ;;  %v5671_v2 = vor.u32 %v5669_v18, %v5667_v45  ;;  %v5675_v29 = vrot.slane %v5673_v48, 1  ;;  %v11618_v28 = vld [vmem:[%s11832_s6 + $0x5c] sm:$0xff]  }
 0x3f0   : > { %v4328_v23 = vpop.f32.mrf.mxu0 }
 0x3f1   : > { %v4485_v39 = vadd.f32 %v4328_v23, %v13875_v10  ;;  %v4886_v4 = vpop.f32.mrf.mxu1 }
 0x3f2   : > { %v10591_v15 = vpop.f32.mrf.mxu0 }
 0x3f3   : > { %v14326_v25 = vadd.f32 %v4886_v4, %v4485_v39  ;;  %v10699_v21 = vpop.f32.mrf.mxu1  ;;  %v5676_v4 = vsel %vm366_vm1, %v5671_v2, %v5675_v29  ;;  %v5677_v15 = vshrl.u32 %v11617_v50, 16 }
 0x3f4   : > { %v4333_v31 = vpop.f32.mrf.mxu0  ;;  %10813 = vmatmul.mubr.bf16.gmra.mxu0 %v14281_v44 }
 0x3f5   : > { %v4486_v13 = vadd.f32 %v4333_v31, %v13885_v46  ;;  %v4891_v55 = vpop.f32.mrf.mxu1  ;;  %10921 = vmatmul.mubr.bf16.gmra.mxu1 %v5668_v49  ;;  %10816 = vmatprep.mubr.msk.bf16.mxu0 %vm11761_vm0, %v15761_v26  ;;  %v5681_v49 = vshll.u32 %v11618_v28, 16  ;;  %v5679_v48 = vor.u32 %v5677_v15, %v5675_v29 }
 0x3f6   : > { %v10594_v10 = vpop.f32.mrf.mxu0  ;;  %10924 = vmatprep.mubr.msk.bf16.mxu1 %vm11761_vm0, %v15761_v26 }
 0x3f7   : > { %v14335_v43 = vadd.f32 %v4891_v55, %v4486_v13  ;;  %v10702_v3 = vpop.f32.mrf.mxu1  ;;  %v5683_v13 = vrot.slane %v5681_v49, 1  ;;  %v11620_v55 = vld [vmem:[%s11832_s6 + $0x64] sm:$0xff]  }
 0x3f8   : > { %v4336_v23 = vpop.f32.mrf.mxu0 }
 0x3f9   : > { %v4487_v44 = vadd.f32 %v4336_v23, %v13893_v62  ;;  %v4894_v39 = vpop.f32.mrf.mxu1 }
 0x3fa   : > { %v10595_v46 = vpop.f32.mrf.mxu0 }
 0x3fb   : > { %v14339_v21 = vadd.f32 %v4894_v39, %v4487_v44  ;;  %v10703_v31 = vpop.f32.mrf.mxu1  ;;  %v5684_v39 = vsel %vm366_vm1, %v5679_v48, %v5683_v13  ;;  %v5685_v46 = vshrl.u32 %v11618_v28, 16 }
 0x3fc   : > { %v4341_v10 = vpop.f32.mrf.mxu0  ;;  %10817 = vmatmul.mubr.bf16.gmra.mxu0 %v11615_v35 }
 0x3fd   : > { %v4488_v45 = vadd.f32 %v4341_v10, %v13903_v37  ;;  %v4899_v18 = vpop.f32.mrf.mxu1  ;;  %10925 = vmatmul.mubr.bf16.gmra.mxu1 %v5676_v4  ;;  %10820 = vmatprep.mubr.msk.bf16.mxu0 %vm11761_vm0, %v15761_v26  ;;  %v5689_v4 = vshll.u32 %v11620_v55, 16  ;;  %v5687_v49 = vor.u32 %v5685_v46, %v5683_v13 }
 0x3fe   : > { %v10598_v62 = vpop.f32.mrf.mxu0  ;;  %10928 = vmatprep.mubr.msk.bf16.mxu1 %vm11761_vm0, %v15761_v26 }
 0x3ff   : > { %v14347_v2 = vadd.f32 %v4899_v18, %v4488_v45  ;;  %v10706_v3 = vpop.f32.mrf.mxu1  ;;  %v5691_v45 = vrot.slane %v5689_v4, 1  ;;  %v11622_v18 = vld [vmem:[%s11832_s6 + $0x6c] sm:$0xff]  }
 0x400   : > { %v4344_v23 = vpop.f32.mrf.mxu0 }
 0x401   : > { %v4489_v35 = vadd.f32 %v4344_v23, %v13911_v22  ;;  %v4902_v44 = vpop.f32.mrf.mxu1 }
 0x402   : > { %v10599_v37 = vpop.f32.mrf.mxu0 }
 0x403   : > { %v14351_v31 = vadd.f32 %v4902_v44, %v4489_v35  ;;  %v10707_v10 = vpop.f32.mrf.mxu1  ;;  %v5692_v44 = vsel %vm366_vm1, %v5687_v49, %v5691_v45  ;;  %v5693_v37 = vshrl.u32 %v11620_v55, 16 }
 0x404   : > { %v4349_v62 = vpop.f32.mrf.mxu0  ;;  %10821 = vmatmul.mubr.bf16.gmra.mxu0 %v11617_v50 }
 0x405   : > { %v4490_v29 = vadd.f32 %v4349_v62, %v13921_v40  ;;  %v4907_v15 = vpop.f32.mrf.mxu1  ;;  %10929 = vmatmul.mubr.bf16.gmra.mxu1 %v5684_v39  ;;  %10824 = vmatprep.mubr.msk.bf16.mxu0 %vm11761_vm0, %v15761_v26  ;;  %v5697_v39 = vshll.u32 %v11622_v18, 16  ;;  %v5695_v4 = vor.u32 %v5693_v37, %v5691_v45 }
 0x406   : > { %v10602_v22 = vpop.f32.mrf.mxu0  ;;  %10932 = vmatprep.mubr.msk.bf16.mxu1 %vm11761_vm0, %v15761_v26 }
 0x407   : > { %v14359_v48 = vadd.f32 %v4907_v15, %v4490_v29  ;;  %v10710_v3 = vpop.f32.mrf.mxu1  ;;  %v5699_v29 = vrot.slane %v5697_v39, 1  ;;  %v11623_v15 = vld [vmem:[%s11832_s6 + $0x74] sm:$0xff]  }
 0x408   : > { %v4352_v23 = vpop.f32.mrf.mxu0 }
 0x409   : > { %v4491_v50 = vadd.f32 %v4352_v23, %v13929_v11  ;;  %v4910_v35 = vpop.f32.mrf.mxu1 }
 0x40a   : > { %v10603_v40 = vpop.f32.mrf.mxu0 }
 0x40b   : > { %v14363_v10 = vadd.f32 %v4910_v35, %v4491_v50  ;;  %v10711_v62 = vpop.f32.mrf.mxu1  ;;  %v5700_v35 = vsel %vm366_vm1, %v5695_v4, %v5699_v29  ;;  %v5701_v40 = vshrl.u32 %v11622_v18, 16 }
 0x40c   : > { %v4357_v22 = vpop.f32.mrf.mxu0  ;;  %10825 = vmatmul.mubr.bf16.gmra.mxu0 %v11618_v28 }
 0x40d   : > { %v4492_v13 = vadd.f32 %v4357_v22, %v13939_v14  ;;  %v4915_v46 = vpop.f32.mrf.mxu1  ;;  %10933 = vmatmul.mubr.bf16.gmra.mxu1 %v5692_v44  ;;  %10828 = vmatprep.mubr.msk.bf16.mxu0 %vm11761_vm0, %v15761_v26  ;;  %v5705_v44 = vshll.u32 %v11623_v15, 16  ;;  %v5703_v39 = vor.u32 %v5701_v40, %v5699_v29 }
 0x40e   : > { %v10606_v11 = vpop.f32.mrf.mxu0  ;;  %10936 = vmatprep.mubr.msk.bf16.mxu1 %vm11761_vm0, %v15761_v26 }
 0x40f   : > { %v14371_v49 = vadd.f32 %v4915_v46, %v4492_v13  ;;  %v10714_v3 = vpop.f32.mrf.mxu1  ;;  %v5707_v13 = vrot.slane %v5705_v44, 1  ;;  %v11626_v46 = vld [vmem:[%s11832_s6 + $0x7c] sm:$0xff]  }
 0x410   : > { %v4360_v23 = vpop.f32.mrf.mxu0 }
 0x411   : > { %v4493_v28 = vadd.f32 %v4360_v23, %v13947_v42  ;;  %v4918_v50 = vpop.f32.mrf.mxu1 }
 0x412   : > { %v10607_v14 = vpop.f32.mrf.mxu0 }
 0x413   : > { %v14375_v62 = vadd.f32 %v4918_v50, %v4493_v28  ;;  %v10715_v22 = vpop.f32.mrf.mxu1  ;;  %v5708_v50 = vsel %vm366_vm1, %v5703_v39, %v5707_v13  ;;  %v5709_v14 = vshrl.u32 %v11623_v15, 16 }
 0x414   : > { %v4365_v11 = vpop.f32.mrf.mxu0  ;;  %10829 = vmatmul.mubr.bf16.gmra.mxu0 %v11620_v55 }
 0x415   : > { %v4494_v45 = vadd.f32 %v4365_v11, %v13957_v12  ;;  %v4923_v37 = vpop.f32.mrf.mxu1  ;;  %10937 = vmatmul.mubr.bf16.gmra.mxu1 %v5700_v35  ;;  %10832 = vmatprep.mubr.msk.bf16.mxu0 %vm11761_vm0, %v15761_v26  ;;  %v5713_v35 = vshll.u32 %v11626_v46, 16  ;;  %v5711_v44 = vor.u32 %v5709_v14, %v5707_v13 }
 0x416   : > { %v10610_v42 = vpop.f32.mrf.mxu0  ;;  %10940 = vmatprep.mubr.msk.bf16.mxu1 %vm11761_vm0, %v15761_v26 }
 0x417   : > { %v14383_v4 = vadd.f32 %v4923_v37, %v4494_v45  ;;  %v10718_v3 = vpop.f32.mrf.mxu1  ;;  %v5715_v45 = vrot.slane %v5713_v35, 1  ;;  %v11627_v37 = vld [vmem:[%s11832_s6 + $0x84] sm:$0xff]  }
 0x418   : > { %v4368_v23 = vpop.f32.mrf.mxu0 }
 0x419   : > { %v4495_v55 = vadd.f32 %v4368_v23, %v13965_v47  ;;  %v4926_v28 = vpop.f32.mrf.mxu1 }
 0x41a   : > { %v10611_v12 = vpop.f32.mrf.mxu0 }
 0x41b   : > { %v14387_v22 = vadd.f32 %v4926_v28, %v4495_v55  ;;  %v10719_v11 = vpop.f32.mrf.mxu1  ;;  %v5716_v28 = vsel %vm366_vm1, %v5711_v44, %v5715_v45  ;;  %v5717_v12 = vshrl.u32 %v11626_v46, 16 }
 0x41c   : > { %v4373_v42 = vpop.f32.mrf.mxu0  ;;  %10833 = vmatmul.mubr.bf16.gmra.mxu0 %v11622_v18 }
 0x41d   : > { %v4496_v29 = vadd.f32 %v4373_v42, %v13975_v8  ;;  %v4931_v40 = vpop.f32.mrf.mxu1  ;;  %10941 = vmatmul.mubr.bf16.gmra.mxu1 %v5708_v50  ;;  %10836 = vmatprep.mubr.msk.bf16.mxu0 %vm11761_vm0, %v15761_v26  ;;  %v5721_v50 = vshll.u32 %v11627_v37, 16  ;;  %v5719_v35 = vor.u32 %v5717_v12, %v5715_v45 }
 0x41e   : > { %v10614_v47 = vpop.f32.mrf.mxu0  ;;  %10944 = vmatprep.mubr.msk.bf16.mxu1 %vm11761_vm0, %v15761_v26 }
 0x41f   : > { %v14395_v39 = vadd.f32 %v4931_v40, %v4496_v29  ;;  %v10722_v3 = vpop.f32.mrf.mxu1  ;;  %v5723_v29 = vrot.slane %v5721_v50, 1  ;;  %v11628_v40 = vld [vmem:[%s11832_s6 + $0x8c] sm:$0xff]  }
 0x420   : > { %v4376_v23 = vpop.f32.mrf.mxu0 }
 0x421   : > { %v4497_v18 = vadd.f32 %v4376_v23, %v13983_v36  ;;  %v4934_v55 = vpop.f32.mrf.mxu1 }
 0x422   : > { %v10615_v8 = vpop.f32.mrf.mxu0 }
 0x423   : > { %v14399_v11 = vadd.f32 %v4934_v55, %v4497_v18  ;;  %v10723_v42 = vpop.f32.mrf.mxu1  ;;  %v5724_v55 = vsel %vm366_vm1, %v5719_v35, %v5723_v29  ;;  %v5725_v8 = vshrl.u32 %v11627_v37, 16 }
 0x424   : > { %v4381_v47 = vpop.f32.mrf.mxu0  ;;  %10837 = vmatmul.mubr.bf16.gmra.mxu0 %v11623_v15 }
 0x425   : > { %v4498_v13 = vadd.f32 %v4381_v47, %v13993_v20  ;;  %v4939_v14 = vpop.f32.mrf.mxu1  ;;  %10945 = vmatmul.mubr.bf16.gmra.mxu1 %v5716_v28  ;;  %10840 = vmatprep.mubr.msk.bf16.mxu0 %vm11761_vm0, %v15761_v26  ;;  %v5729_v28 = vshll.u32 %v11628_v40, 16  ;;  %v5727_v50 = vor.u32 %v5725_v8, %v5723_v29 }
 0x426   : > { %v10618_v36 = vpop.f32.mrf.mxu0  ;;  %10948 = vmatprep.mubr.msk.bf16.mxu1 %vm11761_vm0, %v15761_v26 }
 0x427   : > { %v14407_v44 = vadd.f32 %v4939_v14, %v4498_v13  ;;  %v10726_v3 = vpop.f32.mrf.mxu1  ;;  %v5731_v13 = vrot.slane %v5729_v28, 1  ;;  %v11631_v14 = vld [vmem:[%s11832_s6 + $0x94] sm:$0xff]  }
 0x428   : > { %v4384_v23 = vpop.f32.mrf.mxu0 }
 0x429   : > { %v4499_v15 = vadd.f32 %v4384_v23, %v14001_v5  ;;  %v4942_v18 = vpop.f32.mrf.mxu1 }
 0x42a   : > { %v10619_v20 = vpop.f32.mrf.mxu0 }
 0x42b   : > { %v14411_v42 = vadd.f32 %v4942_v18, %v4499_v15  ;;  %v10727_v47 = vpop.f32.mrf.mxu1  ;;  %v5732_v18 = vsel %vm366_vm1, %v5727_v50, %v5731_v13  ;;  %v5733_v20 = vshrl.u32 %v11628_v40, 16 }
 0x42c   : > { %v4389_v36 = vpop.f32.mrf.mxu0  ;;  %10841 = vmatmul.mubr.bf16.gmra.mxu0 %v11626_v46 }
 0x42d   : > { %v4500_v45 = vadd.f32 %v4389_v36, %v14011_v6  ;;  %v4947_v12 = vpop.f32.mrf.mxu1  ;;  %10949 = vmatmul.mubr.bf16.gmra.mxu1 %v5724_v55  ;;  %10844 = vmatprep.mubr.msk.bf16.mxu0 %vm11761_vm0, %v15761_v26  ;;  %v5737_v55 = vshll.u32 %v11631_v14, 16  ;;  %v5735_v28 = vor.u32 %v5733_v20, %v5731_v13  ;;  %v15871_v13 = vld [vmem:[#allocation8_spill] sm:$0xff] }
 0x42e   : > { %v10622_v5 = vpop.f32.mrf.mxu0  ;;  %10952 = vmatprep.mubr.msk.bf16.mxu1 %vm11761_vm0, %v15761_v26 }
 0x42f   : > { %v14419_v35 = vadd.f32 %v4947_v12, %v4500_v45  ;;  %v10730_v3 = vpop.f32.mrf.mxu1  ;;  %v5739_v45 = vrot.slane %v5737_v55, 1  ;;  %v11632_v12 = vld [vmem:[%s11832_s6 + $0x9c] sm:$0xff]  }
 0x430   : > { %v4392_v23 = vpop.f32.mrf.mxu0 }
 0x431   : > { %v4501_v46 = vadd.f32 %v4392_v23, %v14019_v58  ;;  %v4950_v15 = vpop.f32.mrf.mxu1 }
 0x432   : > { %v10623_v6 = vpop.f32.mrf.mxu0 }
 0x433   : > { %v14423_v47 = vadd.f32 %v4950_v15, %v4501_v46  ;;  %v10731_v36 = vpop.f32.mrf.mxu1  ;;  %v5740_v15 = vsel %vm366_vm1, %v5735_v28, %v5739_v45  ;;  %v5741_v6 = vshrl.u32 %v11631_v14, 16  ;;  %v11633_v28 = vld [vmem:[%s11832_s6 + $0xa4] sm:$0xff]  }
 0x434   : > { %v4397_v5 = vpop.f32.mrf.mxu0  ;;  %10845 = vmatmul.mubr.bf16.gmra.mxu0 %v11627_v37 }
 0x435   : > { %v4502_v29 = vadd.f32 %v4397_v5, %v14029_v7  ;;  %v4955_v8 = vpop.f32.mrf.mxu1  ;;  %10953 = vmatmul.mubr.bf16.gmra.mxu1 %v5732_v18  ;;  %10848 = vmatprep.mubr.msk.bf16.mxu0 %vm11761_vm0, %v15761_v26  ;;  %v5745_v18 = vshll.u32 %v11632_v12, 16 }
 0x436   : > { %v10626_v58 = vpop.f32.mrf.mxu0  ;;  %10956 = vmatprep.mubr.msk.bf16.mxu1 %vm11761_vm0, %v15761_v26 }
 0x437   : > { %v14431_v50 = vadd.f32 %v4955_v8, %v4502_v29  ;;  %v10734_v3 = vpop.f32.mrf.mxu1  ;;  %v5743_v29 = vor.u32 %v5741_v6, %v5739_v45  ;;  %v5747_v8 = vrot.slane %v5745_v18, 1 }
 0x438   : > { %v4400_v23 = vpop.f32.mrf.mxu0 }
 0x439   : > { %15869 = vst [vmem:[#allocation10_spill] sm:$0xff] %v14431_v50  ;;  %v4503_v37 = vadd.f32 %v4400_v23, %v14037_v63  ;;  %v4958_v46 = vpop.f32.mrf.mxu1 }
 0x43a   : > { %v10627_v7 = vpop.f32.mrf.mxu0 }
 0x43b   : > { %v14435_v36 = vadd.f32 %v4958_v46, %v4503_v37  ;;  %v10735_v5 = vpop.f32.mrf.mxu1  ;;  %v15872_v46 = vld [vmem:[#allocation9_spill] sm:$0xff] }
 0x43c   : > { %v4405_v58 = vpop.f32.mrf.mxu0  ;;  %10849 = vmatmul.mubr.bf16.gmra.mxu0 %v11628_v40 }
 0x43d   : > { %15870 = vst [vmem:[#allocation13_spill] sm:$0xff] %v14435_v36  ;;  %v4504_v20 = vadd.f32 %v4405_v58, %v15871_v13  ;;  %v4963_v55 = vpop.f32.mrf.mxu1  ;;  %10957 = vmatmul.mubr.bf16.gmra.mxu1 %v5740_v15  ;;  %10852 = vmatprep.mubr.msk.bf16.mxu0 %vm11761_vm0, %v15761_v26  ;;  %v5748_v15 = vsel %vm366_vm1, %v5743_v29, %v5747_v8  ;;  %v5749_v58 = vshrl.u32 %v11632_v12, 16  ;;  %v5753_v13 = vshll.u32 %v11633_v28, 16  ;;  %v11636_v29 = vld [vmem:[%s11832_s6 + $0xac] sm:$0xff]  }
 0x43e   : > { %v10630_v63 = vpop.f32.mrf.mxu0  ;;  %10960 = vmatprep.mubr.msk.bf16.mxu1 %vm11761_vm0, %v15761_v26 }
 0x43f   : > { %v14443_v3 = vadd.f32 %v4963_v55, %v4504_v20  ;;  %v10738_v23 = vpop.f32.mrf.mxu1  ;;  %v5751_v20 = vor.u32 %v5749_v58, %v5747_v8  ;;  %v5755_v55 = vrot.slane %v5753_v13, 1  ;;  %v15875_v8 = vld [vmem:[#allocation11_spill] sm:$0xff] }
 0x440   : > { %v4408_v37 = vpop.f32.mrf.mxu0 }
 0x441   : > { %v4505_v40 = vadd.f32 %v4408_v37, %v15872_v46  ;;  %v4966_v7 = vpop.f32.mrf.mxu1 }
 0x442   : > { %v10631_v5 = vpop.f32.mrf.mxu0 }
 0x443   : > { %v14447_v63 = vadd.f32 %v4966_v7, %v4505_v40  ;;  %v10739_v36 = vpop.f32.mrf.mxu1  ;;  %v5757_v40 = vshrl.u32 %v11633_v28, 16  ;;  %v5761_v7 = vshll.u32 %v11636_v29, 16 }
 0x444   : > { %v4413_v50 = vpop.f32.mrf.mxu0  ;;  %10853 = vmatmul.mubr.bf16.gmra.mxu0 %v11631_v14 }
 0x445   : > { %v4506_v45 = vadd.f32 %v4413_v50, %v14065_v52  ;;  %v4971_v6 = vpop.f32.mrf.mxu1  ;;  %10961 = vmatmul.mubr.bf16.gmra.mxu1 %v5748_v15  ;;  %10856 = vmatprep.mubr.msk.bf16.mxu0 %vm11761_vm0, %v15761_v26  ;;  %v5756_v50 = vsel %vm366_vm1, %v5751_v20, %v5755_v55  ;;  %v11637_v20 = vld [vmem:[%s11832_s6 + $0xb4] sm:$0xff]  }
 0x446   : > { %v10634_v18 = vpop.f32.mrf.mxu0  ;;  %10964 = vmatprep.mubr.msk.bf16.mxu1 %vm11761_vm0, %v15761_v26 }
 0x447   : > { %v14455_v23 = vadd.f32 %v4971_v6, %v4506_v45  ;;  %v10742_v37 = vpop.f32.mrf.mxu1  ;;  %v5759_v45 = vor.u32 %v5757_v40, %v5755_v55  ;;  %v5763_v6 = vrot.slane %v5761_v7, 1 }
 0x448   : > { %v4416_v36 = vpop.f32.mrf.mxu0 }
 0x449   : > { %15873 = vst [vmem:[#allocation14_spill] sm:$0xff] %v14455_v23  ;;  %v4507_v14 = vadd.f32 %v4416_v36, %v14073_v54  ;;  %v4974_v46 = vpop.f32.mrf.mxu1 }
 0x44a   : > { %v10635_v52 = vpop.f32.mrf.mxu0 }
 0x44b   : > { %v14459_v5 = vadd.f32 %v4974_v46, %v4507_v14  ;;  %v10743_v15 = vpop.f32.mrf.mxu1  ;;  %v15876_v46 = vld [vmem:[#allocation12_spill] sm:$0xff] }
 0x44c   : > { %v4421_v18 = vpop.f32.mrf.mxu0  ;;  %10857 = vmatmul.mubr.bf16.gmra.mxu0 %v11632_v12 }
 0x44d   : > { %15874 = vst [vmem:[#allocation15_spill] sm:$0xff] %v14459_v5  ;;  %v4508_v58 = vadd.f32 %v4421_v18, %v15875_v8  ;;  %v4979_v13 = vpop.f32.mrf.mxu1  ;;  %10965 = vmatmul.mubr.bf16.gmra.mxu1 %v5756_v50  ;;  %10860 = vmatprep.mubr.msk.bf16.mxu0 %vm11761_vm0, %v15761_v26  ;;  %v5764_v50 = vsel %vm366_vm1, %v5759_v45, %v5763_v6  ;;  %v5765_v18 = vshrl.u32 %v11636_v29, 16  ;;  %v5769_v8 = vshll.u32 %v11637_v20, 16  ;;  %v11638_v45 = vld [vmem:[%s11832_s6 + $0xbc] sm:$0xff]  }
 0x44e   : > { %v10638_v54 = vpop.f32.mrf.mxu0  ;;  %10968 = vmatprep.mubr.msk.bf16.mxu1 %vm11761_vm0, %v15761_v26 }
 0x44f   : > { %v14467_v37 = vadd.f32 %v4979_v13, %v4508_v58  ;;  %v10746_v36 = vpop.f32.mrf.mxu1  ;;  %v5767_v58 = vor.u32 %v5765_v18, %v5763_v6  ;;  %v5771_v13 = vrot.slane %v5769_v8, 1 }
 0x450   : > { %v4424_v14 = vpop.f32.mrf.mxu0 }
 0x451   : > { %v4509_v12 = vadd.f32 %v4424_v14, %v15876_v46  ;;  %v4982_v52 = vpop.f32.mrf.mxu1 }
 0x452   : > { %v10639_v15 = vpop.f32.mrf.mxu0 }
 0x453   : > { %v14471_v54 = vadd.f32 %v4982_v52, %v4509_v12  ;;  %v10747_v5 = vpop.f32.mrf.mxu1  ;;  %v5773_v12 = vshrl.u32 %v11637_v20, 16  ;;  %v5777_v52 = vshll.u32 %v11638_v45, 16 }
 0x454   : > { %v4429_v23 = vpop.f32.mrf.mxu0  ;;  %10861 = vmatmul.mubr.bf16.gmra.mxu0 %v11633_v28 }
 0x455   : > { %v4510_v55 = vadd.f32 %v4429_v23, %v14101_v53  ;;  %v4987_v40 = vpop.f32.mrf.mxu1  ;;  %10969 = vmatmul.mubr.bf16.gmra.mxu1 %v5764_v50  ;;  %10864 = vmatprep.mubr.msk.bf16.mxu0 %vm11761_vm0, %v15761_v26  ;;  %v5772_v23 = vsel %vm366_vm1, %v5767_v58, %v5771_v13  ;;  %v5775_v8 = vor.u32 %v5773_v12, %v5771_v13 }
 0x456   : > { %v10642_v7 = vpop.f32.mrf.mxu0  ;;  %10972 = vmatprep.mubr.msk.bf16.mxu1 %vm11761_vm0, %v15761_v26 }
 0x457   : > { %v14479_v36 = vadd.f32 %v4987_v40, %v4510_v55  ;;  %v10750_v14 = vpop.f32.mrf.mxu1  ;;  %v5779_v55 = vrot.slane %v5777_v52, 1  ;;  %v11641_v40 = vld [vmem:[%s11832_s6 + $0xc4] sm:$0x1f]  }
 0x458   : > { %v4432_v5 = vpop.f32.mrf.mxu0 }
 0x459   : > { %v4511_v28 = vadd.f32 %v4432_v5, %v14109_v32  ;;  %v4990_v46 = vpop.f32.mrf.mxu1 }
 0x45a   : > { %v10643_v53 = vpop.f32.mrf.mxu0 }
 0x45b   : > { %v14483_v15 = vadd.f32 %v4990_v46, %v4511_v28  ;;  %v10751_v50 = vpop.f32.mrf.mxu1  ;;  %v5780_v46 = vsel %vm366_vm1, %v5775_v8, %v5779_v55  ;;  %v5781_v53 = vshrl.u32 %v11638_v45, 16  ;;  %v6127_v8 = vld [vmem:[%s11832_s6 + $0x20] sm:$0xf] }
 0x45c   : > { %v4437_v7 = vpop.f32.mrf.mxu0  ;;  %10865 = vmatmul.mubr.bf16.gmra.mxu0 %v11636_v29 }
 0x45d   : > { %v4512_v6 = vadd.f32 %v4437_v7, %v14119_v57  ;;  %v4995_v18 = vpop.f32.mrf.mxu1  ;;  %10973 = vmatmul.mubr.bf16.gmra.mxu1 %v5772_v23  ;;  %10868 = vmatprep.mubr.msk.bf16.mxu0 %vm11761_vm0, %v15761_v26  ;;  %v5785_v23 = vshll.u32 %v11641_v40, 16 }
 0x45e   : > { %v10646_v32 = vpop.f32.mrf.mxu0  ;;  %10976 = vmatprep.mubr.msk.bf16.mxu1 %vm11761_vm0, %v15761_v26 }
 0x45f   : > { %v14491_v58 = vadd.f32 %v4995_v18, %v4512_v6  ;;  %v10754_v14 = vpop.f32.mrf.mxu1  ;;  %v5783_v6 = vor.u32 %v5781_v53, %v5779_v55  ;;  %v5787_v18 = vrot.slane %v5785_v23, 1  ;;  %v6126_v32 = vld [vmem:[%s11832_s6 + $0x1c] sm:$0xf]  ;;  %v5789_v53 = vshrl.u32 %v11641_v40, 16 }
 0x460   : > { %v4440_v5 = vpop.f32.mrf.mxu0 }
 0x461   : > { %v4513_v29 = vadd.f32 %v4440_v5, %v14124_v0  ;;  %v4998_v28 = vpop.f32.mrf.mxu1 }
 0x462   : > { %v10647_v57 = vpop.f32.mrf.mxu0 }
 0x463   : > { %v14495_v50 = vadd.f32 %v4998_v28, %v4513_v29  ;;  %v10755_v7 = vpop.f32.mrf.mxu1  ;;  %v8863_v28 = vcombine.low %v6126_v32, %v6127_v8 }
 0x464   : > { %v4445_v13 = vpop.f32.mrf.mxu0  ;;  %10869 = vmatmul.mubr.bf16.gmra.mxu0 %v11637_v20 }
 0x465   : > { %v4514_v12 = vadd.f32 %v4445_v13, %v14132_v38  ;;  %v5003_v52 = vpop.f32.mrf.mxu1  ;;  %10977 = vmatmul.mubr.bf16.gmra.mxu1 %v5780_v46  ;;  %10872 = vmatprep.mubr.msk.bf16.mxu0 %vm11761_vm0, %v15761_v26  ;;  %v5788_v46 = vsel %vm366_vm1, %v5783_v6, %v5787_v18 }
 0x466   : > { %v10650_v0 = vpop.f32.mrf.mxu0  ;;  %10980 = vmatprep.mubr.msk.bf16.mxu1 %vm11761_vm0, %v15761_v26 }
 0x467   : > { %v14504_v14 = vadd.f32 %v5003_v52, %v4514_v12  ;;  %v10758_v5 = vpop.f32.mrf.mxu1  ;;  %v6307_v52 = vshll.u32 %v8863_v28, 16 }
 0x468   : > { %v4448_v20 = vpop.f32.mrf.mxu0  ;;  %v6821_v5 = vld [vmem:[%s11832_s6 + $0x1c] sm:$0xe] }
 0x469   : > { %v4515_v38 = vadd.f32 %v4448_v20, %v14138_v16  ;;  %v5006_v29 = vpop.f32.mrf.mxu1  ;;  %v14514_v16 = vld [vmem:[%s11832_s6 + $0x24] sm:$0xff]   ;;  %v5791_v20 = vor.u32 %v5789_v53, %v5787_v18 }
 0x46a   : > { %v10651_v57 = vpop.f32.mrf.mxu0 }
 0x46b   : > { %v14508_v7 = vadd.f32 %v5006_v29, %v4515_v38  ;;  %v10759_v13 = vpop.f32.mrf.mxu1  ;;  %v6305_v29 = vshrl.u32 %v8863_v28, 16  ;;  %v6309_v57 = vrot.slane %v6307_v52, 1  ;;  %v14533_v28 = vld [vmem:[%s11832_s6 + $0x2c] sm:$0xff]  }
 0x46c   : > { %v4453_v55 = vpop.f32.mrf.mxu0  ;;  %10873 = vmatmul.mubr.bf16.gmra.mxu0 %v11638_v45 }
 0x46d   : > { %15877 = vst [vmem:[#allocation16_spill] sm:$0xff] %v14508_v7  ;;  %v4516_v23 = vadd.f32 %v4453_v55, %v14148_v33  ;;  %v5011_v12 = vpop.f32.mrf.mxu1  ;;  %10981 = vmatmul.mubr.bf16.gmra.mxu1 %v5788_v46  ;;  %10876 = vmatprep.mubr.msk.bf16.mxu0 %vm11761_vm0, %v15761_v26  ;;  %v15702_v46 = vshll.u32 %v14514_v16, 16  ;;  %v14523_v55 = vcombine.low %v6821_v5, %v6127_v8 }
 0x46e   : > { %v10654_v0 = vpop.f32.mrf.mxu0  ;;  %10984 = vmatprep.mubr.msk.bf16.mxu1 %vm11761_vm0, %v15761_v26 }
 0x46f   : > { %v14518_v6 = vadd.f32 %v5011_v12, %v4516_v23  ;;  %v10762_v32 = vpop.f32.mrf.mxu1  ;;  %v6314_v18 = vrot.slane %v15702_v46, 1 }
 0x470   : > { %v4456_v45 = vpop.f32.mrf.mxu0 }
 0x471   : > { %v4517_v33 = vadd.f32 %v4456_v45, %v14152_v51  ;;  %v5014_v38 = vpop.f32.mrf.mxu1  ;;  %v6310_v51 = vor.u32 %v6309_v57, %v6305_v29  ;;  %v15700_v29 = vshll.u32 %v14533_v28, 16 }
 0x472   : > { %v10655_v13 = vpop.f32.mrf.mxu0 }
 0x473   : > { %v14525_v0 = vadd.f32 %v5014_v38, %v4517_v33  ;;  %v10763_v7 = vpop.f32.mrf.mxu1  ;;  %v11645_v33 = vld [vmem:[%s15607_s1 + $0x3b8] sm:$0xff]   ;;  %v15703_v38 = vshrl.u32 %v14514_v16, 16 }
 0x474   : > { %v4461_v23 = vpop.f32.mrf.mxu0  ;;  %10877 = vmatmul.mubr.bf16.gmra.mxu0 %v11641_v40  ;;  %v6846_v7 = vrot.slane %v14523_v55, 1  ;;  %v6847_v40 = vrot.slane %v14514_v16, 1 }
 0x475   : > { %v4518_v12 = vadd.f32 %v4461_v23, %v14162_v1  ;;  %v5019_v32 = vpop.f32.mrf.mxu1  ;;  %10985 = vmatmul.mubr.bf16.gmra.mxu1 %v5791_v20  ;;  %11004 = vmatprep.mubr.msk.bf16.mxu0 %vm11761_vm0, %v15761_v26  ;;  %v6315_v20 = vsel %vm366_vm1, %v6310_v51, %v6314_v18  ;;  %v11646_v23 = vld [vmem:[%s15607_s1 + $0x3f8] sm:$0xff]  }
 0x476   : > { %v10658_v8 = vpop.f32.mrf.mxu0  ;;  %11112 = vmatprep.mubr.msk.bf16.mxu1 %vm11761_vm0, %v15761_v26  ;;  %v6848_v13 = vsel %vm1151_vm2, %v6846_v7, %v6847_v40  ;;  %v6322_v7 = vrot.slane %v15700_v29, 1 }
 0x477   : > { %v14539_v1 = vadd.f32 %v5019_v32, %v4518_v12  ;;  %v10766_v53 = vpop.f32.mrf.mxu1 }
 0x478   : > { %v4464_v52 = vpop.f32.mrf.mxu0  ;;  %v6318_v53 = vor.u32 %v15703_v38, %v6314_v18  ;;  %v11651_v18 = vld [vmem:[%s15607_s1 + $0x3f0] sm:$0xff]  }
 0x479   : > { %v4519_v5 = vadd.f32 %v4464_v52, %v14174_v30  ;;  %v5022_v45 = vpop.f32.mrf.mxu1  ;;  %v14560_v52 = vld [vmem:[%s11832_s6 + $0x34] sm:$0xff]  }
 0x47a   : > { %v10659_v57 = vpop.f32.mrf.mxu0 }
 0x47b   : > { %v14552_v30 = vadd.f32 %v5022_v45, %v4519_v5  ;;  %v10767_v12 = vpop.f32.mrf.mxu1  ;;  %v11650_v5 = vld [vmem:[%s15607_s1 + $0x3b0] sm:$0xff]  }
 0x47c   : > { %v4469_v32 = vpop.f32.mrf.mxu0  ;;  %11005 = vmatmul.mubr.bf16.vlgmr.msra.gmra.mxu0 %v6315_v20  ;;  %v6323_v12 = vsel %vm366_vm1, %v6318_v53, %v6322_v7  ;;  %v11656_v53 = vld [vmem:[%s15607_s1 + $0x3e8] sm:$0xff]  }
 0x47d   : > { %v4520_v51 = vadd.f32 %v4469_v32, %v14188_v24  ;;  %v5027_v8 = vpop.f32.mrf.mxu1  ;;  %11113 = vmatmul.mubr.bf16.vlgmr.msra.gmra.mxu1 %v6848_v13  ;;  %11205 = vmatpush3.bf16.msra.mxu0 %v11645_v33  ;;  %v6849_v24 = vrot.slane %v14533_v28, 1  ;;  %v15701_v32 = vshrl.u32 %v14533_v28, 16 }
 0x47e   : > { %v10662_v45 = vpop.f32.mrf.mxu0  ;;  %11313 = vmatpush3.bf16.msra.mxu1 %v11646_v23  ;;  %11008 = vmatprep.mubr.msk.bf16.mxu0 %vm11761_vm0, %v15761_v26 }
 0x47f   : > { %v14571_v20 = vadd.f32 %v5027_v8, %v4520_v51  ;;  %v10770_v33 = vpop.f32.mrf.mxu1  ;;  %11116 = vmatprep.mubr.msk.bf16.mxu1 %vm11761_vm0, %v15761_v26  ;;  %11206 = vmatprep.subr.bf16.mxu0 %v15761_v26  ;;  %v15699_v45 = vshll.u32 %v14560_v52, 16  ;;  %v6850_v8 = vsel %vm1151_vm2, %v6847_v40, %v6849_v24 }
 0x480   : > { %v4472_v57 = vpop.f32.mrf.mxu0  ;;  %11314 = vmatprep.subr.bf16.mxu1 %v15761_v26  ;;  %v11654_v33 = vld [vmem:[%s15607_s1 + $0x3a8] sm:$0xff]  }
 0x481   : > { %v4521_v13 = vadd.f32 %v4472_v57, %v14202_v41  ;;  %v5030_v23 = vpop.f32.mrf.mxu1  ;;  %11207 = vmatpush3.bf16.msra.mxu0 %v11650_v5 }
 0x482   : > { %v10663_v51 = vpop.f32.mrf.mxu0  ;;  %11315 = vmatpush3.bf16.msra.mxu1 %v11651_v18  ;;  %11208 = vmatprep.subr.bf16.mxu0 %v15761_v26 }
 0x483   : > { %v14586_v41 = vadd.f32 %v5030_v23, %v4521_v13  ;;  %v10771_v57 = vpop.f32.mrf.mxu1  ;;  %11316 = vmatprep.subr.bf16.mxu1 %v15761_v26  ;;  %v6326_v13 = vor.u32 %v15701_v32, %v6322_v7  ;;  %v6330_v23 = vrot.slane %v15699_v45, 1  ;;  %v14600_v51 = vld [vmem:[%s11832_s6 + $0x3c] sm:$0xff]   ;;  %v15705_v32 = vshrl.u32 %v14560_v52, 16 }
 0x484   : > { %v5363_v5 = vpop.f32.mrf.mxu0  ;;  %11009 = vmatmul.mubr.bf16.gmra.mxu0 %v6323_v12  ;;  %v6851_v12 = vrot.slane %v14560_v52, 1  ;;  %v11661_v7 = vld [vmem:[%s15607_s1 + $0x3e0] sm:$0xff]  }
 0x485   : > { %v5546_v40 = vadd.f32 %v5363_v5, %v14220_v27  ;;  %v5897_v18 = vpop.f32.mrf.mxu1  ;;  %11117 = vmatmul.mubr.bf16.gmra.mxu1 %v6850_v8  ;;  %11012 = vmatprep.mubr.msk.bf16.mxu0 %vm11761_vm0, %v15761_v26  ;;  %v11659_v27 = vld [vmem:[%s15607_s1 + $0x3a0] sm:$0xff]   ;;  %v6331_v29 = vsel %vm366_vm1, %v6326_v13, %v6330_v23 }
 0x486   : > { %v10790_v57 = vpop.f32.mrf.mxu0  ;;  %11120 = vmatprep.mubr.msk.bf16.mxu1 %vm11761_vm0, %v15761_v26  ;;  %11209 = vmatpush3.bf16.msra.mxu0 %v11654_v33 }
 0x487   : > { %v14608_v8 = vadd.f32 %v5897_v18, %v5546_v40  ;;  %v10898_v5 = vpop.f32.mrf.mxu1  ;;  %11317 = vmatpush3.bf16.msra.mxu1 %v11656_v53  ;;  %11210 = vmatprep.subr.bf16.mxu0 %v15761_v26  ;;  %v15704_v40 = vshll.u32 %v14600_v51, 16  ;;  %v6852_v53 = vsel %vm1151_vm2, %v6849_v24, %v6851_v12 }
 0x488   : > { %v5366_v57 = vpop.f32.mrf.mxu0  ;;  %11318 = vmatprep.subr.bf16.mxu1 %v15761_v26  ;;  %v11664_v5 = vld [vmem:[%s15607_s1 + $0x398] sm:$0xff]  }
 0x489   : > { %v5547_v45 = vadd.f32 %v5366_v57, %v14234_v34  ;;  %v5900_v33 = vpop.f32.mrf.mxu1  ;;  %v11665_v34 = vld [vmem:[%s15607_s1 + $0x3d8] sm:$0xff]  }
 0x48a   : > { %v10791_v18 = vpop.f32.mrf.mxu0  ;;  %11211 = vmatpush3.bf16.msra.mxu0 %v11659_v27 }
 0x48b   : > { %v14623_v46 = vadd.f32 %v5900_v33, %v5547_v45  ;;  %v10899_v38 = vpop.f32.mrf.mxu1  ;;  %11319 = vmatpush3.bf16.msra.mxu1 %v11661_v7  ;;  %11212 = vmatprep.subr.bf16.mxu0 %v15761_v26  ;;  %v6338_v45 = vrot.slane %v15704_v40, 1  ;;  %v14638_v7 = vld [vmem:[%s11832_s6 + $0x44] sm:$0xff]   ;;  %v15707_v40 = vshrl.u32 %v14600_v51, 16 }
 0x48c   : > { %v5371_v13 = vpop.f32.mrf.mxu0  ;;  %11013 = vmatmul.mubr.bf16.gmra.mxu0 %v6331_v29  ;;  %11320 = vmatprep.subr.bf16.mxu1 %v15761_v26  ;;  %v6334_v38 = vor.u32 %v15705_v32, %v6330_v23  ;;  %v6853_v29 = vrot.slane %v14600_v51, 1  ;;  %v11670_v23 = vld [vmem:[%s15607_s1 + $0x3d0] sm:$0xff]  }
 0x48d   : > { %v5548_v24 = vadd.f32 %v5371_v13, %v14253_v59  ;;  %v5905_v27 = vpop.f32.mrf.mxu1  ;;  %11121 = vmatmul.mubr.bf16.gmra.mxu1 %v6852_v53  ;;  %11016 = vmatprep.mubr.msk.bf16.mxu0 %vm11761_vm0, %v15761_v26  ;;  %v11669_v59 = vld [vmem:[%s15607_s1 + $0x390] sm:$0xff]  }
 0x48e   : > { %v10794_v57 = vpop.f32.mrf.mxu0  ;;  %11124 = vmatprep.mubr.msk.bf16.mxu1 %vm11761_vm0, %v15761_v26  ;;  %11213 = vmatpush3.bf16.msra.mxu0 %v11664_v5 }
 0x48f   : > { %v14646_v33 = vadd.f32 %v5905_v27, %v5548_v24  ;;  %v10902_v18 = vpop.f32.mrf.mxu1  ;;  %11321 = vmatpush3.bf16.msra.mxu1 %v11665_v34  ;;  %11214 = vmatprep.subr.bf16.mxu0 %v15761_v26  ;;  %v6339_v57 = vsel %vm366_vm1, %v6334_v38, %v6338_v45  ;;  %v15706_v24 = vshll.u32 %v14638_v7, 16  ;;  %v6854_v34 = vsel %vm1151_vm2, %v6851_v12, %v6853_v29 }
 0x490   : > { %v5374_v53 = vpop.f32.mrf.mxu0  ;;  %11322 = vmatprep.subr.bf16.mxu1 %v15761_v26  ;;  %v11674_v18 = vld [vmem:[%s15607_s1 + $0x388] sm:$0xff]  }
 0x491   : > { %15878 = vst [vmem:[#allocation17_spill] sm:$0xff] %v14646_v33  ;;  %v5549_v13 = vadd.f32 %v5374_v53, %v14267_v56  ;;  %v5908_v5 = vpop.f32.mrf.mxu1  ;;  %v11675_v56 = vld [vmem:[%s15607_s1 + $0x3c8] sm:$0xff]  }
 0x492   : > { %v10795_v27 = vpop.f32.mrf.mxu0  ;;  %11215 = vmatpush3.bf16.msra.mxu0 %v11669_v59  ;;  %v14676_v53 = vld [vmem:[%s11832_s6 + $0x4c] sm:$0xff]  }
 0x493   : > { %v14661_v32 = vadd.f32 %v5908_v5, %v5549_v13  ;;  %v10903_v33 = vpop.f32.mrf.mxu1  ;;  %11323 = vmatpush3.bf16.msra.mxu1 %v11670_v23  ;;  %11216 = vmatprep.subr.bf16.mxu0 %v15761_v26  ;;  %v6346_v23 = vrot.slane %v15706_v24, 1  ;;  %v6855_v5 = vrot.slane %v14638_v7, 1  ;;  %v15708_v24 = vshll.u32 %v14676_v53, 16 }
 0x494   : > { %v5379_v38 = vpop.f32.mrf.mxu0  ;;  %11017 = vmatmul.mubr.bf16.gmra.mxu0 %v6339_v57  ;;  %11324 = vmatprep.subr.bf16.mxu1 %v15761_v26  ;;  %v6342_v33 = vor.u32 %v15707_v40, %v6338_v45 }
 0x495   : > { %v5550_v12 = vadd.f32 %v5379_v38, %v14283_v61  ;;  %v5913_v59 = vpop.f32.mrf.mxu1  ;;  %11125 = vmatmul.mubr.bf16.gmra.mxu1 %v6854_v34  ;;  %11020 = vmatprep.mubr.msk.bf16.mxu0 %vm11761_vm0, %v15761_v26 }
 0x496   : > { %v10798_v13 = vpop.f32.mrf.mxu0  ;;  %11128 = vmatprep.mubr.msk.bf16.mxu1 %vm11761_vm0, %v15761_v26  ;;  %11217 = vmatpush3.bf16.msra.mxu0 %v11674_v18  ;;  %v6347_v38 = vsel %vm366_vm1, %v6342_v33, %v6346_v23  ;;  %v6354_v33 = vrot.slane %v15708_v24, 1 }
 0x497   : > { %v14681_v61 = vadd.f32 %v5913_v59, %v5550_v12  ;;  %v10906_v57 = vpop.f32.mrf.mxu1  ;;  %11325 = vmatpush3.bf16.msra.mxu1 %v11675_v56  ;;  %11218 = vmatprep.subr.bf16.mxu0 %v15761_v26  ;;  %v15709_v13 = vshrl.u32 %v14638_v7, 16  ;;  %v6856_v12 = vsel %vm1151_vm2, %v6853_v29, %v6855_v5 }
 0x498   : > { %v5382_v27 = vpop.f32.mrf.mxu0  ;;  %11326 = vmatprep.subr.bf16.mxu1 %v15761_v26 }
 0x499   : > { %15879 = vst [vmem:[#allocation18_spill] sm:$0xff] %v14681_v61  ;;  %v5551_v45 = vadd.f32 %v5382_v27, %v14291_v9  ;;  %v5916_v34 = vpop.f32.mrf.mxu1  ;;  %v6350_v9 = vor.u32 %v15709_v13, %v6346_v23  ;;  %v14700_v27 = vld [vmem:[%s11832_s6 + $0x54] sm:$0xff]   ;;  %v11680_v13 = vld [vmem:[%s15607_s1 + $0x3c0] sm:$0xff]  }
 0x49a   : > { %v10799_v18 = vpop.f32.mrf.mxu0 }
 0x49b   : > { %v14690_v59 = vadd.f32 %v5916_v34, %v5551_v45  ;;  %v10907_v56 = vpop.f32.mrf.mxu1  ;;  %v6857_v45 = vrot.slane %v14676_v53, 1  ;;  %11327 = vmatpush3.bf16.msra.mxu1 %v11680_v13 }
 0x49c   : > { %v5387_v57 = vpop.f32.mrf.mxu0  ;;  %11021 = vmatmul.mubr.bf16.gmra.mxu0 %v6347_v38  ;;  %v11679_v38 = vld [vmem:[%s15607_s1 + $0x380] sm:$0xff]   ;;  %v6355_v56 = vsel %vm366_vm1, %v6350_v9, %v6354_v33 }
 0x49d   : > { %v5552_v40 = vadd.f32 %v5387_v57, %v14300_v60  ;;  %v5921_v61 = vpop.f32.mrf.mxu1  ;;  %11129 = vmatmul.mubr.bf16.gmra.mxu1 %v6856_v12  ;;  %11024 = vmatprep.mubr.msk.bf16.mxu0 %vm11761_vm0, %v15761_v26  ;;  %v15711_v57 = vshrl.u32 %v14676_v53, 16 }
 0x49e   : > { %v10802_v29 = vpop.f32.mrf.mxu0  ;;  %11132 = vmatprep.mubr.msk.bf16.mxu1 %vm11761_vm0, %v15761_v26  ;;  %11219 = vmatpush3.bf16.msra.mxu0 %v11679_v38  ;;  %v14728_v38 = vld [vmem:[%s11832_s6 + $0x5c] sm:$0xff]  }
 0x49f   : > { %v14705_v60 = vadd.f32 %v5921_v61, %v5552_v40  ;;  %v10910_v34 = vpop.f32.mrf.mxu1  ;;  %v15710_v29 = vshll.u32 %v14700_v27, 16  ;;  %v6858_v40 = vsel %vm1151_vm2, %v6855_v5, %v6857_v45 }
 0x4a0   : > { %v5390_v18 = vpop.f32.mrf.mxu0 }
 0x4a1   : > { %15880 = vst [vmem:[#allocation19_spill] sm:$0xff] %v14705_v60  ;;  %v5553_v23 = vadd.f32 %v5390_v18, %v14309_v19  ;;  %v5924_v12 = vpop.f32.mrf.mxu1  ;;  %v6362_v5 = vrot.slane %v15710_v29, 1  ;;  %v15713_v29 = vshrl.u32 %v14700_v27, 16 }
 0x4a2   : > { %v10803_v24 = vpop.f32.mrf.mxu0 }
 0x4a3   : > { %v14715_v61 = vadd.f32 %v5924_v12, %v5553_v23  ;;  %v10911_v34 = vpop.f32.mrf.mxu1  ;;  %v6358_v24 = vor.u32 %v15711_v57, %v6354_v33  ;;  %v6859_v12 = vrot.slane %v14700_v27, 1 }
 0x4a4   : > { %v5395_v19 = vpop.f32.mrf.mxu0  ;;  %11025 = vmatmul.mubr.bf16.gmra.mxu0 %v6355_v56 }
 0x4a5   : > { %15881 = vst [vmem:[#allocation20_spill] sm:$0xff] %v14715_v61  ;;  %v5554_v9 = vadd.f32 %v5395_v19, %v14321_v17  ;;  %v5929_v18 = vpop.f32.mrf.mxu1  ;;  %11133 = vmatmul.mubr.bf16.gmra.mxu1 %v6858_v40  ;;  %11028 = vmatprep.mubr.msk.bf16.mxu0 %vm11761_vm0, %v15761_v26  ;;  %v6363_v33 = vsel %vm366_vm1, %v6358_v24, %v6362_v5  ;;  %v14750_v24 = vld [vmem:[%s11832_s6 + $0x64] sm:$0xff]  }
 0x4a6   : > { %v10806_v23 = vpop.f32.mrf.mxu0  ;;  %11136 = vmatprep.mubr.msk.bf16.mxu1 %vm11761_vm0, %v15761_v26  ;;  %v6860_v61 = vsel %vm1151_vm2, %v6857_v45, %v6859_v12 }
 0x4a7   : > { %v14733_v17 = vadd.f32 %v5929_v18, %v5554_v9  ;;  %v10914_v56 = vpop.f32.mrf.mxu1  ;;  %v15712_v23 = vshll.u32 %v14728_v38, 16 }
 0x4a8   : > { %v5398_v40 = vpop.f32.mrf.mxu0 }
 0x4a9   : > { %v5555_v34 = vadd.f32 %v5398_v40, %v14326_v25  ;;  %v5932_v19 = vpop.f32.mrf.mxu1  ;;  %v6366_v25 = vor.u32 %v15713_v29, %v6362_v5  ;;  %v6861_v40 = vrot.slane %v14728_v38, 1 }
 0x4aa   : > { %v10807_v57 = vpop.f32.mrf.mxu0 }
 0x4ab   : > { %v14740_v60 = vadd.f32 %v5932_v19, %v5555_v34  ;;  %v10915_v13 = vpop.f32.mrf.mxu1  ;;  %v6370_v57 = vrot.slane %v15712_v23, 1  ;;  %v6862_v23 = vsel %vm1151_vm2, %v6859_v12, %v6861_v40 }
 0x4ac   : > { %v5403_v9 = vpop.f32.mrf.mxu0  ;;  %11029 = vmatmul.mubr.bf16.gmra.mxu0 %v6363_v33  ;;  %v15715_v13 = vshrl.u32 %v14728_v38, 16 }
 0x4ad   : > { %15882 = vst [vmem:[#allocation21_spill] sm:$0xff] %v14740_v60  ;;  %v5556_v18 = vadd.f32 %v5403_v9, %v14335_v43  ;;  %v5937_v56 = vpop.f32.mrf.mxu1  ;;  %11137 = vmatmul.mubr.bf16.gmra.mxu1 %v6860_v61  ;;  %11032 = vmatprep.mubr.msk.bf16.mxu0 %vm11761_vm0, %v15761_v26  ;;  %v6371_v5 = vsel %vm366_vm1, %v6366_v25, %v6370_v57  ;;  %v15714_v9 = vshll.u32 %v14750_v24, 16 }
 0x4ae   : > { %v10810_v45 = vpop.f32.mrf.mxu0  ;;  %11140 = vmatprep.mubr.msk.bf16.mxu1 %vm11761_vm0, %v15761_v26 }
 0x4af   : > { %v14755_v43 = vadd.f32 %v5937_v56, %v5556_v18  ;;  %v10918_v61 = vpop.f32.mrf.mxu1  ;;  %v6378_v25 = vrot.slane %v15714_v9, 1 }
 0x4b0   : > { %v5406_v34 = vpop.f32.mrf.mxu0 }
 0x4b1   : > { %v5557_v19 = vadd.f32 %v5406_v34, %v14339_v21  ;;  %v5940_v33 = vpop.f32.mrf.mxu1  ;;  %v6374_v21 = vor.u32 %v15715_v13, %v6370_v57  ;;  %v14772_v34 = vld [vmem:[%s11832_s6 + $0x6c] sm:$0xff]  }
 0x4b2   : > { %v10811_v45 = vpop.f32.mrf.mxu0 }
 0x4b3   : > { %v14762_v29 = vadd.f32 %v5940_v33, %v5557_v19  ;;  %v10919_v60 = vpop.f32.mrf.mxu1  ;;  %v6379_v57 = vsel %vm366_vm1, %v6374_v21, %v6378_v25  ;;  %v15717_v45 = vshrl.u32 %v14750_v24, 16 }
 0x4b4   : > { %v5411_v18 = vpop.f32.mrf.mxu0  ;;  %11033 = vmatmul.mubr.bf16.gmra.mxu0 %v6371_v5  ;;  %v6863_v60 = vrot.slane %v14750_v24, 1 }
 0x4b5   : > { %15883 = vst [vmem:[#allocation22_spill] sm:$0xff] %v14762_v29  ;;  %v5558_v56 = vadd.f32 %v5411_v18, %v14347_v2  ;;  %v5945_v61 = vpop.f32.mrf.mxu1  ;;  %11141 = vmatmul.mubr.bf16.gmra.mxu1 %v6862_v23  ;;  %11036 = vmatprep.mubr.msk.bf16.mxu0 %vm11761_vm0, %v15761_v26  ;;  %v15716_v18 = vshll.u32 %v14772_v34, 16 }
 0x4b6   : > { %v10814_v12 = vpop.f32.mrf.mxu0  ;;  %11144 = vmatprep.mubr.msk.bf16.mxu1 %vm11761_vm0, %v15761_v26  ;;  %v6864_v9 = vsel %vm1151_vm2, %v6861_v40, %v6863_v60 }
 0x4b7   : > { %v14777_v2 = vadd.f32 %v5945_v61, %v5558_v56  ;;  %v10922_v23 = vpop.f32.mrf.mxu1  ;;  %v6386_v21 = vrot.slane %v15716_v18, 1 }
 0x4b8   : > { %v5414_v19 = vpop.f32.mrf.mxu0 }
 0x4b9   : > { %v5559_v33 = vadd.f32 %v5414_v19, %v14351_v31  ;;  %v5948_v5 = vpop.f32.mrf.mxu1  ;;  %v6382_v31 = vor.u32 %v15717_v45, %v6378_v25  ;;  %v14794_v19 = vld [vmem:[%s11832_s6 + $0x74] sm:$0xff]  }
 0x4ba   : > { %v10815_v12 = vpop.f32.mrf.mxu0 }
 0x4bb   : > { %v14784_v13 = vadd.f32 %v5948_v5, %v5559_v33  ;;  %v10923_v29 = vpop.f32.mrf.mxu1  ;;  %v6387_v25 = vsel %vm366_vm1, %v6382_v31, %v6386_v21  ;;  %v15719_v12 = vshrl.u32 %v14772_v34, 16 }
 0x4bc   : > { %v5419_v56 = vpop.f32.mrf.mxu0  ;;  %11037 = vmatmul.mubr.bf16.gmra.mxu0 %v6379_v57  ;;  %v6865_v29 = vrot.slane %v14772_v34, 1 }
 0x4bd   : > { %15884 = vst [vmem:[#allocation24_spill] sm:$0xff] %v14784_v13  ;;  %v5560_v61 = vadd.f32 %v5419_v56, %v14359_v48  ;;  %v5953_v23 = vpop.f32.mrf.mxu1  ;;  %11145 = vmatmul.mubr.bf16.gmra.mxu1 %v6864_v9  ;;  %11040 = vmatprep.mubr.msk.bf16.mxu0 %vm11761_vm0, %v15761_v26  ;;  %v15718_v56 = vshll.u32 %v14794_v19, 16 }
 0x4be   : > { %v10818_v40 = vpop.f32.mrf.mxu0  ;;  %11148 = vmatprep.mubr.msk.bf16.mxu1 %vm11761_vm0, %v15761_v26  ;;  %v6866_v18 = vsel %vm1151_vm2, %v6863_v60, %v6865_v29 }
 0x4bf   : > { %v14799_v48 = vadd.f32 %v5953_v23, %v5560_v61  ;;  %v10926_v9 = vpop.f32.mrf.mxu1  ;;  %v6394_v31 = vrot.slane %v15718_v56, 1 }
 0x4c0   : > { %v5422_v33 = vpop.f32.mrf.mxu0 }
 0x4c1   : > { %v5561_v5 = vadd.f32 %v5422_v33, %v14363_v10  ;;  %v5956_v57 = vpop.f32.mrf.mxu1  ;;  %v6390_v10 = vor.u32 %v15719_v12, %v6386_v21  ;;  %v14816_v33 = vld [vmem:[%s11832_s6 + $0x7c] sm:$0xff]  }
 0x4c2   : > { %v10819_v40 = vpop.f32.mrf.mxu0 }
 0x4c3   : > { %v14806_v45 = vadd.f32 %v5956_v57, %v5561_v5  ;;  %v10927_v13 = vpop.f32.mrf.mxu1  ;;  %v6395_v21 = vsel %vm366_vm1, %v6390_v10, %v6394_v31  ;;  %v15721_v40 = vshrl.u32 %v14794_v19, 16 }
 0x4c4   : > { %v5427_v61 = vpop.f32.mrf.mxu0  ;;  %11041 = vmatmul.mubr.bf16.gmra.mxu0 %v6387_v25  ;;  %v6867_v13 = vrot.slane %v14794_v19, 1 }
 0x4c5   : > { %15885 = vst [vmem:[#allocation23_spill] sm:$0xff] %v14806_v45  ;;  %v5562_v23 = vadd.f32 %v5427_v61, %v14371_v49  ;;  %v5961_v9 = vpop.f32.mrf.mxu1  ;;  %11149 = vmatmul.mubr.bf16.gmra.mxu1 %v6866_v18  ;;  %11044 = vmatprep.mubr.msk.bf16.mxu0 %vm11761_vm0, %v15761_v26  ;;  %v15720_v61 = vshll.u32 %v14816_v33, 16 }
 0x4c6   : > { %v10822_v60 = vpop.f32.mrf.mxu0  ;;  %11152 = vmatprep.mubr.msk.bf16.mxu1 %vm11761_vm0, %v15761_v26  ;;  %v6868_v56 = vsel %vm1151_vm2, %v6865_v29, %v6867_v13 }
 0x4c7   : > { %v14821_v49 = vadd.f32 %v5961_v9, %v5562_v23  ;;  %v10930_v18 = vpop.f32.mrf.mxu1  ;;  %v6402_v10 = vrot.slane %v15720_v61, 1 }
 0x4c8   : > { %v5430_v5 = vpop.f32.mrf.mxu0 }
 0x4c9   : > { %v5563_v57 = vadd.f32 %v5430_v5, %v14375_v62  ;;  %v5964_v25 = vpop.f32.mrf.mxu1  ;;  %v6398_v62 = vor.u32 %v15721_v40, %v6394_v31  ;;  %v14838_v5 = vld [vmem:[%s11832_s6 + $0x84] sm:$0xff]  }
 0x4ca   : > { %v10823_v60 = vpop.f32.mrf.mxu0 }
 0x4cb   : > { %v14828_v12 = vadd.f32 %v5964_v25, %v5563_v57  ;;  %v10931_v45 = vpop.f32.mrf.mxu1  ;;  %v6403_v31 = vsel %vm366_vm1, %v6398_v62, %v6402_v10  ;;  %v15723_v60 = vshrl.u32 %v14816_v33, 16 }
 0x4cc   : > { %v5435_v23 = vpop.f32.mrf.mxu0  ;;  %11045 = vmatmul.mubr.bf16.gmra.mxu0 %v6395_v21  ;;  %v6869_v45 = vrot.slane %v14816_v33, 1 }
 0x4cd   : > { %15886 = vst [vmem:[#allocation26_spill] sm:$0xff] %v14828_v12  ;;  %v5564_v9 = vadd.f32 %v5435_v23, %v14383_v4  ;;  %v5969_v18 = vpop.f32.mrf.mxu1  ;;  %11153 = vmatmul.mubr.bf16.gmra.mxu1 %v6868_v56  ;;  %11048 = vmatprep.mubr.msk.bf16.mxu0 %vm11761_vm0, %v15761_v26  ;;  %v15722_v23 = vshll.u32 %v14838_v5, 16 }
 0x4ce   : > { %v10826_v29 = vpop.f32.mrf.mxu0  ;;  %11156 = vmatprep.mubr.msk.bf16.mxu1 %vm11761_vm0, %v15761_v26  ;;  %v6870_v61 = vsel %vm1151_vm2, %v6867_v13, %v6869_v45 }
 0x4cf   : > { %v14843_v4 = vadd.f32 %v5969_v18, %v5564_v9  ;;  %v10934_v56 = vpop.f32.mrf.mxu1  ;;  %v6410_v62 = vrot.slane %v15722_v23, 1 }
 0x4d0   : > { %v5438_v57 = vpop.f32.mrf.mxu0 }
 0x4d1   : > { %v5565_v25 = vadd.f32 %v5438_v57, %v14387_v22  ;;  %v5972_v21 = vpop.f32.mrf.mxu1  ;;  %v6406_v22 = vor.u32 %v15723_v60, %v6402_v10  ;;  %v14860_v57 = vld [vmem:[%s11832_s6 + $0x8c] sm:$0xff]  }
 0x4d2   : > { %v10827_v29 = vpop.f32.mrf.mxu0 }
 0x4d3   : > { %v14850_v40 = vadd.f32 %v5972_v21, %v5565_v25  ;;  %v10935_v12 = vpop.f32.mrf.mxu1  ;;  %v6411_v10 = vsel %vm366_vm1, %v6406_v22, %v6410_v62  ;;  %v15725_v29 = vshrl.u32 %v14838_v5, 16 }
 0x4d4   : > { %v5443_v9 = vpop.f32.mrf.mxu0  ;;  %11049 = vmatmul.mubr.bf16.gmra.mxu0 %v6403_v31  ;;  %v6871_v12 = vrot.slane %v14838_v5, 1 }
 0x4d5   : > { %15887 = vst [vmem:[#allocation28_spill] sm:$0xff] %v14850_v40  ;;  %v5566_v18 = vadd.f32 %v5443_v9, %v14395_v39  ;;  %v5977_v56 = vpop.f32.mrf.mxu1  ;;  %11157 = vmatmul.mubr.bf16.gmra.mxu1 %v6870_v61  ;;  %11052 = vmatprep.mubr.msk.bf16.mxu0 %vm11761_vm0, %v15761_v26  ;;  %v15724_v9 = vshll.u32 %v14860_v57, 16 }
 0x4d6   : > { %v10830_v13 = vpop.f32.mrf.mxu0  ;;  %11160 = vmatprep.mubr.msk.bf16.mxu1 %vm11761_vm0, %v15761_v26  ;;  %v6872_v23 = vsel %vm1151_vm2, %v6869_v45, %v6871_v12 }
 0x4d7   : > { %v14865_v39 = vadd.f32 %v5977_v56, %v5566_v18  ;;  %v10938_v61 = vpop.f32.mrf.mxu1  ;;  %v6418_v22 = vrot.slane %v15724_v9, 1 }
 0x4d8   : > { %v5446_v25 = vpop.f32.mrf.mxu0 }
 0x4d9   : > { %v5567_v21 = vadd.f32 %v5446_v25, %v14399_v11  ;;  %v5980_v31 = vpop.f32.mrf.mxu1  ;;  %v6414_v11 = vor.u32 %v15725_v29, %v6410_v62  ;;  %v14882_v25 = vld [vmem:[%s11832_s6 + $0x94] sm:$0xff]  }
 0x4da   : > { %v10831_v13 = vpop.f32.mrf.mxu0  ;;  %15889 = vst [vmem:[#allocation27_spill] sm:$0xff] %v14882_v25 }
 0x4db   : > { %v14872_v60 = vadd.f32 %v5980_v31, %v5567_v21  ;;  %v10939_v40 = vpop.f32.mrf.mxu1  ;;  %v6419_v62 = vsel %vm366_vm1, %v6414_v11, %v6418_v22  ;;  %v15727_v13 = vshrl.u32 %v14860_v57, 16 }
 0x4dc   : > { %v5451_v18 = vpop.f32.mrf.mxu0  ;;  %11053 = vmatmul.mubr.bf16.gmra.mxu0 %v6411_v10  ;;  %v6873_v40 = vrot.slane %v14860_v57, 1 }
 0x4dd   : > { %15888 = vst [vmem:[#allocation25_spill] sm:$0xff] %v14872_v60  ;;  %v5568_v56 = vadd.f32 %v5451_v18, %v14407_v44  ;;  %v5985_v61 = vpop.f32.mrf.mxu1  ;;  %11161 = vmatmul.mubr.bf16.gmra.mxu1 %v6872_v23  ;;  %11056 = vmatprep.mubr.msk.bf16.mxu0 %vm11761_vm0, %v15761_v26  ;;  %v15726_v18 = vshll.u32 %v14882_v25, 16 }
 0x4de   : > { %v10834_v45 = vpop.f32.mrf.mxu0  ;;  %11164 = vmatprep.mubr.msk.bf16.mxu1 %vm11761_vm0, %v15761_v26  ;;  %v6874_v9 = vsel %vm1151_vm2, %v6871_v12, %v6873_v40 }
 0x4df   : > { %v14887_v44 = vadd.f32 %v5985_v61, %v5568_v56  ;;  %v10942_v23 = vpop.f32.mrf.mxu1  ;;  %v6426_v11 = vrot.slane %v15726_v18, 1 }
 0x4e0   : > { %v5454_v21 = vpop.f32.mrf.mxu0 }
 0x4e1   : > { %v5569_v31 = vadd.f32 %v5454_v21, %v14411_v42  ;;  %v5988_v10 = vpop.f32.mrf.mxu1  ;;  %v6422_v42 = vor.u32 %v15727_v13, %v6418_v22  ;;  %v14904_v21 = vld [vmem:[%s11832_s6 + $0x9c] sm:$0xff]  }
 0x4e2   : > { %v10835_v45 = vpop.f32.mrf.mxu0 }
 0x4e3   : > { %v14894_v29 = vadd.f32 %v5988_v10, %v5569_v31  ;;  %v10943_v60 = vpop.f32.mrf.mxu1  ;;  %v6427_v22 = vsel %vm366_vm1, %v6422_v42, %v6426_v11  ;;  %v15729_v45 = vshrl.u32 %v14882_v25, 16 }
 0x4e4   : > { %v5459_v56 = vpop.f32.mrf.mxu0  ;;  %11057 = vmatmul.mubr.bf16.gmra.mxu0 %v6419_v62  ;;  %v6875_v60 = vrot.slane %v14882_v25, 1 }
 0x4e5   : > { %15890 = vst [vmem:[#allocation2_spill] sm:$0xff] %v14894_v29  ;;  %v5570_v61 = vadd.f32 %v5459_v56, %v14419_v35  ;;  %v5993_v23 = vpop.f32.mrf.mxu1  ;;  %11165 = vmatmul.mubr.bf16.gmra.mxu1 %v6874_v9  ;;  %11060 = vmatprep.mubr.msk.bf16.mxu0 %vm11761_vm0, %v15761_v26  ;;  %v15728_v56 = vshll.u32 %v14904_v21, 16 }
 0x4e6   : > { %v10838_v12 = vpop.f32.mrf.mxu0  ;;  %11168 = vmatprep.mubr.msk.bf16.mxu1 %vm11761_vm0, %v15761_v26  ;;  %v6876_v18 = vsel %vm1151_vm2, %v6873_v40, %v6875_v60 }
 0x4e7   : > { %v14909_v35 = vadd.f32 %v5993_v23, %v5570_v61  ;;  %v10946_v9 = vpop.f32.mrf.mxu1  ;;  %v15893_v23 = vld [vmem:[#allocation10_spill] sm:$0xff]  ;;  %v6434_v42 = vrot.slane %v15728_v56, 1 }
 0x4e8   : > { %v5462_v31 = vpop.f32.mrf.mxu0 }
 0x4e9   : > { %15891 = vst [vmem:[#allocation4_spill] sm:$0xff] %v14909_v35  ;;  %v5571_v10 = vadd.f32 %v5462_v31, %v14423_v47  ;;  %v5996_v62 = vpop.f32.mrf.mxu1  ;;  %v6430_v47 = vor.u32 %v15729_v45, %v6426_v11  ;;  %v14926_v31 = vld [vmem:[%s11832_s6 + $0xa4] sm:$0xff]  }
 0x4ea   : > { %v10839_v12 = vpop.f32.mrf.mxu0  ;;  %15894 = vst [vmem:[#allocation6_spill] sm:$0xff] %v14926_v31  ;;  %v15732_v56 = vshll.u32 %v14926_v31, 16 }
 0x4eb   : > { %v14916_v13 = vadd.f32 %v5996_v62, %v5571_v10  ;;  %v10947_v29 = vpop.f32.mrf.mxu1  ;;  %v6435_v11 = vsel %vm366_vm1, %v6430_v47, %v6434_v42 }
 0x4ec   : > { %v5467_v61 = vpop.f32.mrf.mxu0  ;;  %11061 = vmatmul.mubr.bf16.gmra.mxu0 %v6427_v22  ;;  %v6877_v29 = vrot.slane %v14904_v21, 1  ;;  %v15895_v22 = vld [vmem:[#allocation13_spill] sm:$0xff] }
 0x4ed   : > { %15892 = vst [vmem:[#allocation3_spill] sm:$0xff] %v14916_v13  ;;  %v5572_v9 = vadd.f32 %v5467_v61, %v15893_v23  ;;  %v6001_v35 = vpop.f32.mrf.mxu1  ;;  %11169 = vmatmul.mubr.bf16.gmra.mxu1 %v6876_v18  ;;  %11064 = vmatprep.mubr.msk.bf16.mxu0 %vm11761_vm0, %v15761_v26  ;;  %v15733_v23 = vshrl.u32 %v14904_v21, 16 }
 0x4ee   : > { %v10842_v40 = vpop.f32.mrf.mxu0  ;;  %11172 = vmatprep.mubr.msk.bf16.mxu1 %vm11761_vm0, %v15761_v26  ;;  %v6878_v45 = vsel %vm1151_vm2, %v6875_v60, %v6877_v29 }
 0x4ef   : > { %v14931_v10 = vadd.f32 %v6001_v35, %v5572_v9  ;;  %v10950_v18 = vpop.f32.mrf.mxu1  ;;  %v6438_v47 = vor.u32 %v15733_v23, %v6434_v42 }
 0x4f0   : > { %v5470_v62 = vpop.f32.mrf.mxu0 }
 0x4f1   : > { %v5573_v12 = vadd.f32 %v5470_v62, %v15895_v22  ;;  %v6004_v61 = vpop.f32.mrf.mxu1  ;;  %v6442_v62 = vrot.slane %v15732_v56, 1  ;;  %v14948_v22 = vld [vmem:[%s11832_s6 + $0xac] sm:$0xff]  }
 0x4f2   : > { %v10843_v40 = vpop.f32.mrf.mxu0 }
 0x4f3   : > { %v14938_v13 = vadd.f32 %v6004_v61, %v5573_v12  ;;  %v10951_v25 = vpop.f32.mrf.mxu1  ;;  %v6443_v42 = vsel %vm366_vm1, %v6438_v47, %v6442_v62  ;;  %v15735_v40 = vshrl.u32 %v14926_v31, 16 }
 0x4f4   : > { %v5475_v35 = vpop.f32.mrf.mxu0  ;;  %11065 = vmatmul.mubr.bf16.gmra.mxu0 %v6435_v11  ;;  %v6879_v25 = vrot.slane %v14926_v31, 1 }
 0x4f5   : > { %15896 = vst [vmem:[#allocation5_spill] sm:$0xff] %v14938_v13  ;;  %v5574_v9 = vadd.f32 %v5475_v35, %v14443_v3  ;;  %v6009_v18 = vpop.f32.mrf.mxu1  ;;  %11173 = vmatmul.mubr.bf16.gmra.mxu1 %v6878_v45  ;;  %11068 = vmatprep.mubr.msk.bf16.mxu0 %vm11761_vm0, %v15761_v26  ;;  %v15734_v35 = vshll.u32 %v14948_v22, 16 }
 0x4f6   : > { %v10846_v60 = vpop.f32.mrf.mxu0  ;;  %11176 = vmatprep.mubr.msk.bf16.mxu1 %vm11761_vm0, %v15761_v26  ;;  %v6880_v56 = vsel %vm1151_vm2, %v6877_v29, %v6879_v25 }
 0x4f7   : > { %v14953_v3 = vadd.f32 %v6009_v18, %v5574_v9  ;;  %v10954_v45 = vpop.f32.mrf.mxu1  ;;  %v15899_v18 = vld [vmem:[#allocation14_spill] sm:$0xff]  ;;  %v6450_v47 = vrot.slane %v15734_v35, 1 }
 0x4f8   : > { %v5478_v12 = vpop.f32.mrf.mxu0 }
 0x4f9   : > { %15897 = vst [vmem:[#allocation7_spill] sm:$0xff] %v14953_v3  ;;  %v5575_v61 = vadd.f32 %v5478_v12, %v14447_v63  ;;  %v6012_v11 = vpop.f32.mrf.mxu1  ;;  %v6446_v63 = vor.u32 %v15735_v40, %v6442_v62  ;;  %v14970_v12 = vld [vmem:[%s11832_s6 + $0xb4] sm:$0xff]  }
 0x4fa   : > { %v10847_v60 = vpop.f32.mrf.mxu0  ;;  %v15738_v35 = vshll.u32 %v14970_v12, 16 }
 0x4fb   : > { %v14960_v23 = vadd.f32 %v6012_v11, %v5575_v61  ;;  %v10955_v13 = vpop.f32.mrf.mxu1  ;;  %v6451_v62 = vsel %vm366_vm1, %v6446_v63, %v6450_v47 }
 0x4fc   : > { %v5483_v9 = vpop.f32.mrf.mxu0  ;;  %11069 = vmatmul.mubr.bf16.gmra.mxu0 %v6443_v42  ;;  %v6881_v13 = vrot.slane %v14948_v22, 1  ;;  %v15900_v42 = vld [vmem:[#allocation15_spill] sm:$0xff] }
 0x4fd   : > { %15898 = vst [vmem:[#allocation8_spill] sm:$0xff] %v14960_v23  ;;  %v5576_v45 = vadd.f32 %v5483_v9, %v15899_v18  ;;  %v6017_v3 = vpop.f32.mrf.mxu1  ;;  %11177 = vmatmul.mubr.bf16.gmra.mxu1 %v6880_v56  ;;  %11072 = vmatprep.mubr.msk.bf16.mxu0 %vm11761_vm0, %v15761_v26  ;;  %v15739_v18 = vshrl.u32 %v14948_v22, 16 }
 0x4fe   : > { %v10850_v29 = vpop.f32.mrf.mxu0  ;;  %11180 = vmatprep.mubr.msk.bf16.mxu1 %vm11761_vm0, %v15761_v26  ;;  %v6882_v40 = vsel %vm1151_vm2, %v6879_v25, %v6881_v13 }
 0x4ff   : > { %v14975_v61 = vadd.f32 %v6017_v3, %v5576_v45  ;;  %v10958_v56 = vpop.f32.mrf.mxu1  ;;  %v6454_v63 = vor.u32 %v15739_v18, %v6450_v47 }
 0x500   : > { %v5486_v11 = vpop.f32.mrf.mxu0 }
 0x501   : > { %v5577_v60 = vadd.f32 %v5486_v11, %v15900_v42  ;;  %v6020_v9 = vpop.f32.mrf.mxu1  ;;  %v6458_v11 = vrot.slane %v15738_v35, 1  ;;  %v14992_v42 = vld [vmem:[%s11832_s6 + $0xbc] sm:$0xff]  }
 0x502   : > { %v10851_v29 = vpop.f32.mrf.mxu0 }
 0x503   : > { %v14982_v23 = vadd.f32 %v6020_v9, %v5577_v60  ;;  %v10959_v31 = vpop.f32.mrf.mxu1  ;;  %v6459_v47 = vsel %vm366_vm1, %v6454_v63, %v6458_v11  ;;  %v15741_v29 = vshrl.u32 %v14970_v12, 16 }
 0x504   : > { %v5491_v3 = vpop.f32.mrf.mxu0  ;;  %11073 = vmatmul.mubr.bf16.gmra.mxu0 %v6451_v62  ;;  %v6883_v31 = vrot.slane %v14970_v12, 1 }
 0x505   : > { %15901 = vst [vmem:[#allocation9_spill] sm:$0xff] %v14982_v23  ;;  %v5578_v45 = vadd.f32 %v5491_v3, %v14467_v37  ;;  %v6025_v56 = vpop.f32.mrf.mxu1  ;;  %11181 = vmatmul.mubr.bf16.gmra.mxu1 %v6882_v40  ;;  %11076 = vmatprep.mubr.msk.bf16.mxu0 %vm11761_vm0, %v15761_v26  ;;  %v15740_v3 = vshll.u32 %v14992_v42, 16 }
 0x506   : > { %v10854_v25 = vpop.f32.mrf.mxu0  ;;  %11184 = vmatprep.mubr.msk.bf16.mxu1 %vm11761_vm0, %v15761_v26  ;;  %v6884_v35 = vsel %vm1151_vm2, %v6881_v13, %v6883_v31  ;;  %v15014_v13 = vld [vmem:[%s11832_s6 + $0xc4] sm:$0xff]  }
 0x507   : > { %v14997_v37 = vadd.f32 %v6025_v56, %v5578_v45  ;;  %v10962_v40 = vpop.f32.mrf.mxu1  ;;  %v6466_v63 = vrot.slane %v15740_v3, 1 }
 0x508   : > { %v5494_v60 = vpop.f32.mrf.mxu0 }
 0x509   : > { %15902 = vst [vmem:[#allocation11_spill] sm:$0xff] %v14997_v37  ;;  %v5579_v9 = vadd.f32 %v5494_v60, %v14471_v54  ;;  %v6028_v62 = vpop.f32.mrf.mxu1  ;;  %v6462_v54 = vor.u32 %v15741_v29, %v6458_v11  ;;  %v6170_v29 = vld [vmem:[%s11832_s6 + $0xcc] sm:$0xf] }
 0x50a   : > { %v10855_v25 = vpop.f32.mrf.mxu0 }
 0x50b   : > { %v15004_v18 = vadd.f32 %v6028_v62, %v5579_v9  ;;  %v10963_v23 = vpop.f32.mrf.mxu1  ;;  %v15742_v25 = vshrl.u32 %v14992_v42, 16 }
 0x50c   : > { %v5499_v45 = vpop.f32.mrf.mxu0  ;;  %11077 = vmatmul.mubr.bf16.gmra.mxu0 %v6459_v47  ;;  %v6467_v47 = vsel %vm366_vm1, %v6462_v54, %v6466_v63 }
 0x50d   : > { %15903 = vst [vmem:[#allocation12_spill] sm:$0xff] %v15004_v18  ;;  %v5580_v56 = vadd.f32 %v5499_v45, %v14479_v36  ;;  %v6033_v40 = vpop.f32.mrf.mxu1  ;;  %11185 = vmatmul.mubr.bf16.gmra.mxu1 %v6884_v35  ;;  %11080 = vmatprep.mubr.msk.bf16.mxu0 %vm11761_vm0, %v15761_v26  ;;  %v6885_v36 = vrot.slane %v14992_v42, 1  ;;  %v15743_v45 = vshll.u32 %v15014_v13, 16  ;;  %v6171_v18 = vld [vmem:[%s11832_s6 + $0xd0] sm:$0x1] }
 0x50e   : > { %v10858_v23 = vpop.f32.mrf.mxu0  ;;  %11188 = vmatprep.mubr.msk.bf16.mxu1 %vm11761_vm0, %v15761_v26  ;;  %v8885_v54 = vcombine.low %v6170_v29, %v6171_v18 }
 0x50f   : > { %v15019_v35 = vadd.f32 %v6033_v40, %v5580_v56  ;;  %v10966_v60 = vpop.f32.mrf.mxu1  ;;  %v6886_v23 = vsel %vm1151_vm2, %v6883_v31, %v6885_v36  ;;  %v6474_v31 = vrot.slane %v15743_v45, 1 }
 0x510   : > { %v5502_v9 = vpop.f32.mrf.mxu0  ;;  %v6480_v45 = vshll.u32 %v8885_v54, 16 }
 0x511   : > { %15904 = vst [vmem:[#allocation10_spill] sm:$0xff] %v15019_v35  ;;  %v5581_v62 = vadd.f32 %v5502_v9, %v14483_v15  ;;  %v6036_v11 = vpop.f32.mrf.mxu1 }
 0x512   : > { %v10859_v3 = vpop.f32.mrf.mxu0 }
 0x513   : > { %v15028_v37 = vadd.f32 %v6036_v11, %v5581_v62  ;;  %v10967_v56 = vpop.f32.mrf.mxu1  ;;  %v6470_v3 = vor.u32 %v15742_v25, %v6466_v63  ;;  %v6887_v62 = vrot.slane %v15014_v13, 1  ;;  %v15744_v25 = vshrl.u32 %v15014_v13, 16 }
 0x514   : > { %v5507_v40 = vpop.f32.mrf.mxu0  ;;  %11081 = vmatmul.mubr.bf16.gmra.mxu0 %v6467_v47  ;;  %v6822_v47 = vld [vmem:[%s11832_s6 + $0xd0] sm:$0x3] }
 0x515   : > { %15905 = vst [vmem:[#allocation13_spill] sm:$0xff] %v15028_v37  ;;  %v5582_v15 = vadd.f32 %v5507_v40, %v14491_v58  ;;  %v6041_v60 = vpop.f32.mrf.mxu1  ;;  %11189 = vmatmul.mubr.bf16.gmra.mxu1 %v6886_v23  ;;  %11084 = vmatprep.mubr.msk.bf16.mxu0 %vm11761_vm0, %v15761_v26  ;;  %v6475_v63 = vsel %vm366_vm1, %v6470_v3, %v6474_v31  ;;  %v6482_v3 = vrot.slane %v6480_v45, 1 }
 0x516   : > { %v10862_v9 = vpop.f32.mrf.mxu0  ;;  %11192 = vmatprep.mubr.msk.bf16.mxu1 %vm11761_vm0, %v15761_v26  ;;  %v15047_v37 = vcombine.low %v6170_v29, %v6822_v47 }
 0x517   : > { %v15040_v11 = vadd.f32 %v6041_v60, %v5582_v15  ;;  %v10970_v58 = vpop.f32.mrf.mxu1  ;;  %v6888_v9 = vsel %vm1151_vm2, %v6885_v36, %v6887_v62 }
 0x518   : > { %v5510_v23 = vpop.f32.mrf.mxu0  ;;  %v6889_v29 = vrot.slane %v15047_v37, 1 }
 0x519   : > { %15906 = vst [vmem:[#allocation14_spill] sm:$0xff] %v15040_v11  ;;  %v5583_v56 = vadd.f32 %v5510_v23, %v14495_v50  ;;  %v6044_v40 = vpop.f32.mrf.mxu1  ;;  %v6478_v50 = vor.u32 %v15744_v25, %v6474_v31 }
 0x51a   : > { %v10863_v18 = vpop.f32.mrf.mxu0 }
 0x51b   : > { %v15049_v35 = vadd.f32 %v6044_v40, %v5583_v56  ;;  %v10971_v15 = vpop.f32.mrf.mxu1  ;;  %v6483_v18 = vsel %vm366_vm1, %v6478_v50, %v6482_v3  ;;  %v7246_v50 = vshll.u32 %v14523_v55, 16 }
 0x51c   : > { %v5515_v60 = vpop.f32.mrf.mxu0  ;;  %11085 = vmatmul.mubr.bf16.gmra.mxu0 %v6475_v63  ;;  %v6890_v15 = vsel %vm1151_vm2, %v6887_v62, %v6889_v29 }
 0x51d   : > { %v5584_v58 = vadd.f32 %v5515_v60, %v14504_v14  ;;  %v6049_v11 = vpop.f32.mrf.mxu1  ;;  %11193 = vmatmul.mubr.bf16.gmra.mxu1 %v6888_v9  ;;  %11088 = vmatprep.mubr.msk.bf16.mxu0 %vm11761_vm0, %v15761_v26  ;;  %v15907_v14 = vld [vmem:[#allocation16_spill] sm:$0xff] }
 0x51e   : > { %v10866_v23 = vpop.f32.mrf.mxu0  ;;  %11196 = vmatprep.mubr.msk.bf16.mxu1 %vm11761_vm0, %v15761_v26 }
 0x51f   : > { %v15059_v36 = vadd.f32 %v6049_v11, %v5584_v58  ;;  %v10974_v47 = vpop.f32.mrf.mxu1  ;;  %v6484_v23 = vshrl.u32 %v8885_v54, 16  ;;  %v7677_v54 = vld [vmem:[%s11832_s6 + $0x1c] sm:$0xc] }
 0x520   : > { %v5518_v56 = vpop.f32.mrf.mxu0  ;;  %v7243_v47 = vshrl.u32 %v14523_v55, 16  ;;  %v15911_v55 = vshll.u32 %v14514_v16, 16 }
 0x521   : > { %v5585_v40 = vadd.f32 %v5518_v56, %v15907_v14  ;;  %v6052_v63 = vpop.f32.mrf.mxu1 }
 0x522   : > { %v10867_v9 = vpop.f32.mrf.mxu0 }
 0x523   : > { %v15064_v45 = vadd.f32 %v6052_v63, %v5585_v40  ;;  %v10975_v31 = vpop.f32.mrf.mxu1 }
 0x524   : > { %v5523_v60 = vpop.f32.mrf.mxu0  ;;  %11089 = vmatmul.mubr.bf16.gmra.mxu0 %v6483_v18  ;;  %v6486_v18 = vor.u32 %v6484_v23, %v6482_v3  ;;  %v7245_v31 = vrot.slane %v7243_v47, 1 }
 0x525   : > { %15908 = vst [vmem:[#allocation15_spill] sm:$0xff] %v15064_v45  ;;  %v5586_v11 = vadd.f32 %v5523_v60, %v14518_v6  ;;  %v6057_v58 = vpop.f32.mrf.mxu1  ;;  %11197 = vmatmul.mubr.bf16.gmra.mxu1 %v6890_v15  ;;  %11092 = vmatprep.mubr.msk.bf16.mxu0 %vm11761_vm0, %v15761_v26  ;;  %v15910_v6 = vshrl.u32 %v14514_v16, 16  ;;  %v7248_v60 = vrot.slane %v7246_v50, 2  ;;  %v11729_v45 = vld [vmem:[%s11832_s6 + $0x20] sm:$0xf] }
 0x526   : > { %v10870_v62 = vpop.f32.mrf.mxu0  ;;  %11200 = vmatprep.mubr.msk.bf16.mxu1 %vm11761_vm0, %v15761_v26 }
 0x527   : > { %v15073_v56 = vadd.f32 %v6057_v58, %v5586_v11  ;;  %v10978_v14 = vpop.f32.mrf.mxu1  ;;  %v7250_v40 = vrot.slane %v15910_v6, 1  ;;  %v7251_v62 = vrot.slane %v15911_v55, 2  ;;  %v8960_v11 = vcombine.low %v7677_v54, %v11729_v45  ;;  %v11730_v45 = vld [vmem:[%s11832_s6 + $0x24] sm:$0xff]  }
 0x528   : > { %v5526_v63 = vpop.f32.mrf.mxu0  ;;  %v7703_v47 = vrot.slane %v11730_v45, 2 }
 0x529   : > { %15909 = vst [vmem:[#allocation16_spill] sm:$0xff] %v15073_v56  ;;  %v5587_v9 = vadd.f32 %v5526_v63, %v14525_v0  ;;  %v6060_v15 = vpop.f32.mrf.mxu1  ;;  %v7249_v0 = vor.u32 %v7248_v60, %v7245_v31  ;;  %v7252_v23 = vor.u32 %v7251_v62, %v7250_v40 }
 0x52a   : > { %v10871_v25 = vpop.f32.mrf.mxu0 }
 0x52b   : > { %v15082_v58 = vadd.f32 %v6060_v15, %v5587_v9  ;;  %v10979_v14 = vpop.f32.mrf.mxu1  ;;  %v7702_v25 = vrot.slane %v8960_v11, 2  ;;  %v15913_v9 = vshll.u32 %v14533_v28, 16 }
 0x52c   : > { %v5531_v56 = vpop.f32.mrf.mxu0  ;;  %11093 = vmatmul.mubr.bf16.gmra.mxu0 %v6486_v18  ;;  %v15912_v18 = vshrl.u32 %v14533_v28, 16  ;;  %v11731_v28 = vld [vmem:[%s11832_s6 + $0x2c] sm:$0xff]  }
 0x52d   : > { %v5588_v6 = vadd.f32 %v5531_v56, %v14539_v1  ;;  %v6065_v3 = vpop.f32.mrf.mxu1  ;;  %11201 = vmatmul.mubr.bf16.gmra.mxu1 %v6889_v29  ;;  %11220 = vmatprep.mubr.msk.bf16.mxu0 %vm11761_vm0, %v15761_v26  ;;  %v7253_v29 = vsel %vm1548_vm3, %v7249_v0, %v7252_v23  ;;  %v7255_v15 = vrot.slane %v15913_v9, 2  ;;  %v7704_v60 = vsel %vm2727_vm4, %v7702_v25, %v7703_v47 }
 0x52e   : > { %v10874_v16 = vpop.f32.mrf.mxu0  ;;  %11328 = vmatprep.mubr.msk.bf16.mxu1 %vm11761_vm0, %v15761_v26  ;;  %v7254_v40 = vrot.slane %v15912_v18, 1  ;;  %v7705_v0 = vrot.slane %v11731_v28, 2 }
 0x52f   : > { %v15090_v50 = vadd.f32 %v6065_v3, %v5588_v6  ;;  %v10982_v54 = vpop.f32.mrf.mxu1 }
 0x530   : > { %v5534_v63 = vpop.f32.mrf.mxu0  ;;  %v7256_v6 = vor.u32 %v7255_v15, %v7254_v40  ;;  %v7706_v9 = vsel %vm2727_vm4, %v7703_v47, %v7705_v0 }
 0x531   : > { %v5589_v1 = vadd.f32 %v5534_v63, %v14552_v30  ;;  %v6068_v56 = vpop.f32.mrf.mxu1 }
 0x532   : > { %v10875_v31 = vpop.f32.mrf.mxu0 }
 0x533   : > { %v15099_v55 = vadd.f32 %v6068_v56, %v5589_v1  ;;  %v10983_v62 = vpop.f32.mrf.mxu1  ;;  %v15914_v1 = vshrl.u32 %v14560_v52, 16 }
 0x534   : > { %v5539_v11 = vpop.f32.mrf.mxu0  ;;  %11221 = vmatmul.mubr.bf16.vlgmr.msra.gmra.mxu0 %v7253_v29  ;;  %v15915_v29 = vshll.u32 %v14560_v52, 16  ;;  %v11732_v52 = vld [vmem:[%s11832_s6 + $0x34] sm:$0xff]  }
 0x535   : > { %v5590_v30 = vadd.f32 %v5539_v11, %v14571_v20  ;;  %v6073_v14 = vpop.f32.mrf.mxu1  ;;  %11329 = vmatmul.mubr.bf16.vlgmr.msra.gmra.mxu1 %v7704_v60  ;;  %11224 = vmatprep.mubr.msk.bf16.mxu0 %vm11761_vm0, %v15761_v26  ;;  %v7257_v20 = vsel %vm1548_vm3, %v7252_v23, %v7256_v6  ;;  %v7258_v56 = vrot.slane %v15914_v1, 1 }
 0x536   : > { %v10878_v3 = vpop.f32.mrf.mxu0  ;;  %11332 = vmatprep.mubr.msk.bf16.mxu1 %vm11761_vm0, %v15761_v26  ;;  %v7259_v18 = vrot.slane %v15915_v29, 2 }
 0x537   : > { %v15107_v16 = vadd.f32 %v6073_v14, %v5590_v30  ;;  %v10986_v25 = vpop.f32.mrf.mxu1  ;;  %v7707_v30 = vrot.slane %v11732_v52, 2 }
 0x538   : > { %v5542_v45 = vpop.f32.mrf.mxu0  ;;  %v7260_v23 = vor.u32 %v7259_v18, %v7258_v56 }
 0x539   : > { %v5591_v54 = vadd.f32 %v5542_v45, %v14586_v41  ;;  %v6076_v63 = vpop.f32.mrf.mxu1  ;;  %v15916_v45 = vshrl.u32 %v14600_v51, 16  ;;  %v7708_v56 = vsel %vm2727_vm4, %v7705_v0, %v7707_v30 }
 0x53a   : > { %v10879_v40 = vpop.f32.mrf.mxu0 }
 0x53b   : > { %v15116_v15 = vadd.f32 %v6076_v63, %v5591_v54  ;;  %v10987_v31 = vpop.f32.mrf.mxu1  ;;  %v7262_v54 = vrot.slane %v15916_v45, 1  ;;  %v15917_v63 = vshll.u32 %v14600_v51, 16  ;;  %v11733_v51 = vld [vmem:[%s11832_s6 + $0x3c] sm:$0xff]  }
 0x53c   : > { %v6592_v60 = vpop.f32.mrf.mxu0  ;;  %11225 = vmatmul.mubr.bf16.gmra.mxu0 %v7257_v20 }
 0x53d   : > { %v6775_v41 = vadd.f32 %v6592_v60, %v14608_v8  ;;  %v6996_v62 = vpop.f32.mrf.mxu1  ;;  %11333 = vmatmul.mubr.bf16.gmra.mxu1 %v7706_v9  ;;  %11228 = vmatprep.mubr.msk.bf16.mxu0 %vm11761_vm0, %v15761_v26  ;;  %v7261_v8 = vsel %vm1548_vm3, %v7256_v6, %v7260_v23  ;;  %v7263_v20 = vrot.slane %v15917_v63, 2  ;;  %v15918_v9 = vld [vmem:[#allocation17_spill] sm:$0xff] }
 0x53e   : > { %v11006_v11 = vpop.f32.mrf.mxu0  ;;  %11336 = vmatprep.mubr.msk.bf16.mxu1 %vm11761_vm0, %v15761_v26 }
 0x53f   : > { %v15124_v47 = vadd.f32 %v6996_v62, %v6775_v41  ;;  %v11114_v14 = vpop.f32.mrf.mxu1  ;;  %v7264_v6 = vor.u32 %v7263_v20, %v7262_v54  ;;  %v7709_v41 = vrot.slane %v11733_v51, 2 }
 0x540   : > { %v6595_v3 = vpop.f32.mrf.mxu0 }
 0x541   : > { %v6776_v28 = vadd.f32 %v6595_v3, %v14623_v46  ;;  %v6999_v25 = vpop.f32.mrf.mxu1  ;;  %v7265_v3 = vsel %vm1548_vm3, %v7260_v23, %v7264_v6  ;;  %v7710_v63 = vsel %vm2727_vm4, %v7707_v30, %v7709_v41 }
 0x542   : > { %v11007_v1 = vpop.f32.mrf.mxu0 }
 0x543   : > { %v15133_v29 = vadd.f32 %v6999_v25, %v6776_v28  ;;  %v11115_v18 = vpop.f32.mrf.mxu1  ;;  %v15919_v28 = vshrl.u32 %v14638_v7, 16 }
 0x544   : > { %v6600_v40 = vpop.f32.mrf.mxu0  ;;  %11229 = vmatmul.mubr.bf16.gmra.mxu0 %v7261_v8  ;;  %v15920_v8 = vshll.u32 %v14638_v7, 16  ;;  %v15921_v18 = vld [vmem:[#allocation18_spill] sm:$0xff] }
 0x545   : > { %v6777_v46 = vadd.f32 %v6600_v40, %v15918_v9  ;;  %v7004_v31 = vpop.f32.mrf.mxu1  ;;  %11337 = vmatmul.mubr.bf16.gmra.mxu1 %v7708_v56  ;;  %11232 = vmatprep.mubr.msk.bf16.mxu0 %vm11761_vm0, %v15761_v26  ;;  %v7266_v25 = vrot.slane %v15919_v28, 1  ;;  %v11734_v7 = vld [vmem:[%s11832_s6 + $0x44] sm:$0xff]  }
 0x546   : > { %v11010_v60 = vpop.f32.mrf.mxu0  ;;  %11340 = vmatprep.mubr.msk.bf16.mxu1 %vm11761_vm0, %v15761_v26  ;;  %v7267_v45 = vrot.slane %v15920_v8, 2 }
 0x547   : > { %v15141_v0 = vadd.f32 %v7004_v31, %v6777_v46  ;;  %v11118_v62 = vpop.f32.mrf.mxu1  ;;  %v7711_v46 = vrot.slane %v11734_v7, 2  ;;  %v15925_v7 = vld [vmem:[#allocation20_spill] sm:$0xff] }
 0x548   : > { %v6603_v11 = vpop.f32.mrf.mxu0  ;;  %v7268_v23 = vor.u32 %v7267_v45, %v7266_v25 }
 0x549   : > { %v6778_v52 = vadd.f32 %v6603_v11, %v14661_v32  ;;  %v7007_v14 = vpop.f32.mrf.mxu1  ;;  %v7712_v8 = vsel %vm2727_vm4, %v7709_v41, %v7711_v46 }
 0x54a   : > { %v11011_v54 = vpop.f32.mrf.mxu0  ;;  %v7269_v11 = vsel %vm1548_vm3, %v7264_v6, %v7268_v23 }
 0x54b   : > { %v15150_v20 = vadd.f32 %v7007_v14, %v6778_v52  ;;  %v11119_v1 = vpop.f32.mrf.mxu1  ;;  %v15922_v52 = vshrl.u32 %v14676_v53, 16 }
 0x54c   : > { %v6608_v56 = vpop.f32.mrf.mxu0  ;;  %11233 = vmatmul.mubr.bf16.gmra.mxu0 %v7265_v3  ;;  %v15923_v3 = vshll.u32 %v14676_v53, 16  ;;  %v15924_v1 = vld [vmem:[#allocation19_spill] sm:$0xff] }
 0x54d   : > { %v6779_v32 = vadd.f32 %v6608_v56, %v15921_v18  ;;  %v7012_v40 = vpop.f32.mrf.mxu1  ;;  %11341 = vmatmul.mubr.bf16.gmra.mxu1 %v7710_v63  ;;  %11236 = vmatprep.mubr.msk.bf16.mxu0 %vm11761_vm0, %v15761_v26  ;;  %v7270_v14 = vrot.slane %v15922_v52, 1  ;;  %v11735_v53 = vld [vmem:[%s11832_s6 + $0x4c] sm:$0xff]   ;;  %v15927_v52 = vshll.u32 %v14700_v27, 16 }
 0x54e   : > { %v11014_v9 = vpop.f32.mrf.mxu0  ;;  %11344 = vmatprep.mubr.msk.bf16.mxu1 %vm11761_vm0, %v15761_v26  ;;  %v7271_v28 = vrot.slane %v15923_v3, 2 }
 0x54f   : > { %v15158_v30 = vadd.f32 %v7012_v40, %v6779_v32  ;;  %v11122_v31 = vpop.f32.mrf.mxu1  ;;  %v7713_v32 = vrot.slane %v11735_v53, 2 }
 0x550   : > { %v6611_v60 = vpop.f32.mrf.mxu0  ;;  %v7272_v6 = vor.u32 %v7271_v28, %v7270_v14  ;;  %v7275_v14 = vrot.slane %v15927_v52, 2 }
 0x551   : > { %v6780_v51 = vadd.f32 %v6611_v60, %v14690_v59  ;;  %v7015_v62 = vpop.f32.mrf.mxu1  ;;  %v7714_v28 = vsel %vm2727_vm4, %v7711_v46, %v7713_v32 }
 0x552   : > { %v11015_v25 = vpop.f32.mrf.mxu0 }
 0x553   : > { %v15167_v45 = vadd.f32 %v7015_v62, %v6780_v51  ;;  %v11123_v54 = vpop.f32.mrf.mxu1  ;;  %v7273_v51 = vsel %vm1548_vm3, %v7268_v23, %v7272_v6  ;;  %v15926_v62 = vshrl.u32 %v14700_v27, 16  ;;  %v11736_v27 = vld [vmem:[%s11832_s6 + $0x54] sm:$0xff]  }
 0x554   : > { %v6616_v63 = vpop.f32.mrf.mxu0  ;;  %11237 = vmatmul.mubr.bf16.gmra.mxu0 %v7269_v11 }
 0x555   : > { %v6781_v59 = vadd.f32 %v6616_v63, %v15924_v1  ;;  %v7020_v56 = vpop.f32.mrf.mxu1  ;;  %11345 = vmatmul.mubr.bf16.gmra.mxu1 %v7712_v8  ;;  %11240 = vmatprep.mubr.msk.bf16.mxu0 %vm11761_vm0, %v15761_v26  ;;  %v7274_v11 = vrot.slane %v15926_v62, 1 }
 0x556   : > { %v11018_v18 = vpop.f32.mrf.mxu0  ;;  %11348 = vmatprep.mubr.msk.bf16.mxu1 %vm11761_vm0, %v15761_v26 }
 0x557   : > { %v15175_v41 = vadd.f32 %v7020_v56, %v6781_v59  ;;  %v11126_v40 = vpop.f32.mrf.mxu1  ;;  %v7276_v23 = vor.u32 %v7275_v14, %v7274_v11  ;;  %v7715_v56 = vrot.slane %v11736_v27, 2 }
 0x558   : > { %v6619_v9 = vpop.f32.mrf.mxu0  ;;  %v15928_v40 = vld [vmem:[#allocation21_spill] sm:$0xff] }
 0x559   : > { %v6782_v31 = vadd.f32 %v6619_v9, %v15925_v7  ;;  %v7023_v60 = vpop.f32.mrf.mxu1  ;;  %v7716_v52 = vsel %vm2727_vm4, %v7713_v32, %v7715_v56 }
 0x55a   : > { %v11019_v3 = vpop.f32.mrf.mxu0 }
 0x55b   : > { %v15184_v25 = vadd.f32 %v7023_v60, %v6782_v31  ;;  %v11127_v8 = vpop.f32.mrf.mxu1  ;;  %v15929_v31 = vshrl.u32 %v14728_v38, 16 }
 0x55c   : > { %v6624_v54 = vpop.f32.mrf.mxu0  ;;  %11241 = vmatmul.mubr.bf16.gmra.mxu0 %v7273_v51  ;;  %v15930_v51 = vshll.u32 %v14728_v38, 16  ;;  %v11737_v38 = vld [vmem:[%s11832_s6 + $0x5c] sm:$0xff]  }
 0x55d   : > { %v6783_v63 = vadd.f32 %v6624_v54, %v14733_v17  ;;  %v7028_v1 = vpop.f32.mrf.mxu1  ;;  %11349 = vmatmul.mubr.bf16.gmra.mxu1 %v7714_v28  ;;  %11244 = vmatprep.mubr.msk.bf16.mxu0 %vm11761_vm0, %v15761_v26  ;;  %v7277_v17 = vsel %vm1548_vm3, %v7272_v6, %v7276_v23  ;;  %v7278_v60 = vrot.slane %v15929_v31, 1 }
 0x55e   : > { %v11022_v59 = vpop.f32.mrf.mxu0  ;;  %11352 = vmatprep.mubr.msk.bf16.mxu1 %vm11761_vm0, %v15761_v26  ;;  %v7279_v62 = vrot.slane %v15930_v51, 2 }
 0x55f   : > { %v15192_v46 = vadd.f32 %v7028_v1, %v6783_v63  ;;  %v11130_v18 = vpop.f32.mrf.mxu1  ;;  %v7717_v1 = vrot.slane %v11737_v38, 2 }
 0x560   : > { %v6627_v53 = vpop.f32.mrf.mxu0  ;;  %v7280_v6 = vor.u32 %v7279_v62, %v7278_v60  ;;  %v15931_v18 = vld [vmem:[#allocation22_spill] sm:$0xff] }
 0x561   : > { %v6784_v9 = vadd.f32 %v6627_v53, %v15928_v40  ;;  %v7031_v7 = vpop.f32.mrf.mxu1  ;;  %v7718_v51 = vsel %vm2727_vm4, %v7715_v56, %v7717_v1 }
 0x562   : > { %v11023_v11 = vpop.f32.mrf.mxu0 }
 0x563   : > { %v15201_v14 = vadd.f32 %v7031_v7, %v6784_v9  ;;  %v11131_v3 = vpop.f32.mrf.mxu1  ;;  %v15932_v9 = vshrl.u32 %v14750_v24, 16 }
 0x564   : > { %v6632_v28 = vpop.f32.mrf.mxu0  ;;  %11245 = vmatmul.mubr.bf16.gmra.mxu0 %v7277_v17  ;;  %v15933_v17 = vshll.u32 %v14750_v24, 16  ;;  %v11738_v24 = vld [vmem:[%s11832_s6 + $0x64] sm:$0xff]  }
 0x565   : > { %v6785_v8 = vadd.f32 %v6632_v28, %v14755_v43  ;;  %v7036_v54 = vpop.f32.mrf.mxu1  ;;  %11353 = vmatmul.mubr.bf16.gmra.mxu1 %v7716_v52  ;;  %11248 = vmatprep.mubr.msk.bf16.mxu0 %vm11761_vm0, %v15761_v26  ;;  %v7281_v43 = vsel %vm1548_vm3, %v7276_v23, %v7280_v6  ;;  %v7282_v7 = vrot.slane %v15932_v9, 1 }
 0x566   : > { %v11026_v63 = vpop.f32.mrf.mxu0  ;;  %11356 = vmatprep.mubr.msk.bf16.mxu1 %vm11761_vm0, %v15761_v26  ;;  %v7283_v31 = vrot.slane %v15933_v17, 2 }
 0x567   : > { %v15209_v32 = vadd.f32 %v7036_v54, %v6785_v8  ;;  %v11134_v59 = vpop.f32.mrf.mxu1  ;;  %v7719_v54 = vrot.slane %v11738_v24, 2 }
 0x568   : > { %v6635_v27 = vpop.f32.mrf.mxu0  ;;  %v7284_v23 = vor.u32 %v7283_v31, %v7282_v7  ;;  %v15934_v59 = vld [vmem:[#allocation24_spill] sm:$0xff] }
 0x569   : > { %v6786_v53 = vadd.f32 %v6635_v27, %v15931_v18  ;;  %v7039_v40 = vpop.f32.mrf.mxu1  ;;  %v7720_v17 = vsel %vm2727_vm4, %v7717_v1, %v7719_v54 }
 0x56a   : > { %v11027_v60 = vpop.f32.mrf.mxu0 }
 0x56b   : > { %v15218_v62 = vadd.f32 %v7039_v40, %v6786_v53  ;;  %v11135_v11 = vpop.f32.mrf.mxu1  ;;  %v15935_v53 = vshrl.u32 %v14772_v34, 16 }
 0x56c   : > { %v6640_v52 = vpop.f32.mrf.mxu0  ;;  %11249 = vmatmul.mubr.bf16.gmra.mxu0 %v7281_v43  ;;  %v15936_v43 = vshll.u32 %v14772_v34, 16  ;;  %v11739_v34 = vld [vmem:[%s11832_s6 + $0x6c] sm:$0xff]  }
 0x56d   : > { %v6787_v3 = vadd.f32 %v6640_v52, %v14777_v2  ;;  %v7044_v28 = vpop.f32.mrf.mxu1  ;;  %11357 = vmatmul.mubr.bf16.gmra.mxu1 %v7718_v51  ;;  %11252 = vmatprep.mubr.msk.bf16.mxu0 %vm11761_vm0, %v15761_v26  ;;  %v7285_v2 = vsel %vm1548_vm3, %v7280_v6, %v7284_v23  ;;  %v7286_v40 = vrot.slane %v15935_v53, 1 }
 0x56e   : > { %v11030_v8 = vpop.f32.mrf.mxu0  ;;  %11360 = vmatprep.mubr.msk.bf16.mxu1 %vm11761_vm0, %v15761_v26  ;;  %v7287_v9 = vrot.slane %v15936_v43, 2 }
 0x56f   : > { %v15226_v56 = vadd.f32 %v7044_v28, %v6787_v3  ;;  %v11138_v63 = vpop.f32.mrf.mxu1  ;;  %v7721_v28 = vrot.slane %v11739_v34, 2 }
 0x570   : > { %v6643_v38 = vpop.f32.mrf.mxu0  ;;  %v7288_v6 = vor.u32 %v7287_v9, %v7286_v40  ;;  %v15937_v63 = vld [vmem:[#allocation23_spill] sm:$0xff] }
 0x571   : > { %v6788_v27 = vadd.f32 %v6643_v38, %v15934_v59  ;;  %v7047_v18 = vpop.f32.mrf.mxu1  ;;  %v7722_v43 = vsel %vm2727_vm4, %v7719_v54, %v7721_v28 }
 0x572   : > { %v11031_v7 = vpop.f32.mrf.mxu0 }
 0x573   : > { %v15235_v31 = vadd.f32 %v7047_v18, %v6788_v27  ;;  %v11139_v60 = vpop.f32.mrf.mxu1  ;;  %v15938_v27 = vshrl.u32 %v14794_v19, 16 }
 0x574   : > { %v6648_v51 = vpop.f32.mrf.mxu0  ;;  %11253 = vmatmul.mubr.bf16.gmra.mxu0 %v7285_v2  ;;  %v15939_v2 = vshll.u32 %v14794_v19, 16  ;;  %v11740_v19 = vld [vmem:[%s11832_s6 + $0x74] sm:$0xff]  }
 0x575   : > { %v6789_v11 = vadd.f32 %v6648_v51, %v14799_v48  ;;  %v7052_v52 = vpop.f32.mrf.mxu1  ;;  %11361 = vmatmul.mubr.bf16.gmra.mxu1 %v7720_v17  ;;  %11256 = vmatprep.mubr.msk.bf16.mxu0 %vm11761_vm0, %v15761_v26  ;;  %v7289_v48 = vsel %vm1548_vm3, %v7284_v23, %v7288_v6  ;;  %v7290_v18 = vrot.slane %v15938_v27, 1 }
 0x576   : > { %v11034_v3 = vpop.f32.mrf.mxu0  ;;  %11364 = vmatprep.mubr.msk.bf16.mxu1 %vm11761_vm0, %v15761_v26  ;;  %v7291_v53 = vrot.slane %v15939_v2, 2 }
 0x577   : > { %v15243_v1 = vadd.f32 %v7052_v52, %v6789_v11  ;;  %v11142_v8 = vpop.f32.mrf.mxu1  ;;  %v7723_v52 = vrot.slane %v11740_v19, 2 }
 0x578   : > { %v6651_v24 = vpop.f32.mrf.mxu0  ;;  %v7292_v23 = vor.u32 %v7291_v53, %v7290_v18  ;;  %v15940_v8 = vld [vmem:[#allocation26_spill] sm:$0xff] }
 0x579   : > { %v6790_v38 = vadd.f32 %v6651_v24, %v15937_v63  ;;  %v7055_v59 = vpop.f32.mrf.mxu1  ;;  %v7724_v2 = vsel %vm2727_vm4, %v7721_v28, %v7723_v52 }
 0x57a   : > { %v11035_v40 = vpop.f32.mrf.mxu0 }
 0x57b   : > { %v15252_v9 = vadd.f32 %v7055_v59, %v6790_v38  ;;  %v11143_v7 = vpop.f32.mrf.mxu1  ;;  %v15941_v38 = vshrl.u32 %v14816_v33, 16 }
 0x57c   : > { %v6656_v17 = vpop.f32.mrf.mxu0  ;;  %11257 = vmatmul.mubr.bf16.gmra.mxu0 %v7289_v48  ;;  %v15942_v48 = vshll.u32 %v14816_v33, 16  ;;  %v11741_v33 = vld [vmem:[%s11832_s6 + $0x7c] sm:$0xff]  }
 0x57d   : > { %v6791_v60 = vadd.f32 %v6656_v17, %v14821_v49  ;;  %v7060_v51 = vpop.f32.mrf.mxu1  ;;  %11365 = vmatmul.mubr.bf16.gmra.mxu1 %v7722_v43  ;;  %11260 = vmatprep.mubr.msk.bf16.mxu0 %vm11761_vm0, %v15761_v26  ;;  %v7293_v49 = vsel %vm1548_vm3, %v7288_v6, %v7292_v23  ;;  %v7294_v59 = vrot.slane %v15941_v38, 1 }
 0x57e   : > { %v11038_v11 = vpop.f32.mrf.mxu0  ;;  %11368 = vmatprep.mubr.msk.bf16.mxu1 %vm11761_vm0, %v15761_v26  ;;  %v7295_v27 = vrot.slane %v15942_v48, 2 }
 0x57f   : > { %v15260_v54 = vadd.f32 %v7060_v51, %v6791_v60  ;;  %v11146_v3 = vpop.f32.mrf.mxu1  ;;  %v7725_v51 = vrot.slane %v11741_v33, 2 }
 0x580   : > { %v6659_v34 = vpop.f32.mrf.mxu0  ;;  %v7296_v6 = vor.u32 %v7295_v27, %v7294_v59  ;;  %v15943_v3 = vld [vmem:[#allocation28_spill] sm:$0xff] }
 0x581   : > { %v6792_v24 = vadd.f32 %v6659_v34, %v15940_v8  ;;  %v7063_v63 = vpop.f32.mrf.mxu1  ;;  %v7726_v48 = vsel %vm2727_vm4, %v7723_v52, %v7725_v51 }
 0x582   : > { %v11039_v18 = vpop.f32.mrf.mxu0 }
 0x583   : > { %v15269_v53 = vadd.f32 %v7063_v63, %v6792_v24  ;;  %v11147_v40 = vpop.f32.mrf.mxu1  ;;  %v15944_v24 = vshrl.u32 %v14838_v5, 16 }
 0x584   : > { %v6664_v43 = vpop.f32.mrf.mxu0  ;;  %11261 = vmatmul.mubr.bf16.gmra.mxu0 %v7293_v49  ;;  %v15945_v49 = vshll.u32 %v14838_v5, 16  ;;  %v11742_v5 = vld [vmem:[%s11832_s6 + $0x84] sm:$0xff]  }
 0x585   : > { %v6793_v7 = vadd.f32 %v6664_v43, %v14843_v4  ;;  %v7068_v17 = vpop.f32.mrf.mxu1  ;;  %11369 = vmatmul.mubr.bf16.gmra.mxu1 %v7724_v2  ;;  %11264 = vmatprep.mubr.msk.bf16.mxu0 %vm11761_vm0, %v15761_v26  ;;  %v7297_v4 = vsel %vm1548_vm3, %v7292_v23, %v7296_v6  ;;  %v7298_v63 = vrot.slane %v15944_v24, 1 }
 0x586   : > { %v11042_v60 = vpop.f32.mrf.mxu0  ;;  %11372 = vmatprep.mubr.msk.bf16.mxu1 %vm11761_vm0, %v15761_v26  ;;  %v7299_v38 = vrot.slane %v15945_v49, 2 }
 0x587   : > { %v15277_v28 = vadd.f32 %v7068_v17, %v6793_v7  ;;  %v11150_v11 = vpop.f32.mrf.mxu1  ;;  %v7727_v17 = vrot.slane %v11742_v5, 2 }
 0x588   : > { %v6667_v19 = vpop.f32.mrf.mxu0  ;;  %v7300_v23 = vor.u32 %v7299_v38, %v7298_v63  ;;  %v15946_v11 = vld [vmem:[#allocation25_spill] sm:$0xff] }
 0x589   : > { %v6794_v34 = vadd.f32 %v6667_v19, %v15943_v3  ;;  %v7071_v8 = vpop.f32.mrf.mxu1  ;;  %v7728_v49 = vsel %vm2727_vm4, %v7725_v51, %v7727_v17 }
 0x58a   : > { %v11043_v59 = vpop.f32.mrf.mxu0 }
 0x58b   : > { %v15286_v27 = vadd.f32 %v7071_v8, %v6794_v34  ;;  %v11151_v18 = vpop.f32.mrf.mxu1  ;;  %v15947_v34 = vshrl.u32 %v14860_v57, 16 }
 0x58c   : > { %v6672_v2 = vpop.f32.mrf.mxu0  ;;  %11265 = vmatmul.mubr.bf16.gmra.mxu0 %v7297_v4  ;;  %v15948_v4 = vshll.u32 %v14860_v57, 16  ;;  %v11743_v57 = vld [vmem:[%s11832_s6 + $0x8c] sm:$0xff]  }
 0x58d   : > { %v6795_v40 = vadd.f32 %v6672_v2, %v14865_v39  ;;  %v7076_v43 = vpop.f32.mrf.mxu1  ;;  %11373 = vmatmul.mubr.bf16.gmra.mxu1 %v7726_v48  ;;  %11268 = vmatprep.mubr.msk.bf16.mxu0 %vm11761_vm0, %v15761_v26  ;;  %v7301_v39 = vsel %vm1548_vm3, %v7296_v6, %v7300_v23  ;;  %v7302_v8 = vrot.slane %v15947_v34, 1 }
 0x58e   : > { %v11046_v7 = vpop.f32.mrf.mxu0  ;;  %11376 = vmatprep.mubr.msk.bf16.mxu1 %vm11761_vm0, %v15761_v26  ;;  %v7303_v24 = vrot.slane %v15948_v4, 2 }
 0x58f   : > { %v15294_v52 = vadd.f32 %v7076_v43, %v6795_v40  ;;  %v11154_v60 = vpop.f32.mrf.mxu1  ;;  %v7729_v43 = vrot.slane %v11743_v57, 2  ;;  %v11744_v57 = vld [vmem:[%s11832_s6 + $0x94] sm:$0xff]  }
 0x590   : > { %v6675_v33 = vpop.f32.mrf.mxu0  ;;  %v7304_v6 = vor.u32 %v7303_v24, %v7302_v8  ;;  %v15949_v60 = vld [vmem:[#allocation2_spill] sm:$0xff] }
 0x591   : > { %v6796_v19 = vadd.f32 %v6675_v33, %v15946_v11  ;;  %v7079_v3 = vpop.f32.mrf.mxu1  ;;  %v7730_v24 = vsel %vm2727_vm4, %v7727_v17, %v7729_v43 }
 0x592   : > { %v11047_v63 = vpop.f32.mrf.mxu0 }
 0x593   : > { %v15303_v38 = vadd.f32 %v7079_v3, %v6796_v19  ;;  %v11155_v59 = vpop.f32.mrf.mxu1  ;;  %v15950_v19 = vld [vmem:[#allocation27_spill] sm:$0xff] }
 0x594   : > { %v6680_v48 = vpop.f32.mrf.mxu0  ;;  %11269 = vmatmul.mubr.bf16.gmra.mxu0 %v7301_v39  ;;  %v15951_v3 = vshrl.u32 %v15950_v19, 16  ;;  %v15952_v34 = vshll.u32 %v15950_v19, 16 }
 0x595   : > { %v6797_v18 = vadd.f32 %v6680_v48, %v14887_v44  ;;  %v7084_v2 = vpop.f32.mrf.mxu1  ;;  %11377 = vmatmul.mubr.bf16.gmra.mxu1 %v7728_v49  ;;  %11272 = vmatprep.mubr.msk.bf16.mxu0 %vm11761_vm0, %v15761_v26  ;;  %v7305_v44 = vsel %vm1548_vm3, %v7300_v23, %v7304_v6  ;;  %v15953_v48 = vld [vmem:[#allocation4_spill] sm:$0xff] }
 0x596   : > { %v11050_v40 = vpop.f32.mrf.mxu0  ;;  %11380 = vmatprep.mubr.msk.bf16.mxu1 %vm11761_vm0, %v15761_v26  ;;  %v7306_v39 = vrot.slane %v15951_v3, 1  ;;  %v7307_v8 = vrot.slane %v15952_v34, 2  ;;  %v15955_v3 = vshrl.u32 %v14904_v21, 16 }
 0x597   : > { %v15311_v51 = vadd.f32 %v7084_v2, %v6797_v18  ;;  %v11158_v7 = vpop.f32.mrf.mxu1 }
 0x598   : > { %v6683_v5 = vpop.f32.mrf.mxu0  ;;  %v7308_v23 = vor.u32 %v7307_v8, %v7306_v39  ;;  %v7731_v7 = vrot.slane %v11744_v57, 2  ;;  %v7310_v34 = vrot.slane %v15955_v3, 1  ;;  %v15956_v39 = vshll.u32 %v14904_v21, 16  ;;  %v11745_v21 = vld [vmem:[%s11832_s6 + $0x9c] sm:$0xff]  }
 0x599   : > { %v6798_v33 = vadd.f32 %v6683_v5, %v15949_v60  ;;  %v7087_v11 = vpop.f32.mrf.mxu1  ;;  %v7733_v57 = vrot.slane %v11745_v21, 2 }
 0x59a   : > { %v11051_v4 = vpop.f32.mrf.mxu0  ;;  %v7309_v19 = vsel %vm1548_vm3, %v7304_v6, %v7308_v23  ;;  %v7311_v8 = vrot.slane %v15956_v39, 2 }
 0x59b   : > { %v15320_v63 = vadd.f32 %v7087_v11, %v6798_v33  ;;  %v11159_v49 = vpop.f32.mrf.mxu1  ;;  %v15954_v33 = vld [vmem:[#allocation3_spill] sm:$0xff] }
 0x59c   : > { %v6688_v59 = vpop.f32.mrf.mxu0  ;;  %11273 = vmatmul.mubr.bf16.gmra.mxu0 %v7305_v44  ;;  %v7312_v6 = vor.u32 %v7311_v8, %v7310_v34 }
 0x59d   : > { %v6799_v18 = vadd.f32 %v6688_v59, %v15953_v48  ;;  %v7092_v2 = vpop.f32.mrf.mxu1  ;;  %11381 = vmatmul.mubr.bf16.gmra.mxu1 %v7730_v24  ;;  %11276 = vmatprep.mubr.msk.bf16.mxu0 %vm11761_vm0, %v15761_v26  ;;  %v7732_v24 = vsel %vm2727_vm4, %v7729_v43, %v7731_v7 }
 0x59e   : > { %v11054_v40 = vpop.f32.mrf.mxu0  ;;  %11384 = vmatprep.mubr.msk.bf16.mxu1 %vm11761_vm0, %v15761_v26 }
 0x59f   : > { %v15328_v17 = vadd.f32 %v7092_v2, %v6799_v18  ;;  %v11162_v5 = vpop.f32.mrf.mxu1 }
 0x5a0   : > { %v6691_v60 = vpop.f32.mrf.mxu0 }
 0x5a1   : > { %v6800_v11 = vadd.f32 %v6691_v60, %v15954_v33  ;;  %v7095_v44 = vpop.f32.mrf.mxu1  ;;  %v15957_v33 = vld [vmem:[#allocation5_spill] sm:$0xff] }
 0x5a2   : > { %v11055_v4 = vpop.f32.mrf.mxu0 }
 0x5a3   : > { %v15337_v49 = vadd.f32 %v7095_v44, %v6800_v11  ;;  %v11163_v59 = vpop.f32.mrf.mxu1 }
 0x5a4   : > { %v6696_v48 = vpop.f32.mrf.mxu0  ;;  %11277 = vmatmul.mubr.bf16.gmra.mxu0 %v7309_v19  ;;  %v15958_v19 = vld [vmem:[#allocation6_spill] sm:$0xff] }
 0x5a5   : > { %v6801_v18 = vadd.f32 %v6696_v48, %v14931_v10  ;;  %v7100_v2 = vpop.f32.mrf.mxu1  ;;  %11385 = vmatmul.mubr.bf16.gmra.mxu1 %v7732_v24  ;;  %11280 = vmatprep.mubr.msk.bf16.mxu0 %vm11761_vm0, %v15761_v26  ;;  %v7313_v10 = vsel %vm1548_vm3, %v7308_v23, %v7312_v6  ;;  %v15959_v3 = vshrl.u32 %v15958_v19, 16  ;;  %v15960_v34 = vshll.u32 %v15958_v19, 16  ;;  %v15962_v19 = vld [vmem:[#allocation8_spill] sm:$0xff] }
 0x5a6   : > { %v11058_v40 = vpop.f32.mrf.mxu0  ;;  %11388 = vmatprep.mubr.msk.bf16.mxu1 %vm11761_vm0, %v15761_v26  ;;  %v7734_v24 = vsel %vm2727_vm4, %v7731_v7, %v7733_v57 }
 0x5a7   : > { %v15345_v43 = vadd.f32 %v7100_v2, %v6801_v18  ;;  %v11166_v5 = vpop.f32.mrf.mxu1  ;;  %v7314_v39 = vrot.slane %v15959_v3, 1  ;;  %v7315_v8 = vrot.slane %v15960_v34, 2  ;;  %v15961_v2 = vld [vmem:[#allocation7_spill] sm:$0xff] }
 0x5a8   : > { %v6699_v60 = vpop.f32.mrf.mxu0 }
 0x5a9   : > { %v6802_v11 = vadd.f32 %v6699_v60, %v15957_v33  ;;  %v7103_v44 = vpop.f32.mrf.mxu1  ;;  %v7316_v23 = vor.u32 %v7315_v8, %v7314_v39  ;;  %v11746_v60 = vld [vmem:[%s11832_s6 + $0xa4] sm:$0xff]   ;;  %v15964_v39 = vshll.u32 %v14948_v22, 16 }
 0x5aa   : > { %v11059_v4 = vpop.f32.mrf.mxu0  ;;  %v7735_v33 = vrot.slane %v11746_v60, 2 }
 0x5ab   : > { %v15354_v59 = vadd.f32 %v7103_v44, %v6802_v11  ;;  %v11167_v48 = vpop.f32.mrf.mxu1  ;;  %v7317_v34 = vsel %vm1548_vm3, %v7312_v6, %v7316_v23  ;;  %v15963_v4 = vshrl.u32 %v14948_v22, 16  ;;  %v7319_v8 = vrot.slane %v15964_v39, 2  ;;  %v11747_v22 = vld [vmem:[%s11832_s6 + $0xac] sm:$0xff]  }
 0x5ac   : > { %v6704_v18 = vpop.f32.mrf.mxu0  ;;  %11281 = vmatmul.mubr.bf16.gmra.mxu0 %v7313_v10  ;;  %v15966_v39 = vshrl.u32 %v14970_v12, 16 }
 0x5ad   : > { %v6803_v40 = vadd.f32 %v6704_v18, %v15961_v2  ;;  %v7108_v21 = vpop.f32.mrf.mxu1  ;;  %11389 = vmatmul.mubr.bf16.gmra.mxu1 %v7734_v24  ;;  %11284 = vmatprep.mubr.msk.bf16.mxu0 %vm11761_vm0, %v15761_v26  ;;  %v7318_v24 = vrot.slane %v15963_v4, 1  ;;  %v7736_v18 = vsel %vm2727_vm4, %v7733_v57, %v7735_v33 }
 0x5ae   : > { %v11062_v5 = vpop.f32.mrf.mxu0  ;;  %11392 = vmatprep.mubr.msk.bf16.mxu1 %vm11761_vm0, %v15761_v26 }
 0x5af   : > { %v15362_v7 = vadd.f32 %v7108_v21, %v6803_v40  ;;  %v11170_v11 = vpop.f32.mrf.mxu1  ;;  %v7320_v6 = vor.u32 %v7319_v8, %v7318_v24  ;;  %v15967_v24 = vshll.u32 %v14970_v12, 16  ;;  %v11748_v12 = vld [vmem:[%s11832_s6 + $0xb4] sm:$0xff]  }
 0x5b0   : > { %v6707_v44 = vpop.f32.mrf.mxu0 }
 0x5b1   : > { %v6804_v10 = vadd.f32 %v6707_v44, %v15962_v19  ;;  %v7111_v3 = vpop.f32.mrf.mxu1  ;;  %v7737_v44 = vrot.slane %v11747_v22, 2  ;;  %v7323_v8 = vrot.slane %v15967_v24, 2 }
 0x5b2   : > { %v11063_v48 = vpop.f32.mrf.mxu0 }
 0x5b3   : > { %v15371_v2 = vadd.f32 %v7111_v3, %v6804_v10  ;;  %v11171_v40 = vpop.f32.mrf.mxu1  ;;  %v15965_v3 = vld [vmem:[#allocation9_spill] sm:$0xff]  ;;  %v7322_v48 = vrot.slane %v15966_v39, 1  ;;  %v15969_v39 = vld [vmem:[#allocation12_spill] sm:$0xff] }
 0x5b4   : > { %v6712_v21 = vpop.f32.mrf.mxu0  ;;  %11285 = vmatmul.mubr.bf16.gmra.mxu0 %v7317_v34  ;;  %v7738_v40 = vsel %vm2727_vm4, %v7735_v33, %v7737_v44 }
 0x5b5   : > { %v6805_v5 = vadd.f32 %v6712_v21, %v14975_v61  ;;  %v7116_v60 = vpop.f32.mrf.mxu1  ;;  %11393 = vmatmul.mubr.bf16.gmra.mxu1 %v7736_v18  ;;  %11288 = vmatprep.mubr.msk.bf16.mxu0 %vm11761_vm0, %v15761_v26  ;;  %v7321_v61 = vsel %vm1548_vm3, %v7316_v23, %v7320_v6  ;;  %v7324_v23 = vor.u32 %v7323_v8, %v7322_v48  ;;  %v15971_v48 = vshll.u32 %v14992_v42, 16 }
 0x5b6   : > { %v11066_v11 = vpop.f32.mrf.mxu0  ;;  %11396 = vmatprep.mubr.msk.bf16.mxu1 %vm11761_vm0, %v15761_v26 }
 0x5b7   : > { %v15379_v57 = vadd.f32 %v7116_v60, %v6805_v5  ;;  %v11174_v19 = vpop.f32.mrf.mxu1  ;;  %v15968_v11 = vld [vmem:[#allocation11_spill] sm:$0xff]  ;;  %v7327_v8 = vrot.slane %v15971_v48, 2  ;;  %v15975_v48 = vld [vmem:[#allocation13_spill] sm:$0xff] }
 0x5b8   : > { %v6715_v10 = vpop.f32.mrf.mxu0 }
 0x5b9   : > { %v6806_v34 = vadd.f32 %v6715_v10, %v15965_v3  ;;  %v7119_v4 = vpop.f32.mrf.mxu1  ;;  %v7739_v3 = vrot.slane %v11748_v12, 2  ;;  %v15973_v12 = vld [vmem:[#allocation10_spill] sm:$0xff] }
 0x5ba   : > { %v11067_v18 = vpop.f32.mrf.mxu0 }
 0x5bb   : > { %v15388_v21 = vadd.f32 %v7119_v4, %v6806_v34  ;;  %v11175_v5 = vpop.f32.mrf.mxu1  ;;  %v7325_v18 = vsel %vm1548_vm3, %v7320_v6, %v7324_v23 }
 0x5bc   : > { %v6720_v60 = vpop.f32.mrf.mxu0  ;;  %11289 = vmatmul.mubr.bf16.gmra.mxu0 %v7321_v61 }
 0x5bd   : > { %v6807_v22 = vadd.f32 %v6720_v60, %v15968_v11  ;;  %v7124_v19 = vpop.f32.mrf.mxu1  ;;  %11397 = vmatmul.mubr.bf16.gmra.mxu1 %v7738_v40  ;;  %11292 = vmatprep.mubr.msk.bf16.mxu0 %vm11761_vm0, %v15761_v26  ;;  %v15970_v40 = vshrl.u32 %v14992_v42, 16  ;;  %v7740_v11 = vsel %vm2727_vm4, %v7737_v44, %v7739_v3  ;;  %v11749_v42 = vld [vmem:[%s11832_s6 + $0xbc] sm:$0xff]  }
 0x5be   : > { %v11070_v10 = vpop.f32.mrf.mxu0  ;;  %11400 = vmatprep.mubr.msk.bf16.mxu1 %vm11761_vm0, %v15761_v26 }
 0x5bf   : > { %v15396_v33 = vadd.f32 %v7124_v19, %v6807_v22  ;;  %v11178_v34 = vpop.f32.mrf.mxu1  ;;  %v7326_v5 = vrot.slane %v15970_v40, 1  ;;  %v7741_v40 = vrot.slane %v11749_v42, 2 }
 0x5c0   : > { %v6723_v4 = vpop.f32.mrf.mxu0 }
 0x5c1   : > { %v6808_v61 = vadd.f32 %v6723_v4, %v15969_v39  ;;  %v7127_v24 = vpop.f32.mrf.mxu1  ;;  %v7328_v6 = vor.u32 %v7327_v8, %v7326_v5  ;;  %v15977_v5 = vshll.u32 %v15014_v13, 16 }
 0x5c2   : > { %v11071_v60 = vpop.f32.mrf.mxu0 }
 0x5c3   : > { %v15405_v10 = vadd.f32 %v7127_v24, %v6808_v61  ;;  %v11179_v22 = vpop.f32.mrf.mxu1  ;;  %v7331_v8 = vrot.slane %v15977_v5, 2 }
 0x5c4   : > { %v6728_v19 = vpop.f32.mrf.mxu0  ;;  %11293 = vmatmul.mubr.bf16.gmra.mxu0 %v7325_v18  ;;  %v7329_v22 = vsel %vm1548_vm3, %v7324_v23, %v7328_v6 }
 0x5c5   : > { %15972 = vst [vmem:[#allocation17_spill] sm:$0xff] %v15405_v10  ;;  %v6809_v34 = vadd.f32 %v6728_v19, %v15973_v12  ;;  %v7132_v4 = vpop.f32.mrf.mxu1  ;;  %11401 = vmatmul.mubr.bf16.gmra.mxu1 %v7740_v11  ;;  %11296 = vmatprep.mubr.msk.bf16.mxu0 %vm11761_vm0, %v15761_v26  ;;  %v15976_v11 = vshrl.u32 %v15014_v13, 16  ;;  %v7335_v13 = vshrl.u32 %v15047_v37, 16 }
 0x5c6   : > { %v11074_v39 = vpop.f32.mrf.mxu0  ;;  %11404 = vmatprep.mubr.msk.bf16.mxu1 %vm11761_vm0, %v15761_v26 }
 0x5c7   : > { %v15413_v44 = vadd.f32 %v7132_v4, %v6809_v34  ;;  %v11182_v61 = vpop.f32.mrf.mxu1  ;;  %v7330_v19 = vrot.slane %v15976_v11, 1  ;;  %v7742_v39 = vsel %vm2727_vm4, %v7739_v3, %v7741_v40  ;;  %v7338_v11 = vshll.u32 %v15047_v37, 16 }
 0x5c8   : > { %v6731_v24 = vpop.f32.mrf.mxu0  ;;  %v15979_v61 = vld [vmem:[#allocation14_spill] sm:$0xff] }
 0x5c9   : > { %15974 = vst [vmem:[#allocation18_spill] sm:$0xff] %v15413_v44  ;;  %v6810_v18 = vadd.f32 %v6731_v24, %v15975_v48  ;;  %v7135_v60 = vpop.f32.mrf.mxu1  ;;  %v7332_v23 = vor.u32 %v7331_v8, %v7330_v19  ;;  %v7337_v8 = vrot.slane %v7335_v13, 1 }
 0x5ca   : > { %v11075_v12 = vpop.f32.mrf.mxu0 }
 0x5cb   : > { %v15422_v42 = vadd.f32 %v7135_v60, %v6810_v18  ;;  %v11183_v34 = vpop.f32.mrf.mxu1  ;;  %v11750_v18 = vld [vmem:[%s11832_s6 + $0xc4] sm:$0xff]   ;;  %v7678_v12 = vld [vmem:[%s11832_s6 + $0xd0] sm:$0x7]  ;;  %v7333_v19 = vsel %vm1548_vm3, %v7328_v6, %v7332_v23 }
 0x5cc   : > { %v6736_v4 = vpop.f32.mrf.mxu0  ;;  %11297 = vmatmul.mubr.bf16.gmra.mxu0 %v7329_v22  ;;  %v7743_v60 = vrot.slane %v11750_v18, 2 }
 0x5cd   : > { %15978 = vst [vmem:[#allocation19_spill] sm:$0xff] %v15422_v42  ;;  %v6811_v24 = vadd.f32 %v6736_v4, %v15979_v61  ;;  %v7140_v48 = vpop.f32.mrf.mxu1  ;;  %11405 = vmatmul.mubr.bf16.gmra.mxu1 %v7742_v39  ;;  %11300 = vmatprep.mubr.msk.bf16.mxu0 %vm11761_vm0, %v15761_v26  ;;  %v7340_v61 = vrot.slane %v7338_v11, 2  ;;  %v11751_v42 = vld [vmem:[%s11832_s6 + $0xcc] sm:$0xf] }
 0x5ce   : > { %v11078_v3 = vpop.f32.mrf.mxu0  ;;  %11408 = vmatprep.mubr.msk.bf16.mxu1 %vm11761_vm0, %v15761_v26  ;;  %v8961_v44 = vcombine.low %v11751_v42, %v7678_v12  ;;  %v15980_v12 = vld [vmem:[#allocation15_spill] sm:$0xff] }
 0x5cf   : > { %v15432_v22 = vadd.f32 %v7140_v48, %v6811_v24  ;;  %v11186_v5 = vpop.f32.mrf.mxu1  ;;  %v7744_v3 = vsel %vm2727_vm4, %v7741_v40, %v7743_v60 }
 0x5d0   : > { %v6739_v39 = vpop.f32.mrf.mxu0  ;;  %v7745_v40 = vrot.slane %v8961_v44, 2 }
 0x5d1   : > { %v6812_v34 = vadd.f32 %v6739_v39, %v15049_v35  ;;  %v7143_v4 = vpop.f32.mrf.mxu1  ;;  %v7341_v35 = vor.u32 %v7340_v61, %v7337_v8 }
 0x5d2   : > { %v11079_v37 = vpop.f32.mrf.mxu0 }
 0x5d3   : > { %v15439_v10 = vadd.f32 %v7143_v4, %v6812_v34  ;;  %v11187_v18 = vpop.f32.mrf.mxu1 }
 0x5d4   : > { %v6744_v24 = vpop.f32.mrf.mxu0  ;;  %11301 = vmatmul.mubr.bf16.gmra.mxu0 %v7333_v19  ;;  %v7746_v19 = vsel %vm2727_vm4, %v7743_v60, %v7745_v40 }
 0x5d5   : > { %v6813_v48 = vadd.f32 %v6744_v24, %v15059_v36  ;;  %v7148_v5 = vpop.f32.mrf.mxu1  ;;  %11409 = vmatmul.mubr.bf16.gmra.mxu1 %v7744_v3  ;;  %11304 = vmatprep.mubr.msk.bf16.mxu0 %vm11761_vm0, %v15761_v26  ;;  %v7342_v36 = vsel %vm1548_vm3, %v7332_v23, %v7341_v35  ;;  %v15981_v3 = vld [vmem:[#allocation16_spill] sm:$0xff] }
 0x5d6   : > { %v11082_v6 = vpop.f32.mrf.mxu0  ;;  %11412 = vmatprep.mubr.msk.bf16.mxu1 %vm11761_vm0, %v15761_v26 }
 0x5d7   : > { %v15446_v13 = vadd.f32 %v7148_v5, %v6813_v48  ;;  %v11190_v42 = vpop.f32.mrf.mxu1 }
 0x5d8   : > { %v6747_v11 = vpop.f32.mrf.mxu0 }
 0x5d9   : > { %v6814_v39 = vadd.f32 %v6747_v11, %v15980_v12  ;;  %v7151_v34 = vpop.f32.mrf.mxu1 }
 0x5da   : > { %v11083_v4 = vpop.f32.mrf.mxu0 }
 0x5db   : > { %v15451_v37 = vadd.f32 %v7151_v34, %v6814_v39  ;;  %v11191_v8 = vpop.f32.mrf.mxu1 }
 0x5dc   : > { %v6752_v61 = vpop.f32.mrf.mxu0  ;;  %11305 = vmatmul.mubr.bf16.gmra.mxu0 %v7342_v36 }
 0x5dd   : > { %v6815_v18 = vadd.f32 %v6752_v61, %v15981_v3  ;;  %v7156_v44 = vpop.f32.mrf.mxu1  ;;  %11413 = vmatmul.mubr.bf16.gmra.mxu1 %v7746_v19  ;;  %11308 = vmatprep.mubr.msk.bf16.mxu0 %vm11761_vm0, %v15761_v26 }
 0x5de   : > { %v11086_v24 = vpop.f32.mrf.mxu0  ;;  %11416 = vmatprep.mubr.msk.bf16.mxu1 %vm11761_vm0, %v15761_v26 }
 0x5df   : > { %v15458_v23 = vadd.f32 %v7156_v44, %v6815_v18  ;;  %v11194_v48 = vpop.f32.mrf.mxu1 }
 0x5e0   : > { %v6755_v60 = vpop.f32.mrf.mxu0 }
 0x5e1   : > { %v6816_v5 = vadd.f32 %v6755_v60, %v15082_v58  ;;  %v7159_v6 = vpop.f32.mrf.mxu1 }
 0x5e2   : > { %v11087_v42 = vpop.f32.mrf.mxu0 }
 0x5e3   : > { %v15461_v11 = vadd.f32 %v7159_v6, %v6816_v5  ;;  %v11195_v12 = vpop.f32.mrf.mxu1 }
 0x5e4   : > { %v6760_v39 = vpop.f32.mrf.mxu0  ;;  %11309 = vmatmul.mubr.bf16.gmra.mxu0 %v7341_v35 }
 0x5e5   : > { %v6817_v34 = vadd.f32 %v6760_v39, %v15090_v50  ;;  %v7164_v36 = vpop.f32.mrf.mxu1  ;;  %11417 = vmatmul.mubr.bf16.gmra.mxu1 %v7745_v40 }
 0x5e6   : > { %v11090_v4 = vpop.f32.mrf.mxu0 }
 0x5e7   : > { %v15464_v19 = vadd.f32 %v7164_v36, %v6817_v34  ;;  %v11198_v26 = vpop.f32.mrf.mxu1 }
 0x5e8   : > { %v6763_v8 = vpop.f32.mrf.mxu0 }
 0x5e9   : > { %v6818_v61 = vadd.f32 %v6763_v8, %v15099_v55  ;;  %v7167_v3 = vpop.f32.mrf.mxu1 }
 0x5ea   : > { %v11091_v58 = vpop.f32.mrf.mxu0 }
 0x5eb   : > { %v15467_v18 = vadd.f32 %v7167_v3, %v6818_v61  ;;  %v11199_v44 = vpop.f32.mrf.mxu1  ;;  %v15479_v61 = vld [vmem:[%s15608_s2] ss:$0 sm:$0xff] }
 0x5ec   : > { %v6768_v24 = vpop.f32.mrf.mxu0 }
 0x5ed   : > { %v6819_v48 = vadd.f32 %v6768_v24, %v15107_v16  ;;  %v7172_v35 = vpop.f32.mrf.mxu1 }
 0x5ee   : > { %v11094_v60 = vpop.f32.mrf.mxu0 }
 0x5ef   : > { %v15470_v50 = vadd.f32 %v7172_v35, %v6819_v48  ;;  %v11202_v40 = vpop.f32.mrf.mxu1 }
 0x5f0   : > { %v6771_v5 = vpop.f32.mrf.mxu0 }
 0x5f1   : > { %v6820_v6 = vadd.f32 %v6771_v5, %v15116_v15  ;;  %v7175_v42 = vpop.f32.mrf.mxu1 }
 0x5f2   : > { %v11095_v12 = vpop.f32.mrf.mxu0 }
 0x5f3   : > { %v15473_v39 = vadd.f32 %v7175_v42, %v6820_v6  ;;  %v11203_v55 = vpop.f32.mrf.mxu1 }
 0x5f4   : > { %v7448_v34 = vpop.f32.mrf.mxu0 }
 0x5f5   : > { %v7631_v36 = vadd.f32 %v7448_v34, %v15124_v47  ;;  %v7852_v4 = vpop.f32.mrf.mxu1 }
 0x5f6   : > { %v11222_v26 = vpop.f32.mrf.mxu0 }
 0x5f7   : > { %v8035_v16 = vadd.f32 %v7852_v4, %v7631_v36  ;;  %v11330_v8 = vpop.f32.mrf.mxu1 }
 0x5f8   : > { %v7451_v3 = vpop.f32.mrf.mxu0 }
 0x5f9   : > { %v7632_v15 = vadd.f32 %v7451_v3, %v15133_v29  ;;  %v7855_v58 = vpop.f32.mrf.mxu1  ;;  %v8088_v24 = vadd.f32 %v15479_v61, %v8035_v16 }
 0x5fa   : > { %v11223_v44 = vpop.f32.mrf.mxu0 }
 0x5fb   : > { %v8036_v48 = vadd.f32 %v7855_v58, %v7632_v15  ;;  %v11331_v35 = vpop.f32.mrf.mxu1  ;;  %v8134_v42 = vmax.f32 %v8088_v24, 0.0 }
 0x5fc   : > { %v7456_v47 = vpop.f32.mrf.mxu0 }
 0x5fd   : > { %v8089_v60 = vadd.f32 %v15479_v61, %v8036_v48  ;;  %v7633_v40 = vadd.f32 %v7456_v47, %v15141_v0  ;;  %v7860_v5 = vpop.f32.mrf.mxu1 }
 0x5fe   : > { %v11226_v6 = vpop.f32.mrf.mxu0 }
 0x5ff   : > { %v8135_v12 = vmax.f32 %v8089_v60, 0.0  ;;  %v8037_v55 = vadd.f32 %v7860_v5, %v7633_v40  ;;  %v11334_v34 = vpop.f32.mrf.mxu1 }
 0x600   : > { %v7459_v29 = vpop.f32.mrf.mxu0 }
 0x601   : > { %v9068_v36 = vpack.c.bf16 %v8135_v12, %v8134_v42  ;;  %v7634_v4 = vadd.f32 %v7459_v29, %v15150_v20  ;;  %v7863_v26 = vpop.f32.mrf.mxu1  ;;  %v8090_v0 = vadd.f32 %v15479_v61, %v8037_v55 }
 0x602   : > { %v11227_v16 = vpop.f32.mrf.mxu0 }
 0x603   : > { %9069 = vst [vmem:[%s15489_s11] sm:$0xff] %v9068_v36   ;;  %v8038_v8 = vadd.f32 %v7863_v26, %v7634_v4  ;;  %v11335_v3 = vpop.f32.mrf.mxu1  ;;  %v8136_v35 = vmax.f32 %v8090_v0, 0.0 }
 0x604   : > { %v7464_v15 = vpop.f32.mrf.mxu0 }
 0x605   : > { %v8091_v58 = vadd.f32 %v15479_v61, %v8038_v8  ;;  %v7635_v44 = vadd.f32 %v7464_v15, %v15158_v30  ;;  %v7868_v24 = vpop.f32.mrf.mxu1 }
 0x606   : > { %v11230_v48 = vpop.f32.mrf.mxu0 }
 0x607   : > { %v8137_v47 = vmax.f32 %v8091_v58, 0.0  ;;  %v8039_v60 = vadd.f32 %v7868_v24, %v7635_v44  ;;  %v11338_v40 = vpop.f32.mrf.mxu1 }
 0x608   : > { %v7467_v20 = vpop.f32.mrf.mxu0 }
 0x609   : > { %v9073_v5 = vpack.c.bf16 %v8137_v47, %v8136_v35  ;;  %v7636_v6 = vadd.f32 %v7467_v20, %v15167_v45  ;;  %v7871_v42 = vpop.f32.mrf.mxu1  ;;  %v8092_v55 = vadd.f32 %v15479_v61, %v8039_v60 }
 0x60a   : > { %v11231_v12 = vpop.f32.mrf.mxu0 }
 0x60b   : > { %9175 = vst [vmem:[%s15489_s11 + $0x8] sm:$0xff] %v9073_v5   ;;  %v8040_v34 = vadd.f32 %v7871_v42, %v7636_v6  ;;  %v11339_v29 = vpop.f32.mrf.mxu1  ;;  %v8138_v0 = vmax.f32 %v8092_v55, 0.0 }
 0x60c   : > { %v7472_v36 = vpop.f32.mrf.mxu0 }
 0x60d   : > { %v8093_v30 = vadd.f32 %v15479_v61, %v8040_v34  ;;  %v7637_v4 = vadd.f32 %v7472_v36, %v15175_v41  ;;  %v7876_v26 = vpop.f32.mrf.mxu1 }
 0x60e   : > { %v11234_v16 = vpop.f32.mrf.mxu0 }
 0x60f   : > { %v8139_v8 = vmax.f32 %v8093_v30, 0.0  ;;  %v8041_v3 = vadd.f32 %v7876_v26, %v7637_v4  ;;  %v11342_v15 = vpop.f32.mrf.mxu1 }
 0x610   : > { %v7475_v45 = vpop.f32.mrf.mxu0 }
 0x611   : > { %v9078_v58 = vpack.c.bf16 %v8139_v8, %v8138_v0  ;;  %v7638_v44 = vadd.f32 %v7475_v45, %v15184_v25  ;;  %v7879_v24 = vpop.f32.mrf.mxu1  ;;  %v8094_v35 = vadd.f32 %v15479_v61, %v8041_v3 }
 0x612   : > { %v11235_v48 = vpop.f32.mrf.mxu0 }
 0x613   : > { %9176 = vst [vmem:[%s15489_s11 + $0x10] sm:$0xff] %v9078_v58   ;;  %v8042_v47 = vadd.f32 %v7879_v24, %v7638_v44  ;;  %v11343_v60 = vpop.f32.mrf.mxu1  ;;  %v8140_v42 = vmax.f32 %v8094_v35, 0.0 }
 0x614   : > { %v7480_v40 = vpop.f32.mrf.mxu0 }
 0x615   : > { %v8095_v41 = vadd.f32 %v15479_v61, %v8042_v47  ;;  %v7639_v20 = vadd.f32 %v7480_v40, %v15192_v46  ;;  %v7884_v5 = vpop.f32.mrf.mxu1 }
 0x616   : > { %v11238_v6 = vpop.f32.mrf.mxu0 }
 0x617   : > { %v8141_v12 = vmax.f32 %v8095_v41, 0.0  ;;  %v8043_v55 = vadd.f32 %v7884_v5, %v7639_v20  ;;  %v11346_v34 = vpop.f32.mrf.mxu1 }
 0x618   : > { %v7483_v25 = vpop.f32.mrf.mxu0 }
 0x619   : > { %v9083_v29 = vpack.c.bf16 %v8141_v12, %v8140_v42  ;;  %v7640_v36 = vadd.f32 %v7483_v25, %v15201_v14  ;;  %v7887_v30 = vpop.f32.mrf.mxu1  ;;  %v8096_v26 = vadd.f32 %v15479_v61, %v8043_v55 }
 0x61a   : > { %v11239_v4 = vpop.f32.mrf.mxu0 }
 0x61b   : > { %9177 = vst [vmem:[%s15489_s11 + $0x18] sm:$0xff] %v9083_v29   ;;  %v8044_v16 = vadd.f32 %v7887_v30, %v7640_v36  ;;  %v11347_v0 = vpop.f32.mrf.mxu1  ;;  %v8142_v58 = vmax.f32 %v8096_v26, 0.0 }
 0x61c   : > { %v7488_v8 = vpop.f32.mrf.mxu0 }
 0x61d   : > { %v8097_v46 = vadd.f32 %v15479_v61, %v8044_v16  ;;  %v7641_v3 = vadd.f32 %v7488_v8, %v15209_v32  ;;  %v7892_v15 = vpop.f32.mrf.mxu1 }
 0x61e   : > { %v11242_v45 = vpop.f32.mrf.mxu0 }
 0x61f   : > { %v8143_v44 = vmax.f32 %v8097_v46, 0.0  ;;  %v8045_v24 = vadd.f32 %v7892_v15, %v7641_v3  ;;  %v11350_v48 = vpop.f32.mrf.mxu1 }
 0x620   : > { %v7491_v14 = vpop.f32.mrf.mxu0 }
 0x621   : > { %v9088_v35 = vpack.c.bf16 %v8143_v44, %v8142_v58  ;;  %v7642_v47 = vadd.f32 %v7491_v14, %v15218_v62  ;;  %v7895_v60 = vpop.f32.mrf.mxu1  ;;  %v8098_v41 = vadd.f32 %v15479_v61, %v8045_v24 }
 0x622   : > { %v11243_v40 = vpop.f32.mrf.mxu0 }
 0x623   : > { %9178 = vst [vmem:[%s15489_s11 + $0x20] sm:$0xff] %v9088_v35   ;;  %v8046_v20 = vadd.f32 %v7895_v60, %v7642_v47  ;;  %v11351_v5 = vpop.f32.mrf.mxu1  ;;  %v8144_v34 = vmax.f32 %v8098_v41, 0.0 }
 0x624   : > { %v7496_v6 = vpop.f32.mrf.mxu0 }
 0x625   : > { %v8099_v32 = vadd.f32 %v15479_v61, %v8046_v20  ;;  %v7643_v42 = vadd.f32 %v7496_v6, %v15226_v56  ;;  %v7900_v12 = vpop.f32.mrf.mxu1 }
 0x626   : > { %v11246_v55 = vpop.f32.mrf.mxu0 }
 0x627   : > { %v8145_v25 = vmax.f32 %v8099_v32, 0.0  ;;  %v8047_v29 = vadd.f32 %v7900_v12, %v7643_v42  ;;  %v11354_v36 = vpop.f32.mrf.mxu1 }
 0x628   : > { %v7499_v62 = vpop.f32.mrf.mxu0 }
 0x629   : > { %v9093_v30 = vpack.c.bf16 %v8145_v25, %v8144_v34  ;;  %v7644_v4 = vadd.f32 %v7499_v62, %v15235_v31  ;;  %v7903_v26 = vpop.f32.mrf.mxu1  ;;  %v8100_v0 = vadd.f32 %v15479_v61, %v8047_v29 }
 0x62a   : > { %v11247_v16 = vpop.f32.mrf.mxu0 }
 0x62b   : > { %9179 = vst [vmem:[%s15489_s11 + $0x28] sm:$0xff] %v9093_v30   ;;  %v8048_v8 = vadd.f32 %v7903_v26, %v7644_v4  ;;  %v11355_v46 = vpop.f32.mrf.mxu1  ;;  %v8146_v44 = vmax.f32 %v8100_v0, 0.0 }
 0x62c   : > { %v7504_v3 = vpop.f32.mrf.mxu0 }
 0x62d   : > { %v8101_v56 = vadd.f32 %v15479_v61, %v8048_v8  ;;  %v7645_v15 = vadd.f32 %v7504_v3, %v15243_v1  ;;  %v7908_v45 = vpop.f32.mrf.mxu1 }
 0x62e   : > { %v11250_v58 = vpop.f32.mrf.mxu0 }
 0x62f   : > { %v8147_v24 = vmax.f32 %v8101_v56, 0.0  ;;  %v8049_v48 = vadd.f32 %v7908_v45, %v7645_v15  ;;  %v11358_v14 = vpop.f32.mrf.mxu1 }
 0x630   : > { %v7507_v31 = vpop.f32.mrf.mxu0 }
 0x631   : > { %v9098_v35 = vpack.c.bf16 %v8147_v24, %v8146_v44  ;;  %v7646_v47 = vadd.f32 %v7507_v31, %v15252_v9  ;;  %v7911_v60 = vpop.f32.mrf.mxu1  ;;  %v8102_v41 = vadd.f32 %v15479_v61, %v8049_v48 }
 0x632   : > { %v11251_v40 = vpop.f32.mrf.mxu0 }
 0x633   : > { %9180 = vst [vmem:[%s15489_s11 + $0x30] sm:$0xff] %v9098_v35   ;;  %v8050_v20 = vadd.f32 %v7911_v60, %v7646_v47  ;;  %v11359_v5 = vpop.f32.mrf.mxu1  ;;  %v8148_v55 = vmax.f32 %v8102_v41, 0.0 }
 0x634   : > { %v7512_v6 = vpop.f32.mrf.mxu0 }
 0x635   : > { %v8103_v1 = vadd.f32 %v15479_v61, %v8050_v20  ;;  %v7647_v32 = vadd.f32 %v7512_v6, %v15260_v54  ;;  %v7916_v42 = vpop.f32.mrf.mxu1 }
 0x636   : > { %v11254_v12 = vpop.f32.mrf.mxu0 }
 0x637   : > { %v8149_v34 = vmax.f32 %v8103_v1, 0.0  ;;  %v8051_v25 = vadd.f32 %v7916_v42, %v7647_v32  ;;  %v11362_v29 = vpop.f32.mrf.mxu1 }
 0x638   : > { %v7515_v9 = vpop.f32.mrf.mxu0 }
 0x639   : > { %v9103_v36 = vpack.c.bf16 %v8149_v34, %v8148_v55  ;;  %v7648_v62 = vadd.f32 %v7515_v9, %v15269_v53  ;;  %v7919_v30 = vpop.f32.mrf.mxu1  ;;  %v8104_v26 = vadd.f32 %v15479_v61, %v8051_v25 }
 0x63a   : > { %v11255_v4 = vpop.f32.mrf.mxu0 }
 0x63b   : > { %9181 = vst [vmem:[%s15489_s11 + $0x38] sm:$0xff] %v9103_v36   ;;  %v8052_v16 = vadd.f32 %v7919_v30, %v7648_v62  ;;  %v11363_v0 = vpop.f32.mrf.mxu1  ;;  %v8150_v15 = vmax.f32 %v8104_v26, 0.0 }
 0x63c   : > { %v7520_v8 = vpop.f32.mrf.mxu0 }
 0x63d   : > { %v8105_v54 = vadd.f32 %v15479_v61, %v8052_v16  ;;  %v7649_v46 = vadd.f32 %v7520_v8, %v15277_v28  ;;  %v7924_v3 = vpop.f32.mrf.mxu1 }
 0x63e   : > { %v11258_v56 = vpop.f32.mrf.mxu0 }
 0x63f   : > { %v8151_v45 = vmax.f32 %v8105_v54, 0.0  ;;  %v8053_v58 = vadd.f32 %v7924_v3, %v7649_v46  ;;  %v11366_v44 = vpop.f32.mrf.mxu1 }
 0x640   : > { %v7523_v53 = vpop.f32.mrf.mxu0 }
 0x641   : > { %v9108_v24 = vpack.c.bf16 %v8151_v45, %v8150_v15  ;;  %v7650_v48 = vadd.f32 %v7523_v53, %v15286_v27  ;;  %v7927_v14 = vpop.f32.mrf.mxu1  ;;  %v8106_v35 = vadd.f32 %v15479_v61, %v8053_v58 }
 0x642   : > { %v11259_v31 = vpop.f32.mrf.mxu0 }
 0x643   : > { %9182 = vst [vmem:[%s15489_s11 + $0x40] sm:$0xff] %v9108_v24   ;;  %v8054_v47 = vadd.f32 %v7927_v14, %v7650_v48  ;;  %v11367_v60 = vpop.f32.mrf.mxu1  ;;  %v8152_v6 = vmax.f32 %v8106_v35, 0.0 }
 0x644   : > { %v7528_v40 = vpop.f32.mrf.mxu0 }
 0x645   : > { %v8107_v28 = vadd.f32 %v15479_v61, %v8054_v47  ;;  %v7651_v41 = vadd.f32 %v7528_v40, %v15294_v52  ;;  %v7932_v20 = vpop.f32.mrf.mxu1 }
 0x646   : > { %v11262_v5 = vpop.f32.mrf.mxu0 }
 0x647   : > { %v8153_v1 = vmax.f32 %v8107_v28, 0.0  ;;  %v8055_v32 = vadd.f32 %v7932_v20, %v7651_v41  ;;  %v11370_v42 = vpop.f32.mrf.mxu1 }
 0x648   : > { %v7531_v27 = vpop.f32.mrf.mxu0 }
 0x649   : > { %v9113_v12 = vpack.c.bf16 %v8153_v1, %v8152_v6  ;;  %v7652_v55 = vadd.f32 %v7531_v27, %v15303_v38  ;;  %v7935_v34 = vpop.f32.mrf.mxu1  ;;  %v8108_v29 = vadd.f32 %v15479_v61, %v8055_v32 }
 0x64a   : > { %v11263_v25 = vpop.f32.mrf.mxu0 }
 0x64b   : > { %9183 = vst [vmem:[%s15489_s11 + $0x48] sm:$0xff] %v9113_v12   ;;  %v8056_v9 = vadd.f32 %v7935_v34, %v7652_v55  ;;  %v11371_v36 = vpop.f32.mrf.mxu1  ;;  %v8154_v16 = vmax.f32 %v8108_v29, 0.0 }
 0x64c   : > { %v7536_v62 = vpop.f32.mrf.mxu0 }
 0x64d   : > { %v8109_v52 = vadd.f32 %v15479_v61, %v8056_v9  ;;  %v7653_v30 = vadd.f32 %v7536_v62, %v15311_v51  ;;  %v7940_v4 = vpop.f32.mrf.mxu1 }
 0x64e   : > { %v11266_v26 = vpop.f32.mrf.mxu0 }
 0x64f   : > { %v8155_v0 = vmax.f32 %v8109_v52, 0.0  ;;  %v8057_v8 = vadd.f32 %v7940_v4, %v7653_v30  ;;  %v11374_v54 = vpop.f32.mrf.mxu1 }
 0x650   : > { %v7539_v38 = vpop.f32.mrf.mxu0 }
 0x651   : > { %v9118_v46 = vpack.c.bf16 %v8155_v0, %v8154_v16  ;;  %v7654_v3 = vadd.f32 %v7539_v38, %v15320_v63  ;;  %v7943_v56 = vpop.f32.mrf.mxu1  ;;  %v8110_v45 = vadd.f32 %v15479_v61, %v8057_v8 }
 0x652   : > { %v11267_v15 = vpop.f32.mrf.mxu0 }
 0x653   : > { %9184 = vst [vmem:[%s15489_s11 + $0x50] sm:$0xff] %v9118_v46   ;;  %v8058_v58 = vadd.f32 %v7943_v56, %v7654_v3  ;;  %v11375_v44 = vpop.f32.mrf.mxu1  ;;  %v8156_v31 = vmax.f32 %v8110_v45, 0.0 }
 0x654   : > { %v7544_v53 = vpop.f32.mrf.mxu0 }
 0x655   : > { %v8111_v51 = vadd.f32 %v15479_v61, %v8058_v58  ;;  %v7655_v24 = vadd.f32 %v7544_v53, %v15328_v17  ;;  %v7948_v48 = vpop.f32.mrf.mxu1 }
 0x656   : > { %v11270_v14 = vpop.f32.mrf.mxu0 }
 0x657   : > { %v8157_v35 = vmax.f32 %v8111_v51, 0.0  ;;  %v8059_v47 = vadd.f32 %v7948_v48, %v7655_v24  ;;  %v11378_v60 = vpop.f32.mrf.mxu1 }
 0x658   : > { %v7547_v63 = vpop.f32.mrf.mxu0 }
 0x659   : > { %v9123_v40 = vpack.c.bf16 %v8157_v35, %v8156_v31  ;;  %v7656_v28 = vadd.f32 %v7547_v63, %v15337_v49  ;;  %v7951_v41 = vpop.f32.mrf.mxu1  ;;  %v8112_v5 = vadd.f32 %v15479_v61, %v8059_v47 }
 0x65a   : > { %v11271_v20 = vpop.f32.mrf.mxu0 }
 0x65b   : > { %9185 = vst [vmem:[%s15489_s11 + $0x58] sm:$0xff] %v9123_v40   ;;  %v8060_v6 = vadd.f32 %v7951_v41, %v7656_v28  ;;  %v11379_v1 = vpop.f32.mrf.mxu1  ;;  %v8158_v55 = vmax.f32 %v8112_v5, 0.0 }
 0x65c   : > { %v7552_v32 = vpop.f32.mrf.mxu0 }
 0x65d   : > { %v8113_v17 = vadd.f32 %v15479_v61, %v8060_v6  ;;  %v7657_v42 = vadd.f32 %v7552_v32, %v15345_v43  ;;  %v7956_v27 = vpop.f32.mrf.mxu1 }
 0x65e   : > { %v11274_v12 = vpop.f32.mrf.mxu0 }
 0x65f   : > { %v8159_v34 = vmax.f32 %v8113_v17, 0.0  ;;  %v8061_v25 = vadd.f32 %v7956_v27, %v7657_v42  ;;  %v11382_v29 = vpop.f32.mrf.mxu1 }
 0x660   : > { %v7555_v49 = vpop.f32.mrf.mxu0 }
 0x661   : > { %v9128_v9 = vpack.c.bf16 %v8159_v34, %v8158_v55  ;;  %v7658_v36 = vadd.f32 %v7555_v49, %v15354_v59  ;;  %v7959_v62 = vpop.f32.mrf.mxu1  ;;  %v8114_v30 = vadd.f32 %v15479_v61, %v8061_v25 }
 0x662   : > { %v11275_v52 = vpop.f32.mrf.mxu0 }
 0x663   : > { %9186 = vst [vmem:[%s15489_s11 + $0x60] sm:$0xff] %v9128_v9   ;;  %v8062_v4 = vadd.f32 %v7959_v62, %v7658_v36  ;;  %v11383_v26 = vpop.f32.mrf.mxu1  ;;  %v8160_v38 = vmax.f32 %v8114_v30, 0.0  ;;  %v15982_v9 = vld [vmem:[#allocation17_spill] sm:$0xff] }
 0x664   : > { %v7560_v16 = vpop.f32.mrf.mxu0 }
 0x665   : > { %v8115_v43 = vadd.f32 %v15479_v61, %v8062_v4  ;;  %v7659_v0 = vadd.f32 %v7560_v16, %v15362_v7  ;;  %v7964_v8 = vpop.f32.mrf.mxu1 }
 0x666   : > { %v11278_v54 = vpop.f32.mrf.mxu0 }
 0x667   : > { %v8161_v46 = vmax.f32 %v8115_v43, 0.0  ;;  %v8063_v3 = vadd.f32 %v7964_v8, %v7659_v0  ;;  %v11386_v56 = vpop.f32.mrf.mxu1  ;;  %v15983_v43 = vld [vmem:[#allocation18_spill] sm:$0xff] }
 0x668   : > { %v7563_v59 = vpop.f32.mrf.mxu0 }
 0x669   : > { %v9133_v15 = vpack.c.bf16 %v8161_v46, %v8160_v38  ;;  %v7660_v45 = vadd.f32 %v7563_v59, %v15371_v2  ;;  %v7967_v58 = vpop.f32.mrf.mxu1  ;;  %v8116_v53 = vadd.f32 %v15479_v61, %v8063_v3 }
 0x66a   : > { %v11279_v44 = vpop.f32.mrf.mxu0 }
 0x66b   : > { %9187 = vst [vmem:[%s15489_s11 + $0x68] sm:$0xff] %v9133_v15   ;;  %v8064_v51 = vadd.f32 %v7967_v58, %v7660_v45  ;;  %v11387_v24 = vpop.f32.mrf.mxu1  ;;  %v8162_v47 = vmax.f32 %v8116_v53, 0.0  ;;  %v15984_v45 = vld [vmem:[#allocation19_spill] sm:$0xff] }
 0x66c   : > { %v7568_v48 = vpop.f32.mrf.mxu0 }
 0x66d   : > { %v8117_v7 = vadd.f32 %v15479_v61, %v8064_v51  ;;  %v7661_v14 = vadd.f32 %v7568_v48, %v15379_v57  ;;  %v7972_v31 = vpop.f32.mrf.mxu1 }
 0x66e   : > { %v11282_v35 = vpop.f32.mrf.mxu0 }
 0x66f   : > { %v8163_v60 = vmax.f32 %v8117_v7, 0.0  ;;  %v8065_v63 = vadd.f32 %v7972_v31, %v7661_v14  ;;  %v11390_v40 = vpop.f32.mrf.mxu1 }
 0x670   : > { %v7571_v2 = vpop.f32.mrf.mxu0 }
 0x671   : > { %v9138_v28 = vpack.c.bf16 %v8163_v60, %v8162_v47  ;;  %v7662_v41 = vadd.f32 %v7571_v2, %v15388_v21  ;;  %v7975_v20 = vpop.f32.mrf.mxu1  ;;  %v8118_v6 = vadd.f32 %v15479_v61, %v8065_v63 }
 0x672   : > { %v11283_v5 = vpop.f32.mrf.mxu0 }
 0x673   : > { %9188 = vst [vmem:[%s15489_s11 + $0x70] sm:$0xff] %v9138_v28   ;;  %v8066_v1 = vadd.f32 %v7975_v20, %v7662_v41  ;;  %v11391_v32 = vpop.f32.mrf.mxu1  ;;  %v8164_v55 = vmax.f32 %v8118_v6, 0.0 }
 0x674   : > { %v7576_v17 = vpop.f32.mrf.mxu0 }
 0x675   : > { %v8119_v57 = vadd.f32 %v15479_v61, %v8066_v1  ;;  %v7663_v42 = vadd.f32 %v7576_v17, %v15396_v33  ;;  %v7980_v27 = vpop.f32.mrf.mxu1 }
 0x676   : > { %v11286_v12 = vpop.f32.mrf.mxu0 }
 0x677   : > { %v8165_v34 = vmax.f32 %v8119_v57, 0.0  ;;  %v8067_v25 = vadd.f32 %v7980_v27, %v7663_v42  ;;  %v11394_v29 = vpop.f32.mrf.mxu1 }
 0x678   : > { %v7579_v21 = vpop.f32.mrf.mxu0 }
 0x679   : > { %v9143_v49 = vpack.c.bf16 %v8165_v34, %v8164_v55  ;;  %v7664_v36 = vadd.f32 %v7579_v21, %v15982_v9  ;;  %v7983_v62 = vpop.f32.mrf.mxu1  ;;  %v8120_v30 = vadd.f32 %v15479_v61, %v8067_v25 }
 0x67a   : > { %v11287_v52 = vpop.f32.mrf.mxu0 }
 0x67b   : > { %9189 = vst [vmem:[%s15489_s11 + $0x78] sm:$0xff] %v9143_v49   ;;  %v8068_v4 = vadd.f32 %v7983_v62, %v7664_v36  ;;  %v11395_v26 = vpop.f32.mrf.mxu1  ;;  %v8166_v38 = vmax.f32 %v8120_v30, 0.0 }
 0x67c   : > { %v7584_v16 = vpop.f32.mrf.mxu0 }
 0x67d   : > { %v8121_v33 = vadd.f32 %v15479_v61, %v8068_v4  ;;  %v7665_v0 = vadd.f32 %v7584_v16, %v15983_v43  ;;  %v7988_v8 = vpop.f32.mrf.mxu1 }
 0x67e   : > { %v11290_v54 = vpop.f32.mrf.mxu0 }
 0x67f   : > { %v8167_v46 = vmax.f32 %v8121_v33, 0.0  ;;  %v8069_v3 = vadd.f32 %v7988_v8, %v7665_v0  ;;  %v11398_v56 = vpop.f32.mrf.mxu1 }
 0x680   : > { %v7587_v59 = vpop.f32.mrf.mxu0 }
 0x681   : > { %v9148_v15 = vpack.c.bf16 %v8167_v46, %v8166_v38  ;;  %v7666_v58 = vadd.f32 %v7587_v59, %v15984_v45  ;;  %v7991_v44 = vpop.f32.mrf.mxu1  ;;  %v8122_v51 = vadd.f32 %v15479_v61, %v8069_v3 }
 0x682   : > { %v11291_v53 = vpop.f32.mrf.mxu0 }
 0x683   : > { %9190 = vst [vmem:[%s15489_s11 + $0x80] sm:$0xff] %v9148_v15   ;;  %v8070_v24 = vadd.f32 %v7991_v44, %v7666_v58  ;;  %v11399_v48 = vpop.f32.mrf.mxu1  ;;  %v8168_v60 = vmax.f32 %v8122_v51, 0.0 }
 0x684   : > { %v7592_v7 = vpop.f32.mrf.mxu0 }
 0x685   : > { %v8123_v14 = vadd.f32 %v15479_v61, %v8070_v24  ;;  %v7667_v31 = vadd.f32 %v7592_v7, %v15432_v22  ;;  %v7996_v35 = vpop.f32.mrf.mxu1 }
 0x686   : > { %v11294_v47 = vpop.f32.mrf.mxu0 }
 0x687   : > { %v8169_v63 = vmax.f32 %v8123_v14, 0.0  ;;  %v8071_v40 = vadd.f32 %v7996_v35, %v7667_v31  ;;  %v11402_v2 = vpop.f32.mrf.mxu1 }
 0x688   : > { %v7595_v28 = vpop.f32.mrf.mxu0 }
 0x689   : > { %v9153_v41 = vpack.c.bf16 %v8169_v63, %v8168_v60  ;;  %v7668_v20 = vadd.f32 %v7595_v28, %v15439_v10  ;;  %v7999_v5 = vpop.f32.mrf.mxu1  ;;  %v8124_v1 = vadd.f32 %v15479_v61, %v8071_v40 }
 0x68a   : > { %v11295_v6 = vpop.f32.mrf.mxu0 }
 0x68b   : > { %9191 = vst [vmem:[%s15489_s11 + $0x88] sm:$0xff] %v9153_v41   ;;  %v8072_v32 = vadd.f32 %v7999_v5, %v7668_v20  ;;  %v11403_v17 = vpop.f32.mrf.mxu1  ;;  %v8170_v55 = vmax.f32 %v8124_v1, 0.0 }
 0x68c   : > { %v7600_v57 = vpop.f32.mrf.mxu0 }
 0x68d   : > { %v8125_v22 = vadd.f32 %v15479_v61, %v8072_v32  ;;  %v7669_v42 = vadd.f32 %v7600_v57, %v15446_v13  ;;  %v8004_v27 = vpop.f32.mrf.mxu1 }
 0x68e   : > { %v11298_v12 = vpop.f32.mrf.mxu0 }
 0x68f   : > { %v8171_v34 = vmax.f32 %v8125_v22, 0.0  ;;  %v8073_v25 = vadd.f32 %v8004_v27, %v7669_v42  ;;  %v11406_v29 = vpop.f32.mrf.mxu1 }
 0x690   : > { %v7603_v10 = vpop.f32.mrf.mxu0 }
 0x691   : > { %v9158_v21 = vpack.c.bf16 %v8171_v34, %v8170_v55  ;;  %v7670_v49 = vadd.f32 %v7603_v10, %v15451_v37  ;;  %v8007_v9 = vpop.f32.mrf.mxu1  ;;  %v8126_v62 = vadd.f32 %v15479_v61, %v8073_v25 }
 0x692   : > { %v11299_v36 = vpop.f32.mrf.mxu0 }
 0x693   : > { %9192 = vst [vmem:[%s15489_s11 + $0x90] sm:$0xff] %v9158_v21   ;;  %v8074_v52 = vadd.f32 %v8007_v9, %v7670_v49  ;;  %v11407_v30 = vpop.f32.mrf.mxu1  ;;  %v8172_v43 = vmax.f32 %v8126_v62, 0.0  ;;  %v8412_v21 = vld [vmem:[%s15489_s11 + $0xb4] sm:$0x1] }
 0x694   : > { %v7608_v4 = vpop.f32.mrf.mxu0 }
 0x695   : > { %v8127_v13 = vadd.f32 %v15479_v61, %v8074_v52  ;;  %v7671_v26 = vadd.f32 %v7608_v4, %v15458_v23  ;;  %v8012_v16 = vpop.f32.mrf.mxu1 }
 0x696   : > { %v11302_v33 = vpop.f32.mrf.mxu0 }
 0x697   : > { %v8173_v0 = vmax.f32 %v8127_v13, 0.0  ;;  %v8075_v8 = vadd.f32 %v8012_v16, %v7671_v26  ;;  %v11410_v54 = vpop.f32.mrf.mxu1 }
 0x698   : > { %v7611_v37 = vpop.f32.mrf.mxu0 }
 0x699   : > { %v9163_v38 = vpack.c.bf16 %v8173_v0, %v8172_v43  ;;  %v7672_v46 = vadd.f32 %v7611_v37, %v15461_v11  ;;  %v8015_v3 = vpop.f32.mrf.mxu1  ;;  %v8128_v59 = vadd.f32 %v15479_v61, %v8075_v8 }
 0x69a   : > { %v11303_v56 = vpop.f32.mrf.mxu0 }
 0x69b   : > { %9193 = vst [vmem:[%s15489_s11 + $0x98] sm:$0xff] %v9163_v38   ;;  %v8076_v15 = vadd.f32 %v8015_v3, %v7672_v46  ;;  %v11411_v45 = vpop.f32.mrf.mxu1  ;;  %v8174_v24 = vmax.f32 %v8128_v59, 0.0 }
 0x69c   : > { %v7616_v58 = vpop.f32.mrf.mxu0 }
 0x69d   : > { %v8129_v23 = vadd.f32 %v15479_v61, %v8076_v15  ;;  %v7673_v44 = vadd.f32 %v7616_v58, %v15464_v19  ;;  %v8020_v53 = vpop.f32.mrf.mxu1 }
 0x69e   : > { %v11306_v51 = vpop.f32.mrf.mxu0 }
 0x69f   : > { %v8175_v48 = vmax.f32 %v8129_v23, 0.0  ;;  %v8077_v7 = vadd.f32 %v8020_v53, %v7673_v44  ;;  %v11414_v14 = vpop.f32.mrf.mxu1 }
 0x6a0   : > { %v7619_v11 = vpop.f32.mrf.mxu0 }
 0x6a1   : > { %v9168_v31 = vpack.c.bf16 %v8175_v48, %v8174_v24  ;;  %v7674_v35 = vadd.f32 %v7619_v11, %v15467_v18  ;;  %v8023_v47 = vpop.f32.mrf.mxu1  ;;  %v8130_v63 = vadd.f32 %v15479_v61, %v8077_v7 }
 0x6a2   : > { %v11307_v60 = vpop.f32.mrf.mxu0 }
 0x6a3   : > { %9194 = vst [vmem:[%s15489_s11 + $0xa0] sm:$0xff] %v9168_v31   ;;  %v8078_v40 = vadd.f32 %v8023_v47, %v7674_v35  ;;  %v11415_v2 = vpop.f32.mrf.mxu1  ;;  %v8176_v6 = vmax.f32 %v8130_v63, 0.0 }
 0x6a4   : > { %v7624_v28 = vpop.f32.mrf.mxu0 }
 0x6a5   : > { %v8131_v19 = vadd.f32 %v15479_v61, %v8078_v40  ;;  %v7675_v41 = vadd.f32 %v7624_v28, %v15470_v50  ;;  %v8028_v20 = vpop.f32.mrf.mxu1 }
 0x6a6   : > { %v11310_v5 = vpop.f32.mrf.mxu0 }
 0x6a7   : > { %v8177_v1 = vmax.f32 %v8131_v19, 0.0  ;;  %v8079_v32 = vadd.f32 %v8028_v20, %v7675_v41  ;;  %v11418_v18 = vpop.f32.mrf.mxu1 }
 0x6a8   : > { %v7627_v17 = vpop.f32.mrf.mxu0 }
 0x6a9   : > { %v9173_v57 = vpack.c.bf16 %v8177_v1, %v8176_v6  ;;  %v8132_v22 = vadd.f32 %v15479_v61, %v8079_v32  ;;  %v7676_v42 = vadd.f32 %v7627_v17, %v15473_v39  ;;  %v8031_v27 = vpop.f32.mrf.mxu1 }
 0x6aa   : > { %v11311_v12 = vpop.f32.mrf.mxu0 }
 0x6ab   : > { %9195 = vst [vmem:[%s15489_s11 + $0xa8] sm:$0xff] %v9173_v57   ;;  %v8178_v55 = vmax.f32 %v8132_v22, 0.0  ;;  %v8080_v50 = vadd.f32 %v8031_v27, %v7676_v42  ;;  %v11419_v34 = vpop.f32.mrf.mxu1 }
 0x6ad   : > { %v9063_v25 = vpack.c.bf16 %v8178_v55, %v8178_v55  ;;  %v8133_v29 = vadd.f32 %v15479_v61, %v8080_v50 }
 0x6af   : > { %8408 = vst [vmem:[%s15489_s11 + $0xb0] sm:$0xf] %v9063_v25  ;;  %v8179_v10 = vmax.f32 %v8133_v29, 0.0 }
 0x6b1   : > { %v9064_v49 = vpack.c.bf16 %v8179_v10, %v8179_v10 }
 0x6b3   : > { %v8413_v9 = vsel %vm8411_vm10, %v9064_v49, %v8412_v21 }
 0x6b4   : > { %8414 = vst [vmem:[%s15489_s11 + $0xb4] sm:$0x1] %v8413_v9 }
 0x6b5 PF: > { %s13_s12 = sadd.s32 1, %s11758_s12  }
 0x6b6   : > { %p10_p4 = scmp.ge.s32.totalorder %s13_s12, 4  }
 0x6b8   :  { %12 = sbr.rel (!%p10_p4) target bundleno = 1 (0x1), region = 77 }

// kernel: modified_resnet_forward.4
= control target key start
LH: loop header
LB: loop body
LE: loop exit
PB: predicated region body
PF: predicated region fallthrough
CT: control target
= control target key end

     0   :  { %s805_s6 = smov 0   ;;  %s1156_s0 = inlined_call_operand.vmem [shape: bf16[2,4,9,9,128], index: 0, kind: input, shape index: {}]   ;;  %s1157_s1 = inlined_call_operand.vmem [shape: bf16[2,8,8,128], index: 1, kind: output, shape index: {}]  }
   0x1 LB: > { %s684_s7 = sadd.s32 4294967295, %s793_s6   ;;  %p688_p0 = scmp.ge.s32.totalorder %s793_s6, 1  ;;  %s793_s6 = sphi %s805_s6, %s11_s6  }
   0x2   : > { %p87_p1 = scmp.lt.s32.totalorder %s793_s6, 3 }
   0x4   : > { %p88_p2 = pnand %p688_p0, %p87_p1 }
   0x5   : > { %p107_p3 = scmp.lt.s32.totalorder (!%p88_p2), %s684_s7, 1 }
   0x6   : > { %91 = sbr.rel (%p88_p2) target bundleno = 97 (0x61), region = 24 }
   0xb   : > { %s1161_s7 = smov (!%p107_p3, %s684_s7), 1  ;;  %vm150_vm0 = vsmask.f32 3328  ;;  %vm151_vm1 = vsmask.f32 7440 }
   0xc   : > { %s778_s8 = smul.u32 288, %s1161_s7  ;;  %vm900_vm2 = vmor %vm150_vm0, %vm151_vm1  ;;  %s750_s12 = sshll.u32 %s1161_s7, 5 }
   0xd   : > { %s116_s15 = scalar_lea.vmem %s1157_s1, %s750_s12 }
   0xe   : > { %s819_s11 = scalar_lea.vmem %s1156_s0, %s778_s8 }
   0xf   : > { %v822_v0 = vld [vmem:[%s819_s11 + $0x48] sm:$0xf]  ;;  %v825_v1 = vld [vmem:[%s819_s11] sm:$0xf]  ;;  %v831_v3 = vld [vmem:[%s819_s11 + $0x10] sm:$0xf] }
  0x10   : > { %v828_v2 = vld [vmem:[%s819_s11 + $0x8] sm:$0xf]  ;;  %v834_v4 = vld [vmem:[%s819_s11 + $0x18] sm:$0xf]  ;;  %v837_v5 = vld [vmem:[%s819_s11 + $0x50] sm:$0xf]  ;;  %v134_v17 = vmax.bf16 %v822_v0, %v825_v1 }
  0x11   : > { %v840_v6 = vld [vmem:[%s819_s11 + $0x58] sm:$0xf]  ;;  %v843_v7 = vld [vmem:[%s819_s11 + $0x60] sm:$0xf]  ;;  %v849_v9 = vld [vmem:[%s819_s11 + $0x68] sm:$0xf]  ;;  %v135_v18 = vmax.bf16 %v837_v5, %v828_v2 }
  0x12   : > { %v846_v8 = vld [vmem:[%s819_s11 + $0x20] sm:$0xf]  ;;  %v852_v10 = vld [vmem:[%s819_s11 + $0x70] sm:$0xf]  ;;  %v855_v11 = vld [vmem:[%s819_s11 + $0x78] sm:$0xf]  ;;  %v136_v19 = vmax.bf16 %v840_v6, %v831_v3  ;;  %v137_v20 = vmax.bf16 %v843_v7, %v834_v4 }
  0x13   : > { %v858_v12 = vld [vmem:[%s819_s11 + $0x28] sm:$0xf]  ;;  %v861_v13 = vld [vmem:[%s819_s11 + $0x80] sm:$0xf]  ;;  %v142_v14 = vld [vmem:[%s819_s11 + $0x4] sm:$0x1]  ;;  %v138_v22 = vmax.bf16 %v849_v9, %v846_v8 }
  0x14   : > { %v865_v15 = vld [vmem:[%s819_s11 + $0x30] sm:$0xf]  ;;  %v868_v16 = vld [vmem:[%s819_s11 + $0x38] sm:$0xf]  ;;  %v143_v21 = vld [vmem:[%s819_s11 + $0xc] sm:$0x1]  ;;  %v139_v23 = vmax.bf16 %v852_v10, %v858_v12 }
  0x15   : > { %v140_v24 = vmax.bf16 %v855_v11, %v865_v15  ;;  %v141_v25 = vmax.bf16 %v861_v13, %v868_v16  ;;  %v154_v26 = vshrl.u32 %v825_v1, 16  ;;  %v157_v27 = vshll.u32 %v825_v1, 16  ;;  %v144_v30 = vld [vmem:[%s819_s11 + $0x14] sm:$0x1]  ;;  %v145_v35 = vld [vmem:[%s819_s11 + $0x1c] sm:$0x1] }
  0x16   : > { %v163_v28 = vshll.u32 %v142_v14, 16  ;;  %v168_v29 = vshrl.u32 %v828_v2, 16  ;;  %v171_v31 = vshll.u32 %v828_v2, 16  ;;  %v177_v32 = vshll.u32 %v143_v21, 16  ;;  %v146_v48 = vld [vmem:[%s819_s11 + $0x24] sm:$0x1] }
  0x17   : > { %v182_v33 = vshrl.u32 %v831_v3, 16  ;;  %v185_v34 = vshll.u32 %v831_v3, 16  ;;  %v156_v36 = vrot.slane %v154_v26, 4  ;;  %v159_v37 = vrot.slane %v157_v27, 5  ;;  %v147_v58 = vld [vmem:[%s819_s11 + $0x2c] sm:$0x1] }
  0x18   : > { %v165_v38 = vrot.slane %v163_v28, 5  ;;  %v170_v39 = vrot.slane %v168_v29, 4  ;;  %v173_v40 = vrot.slane %v171_v31, 5  ;;  %v179_v41 = vrot.slane %v177_v32, 5  ;;  %v148_v27 = vld [vmem:[%s819_s11 + $0x34] sm:$0x1] }
  0x19   : > { %v184_v42 = vrot.slane %v182_v33, 4  ;;  %v187_v43 = vrot.slane %v185_v34, 5  ;;  %v160_v44 = vor.u32 %v159_v37, %v156_v36  ;;  %v191_v45 = vshll.u32 %v144_v30, 16  ;;  %v149_v36 = vld [vmem:[%s819_s11 + $0x3c] sm:$0x1] }
  0x1a   : > { %v196_v46 = vshrl.u32 %v834_v4, 16  ;;  %v199_v47 = vshll.u32 %v834_v4, 16  ;;  %v174_v50 = vor.u32 %v173_v40, %v170_v39  ;;  %v205_v52 = vshll.u32 %v145_v35, 16  ;;  %v948_v5 = vld [vmem:[%s819_s11 + $0xb0] sm:$0xf] }
  0x1b   : > { %v188_v51 = vor.u32 %v187_v43, %v184_v42  ;;  %v210_v53 = vshrl.u32 %v846_v8, 16  ;;  %v161_v54 = vrot.slane %v160_v44, 4  ;;  %v193_v55 = vrot.slane %v191_v45, 5  ;;  %v709_v6 = vld [vmem:[%s819_s11 + $0xe0] sm:$0xf] }
  0x1c   : > { %v198_v56 = vrot.slane %v196_v46, 4  ;;  %v201_v57 = vrot.slane %v199_v47, 5  ;;  %v175_v59 = vrot.slane %v174_v50, 4  ;;  %v207_v61 = vrot.slane %v205_v52, 5  ;;  %v710_v4 = vld [vmem:[%s819_s11 + $0xe8] sm:$0xf] }
  0x1d   : > { %v189_v60 = vrot.slane %v188_v51, 4  ;;  %v212_v62 = vrot.slane %v210_v53, 4  ;;  %v166_v63 = vsel %vm900_vm2, %v161_v54, %v165_v38  ;;  %v213_v21 = vshll.u32 %v846_v8, 16  ;;  %v711_v7 = vld [vmem:[%s819_s11 + $0xf0] sm:$0xf] }
  0x1e   : > { %v202_v14 = vor.u32 %v201_v57, %v198_v56  ;;  %v219_v26 = vshll.u32 %v146_v48, 16  ;;  %v180_v28 = vsel %vm900_vm2, %v175_v59, %v179_v41  ;;  %v224_v30 = vshrl.u32 %v858_v12, 16  ;;  %v712_v10 = vld [vmem:[%s819_s11 + $0xf8] sm:$0xf]  ;;  %v717_v11 = vld [vmem:[%s819_s11 + $0x9c] sm:$0x1] }
  0x1f   : > { %v194_v29 = vsel %vm900_vm2, %v189_v60, %v193_v55  ;;  %v227_v31 = vshll.u32 %v858_v12, 16  ;;  %v215_v33 = vrot.slane %v213_v21, 5  ;;  %v233_v35 = vshll.u32 %v147_v58, 16  ;;  %v700_v58 = vld [vmem:[%s819_s11 + $0x90] sm:$0xf] }
  0x20   : > { %v203_v32 = vrot.slane %v202_v14, 4  ;;  %v221_v34 = vrot.slane %v219_v26, 5  ;;  %v226_v37 = vrot.slane %v224_v30, 4  ;;  %v238_v39 = vshrl.u32 %v865_v15, 16  ;;  %v701_v14 = vld [vmem:[%s819_s11 + $0x98] sm:$0xf] }
  0x21   : > { %v229_v38 = vrot.slane %v227_v31, 5  ;;  %v241_v40 = vshll.u32 %v865_v15, 16  ;;  %v216_v42 = vor.u32 %v215_v33, %v212_v62  ;;  %v235_v43 = vrot.slane %v233_v35, 5  ;;  %v934_v21 = vld [vmem:[%s819_s11 + $0xa0] sm:$0xf] }
  0x22   : > { %v208_v41 = vsel %vm900_vm2, %v203_v32, %v207_v61  ;;  %v247_v44 = vshll.u32 %v148_v27, 16  ;;  %v240_v46 = vrot.slane %v238_v39, 4  ;;  %v252_v48 = vshrl.u32 %v868_v16, 16  ;;  %v937_v26 = vld [vmem:[%s819_s11 + $0xa8] sm:$0xf] }
  0x23   : > { %v230_v45 = vor.u32 %v229_v38, %v226_v37  ;;  %v243_v47 = vrot.slane %v241_v40, 5  ;;  %v217_v50 = vrot.slane %v216_v42, 4  ;;  %v255_v52 = vshll.u32 %v868_v16, 16  ;;  %v713_v12 = vld [vmem:[%s819_s11 + $0x100] sm:$0xf] }
  0x24   : > { %v249_v51 = vrot.slane %v247_v44, 5  ;;  %v261_v53 = vshll.u32 %v149_v36, 16  ;;  %v254_v56 = vrot.slane %v252_v48, 4  ;;  %v273_v57 = vmax.bf16 %v166_v63, %v134_v17  ;;  %v716_v32 = vld [vmem:[%s819_s11 + $0x94] sm:$0x1] }
  0x25   : > { %v231_v54 = vrot.slane %v230_v45, 4  ;;  %v244_v55 = vor.u32 %v243_v47, %v240_v46  ;;  %v222_v59 = vsel %vm900_vm2, %v217_v50, %v221_v34  ;;  %v257_v60 = vrot.slane %v255_v52, 5  ;;  %v976_v33 = vld [vmem:[%s819_s11 + $0xc0] sm:$0xf]  ;;  %v714_v34 = vld [vmem:[%s819_s11 + $0x108] sm:$0xf] }
  0x26   : > { %v263_v61 = vrot.slane %v261_v53, 5  ;;  %v274_v62 = vmax.bf16 %v180_v28, %v135_v18  ;;  %v275_v17 = vmax.bf16 %v194_v29, %v136_v19  ;;  %v276_v2 = vmax.bf16 %v208_v41, %v137_v20  ;;  %v708_v18 = vld [vmem:[%s819_s11 + $0xd8] sm:$0xf]  ;;  %v718_v48 = vld [vmem:[%s819_s11 + $0xa4] sm:$0x1] }
  0x27   : > { %v236_v0 = vsel %vm900_vm2, %v231_v54, %v235_v43  ;;  %v245_v1 = vrot.slane %v244_v55, 4  ;;  %v258_v63 = vor.u32 %v257_v60, %v254_v56  ;;  %v277_v27 = vmax.bf16 %v222_v59, %v138_v22  ;;  %v963_v20 = vld [vmem:[%s819_s11 + $0xb8] sm:$0xf]  ;;  %v715_v43 = vld [vmem:[%s819_s11 + $0x110] sm:$0xf] }
  0x28   : > { %v278_v28 = vmax.bf16 %v236_v0, %v139_v23  ;;  %v290_v3 = vmax.bf16 %v700_v58, %v273_v57  ;;  %v291_v29 = vmax.bf16 %v701_v14, %v274_v62  ;;  %v292_v8 = vmax.bf16 %v934_v21, %v275_v17  ;;  %v719_v57 = vld [vmem:[%s819_s11 + $0xac] sm:$0x1] }
  0x29   : > { %v250_v19 = vsel %vm900_vm2, %v245_v1, %v249_v51  ;;  %v293_v9 = vmax.bf16 %v937_v26, %v276_v2  ;;  %v259_v22 = vrot.slane %v258_v63, 4  ;;  %v294_v30 = vmax.bf16 %v948_v5, %v277_v27  ;;  %v720_v2 = vld [vmem:[%s819_s11 + $0xb4] sm:$0x1] }
  0x2a   : > { %v279_v23 = vmax.bf16 %v250_v19, %v140_v24  ;;  %v295_v31 = vmax.bf16 %v963_v20, %v278_v28  ;;  %v979_v35 = vmax.bf16 %v708_v18, %v290_v3  ;;  %v981_v36 = vmax.bf16 %v709_v6, %v291_v29  ;;  %v991_v24 = vld [vmem:[%s819_s11 + $0xc8] sm:$0xf]  ;;  %v721_v19 = vld [vmem:[%s819_s11 + $0xbc] sm:$0x1] }
  0x2b   : > { %v983_v37 = vmax.bf16 %v710_v4, %v292_v8  ;;  %v985_v38 = vmax.bf16 %v711_v7, %v293_v9  ;;  %v264_v15 = vsel %vm900_vm2, %v259_v22, %v263_v61  ;;  %v994_v40 = vmax.bf16 %v712_v10, %v294_v30 }
  0x2c   : > { %v296_v39 = vmax.bf16 %v976_v33, %v279_v23  ;;  %v996_v41 = vmax.bf16 %v713_v12, %v295_v31  ;;  %v280_v42 = vmax.bf16 %v264_v15, %v141_v25  ;;  %v324_v44 = vshrl.u32 %v700_v58, 16 }
  0x2d   : > { %v327_v45 = vshll.u32 %v700_v58, 16  ;;  %v333_v46 = vshll.u32 %v716_v32, 16  ;;  %v338_v50 = vshrl.u32 %v701_v14, 16  ;;  %v341_v51 = vshll.u32 %v701_v14, 16 }
  0x2e   : > { %v1002_v47 = vmax.bf16 %v714_v34, %v296_v39  ;;  %v347_v52 = vshll.u32 %v717_v11, 16  ;;  %v297_v53 = vmax.bf16 %v991_v24, %v280_v42  ;;  %v326_v54 = vrot.slane %v324_v44, 4  ;;  %v722_v34 = vld [vmem:[%s819_s11 + $0xc4] sm:$0x1] }
  0x2f   : > { %v329_v55 = vrot.slane %v327_v45, 5  ;;  %v335_v56 = vrot.slane %v333_v46, 5  ;;  %v340_v59 = vrot.slane %v338_v50, 4  ;;  %v343_v13 = vrot.slane %v341_v51, 5 }
  0x30   : > { %v1007_v16 = vrot.slane %v347_v52, 5  ;;  %v352_v25 = vshrl.u32 %v934_v21, 16  ;;  %v1010_v58 = vmax.bf16 %v715_v43, %v297_v53  ;;  %v355_v61 = vshll.u32 %v934_v21, 16 }
  0x31   : > { %v330_v60 = vor.u32 %v329_v55, %v326_v54  ;;  %v361_v62 = vshll.u32 %v718_v48, 16  ;;  %v344_v14 = vor.u32 %v343_v13, %v340_v59  ;;  %v366_v1 = vshrl.u32 %v937_v26, 16 }
  0x32   : > { %v354_v0 = vrot.slane %v352_v25, 4  ;;  %v369_v17 = vshll.u32 %v937_v26, 16  ;;  %v357_v63 = vrot.slane %v355_v61, 5  ;;  %v375_v28 = vshll.u32 %v719_v57, 16  ;;  %v724_v61 = vld [vmem:[%s819_s11 + $0x8] sm:$0xf] }
  0x33   : > { %v331_v18 = vrot.slane %v330_v60, 4  ;;  %v363_v27 = vrot.slane %v361_v62, 5  ;;  %v345_v3 = vrot.slane %v344_v14, 4  ;;  %v368_v6 = vrot.slane %v366_v1, 4  ;;  %v725_v1 = vld [vmem:[%s819_s11 + $0x10] sm:$0xf] }
  0x34   : > { %v371_v4 = vrot.slane %v369_v17, 5  ;;  %v380_v7 = vshrl.u32 %v948_v5, 16  ;;  %v358_v29 = vor.u32 %v357_v63, %v354_v0  ;;  %v377_v8 = vrot.slane %v375_v28, 5  ;;  %v1054_v28 = vld [vmem:[%s819_s11 + $0x28] sm:$0xf] }
  0x35   : > { %v336_v21 = vsel %vm900_vm2, %v331_v18, %v335_v56  ;;  %v383_v26 = vshll.u32 %v948_v5, 16  ;;  %v350_v9 = vsel %vm900_vm2, %v345_v3, %v1007_v16  ;;  %v389_v22 = vshll.u32 %v720_v2, 16  ;;  %v723_v5 = vld [vmem:[%s819_s11 + $0xcc] sm:$0x1] }
  0x36   : > { %v372_v10 = vor.u32 %v371_v4, %v368_v6  ;;  %v382_v12 = vrot.slane %v380_v7, 4  ;;  %v359_v23 = vrot.slane %v358_v29, 4  ;;  %v394_v31 = vshrl.u32 %v963_v20, 16 }
  0x37   : > { %v385_v30 = vrot.slane %v383_v26, 5  ;;  %v397_v32 = vshll.u32 %v963_v20, 16  ;;  %v391_v15 = vrot.slane %v389_v22, 5  ;;  %v403_v39 = vshll.u32 %v721_v19, 16  ;;  %v733_v19 = vld [vmem:[%s819_s11 + $0x58] sm:$0xf] }
  0x38   : > { %v373_v11 = vrot.slane %v372_v10, 4  ;;  %v408_v42 = vshrl.u32 %v976_v33, 16  ;;  %v364_v43 = vsel %vm900_vm2, %v359_v23, %v363_v27  ;;  %v396_v45 = vrot.slane %v394_v31, 4  ;;  %v1051_v27 = vld [vmem:[%s819_s11 + $0x20] sm:$0xf] }
  0x39   : > { %v386_v44 = vor.u32 %v385_v30, %v382_v12  ;;  %v399_v46 = vrot.slane %v397_v32, 5  ;;  %v405_v50 = vrot.slane %v403_v39, 5  ;;  %v411_v20 = vshll.u32 %v976_v33, 16  ;;  %v735_v26 = vld [vmem:[%s819_s11 + $0x68] sm:$0xf] }
  0x3a   : > { %v378_v48 = vsel %vm900_vm2, %v373_v11, %v377_v8  ;;  %v410_v51 = vrot.slane %v408_v42, 4  ;;  %v417_v54 = vshll.u32 %v722_v34, 16  ;;  %v422_v55 = vshrl.u32 %v991_v24, 16  ;;  %v740_v22 = vld [vmem:[%s819_s11 + $0xc] sm:$0x1] }
  0x3b   : > { %v387_v52 = vrot.slane %v386_v44, 4  ;;  %v400_v53 = vor.u32 %v399_v46, %v396_v45  ;;  %v413_v56 = vrot.slane %v411_v20, 5  ;;  %v425_v57 = vshll.u32 %v991_v24, 16  ;;  %v1074_v30 = vld [vmem:[%s819_s11 + $0x38] sm:$0xf] }
  0x3c   : > { %v431_v59 = vshll.u32 %v723_v5, 16  ;;  %v443_v13 = vmax.bf16 %v336_v21, %v979_v35  ;;  %v419_v33 = vrot.slane %v417_v54, 5  ;;  %v424_v60 = vrot.slane %v422_v55, 4  ;;  %v1043_v35 = vld [vmem:[%s819_s11 + $0x18] sm:$0xf] }
  0x3d   : > { %v392_v16 = vsel %vm900_vm2, %v387_v52, %v391_v15  ;;  %v401_v25 = vrot.slane %v400_v53, 4  ;;  %v414_v62 = vor.u32 %v413_v56, %v410_v51  ;;  %v427_v14 = vrot.slane %v425_v57, 5  ;;  %v1061_v21 = vld [vmem:[%s819_s11 + $0x30] sm:$0xf]  ;;  %v741_v11 = vld [vmem:[%s819_s11 + $0x14] sm:$0x1] }
  0x3e   : > { %v433_v0 = vrot.slane %v431_v59, 5  ;;  %v444_v24 = vmax.bf16 %v350_v9, %v981_v36  ;;  %v445_v2 = vmax.bf16 %v364_v43, %v983_v37  ;;  %v446_v18 = vmax.bf16 %v378_v48, %v985_v38  ;;  %v732_v36 = vld [vmem:[%s819_s11 + $0x50] sm:$0xf]  ;;  %v734_v37 = vld [vmem:[%s819_s11 + $0x60] sm:$0xf] }
  0x3f   : > { %v406_v17 = vsel %vm900_vm2, %v401_v25, %v405_v50  ;;  %v447_v63 = vmax.bf16 %v392_v16, %v994_v40  ;;  %v415_v3 = vrot.slane %v414_v62, 4  ;;  %v428_v6 = vor.u32 %v427_v14, %v424_v60  ;;  %v736_v9 = vld [vmem:[%s819_s11 + $0x70] sm:$0xf]  ;;  %v737_v39 = vld [vmem:[%s819_s11 + $0x78] sm:$0xf] }
  0x40   : > { %v448_v4 = vmax.bf16 %v406_v17, %v996_v41  ;;  %v460_v7 = vmax.bf16 %v724_v61, %v443_v13  ;;  %v461_v38 = vmax.bf16 %v725_v1, %v444_v24  ;;  %v462_v40 = vmax.bf16 %v1043_v35, %v445_v2  ;;  %v738_v42 = vld [vmem:[%s819_s11 + $0x80] sm:$0xf]  ;;  %v742_v51 = vld [vmem:[%s819_s11 + $0x1c] sm:$0x1]  ;;  %v743_v59 = vld [vmem:[%s819_s11 + $0x24] sm:$0x1] }
  0x41   : > { %v463_v29 = vmax.bf16 %v1051_v27, %v446_v18  ;;  %v464_v8 = vmax.bf16 %v1054_v28, %v447_v63  ;;  %v420_v41 = vsel %vm900_vm2, %v415_v3, %v419_v33  ;;  %v429_v10 = vrot.slane %v428_v6, 4  ;;  %v1095_v45 = vld [vmem:[%s819_s11 + $0x40] sm:$0xf]  ;;  %v744_v2 = vld [vmem:[%s819_s11 + $0x2c] sm:$0x1] }
  0x42   : > { %v465_v12 = vmax.bf16 %v1061_v21, %v448_v4  ;;  %v449_v23 = vmax.bf16 %v420_v41, %v1002_v47  ;;  %v1076_v31 = vmax.bf16 %v732_v36, %v460_v7  ;;  %v1078_v32 = vmax.bf16 %v733_v19, %v461_v38 }
  0x43   : > { %v1080_v34 = vmax.bf16 %v734_v37, %v462_v40  ;;  %v434_v15 = vsel %vm900_vm2, %v429_v10, %v433_v0  ;;  %v1087_v5 = vmax.bf16 %v735_v26, %v463_v29  ;;  %v1089_v43 = vmax.bf16 %v736_v9, %v464_v8  ;;  %v745_v37 = vld [vmem:[%s819_s11 + $0x34] sm:$0x1] }
  0x44   : > { %v494_v47 = vshrl.u32 %v724_v61, 16  ;;  %v1092_v44 = vmax.bf16 %v434_v15, %v1010_v58  ;;  %v466_v46 = vmax.bf16 %v1074_v30, %v449_v23  ;;  %v497_v48 = vshll.u32 %v724_v61, 16  ;;  %v746_v23 = vld [vmem:[%s819_s11 + $0x3c] sm:$0x1] }
  0x45   : > { %v503_v50 = vshll.u32 %v740_v22, 16  ;;  %v508_v52 = vshrl.u32 %v725_v1, 16  ;;  %v511_v53 = vshll.u32 %v725_v1, 16  ;;  %v517_v54 = vshll.u32 %v741_v11, 16 }
  0x46   : > { %v496_v20 = vrot.slane %v494_v47, 4  ;;  %v467_v55 = vmax.bf16 %v1095_v45, %v1092_v44  ;;  %v1101_v56 = vmax.bf16 %v737_v39, %v465_v12  ;;  %v1103_v57 = vmax.bf16 %v738_v42, %v466_v46 }
  0x47   : > { %v499_v58 = vrot.slane %v497_v48, 5  ;;  %v505_v13 = vrot.slane %v503_v50, 5  ;;  %v510_v16 = vrot.slane %v508_v52, 4  ;;  %v513_v25 = vrot.slane %v511_v53, 5 }
  0x48   : > { %v522_v33 = vshrl.u32 %v1043_v35, 16  ;;  %v519_v61 = vrot.slane %v517_v54, 5  ;;  %v525_v62 = vshll.u32 %v1043_v35, 16  ;;  %v531_v14 = vshll.u32 %v742_v51, 16 }
  0x49   : > { %v500_v60 = vor.u32 %v499_v58, %v496_v20  ;;  %v514_v0 = vor.u32 %v513_v25, %v510_v16  ;;  %v536_v1 = vshrl.u32 %v1051_v27, 16  ;;  %v539_v17 = vshll.u32 %v1051_v27, 16 }
  0x4a   : > { %v524_v24 = vrot.slane %v522_v33, 4  ;;  %v527_v63 = vrot.slane %v525_v62, 5  ;;  %v533_v36 = vrot.slane %v531_v14, 5  ;;  %v545_v3 = vshll.u32 %v743_v59, 16 }
  0x4b   : > { %v501_v18 = vrot.slane %v500_v60, 4  ;;  %v515_v6 = vrot.slane %v514_v0, 4  ;;  %v538_v4 = vrot.slane %v536_v1, 4  ;;  %v541_v7 = vrot.slane %v539_v17, 5  ;;  %v739_v0 = vld [vmem:[%s819_s11 + $0x88] sm:$0xf] }
  0x4c   : > { %v550_v19 = vshrl.u32 %v1054_v28, 16  ;;  %v528_v38 = vor.u32 %v527_v63, %v524_v24  ;;  %v547_v40 = vrot.slane %v545_v3, 5  ;;  %v553_v27 = vshll.u32 %v1054_v28, 16  ;;  %v747_v28 = vld [vmem:[%s819_s11 + $0x44] sm:$0x1] }
  0x4d   : > { %v506_v35 = vsel %vm900_vm2, %v501_v18, %v505_v13  ;;  %v520_v29 = vsel %vm900_vm2, %v515_v6, %v519_v61  ;;  %v542_v8 = vor.u32 %v541_v7, %v538_v4  ;;  %v559_v9 = vshll.u32 %v744_v2, 16 }
  0x4e   : > { %v552_v26 = vrot.slane %v550_v19, 4  ;;  %v529_v41 = vrot.slane %v528_v38, 4  ;;  %v555_v10 = vrot.slane %v553_v27, 5  ;;  %v564_v12 = vshrl.u32 %v1061_v21, 16 }
  0x4f   : > { %v567_v22 = vshll.u32 %v1061_v21, 16  ;;  %v543_v11 = vrot.slane %v542_v8, 4  ;;  %v561_v15 = vrot.slane %v559_v9, 5  ;;  %v573_v39 = vshll.u32 %v745_v37, 16 }
  0x50   : > { %v578_v42 = vshrl.u32 %v1074_v30, 16  ;;  %v534_v47 = vsel %vm900_vm2, %v529_v41, %v533_v36  ;;  %v556_v46 = vor.u32 %v555_v10, %v552_v26  ;;  %v566_v48 = vrot.slane %v564_v12, 4 }
  0x51   : > { %v569_v50 = vrot.slane %v567_v22, 5  ;;  %v548_v51 = vsel %vm900_vm2, %v543_v11, %v547_v40  ;;  %v575_v20 = vrot.slane %v573_v39, 5  ;;  %v581_v52 = vshll.u32 %v1074_v30, 16 }
  0x52   : > { %v580_v21 = vrot.slane %v578_v42, 4  ;;  %v557_v53 = vrot.slane %v556_v46, 4  ;;  %v587_v58 = vshll.u32 %v746_v23, 16  ;;  %v592_v59 = vshrl.u32 %v1095_v45, 16 }
  0x53   : > { %v570_v54 = vor.u32 %v569_v50, %v566_v48  ;;  %v583_v13 = vrot.slane %v581_v52, 5  ;;  %v595_v16 = vshll.u32 %v1095_v45, 16  ;;  %v601_v25 = vshll.u32 %v747_v28, 16 }
  0x54   : > { %v613_v33 = vmax.bf16 %v506_v35, %v1076_v31  ;;  %v562_v60 = vsel %vm900_vm2, %v557_v53, %v561_v15  ;;  %v589_v62 = vrot.slane %v587_v58, 5  ;;  %v594_v14 = vrot.slane %v592_v59, 4 }
  0x55   : > { %v571_v61 = vrot.slane %v570_v54, 4  ;;  %v584_v30 = vor.u32 %v583_v13, %v580_v21  ;;  %v597_v24 = vrot.slane %v595_v16, 5  ;;  %v603_v1 = vrot.slane %v601_v25, 5 }
  0x56   : > { %v614_v17 = vmax.bf16 %v520_v29, %v1078_v32  ;;  %v615_v31 = vmax.bf16 %v534_v47, %v1080_v34  ;;  %v616_v18 = vmax.bf16 %v548_v51, %v1087_v5  ;;  %v617_v63 = vmax.bf16 %v562_v60, %v1089_v43 }
  0x57   : > { %v576_v2 = vsel %vm900_vm2, %v571_v61, %v575_v20  ;;  %v585_v36 = vrot.slane %v584_v30, 4  ;;  %v598_v3 = vor.u32 %v597_v24, %v594_v14  ;;  %v484_v32 = vmax.bf16 %v739_v0, %v467_v55 }
  0x58   : > { %v618_v6 = vmax.bf16 %v576_v2, %v1101_v56  ;;  %v771_v4 = vcombine.low %v613_v33, %v614_v17  ;;  %v772_v7 = vcombine.low %v615_v31, %v616_v18 }
  0x59   : > { %v590_v19 = vsel %vm900_vm2, %v585_v36, %v589_v62  ;;  %v599_v37 = vrot.slane %v598_v3, 4 }
  0x5a   : > { %755 = vst [vmem:[%s116_s15] sm:$0xff] %v771_v4   ;;  %v774_v34 = vcombine.low %v617_v63, %v618_v6  ;;  %v619_v5 = vmax.bf16 %v590_v19, %v1103_v57  ;;  %773 = vst [vmem:[%s116_s15 + $0x8] sm:$0xff] %v772_v7  }
  0x5b   : > { %v604_v43 = vsel %vm900_vm2, %v599_v37, %v603_v1 }
  0x5c   : > { %775 = vst [vmem:[%s116_s15 + $0x10] sm:$0xff] %v774_v34   ;;  %v620_v56 = vmax.bf16 %v604_v43, %v484_v32 }
  0x5e   : > { %v776_v35 = vcombine.low %v619_v5, %v620_v56 }
  0x60   : > { %777 = vst [vmem:[%s116_s15 + $0x18] sm:$0xff] %v776_v35  }
  0x61 PF: > { %s11_s6 = sadd.s32 1, %s793_s6  }
  0x62   : > { %p8_p4 = scmp.ge.s32.totalorder %s11_s6, 4  }
  0x64   :  { %10 = sbr.rel (!%p8_p4) target bundleno = 1 (0x1), region = 59 }

// kernel: modified_resnet_forward.5
= control target key start
LH: loop header
LB: loop body
LE: loop exit
PB: predicated region body
PF: predicated region fallthrough
CT: control target
= control target key end

     0   :  { %15 = vsyncpa [#allocation3], 0  ;;  %s5613_s0 = inlined_call_operand.vmem [shape: bf16[2,128,128], index: 0, kind: input, shape index: {}]   ;;  %s5614_s1 = inlined_call_operand.vmem [shape: f32[128,1], index: 1, kind: input, shape index: {}]   ;;  %s5615_s2 = inlined_call_operand.vmem [shape: bf16[128,256], index: 2, kind: input, shape index: {}]   ;;  %s5616_s3 = inlined_call_operand.vmem [shape: f32[1,256], index: 3, kind: input, shape index: {}]   ;;  %s5617_s4 = inlined_call_operand.vmem [shape: bf16[9,128,128], index: 4, kind: input, shape index: {}]   ;;  %s5618_s5 = inlined_call_operand.vmem [shape: f32[1,128], index: 5, kind: input, shape index: {}]   ;;  %s5619_s6 = inlined_call_operand.vmem [shape: bf16[128,128], index: 6, kind: input, shape index: {}]   ;;  %s5620_s7 = inlined_call_operand.vmem [shape: f32[1,128], index: 7, kind: input, shape index: {}]   ;;  %s5621_s8 = inlined_call_operand.vmem [shape: bf16[128,128], index: 8, kind: input, shape index: {}]   ;;  %s5622_s9 = inlined_call_operand.vmem [shape: f32[1,128], index: 9, kind: input, shape index: {}]   ;;  %s5623_s10 = inlined_call_operand.hbm [shape: f32[2,1,128], index: 10, kind: output, shape index: {}]  }
   0x1   :  { %17 = vsyncpa [#allocation3 + $0x1], 0  ;;  %s4270_s13 = smov 0   ;;  %s4272_s14 = smov 0  }
   0x2   :  { %s4274_s15 = smov 0   ;;  %s4276_s16 = smov 0  }
   0x3 LB: > { %s4291_s17 = sadd.s32 4294967295, %s4209_s16   ;;  %s3098_s18 = sadd.s32 4294967294, %s4209_s16   ;;  %s4209_s16 = sphi %s4276_s16, %s5631_s16   ;;  %s4205_s15 = sphi %s4274_s15, %s5630_s15   ;;  %s4201_s14 = sphi %s4272_s14, %s5629_s14   ;;  %s4197_s13 = sphi %s4270_s13, %s5628_s13  }
   0x4   : > { %s4295_s19 = sadd.s32 1, %s4209_s16   ;;  %s245_s20 = sadd.s32 1, %s4205_s15 }
   0x5   : > { %s242_s21 = ssub.s32 %s4209_s16, %s4295_s19  ;;  %p255_p0 = scmp.ne.s32.totalorder %s4205_s15, %s4201_s14 }
   0x6   : > { %p243_p1 = scmp.eq.s32.totalorder %s242_s21, 0  ;;  %p256_p2 = scmp.eq.s32.totalorder %s4291_s17, 1 }
   0x7   : > { %p261_p3 = scmp.ne.s32.totalorder %s4201_s14, %s4197_s13  ;;  %p262_p4 = scmp.eq.s32.totalorder %s3098_s18, 1 }
   0x8   : > { %s4306_s22 = scalar_select %p243_p1, %s4205_s15, %s245_s20  }
   0x9   : > { %p4308_p5 = por %p256_p2, %p255_p0  ;;  %p4312_p6 = por %p262_p4, %p261_p3 }
   0xa   : > { %5624 = sst [smem:[#allocation5_spill]] %s4306_s22  ;;  %p3101_p7 = scmp.ge.s32.totalorder %s4209_s16, 1 }
   0xb   : > { %p315_p8 = scmp.lt.s32.totalorder %s4209_s16, 3 }
   0xd   : > { %p316_p9 = pnand %p3101_p7, %p315_p8 }
   0xe   : > { %p352_p10 = scmp.lt.s32.totalorder (!%p316_p9), %s4291_s17, 1  ;;  %s350_s20 = sand.u32 (!%p316_p9), 1, %s4201_s14  }
   0xf   : > { %319 = sbr.rel (%p316_p9) target bundleno = 1184 (0x4a0), region = 60  ;;  %s3346_s26 = sshll.u32 (!%p316_p9), %s4291_s17, 4 }
  0x10   : > { %s351_s27 = scalar_lea.vmem (!%p316_p9), [#allocation2], %s350_s20  ;;  %s3031_s29 = scalar_lea.sflag (!%p316_p9), [#allocation3], %s350_s20 }
  0x11   : > { %s3043_s28 = sshll.u32 (!%p316_p9), %s351_s27, 4  ;;  %s5574_s28 = int_to_ptr.vmem [resolvable:$true] %s3043_s28 }
  0x12   : > { %s4149_s30 = scalar_lea.vmem (!%p316_p9), %s5574_s28, 16 }
  0x13   : > { %p4150_p11 = scmp.ne.s32.totalorder (!%p316_p9), %s5574_s28, %s4149_s30 }
  0x14   : > { %v4029_v0 = vld [vmem:[%s5615_s2 + $0x74] ss:$8 sps:$4 sm:$0xff]   ;;  %v4031_v1 = vld [vmem:[%s5615_s2 + $0x70] ss:$8 sps:$4 sm:$0xff]   ;;  %v4211_v2 = vmov 0   ;;  %s353_s11 = scalar_select %p352_p10, %s4291_s17, 1  ;;  %v392_v57 = vlaneseq }
  0x15   : > { %562 = vmatprep.mubr.bf16.mxu0 %v4211_v2  ;;  %4027 = vset.pattern.permute.xlu0 %v4211_v2  ;;  %v4032_v3 = vld [vmem:[%s5615_s2 + $0x64] ss:$8 sps:$4 sm:$0xff]   ;;  %v4034_v4 = vld [vmem:[%s5615_s2 + $0x60] ss:$8 sps:$4 sm:$0xff]   ;;  %v4035_v5 = vld [vmem:[%s5615_s2 + $0x54] ss:$8 sps:$4 sm:$0xff]   ;;  %p4151_p12 = pnand %p4150_p11, %p4308_p5 }
  0x16   : > { %530 = vmatprep.subr.bf16.mxu0 %v4029_v0  ;;  %4028 = vset.pattern.permute.xlu1 %v4211_v2  ;;  %s3349_s25 = sshll.u32 %s353_s11, 6  ;;  %v4037_v6 = vld [vmem:[%s5615_s2 + $0x50] ss:$8 sps:$4 sm:$0xff]   ;;  %v4038_v7 = vld [vmem:[%s5615_s2 + $0x44] ss:$8 sps:$4 sm:$0xff]   ;;  %v4212_v22 = vmov 0.0  }
  0x17   : > { %531 = vmatpush1.bf16.msra.mxu0 %v4031_v1  ;;  %s4347_s12 = scalar_lea.vmem %s5613_s0, %s3349_s25  ;;  %v4040_v8 = vld [vmem:[%s5615_s2 + $0x40] ss:$8 sps:$4 sm:$0xff]   ;;  %v4041_v9 = vld [vmem:[%s5615_s2 + $0x34] ss:$8 sps:$4 sm:$0xff]   ;;  %v4043_v10 = vld [vmem:[%s5615_s2 + $0x30] ss:$8 sps:$4 sm:$0xff]   ;;  %3969 = vmatprep.subr.bf16.mxu1 %v4212_v22  ;;  %s5572_s25 = scalar_lea.hbm %s5623_s10, %s3346_s26 }
  0x18   : > { %532 = vmatprep.subr.bf16.mxu0 %v4032_v3  ;;  %v4044_v11 = vld [vmem:[%s5615_s2 + $0x24] ss:$8 sps:$4 sm:$0xff]   ;;  %v662_v12 = vld [vmem:[%s5614_s1 + $0x30] sm:$0xff]  ;;  %v663_v14 = vld [vmem:[%s5614_s1 + $0x38] sm:$0xff]  ;;  %v393_v59 = vshrl.u32 %v392_v57, 7  ;;  %vm4213_vm0 = vmmov 0   ;;  %p4152_p13 = pneg %p4151_p12 }
  0x19   : > { %704 = vperm.xlu0 %4027, %v662_v12   ;;  %v664_v13 = vld [vmem:[%s5614_s1 + $0x40] sm:$0xff]  ;;  %v665_v16 = vld [vmem:[%s5614_s1 + $0x48] sm:$0xff]  ;;  %v4047_v17 = vld [vmem:[%s5615_s2 + $0x14] ss:$8 sps:$4 sm:$0xff]   ;;  %3537 = vmatprep.mubr.msk.bf16.mxu1 %vm4213_vm0, %v4212_v22  ;;  %vm2331_vm1 = vcmask 1044480   ;;  %vm1175_vm4 = vcmask 1046528  }
  0x1a   : > { %714 = vperm.xlu1 %4028, %v664_v13   ;;  %v4046_v15 = vld [vmem:[%s5615_s2 + $0x20] ss:$8 sps:$4 sm:$0xff]   ;;  %v4049_v19 = vld [vmem:[%s5615_s2 + $0x10] ss:$8 sps:$4 sm:$0xff]   ;;  %v4050_v21 = vld [vmem:[%s5615_s2 + $0x4] ss:$8 sps:$4 sm:$0xff]  }
  0x1b   : > { %533 = vmatpush1.bf16.msra.mxu0 %v4034_v4  ;;  %v656_v18 = vld [vmem:[%s5614_s1] sm:$0xff]  ;;  %v657_v20 = vld [vmem:[%s5614_s1 + $0x8] sm:$0xff]  ;;  %v658_v23 = vld [vmem:[%s5614_s1 + $0x10] sm:$0xff]  ;;  %v398_v60 = vsub.s32 1, %v393_v59  ;;  %vm816_vm2 = vsmask.f32 7424 }
  0x1c   : > { %534 = vmatprep.subr.bf16.mxu0 %v4035_v5  ;;  %v4052_v24 = vld [vmem:[%s5615_s2] ss:$8 sps:$4 sm:$0xff]   ;;  %v659_v25 = vld [vmem:[%s5614_s1 + $0x18] sm:$0xff]  ;;  %v666_v27 = vld [vmem:[%s5614_s1 + $0x50] sm:$0xff]  ;;  %vm1549_vm3 = vsmask.f32 2304 }
  0x1d   : > { %709 = vperm.xlu0 %4027, %v663_v14   ;;  %v4053_v26 = vld [vmem:[%s4347_s12] sm:$0xff]   ;;  %v667_v28 = vld [vmem:[%s5614_s1 + $0x58] sm:$0xff]  ;;  %v4062_v31 = vld [vmem:[%s5617_s4 + $0x70] sm:$0xff]   ;;  %vm2125_vm5 = vsmask.f32 5376  ;;  %vm1362_vm6 = vcmask 1042432  }
  0x1e   : > { %719 = vperm.xlu1 %4028, %v665_v16   ;;  %v4061_v29 = vld [vmem:[%s5617_s4 + $0x78] sm:$0xff]   ;;  %v668_v30 = vld [vmem:[%s5614_s1 + $0x60] sm:$0xff]  ;;  %v669_v32 = vld [vmem:[%s5614_s1 + $0x68] sm:$0xff]  ;;  %vm1938_vm7 = vcmask 1045504   ;;  %vm1750_vm8 = vcmask 1041408   ;;  %vm2913_vm9 = vcmask 1043456  }
  0x1f   : > { %535 = vmatpush1.bf16.msra.mxu0 %v4037_v6  ;;  %3977 = vmatpush3.bf16.msra.mxu1 %v4061_v29  ;;  %v4054_v33 = vld [vmem:[%s4347_s12 + $0x8] sm:$0xff]   ;;  %v660_v34 = vld [vmem:[%s5614_s1 + $0x20] sm:$0xff]  ;;  %v670_v36 = vld [vmem:[%s5614_s1 + $0x70] sm:$0xff]  ;;  %s4214_s17 = smov [#allocation2]  }
  0x20   : > { %536 = vmatprep.subr.bf16.mxu0 %v4038_v7  ;;  %3970 = vmatprep.subr.bf16.mxu1 %v4212_v22  ;;  %v661_v35 = vld [vmem:[%s5614_s1 + $0x28] sm:$0xff]  ;;  %v671_v37 = vld [vmem:[%s5614_s1 + $0x78] sm:$0xff]  ;;  %v4055_v38 = vld [vmem:[%s4347_s12 + $0x10] sm:$0xff]   ;;  %v394_v7 = vsub.s32 0, %v393_v59  ;;  %s4153_s18 = sshll.u32 %s4214_s17, 4  ;;  %s4154_s18 = int_to_ptr.vmem [resolvable:$false] %s4153_s18 }
  0x21   : > { %674 = vperm.xlu0 %4027, %v656_v18   ;;  %v2798_v39 = vld [vmem:[%s5614_s1 + $0xb] sm:$0xff]  ;;  %v2799_v40 = vld [vmem:[%s5614_s1 + $0x13] sm:$0xff]  ;;  %v2800_v41 = vld [vmem:[%s5614_s1 + $0x1b] sm:$0xff]  ;;  %s4155_s11 = scalar_lea.vmem %s4154_s18, 32  ;;  %p4156_p0 = scmp.lt.s32.totalorder %s5574_s28, %s4154_s18 }
  0x22   : > { %679 = vperm.xlu1 %4028, %v657_v20   ;;  %v2801_v42 = vld [vmem:[%s5614_s1 + $0x23] sm:$0xff]  ;;  %v4056_v43 = vld [vmem:[%s4347_s12 + $0x18] sm:$0xff]   ;;  %v2802_v44 = vld [vmem:[%s5614_s1 + $0x2b] sm:$0xff]  ;;  %p4157_p1 = scmp.lt.s32.totalorder %s4155_s11, %s4149_s30 }
  0x23   : > { %537 = vmatpush1.bf16.msra.mxu0 %v4040_v8  ;;  %3978 = vmatpush3.bf16.msra.mxu1 %v4062_v31  ;;  %v2803_v45 = vld [vmem:[%s5614_s1 + $0x33] sm:$0xff]  ;;  %v2804_v46 = vld [vmem:[%s5614_s1 + $0x3b] sm:$0xff]  ;;  %v2805_v47 = vld [vmem:[%s5614_s1 + $0x43] sm:$0xff] }
  0x24   : > { %538 = vmatprep.subr.bf16.mxu0 %v4041_v9  ;;  %3971 = vmatprep.subr.bf16.mxu1 %v4212_v22  ;;  %v4057_v48 = vld [vmem:[%s4347_s12 + $0x20] sm:$0xff]   ;;  %v2806_v49 = vld [vmem:[%s5614_s1 + $0x4b] sm:$0xff]  ;;  %v2807_v50 = vld [vmem:[%s5614_s1 + $0x53] sm:$0xff]  ;;  %p4158_p2 = por %p4157_p1, %p4156_p0 }
  0x25   : > { %684 = vperm.xlu0 %4027, %v658_v23   ;;  %v2808_v51 = vld [vmem:[%s5614_s1 + $0x5b] sm:$0xff]  ;;  %v2809_v52 = vld [vmem:[%s5614_s1 + $0x63] sm:$0xff]  ;;  %v2810_v54 = vld [vmem:[%s5614_s1 + $0x6b] sm:$0xf] }
  0x26   : > { %689 = vperm.xlu1 %4028, %v659_v25   ;;  %v4058_v53 = vld [vmem:[%s4347_s12 + $0x28] sm:$0xff]   ;;  %v4059_v55 = vld [vmem:[%s4347_s12 + $0x30] sm:$0xff]   ;;  %v4060_v56 = vld [vmem:[%s4347_s12 + $0x38] sm:$0xff]   ;;  %p4159_p3 = pnand %p4158_p2, %p4152_p13 }
  0x27   : > { %539 = vmatpush1.bf16.msra.mxu0 %v4043_v10  ;;  %v4063_v58 = vld [vmem:[%s5617_s4 + $0x68] sm:$0xff]   ;;  %v390_v61 = vld [vmem:[%s5616_s3] sm:$0x3]  ;;  %v4065_v0 = vld [vmem:[%s5617_s4 + $0x58] sm:$0xff]  }
  0x28   : > { %540 = vmatprep.subr.bf16.mxu0 %v4044_v11  ;;  %3979 = vmatpush3.bf16.msra.mxu1 %v4063_v58  ;;  %v4064_v62 = vld [vmem:[%s5617_s4 + $0x60] sm:$0xff]   ;;  %v4501_v63 = vrot.slane %v390_v61, %v398_v60  ;;  %v4066_v1 = vld [vmem:[%s5617_s4 + $0x50] sm:$0xff]   ;;  %v4537_v9 = vrot.slane %v390_v61, %v394_v7 }
  0x29   : > { %724 = vperm.xlu0 %4027, %v666_v27   ;;  %3972 = vmatprep.subr.bf16.mxu1 %v4212_v22  ;;  %v4068_v3 = vld [vmem:[%s5617_s4 + $0x40] sm:$0xff]  }
  0x2a   : > { %729 = vperm.xlu1 %4028, %v667_v28  }
  0x2b   : > { %541 = vmatpush1.bf16.msra.mxu0 %v4046_v15 }
  0x2c   : > { %542 = vmatprep.subr.bf16.mxu0 %v4047_v17  ;;  %3980 = vmatpush3.bf16.msra.mxu1 %v4064_v62 }
  0x2d   : > { %734 = vperm.xlu0 %4027, %v668_v30   ;;  %3973 = vmatprep.subr.bf16.mxu1 %v4212_v22 }
  0x2e   : > { %739 = vperm.xlu1 %4028, %v669_v32  }
  0x2f   : > { %543 = vmatpush1.bf16.msra.mxu0 %v4049_v19 }
  0x30   : > { %544 = vmatprep.subr.bf16.mxu0 %v4050_v21  ;;  %3981 = vmatpush3.bf16.msra.mxu1 %v4065_v0 }
  0x31   : > { %694 = vperm.xlu0 %4027, %v660_v34   ;;  %3974 = vmatprep.subr.bf16.mxu1 %v4212_v22 }
  0x32   : > { %699 = vperm.xlu1 %4028, %v661_v35  }
  0x33   : > { %545 = vmatpush1.bf16.msra.mxu0 %v4052_v24 }
  0x34   : > { %3509 = vmatprep.subr.bf16.mxu0 %v4212_v22  ;;  %3982 = vmatpush3.bf16.msra.mxu1 %v4066_v1 }
  0x35   : > { %744 = vperm.xlu0 %4027, %v670_v36   ;;  %3975 = vmatprep.subr.bf16.mxu1 %v4212_v22 }
  0x36   : > { %563 = vmatmul.mubr.bf16.vlgmr.msra.gmra.mxu0 %v4053_v26  ;;  %749 = vperm.xlu1 %4028, %v671_v37  }
  0x37   : > { %571 = vmatprep.mubr.bf16.mxu0 %v4211_v2  ;;  %3510 = vmatpush3.bf16.msra.mxu0 %v4061_v29 }
  0x38   : > { %3511 = vmatprep.subr.bf16.mxu0 %v4212_v22 }
  0x39   : > { %2826 = vperm.xlu0 %4027, %v2798_v39  }
  0x3a   : > { %2831 = vperm.xlu1 %4028, %v2799_v40  }
  0x3b   : > { %3512 = vmatpush3.bf16.msra.mxu0 %v4062_v31 }
  0x3c   : > { %3513 = vmatprep.subr.bf16.mxu0 %v4212_v22 }
  0x3d   : > { %2836 = vperm.xlu0 %4027, %v2800_v41  }
  0x3e   : > { %572 = vmatmul.mubr.bf16.gmra.mxu0 %v4054_v33  ;;  %2841 = vperm.xlu1 %4028, %v2801_v42  }
  0x3f   : > { %581 = vmatprep.mubr.bf16.mxu0 %v4211_v2  ;;  %3514 = vmatpush3.bf16.msra.mxu0 %v4063_v58 }
  0x40   : > { %3515 = vmatprep.subr.bf16.mxu0 %v4212_v22 }
  0x41   : > { %2846 = vperm.xlu0 %4027, %v2802_v44  }
  0x42   : > { %2851 = vperm.xlu1 %4028, %v2803_v45  }
  0x43   : > { %3516 = vmatpush3.bf16.msra.mxu0 %v4064_v62 }
  0x44   : > { %3517 = vmatprep.subr.bf16.mxu0 %v4212_v22 }
  0x45   : > { %2856 = vperm.xlu0 %4027, %v2804_v46  }
  0x46   : > { %582 = vmatmul.mubr.bf16.gmra.mxu0 %v4055_v38  ;;  %2861 = vperm.xlu1 %4028, %v2805_v47  }
  0x47   : > { %591 = vmatprep.mubr.bf16.mxu0 %v4211_v2  ;;  %3518 = vmatpush3.bf16.msra.mxu0 %v4065_v0 }
  0x48   : > { %3519 = vmatprep.subr.bf16.mxu0 %v4212_v22 }
  0x49   : > { %2866 = vperm.xlu0 %4027, %v2806_v49  }
  0x4a   : > { %2871 = vperm.xlu1 %4028, %v2807_v50  }
  0x4b   : > { %3520 = vmatpush3.bf16.msra.mxu0 %v4066_v1 }
  0x4c   : > { %3521 = vmatprep.subr.bf16.mxu0 %v4212_v22 }
  0x4d   : > { %2876 = vperm.xlu0 %4027, %v2808_v51  }
  0x4e   : > { %592 = vmatmul.mubr.bf16.gmra.mxu0 %v4056_v43  ;;  %2881 = vperm.xlu1 %4028, %v2809_v52  }
  0x4f   : > { %601 = vmatprep.mubr.bf16.mxu0 %v4211_v2 }
  0x51   : > { %2886 = vperm.xlu0 %4027, %v2810_v54  }
  0x56   : > { %602 = vmatmul.mubr.bf16.gmra.mxu0 %v4057_v48 }
  0x57   : > { %611 = vmatprep.mubr.bf16.mxu0 %v4211_v2 }
  0x5e   : > { %612 = vmatmul.mubr.bf16.gmra.mxu0 %v4058_v53 }
  0x5f   : > { %621 = vmatprep.mubr.bf16.mxu0 %v4211_v2 }
  0x66   : > { %622 = vmatmul.mubr.bf16.gmra.mxu0 %v4059_v55 }
  0x67   : > { %631 = vmatprep.mubr.bf16.mxu0 %v4211_v2  ;;  %v4067_v2 = vld [vmem:[%s5617_s4 + $0x48] sm:$0xff]  }
  0x68   : > { %3522 = vmatpush3.bf16.msra.mxu0 %v4067_v2  ;;  %3983 = vmatpush3.bf16.msra.mxu1 %v4067_v2 }
  0x69   : > { %3523 = vmatprep.subr.bf16.mxu0 %v4212_v22  ;;  %3976 = vmatprep.subr.bf16.mxu1 %v4212_v22 }
  0x6c   : > { %3524 = vmatpush3.bf16.msra.mxu0 %v4068_v3  ;;  %3984 = vmatpush3.bf16.msra.mxu1 %v4068_v3 }
  0x6d   : > { %3597 = vmatprep.subr.bf16.mxu0 %v4212_v22  ;;  %3553 = vmatprep.subr.bf16.mxu1 %v4212_v22 }
  0x6e   : > { %632 = vmatmul.mubr.bf16.gmra.mxu0 %v4060_v56 }
  0x6f   : > { %3525 = vmatprep.mubr.msk.bf16.mxu0 %vm4213_vm0, %v4212_v22 }
  0x94   : > { %v4529_v4 = vpop.permute.xlu0 %704 }
  0x95   : > { %v4531_v5 = vpop.permute.xlu1 %714 }
  0x98   : > { %v4533_v6 = vpop.permute.xlu0 %709 }
  0x99   : > { %v4535_v8 = vpop.permute.xlu1 %719 }
  0x9c   : > { %v675_v10 = vpop.permute.xlu0 %674 }
  0x9d   : > { %v680_v11 = vpop.permute.xlu1 %679 }
  0xa0   : > { %v685_v16 = vpop.permute.xlu0 %684 }
  0xa1   : > { %v690_v19 = vpop.permute.xlu1 %689 }
  0xa4   : > { %v4542_v28 = vpop.permute.xlu0 %724 }
  0xa5   : > { %v4548_v32 = vpop.permute.xlu1 %729 }
  0xa8   : > { %v4553_v47 = vpop.permute.xlu0 %734 }
  0xa9   : > { %v4558_v52 = vpop.permute.xlu1 %739 }
  0xac   : > { %v695_v7 = vpop.permute.xlu0 %694 }
  0xf6   : > { %v564_v12 = vpop.f32.mrf.mxu0 }
  0xf7   : > { %v565_v13 = vadd.f32 %v564_v12, %v4537_v9 }
  0xf8   : > { %v566_v14 = vpop.f32.mrf.mxu0 }
  0xf9   : > { %v640_v17 = vmax.f32 %v565_v13, 0.0 }
  0xfa   : > { %v567_v15 = vpop.f32.mrf.mxu0 }
  0xfb   : > { %v568_v18 = vadd.f32 %v567_v15, %v4537_v9  ;;  %v752_v24 = vmul.f32 %v675_v10, %v640_v17  ;;  %v4069_v15 = vld [vmem:[%s5617_s4 + $0xb8] sm:$0xff]  }
  0xfc   : > { %v569_v20 = vpop.f32.mrf.mxu0 }
  0xfd   : > { %v641_v21 = vmax.f32 %v568_v18, 0.0  ;;  %v570_v30 = vadd.f32 %v569_v20, %v4501_v63 }
  0xfe   : > { %v573_v23 = vpop.f32.mrf.mxu0 }
  0xff   : > { %v753_v25 = vmul.f32 %v680_v11, %v641_v21  ;;  %v574_v26 = vadd.f32 %v573_v23, %v4537_v9  ;;  %v700_v11 = vpop.permute.xlu1 %699 }
 0x100   : > { %v575_v27 = vpop.f32.mrf.mxu0 }
 0x101   : > { %v4544_v29 = vpack.c.bf16 %v753_v25, %v752_v24  ;;  %v576_v31 = vadd.f32 %v575_v27, %v4501_v63  ;;  %v642_v33 = vmax.f32 %v574_v26, 0.0 }
 0x102   : > { %v577_v34 = vpop.f32.mrf.mxu0 }
 0x103   : > { %v776_v35 = vpack.c.bf16 %v576_v31, %v570_v30  ;;  %v578_v36 = vadd.f32 %v577_v34, %v4537_v9  ;;  %v818_v37 = vshrl.u32 %v4544_v29, 16  ;;  %v820_v39 = vshll.u32 %v4544_v29, 16  ;;  %v4070_v31 = vld [vmem:[%s5617_s4 + $0xb0] sm:$0xff]  }
 0x104   : > { %v579_v38 = vpop.f32.mrf.mxu0  ;;  %v754_v43 = vmul.f32 %v685_v16, %v642_v33 }
 0x105   : > { %v2700_v40 = vunpack.c.l.bf16 %v776_v35  ;;  %v2701_v41 = vunpack.c.h.bf16 %v776_v35  ;;  %v643_v42 = vmax.f32 %v578_v36, 0.0  ;;  %v1550_v45 = vrot.slane %v818_v37, 5 }
 0x106   : > { %v583_v44 = vpop.f32.mrf.mxu0  ;;  %v1551_v46 = vrot.slane %v820_v39, 6  ;;  %v580_v56 = vadd.f32 %v579_v38, %v4501_v63  ;;  %v822_v60 = vrot.slane %v820_v39, 1 }
 0x107   : > { %v2727_v48 = vrot.slane %v2700_v40, 3  ;;  %v4555_v49 = vrot.slane %v2701_v41, 3  ;;  %v755_v50 = vmul.f32 %v690_v19, %v643_v42  ;;  %v584_v51 = vadd.f32 %v583_v44, %v4537_v9  ;;  %v4071_v44 = vld [vmem:[%s5617_s4 + $0xa8] sm:$0xff]  }
 0x108   : > { %v585_v53 = vpop.f32.mrf.mxu0  ;;  %v1552_v54 = vor.u32 %v1551_v46, %v1550_v45  ;;  %v823_v13 = vor.u32 %v822_v60, %v818_v37 }
 0x109   : > { %v4560_v55 = vpack.c.bf16 %v755_v50, %v754_v43  ;;  %v586_v57 = vadd.f32 %v585_v53, %v4501_v63  ;;  %v4566_v58 = vsel %vm2331_vm1, %v2727_v48, %v4555_v49  ;;  %v644_v61 = vmax.f32 %v584_v51, 0.0 }
 0x10a   : > { %v587_v59 = vpop.f32.mrf.mxu0 }
 0x10b   : > { %v4568_v62 = vpack.c.bf16 %v586_v57, %v580_v56  ;;  %v588_v0 = vadd.f32 %v587_v59, %v4537_v9  ;;  %v4572_v1 = vshll.u32 %v4560_v55, 16  ;;  %v4575_v3 = vshrl.u32 %v4560_v55, 16 }
 0x10c   : > { %v589_v2 = vpop.f32.mrf.mxu0  ;;  %v756_v18 = vmul.f32 %v695_v7, %v644_v61 }
 0x10d   : > { %v645_v10 = vmax.f32 %v588_v0, 0.0  ;;  %v827_v14 = vrot.slane %v4572_v1, 1  ;;  %v1553_v16 = vrot.slane %v4575_v3, 5  ;;  %v1554_v17 = vrot.slane %v4572_v1, 6 }
 0x10e   : > { %v593_v12 = vpop.f32.mrf.mxu0  ;;  %v590_v26 = vadd.f32 %v589_v2, %v4501_v63 }
 0x10f   : > { %v757_v19 = vmul.f32 %v700_v11, %v645_v10  ;;  %v594_v20 = vadd.f32 %v593_v12, %v4537_v9  ;;  %v828_v23 = vsel %vm816_vm2, %v823_v13, %v827_v14  ;;  %v1555_v24 = vor.u32 %v1554_v17, %v1553_v16  ;;  %v4073_v17 = vld [vmem:[%s5617_s4 + $0x98] sm:$0xff]  }
 0x110   : > { %v595_v21 = vpop.f32.mrf.mxu0  ;;  %3526 = vmatmul.mubr.bf16.vlgmr.msra.gmra.mxu0 %v828_v23  ;;  %v831_v42 = vor.u32 %v4575_v3, %v827_v14 }
 0x111   : > { %v4585_v25 = vpack.c.bf16 %v757_v19, %v756_v18  ;;  %v596_v27 = vadd.f32 %v595_v21, %v4501_v63  ;;  %3598 = vmatpush3.bf16.msra.mxu0 %v4069_v15  ;;  %3529 = vmatprep.mubr.msk.bf16.mxu0 %vm4213_vm0, %v4212_v22  ;;  %v4595_v33 = vsel %vm1549_vm3, %v1552_v54, %v1555_v24  ;;  %v646_v34 = vmax.f32 %v594_v20, 0.0 }
 0x112   : > { %v597_v30 = vpop.f32.mrf.mxu0  ;;  %3599 = vmatprep.subr.bf16.mxu0 %v4212_v22 }
 0x113   : > { %v4597_v35 = vpack.c.bf16 %v596_v27, %v590_v26  ;;  %v598_v36 = vadd.f32 %v597_v30, %v4537_v9  ;;  %v4602_v37 = vshll.u32 %v4585_v25, 16  ;;  %v4605_v39 = vshrl.u32 %v4585_v25, 16 }
 0x114   : > { %v599_v38 = vpop.f32.mrf.mxu0  ;;  %v758_v48 = vmul.f32 %v4529_v4, %v646_v34  ;;  %v4072_v4 = vld [vmem:[%s5617_s4 + $0xa0] sm:$0xff]  }
 0x115   : > { %v647_v40 = vmax.f32 %v598_v36, 0.0  ;;  %3600 = vmatpush3.bf16.msra.mxu0 %v4070_v31  ;;  %v835_v43 = vrot.slane %v4602_v37, 1  ;;  %v1557_v45 = vrot.slane %v4605_v39, 5  ;;  %v1558_v46 = vrot.slane %v4602_v37, 6 }
 0x116   : > { %v603_v41 = vpop.f32.mrf.mxu0  ;;  %3601 = vmatprep.subr.bf16.mxu0 %v4212_v22  ;;  %v600_v59 = vadd.f32 %v599_v38, %v4501_v63 }
 0x117   : > { %v759_v50 = vmul.f32 %v4533_v6, %v647_v40  ;;  %v604_v51 = vadd.f32 %v603_v41, %v4537_v9  ;;  %v836_v54 = vsel %vm816_vm2, %v831_v42, %v835_v43  ;;  %v1559_v56 = vor.u32 %v1558_v46, %v1557_v45 }
 0x118   : > { %v605_v53 = vpop.f32.mrf.mxu0  ;;  %3530 = vmatmul.mubr.bf16.gmra.mxu0 %v836_v54  ;;  %v839_v15 = vor.u32 %v4605_v39, %v835_v43 }
 0x119   : > { %v4619_v57 = vpack.c.bf16 %v759_v50, %v758_v48  ;;  %v606_v60 = vadd.f32 %v605_v53, %v4501_v63  ;;  %3602 = vmatpush3.bf16.msra.mxu0 %v4071_v44  ;;  %3533 = vmatprep.mubr.msk.bf16.mxu0 %vm4213_vm0, %v4212_v22  ;;  %v4629_v6 = vsel %vm1549_vm3, %v1555_v24, %v1559_v56  ;;  %v648_v0 = vmax.f32 %v604_v51, 0.0  ;;  %v4075_v51 = vld [vmem:[%s5617_s4 + $0x38] sm:$0xff]   ;;  %v4076_v53 = vld [vmem:[%s5617_s4 + $0x88] sm:$0xff]  }
 0x11a   : > { %v607_v61 = vpop.f32.mrf.mxu0  ;;  %3603 = vmatprep.subr.bf16.mxu0 %v4212_v22 }
 0x11b   : > { %v4631_v2 = vpack.c.bf16 %v606_v60, %v600_v59  ;;  %v608_v7 = vadd.f32 %v607_v61, %v4537_v9  ;;  %v4636_v10 = vshll.u32 %v4619_v57, 16  ;;  %v4639_v12 = vshrl.u32 %v4619_v57, 16 }
 0x11c   : > { %v609_v11 = vpop.f32.mrf.mxu0  ;;  %v760_v20 = vmul.f32 %v4531_v5, %v648_v0  ;;  %v4074_v5 = vld [vmem:[%s5617_s4 + $0x90] sm:$0xff]  }
 0x11d   : > { %v649_v13 = vmax.f32 %v608_v7, 0.0  ;;  %3604 = vmatpush3.bf16.msra.mxu0 %v4072_v4  ;;  %v843_v16 = vrot.slane %v4636_v10, 1  ;;  %v1561_v18 = vrot.slane %v4639_v12, 5  ;;  %v1562_v19 = vrot.slane %v4636_v10, 6 }
 0x11e   : > { %v613_v14 = vpop.f32.mrf.mxu0  ;;  %3605 = vmatprep.subr.bf16.mxu0 %v4212_v22  ;;  %v610_v31 = vadd.f32 %v609_v11, %v4501_v63 }
 0x11f   : > { %v761_v21 = vmul.f32 %v4535_v8, %v649_v13  ;;  %v614_v23 = vadd.f32 %v613_v14, %v4537_v9  ;;  %v844_v26 = vsel %vm816_vm2, %v839_v15, %v843_v16  ;;  %v1563_v27 = vor.u32 %v1562_v19, %v1561_v18  ;;  %v4078_v15 = vld [vmem:[%s5617_s4 + $0x80] sm:$0xff]  }
 0x120   : > { %v615_v24 = vpop.f32.mrf.mxu0  ;;  %3534 = vmatmul.mubr.bf16.gmra.mxu0 %v844_v26  ;;  %v847_v48 = vor.u32 %v4639_v12, %v843_v16  ;;  %v1177_v16 = vrot.slane %v4560_v55, 1 }
 0x121   : > { %v4653_v30 = vpack.c.bf16 %v761_v21, %v760_v20  ;;  %v616_v34 = vadd.f32 %v615_v24, %v4501_v63  ;;  %3606 = vmatpush3.bf16.msra.mxu0 %v4073_v17  ;;  %3613 = vmatprep.mubr.msk.bf16.mxu0 %vm4213_vm0, %v4212_v22  ;;  %v4663_v8 = vsel %vm1549_vm3, %v1559_v56, %v1563_v27  ;;  %v650_v38 = vmax.f32 %v614_v23, 0.0 }
 0x122   : > { %v617_v36 = vpop.f32.mrf.mxu0  ;;  %3607 = vmatprep.subr.bf16.mxu0 %v4212_v22  ;;  %v1176_v24 = vrot.slane %v4544_v29, 1 }
 0x123   : > { %v4665_v40 = vpack.c.bf16 %v616_v34, %v610_v31  ;;  %v618_v41 = vadd.f32 %v617_v36, %v4537_v9  ;;  %v4670_v42 = vshll.u32 %v4653_v30, 16  ;;  %v4673_v44 = vshrl.u32 %v4653_v30, 16 }
 0x124   : > { %v619_v43 = vpop.f32.mrf.mxu0  ;;  %v762_v59 = vmul.f32 %v4542_v28, %v650_v38  ;;  %v2703_v31 = vunpack.c.h.bf16 %v4568_v62  ;;  %v1179_v36 = vrot.slane %v4585_v25, 1 }
 0x125   : > { %v651_v45 = vmax.f32 %v618_v41, 0.0  ;;  %3608 = vmatpush3.bf16.msra.mxu0 %v4074_v5  ;;  %v851_v50 = vrot.slane %v4670_v42, 1  ;;  %v1565_v54 = vrot.slane %v4673_v44, 5  ;;  %v1566_v56 = vrot.slane %v4670_v42, 6 }
 0x126   : > { %v623_v46 = vpop.f32.mrf.mxu0  ;;  %3609 = vmatprep.subr.bf16.mxu0 %v4212_v22  ;;  %v620_v13 = vadd.f32 %v619_v43, %v4501_v63  ;;  %v4079_v43 = vld [vmem:[%s5617_s4 + $0x28] sm:$0xff]  }
 0x127   : > { %v763_v60 = vmul.f32 %v4548_v32, %v651_v45  ;;  %v624_v61 = vadd.f32 %v623_v46, %v4537_v9  ;;  %v852_v0 = vsel %vm816_vm2, %v847_v48, %v851_v50  ;;  %v1567_v7 = vor.u32 %v1566_v56, %v1565_v54  ;;  %v4077_v32 = vld [vmem:[%s5617_s4 + $0x30] sm:$0xff]  }
 0x128   : > { %v625_v4 = vpop.f32.mrf.mxu0  ;;  %3538 = vmatmul.mubr.bf16.vlgmr.msra.gmra.mxu1 %v852_v0  ;;  %v855_v38 = vor.u32 %v4673_v44, %v851_v50  ;;  %v1178_v50 = vsel %vm1175_vm4, %v1176_v24, %v1177_v16  ;;  %v2705_v0 = vunpack.c.h.bf16 %v4597_v35 }
 0x129   : > { %v4690_v11 = vpack.c.bf16 %v763_v60, %v762_v59  ;;  %v626_v14 = vadd.f32 %v625_v4, %v4501_v63  ;;  %3554 = vmatpush3.bf16.msra.mxu1 %v4075_v51  ;;  %3610 = vmatpush3.bf16.msra.mxu0 %v4076_v53  ;;  %v4702_v17 = vsel %vm1549_vm3, %v1563_v27, %v1567_v7  ;;  %v652_v18 = vmax.f32 %v624_v61, 0.0  ;;  %v4086_v60 = vld [vmem:[%s5617_s4 + $0x138] sm:$0xff]  }
 0x12a   : > { %v627_v28 = vpop.f32.mrf.mxu0  ;;  %3555 = vmatprep.subr.bf16.mxu1 %v4212_v22  ;;  %3611 = vmatprep.subr.bf16.mxu0 %v4212_v22  ;;  %v2702_v27 = vunpack.c.l.bf16 %v4568_v62  ;;  %v2704_v62 = vunpack.c.l.bf16 %v4597_v35 }
 0x12b   : > { %v4704_v19 = vpack.c.bf16 %v626_v14, %v620_v13  ;;  %v628_v20 = vadd.f32 %v627_v28, %v4537_v9  ;;  %v4710_v21 = vshll.u32 %v4690_v11, 16  ;;  %3541 = vmatprep.mubr.msk.bf16.mxu1 %vm4213_vm0, %v4212_v22  ;;  %v4716_v26 = vshrl.u32 %v4690_v11, 16  ;;  %v4080_v14 = vld [vmem:[%s5617_s4 + $0x20] sm:$0xff]  }
 0x12c   : > { %v629_v23 = vpop.f32.mrf.mxu0  ;;  %v764_v48 = vmul.f32 %v4553_v47, %v652_v18  ;;  %v4740_v61 = vrot.slane %v2702_v27, 3  ;;  %v1180_v28 = vsel %vm1175_vm4, %v1177_v16, %v1179_v36  ;;  %v4770_v16 = vrot.slane %v2704_v62, 3 }
 0x12d   : > { %v653_v34 = vmax.f32 %v628_v20, 0.0  ;;  %3556 = vmatpush3.bf16.msra.mxu1 %v4077_v32  ;;  %3612 = vmatpush3.bf16.msra.mxu0 %v4078_v15  ;;  %v859_v41 = vrot.slane %v4710_v21, 1  ;;  %v1569_v45 = vrot.slane %v4716_v26, 5  ;;  %v1570_v46 = vrot.slane %v4710_v21, 6 }
 0x12e   : > { %v633_v5 = vpop.f32.mrf.mxu0  ;;  %3557 = vmatprep.subr.bf16.mxu1 %v4212_v22  ;;  %3685 = vmatprep.subr.bf16.mxu0 %v4212_v22  ;;  %v630_v53 = vadd.f32 %v629_v23, %v4501_v63  ;;  %v2126_v63 = vrot.slane %v4575_v3, 2  ;;  %v2127_v3 = vrot.slane %v4572_v1, 3  ;;  %v1181_v23 = vrot.slane %v4619_v57, 1 }
 0x12f   : > { %v765_v51 = vmul.f32 %v4558_v52, %v653_v34  ;;  %v634_v54 = vadd.f32 %v633_v5, %v4537_v9  ;;  %v860_v59 = vsel %vm816_vm2, %v855_v38, %v859_v41  ;;  %v1571_v47 = vor.u32 %v1570_v46, %v1569_v45  ;;  %v745_v38 = vpop.permute.xlu0 %744 }
 0x130   : > { %v635_v56 = vpop.f32.mrf.mxu0  ;;  %v4742_v52 = vrot.slane %v2703_v31, 3  ;;  %3614 = vmatmul.mubr.bf16.vlgmr.msra.gmra.mxu0 %v1178_v50  ;;  %3542 = vmatmul.mubr.bf16.gmra.mxu1 %v860_v59  ;;  %v863_v1 = vor.u32 %v4716_v26, %v859_v41  ;;  %v2706_v41 = vunpack.c.l.bf16 %v4631_v2  ;;  %v2707_v45 = vunpack.c.h.bf16 %v4631_v2 }
 0x131   : > { %v4744_v4 = vpack.c.bf16 %v765_v51, %v764_v48  ;;  %3558 = vmatpush3.bf16.msra.mxu1 %v4079_v43  ;;  %3617 = vmatprep.mubr.msk.bf16.mxu0 %vm4213_vm0, %v4212_v22  ;;  %v4757_v32 = vsel %vm1549_vm3, %v1567_v7, %v1571_v47  ;;  %v654_v15 = vmax.f32 %v634_v54, 0.0  ;;  %v782_v7 = vpack.c.bf16 %v630_v53, %v630_v53  ;;  %v750_v43 = vpop.permute.xlu1 %749  ;;  %v4081_v48 = vld [vmem:[%s5617_s4 + $0x18] sm:$0xff]  }
 0x132   : > { %v636_v13 = vpop.f32.mrf.mxu0  ;;  %3559 = vmatprep.subr.bf16.mxu1 %v4212_v22  ;;  %3545 = vmatprep.mubr.msk.bf16.mxu1 %vm4213_vm0, %v4212_v22  ;;  %v2708_v46 = vunpack.c.l.bf16 %v4665_v40  ;;  %v2709_v62 = vunpack.c.h.bf16 %v4665_v40  ;;  %v4792_v56 = vrot.slane %v2705_v0, 3  ;;  %v2710_v2 = vunpack.c.l.bf16 %v4704_v19 }
 0x133   : > { %v637_v35 = vadd.f32 %v636_v13, %v4537_v9  ;;  %v4765_v18 = vshll.u32 %v4744_v4, 16  ;;  %v4768_v20 = vshrl.u32 %v4744_v4, 16  ;;  %3686 = vmatpush3.bf16.msra.mxu0 %v4086_v60  ;;  %v4087_v9 = vld [vmem:[%s5617_s4 + $0x130] sm:$0xff]   ;;  %v766_v51 = vmul.f32 %v745_v38, %v654_v15  ;;  %v4089_v13 = vld [vmem:[%s5617_s4 + $0x128] sm:$0xff]  }
 0x134   : > { %v638_v24 = vpop.f32.mrf.mxu0  ;;  %3687 = vmatprep.subr.bf16.mxu0 %v4212_v22  ;;  %v2711_v59 = vunpack.c.h.bf16 %v4704_v19  ;;  %v4796_v40 = vunpack.c.l.bf16 %v782_v7  ;;  %v2128_v0 = vor.u32 %v2127_v3, %v2126_v63  ;;  %v2129_v15 = vrot.slane %v4605_v39, 2  ;;  %v4082_v7 = vld [vmem:[%s5617_s4 + $0x10] sm:$0xff]  }
 0x135   : > { %v655_v27 = vmax.f32 %v637_v35, 0.0  ;;  %v867_v31 = vrot.slane %v4765_v18, 1  ;;  %v1573_v34 = vrot.slane %v4768_v20, 5  ;;  %v1574_v5 = vrot.slane %v4765_v18, 6  ;;  %3560 = vmatpush3.bf16.msra.mxu1 %v4080_v14 }
 0x136   : > { %3561 = vmatprep.subr.bf16.mxu1 %v4212_v22  ;;  %v2738_v35 = vrot.slane %v2706_v41, 3  ;;  %v2740_v19 = vrot.slane %v2707_v45, 3  ;;  %v2130_v63 = vrot.slane %v4602_v37, 3  ;;  %v2744_v39 = vrot.slane %v2709_v62, 3 }
 0x137   : > { %v767_v50 = vmul.f32 %v750_v43, %v655_v27  ;;  %v868_v53 = vsel %vm816_vm2, %v863_v1, %v867_v31  ;;  %v4790_v54 = vor.u32 %v1574_v5, %v1573_v34  ;;  %3688 = vmatpush3.bf16.msra.mxu0 %v4087_v9  ;;  %v2133_v3 = vrot.slane %v4639_v12, 2 }
 0x138   : > { %3618 = vmatmul.mubr.bf16.gmra.mxu0 %v1180_v28  ;;  %3546 = vmatmul.mubr.bf16.gmra.mxu1 %v868_v53  ;;  %v2742_v28 = vrot.slane %v2708_v46, 3  ;;  %v2134_v1 = vrot.slane %v4636_v10, 3  ;;  %v2746_v9 = vrot.slane %v2710_v2, 3  ;;  %v2131_v24 = vor.u32 %v2130_v63, %v2129_v15  ;;  %v4083_v10 = vld [vmem:[%s5617_s4 + $0x8] sm:$0xff]   ;;  %v4090_v46 = vld [vmem:[%s5617_s4 + $0x120] sm:$0xff]  }
 0x139   : > { %v4798_v60 = vpack.c.bf16 %v767_v50, %v766_v51  ;;  %v4805_v14 = vsel %vm1549_vm3, %v1571_v47, %v4790_v54  ;;  %3562 = vmatpush3.bf16.msra.mxu1 %v4081_v48  ;;  %3621 = vmatprep.mubr.msk.bf16.mxu0 %vm4213_vm0, %v4212_v22  ;;  %v1182_v47 = vsel %vm1175_vm4, %v1179_v36, %v1181_v23  ;;  %v2137_v27 = vrot.slane %v4673_v44, 2 }
 0x13a   : > { %3563 = vmatprep.subr.bf16.mxu1 %v4212_v22  ;;  %3549 = vmatprep.mubr.msk.bf16.mxu1 %vm4213_vm0, %v4212_v22  ;;  %v2138_v36 = vrot.slane %v4670_v42, 3  ;;  %v2748_v37 = vrot.slane %v2711_v59, 3  ;;  %v2750_v34 = vrot.slane %v4796_v40, 3  ;;  %v2135_v5 = vor.u32 %v2134_v1, %v2133_v3  ;;  %v4093_v1 = vld [vmem:[%s5617_s4 + $0x110] sm:$0xff]  }
 0x13b   : > { %3689 = vmatprep.subr.bf16.mxu0 %v4212_v22  ;;  %v2141_v38 = vrot.slane %v4716_v26, 2  ;;  %v871_v12 = vor.u32 %v4768_v20, %v867_v31  ;;  %v4835_v44 = vsel %vm2125_vm5, %v2128_v0, %v2131_v24  ;;  %v2142_v43 = vrot.slane %v4710_v21, 3 }
 0x13c   : > { %3690 = vmatpush3.bf16.msra.mxu0 %v4089_v13  ;;  %v2139_v42 = vor.u32 %v2138_v36, %v2137_v27  ;;  %v4840_v41 = vsel %vm2125_vm5, %v2131_v24, %v2135_v5  ;;  %v2145_v26 = vrot.slane %v4768_v20, 2  ;;  %v2146_v31 = vrot.slane %v4765_v18, 3  ;;  %v4091_v24 = vld [vmem:[%s5617_s4 + $0xe8] sm:$0xff]  }
 0x13d   : > { %3564 = vmatpush3.bf16.msra.mxu1 %v4082_v7  ;;  %3691 = vmatprep.subr.bf16.mxu0 %v4212_v22  ;;  %v2150_v45 = vshrl.u32 %v4798_v60, 16  ;;  %v2143_v48 = vor.u32 %v2142_v43, %v2141_v38  ;;  %v2153_v21 = vshll.u32 %v4798_v60, 16  ;;  %v4855_v51 = vsel %vm2331_vm1, %v4555_v49, %v4740_v61  ;;  %v4084_v49 = vld [vmem:[%s5617_s4] sm:$0xff]   ;;  %v4095_v36 = vld [vmem:[%s5617_s4 + $0x108] sm:$0xff]  }
 0x13e   : > { %3565 = vmatprep.subr.bf16.mxu1 %v4212_v22  ;;  %v4849_v62 = vsel %vm2125_vm5, %v2135_v5, %v2139_v42  ;;  %v2147_v18 = vor.u32 %v2146_v31, %v2145_v26  ;;  %v4860_v50 = vsel %vm2331_vm1, %v4740_v61, %v4742_v52  ;;  %v4865_v53 = vsel %vm2331_vm1, %v4742_v52, %v4770_v16  ;;  %v4097_v38 = vld [vmem:[%s5617_s4 + $0x100] sm:$0xff]   ;;  %v4099_v43 = vld [vmem:[%s5617_s4 + $0xc8] sm:$0xff]   ;;  %v4102_v31 = vld [vmem:[%s5617_s4 + $0x1b8] sm:$0xff]  }
 0x13f   : > { %v2152_v20 = vrot.slane %v2150_v45, 2  ;;  %v4873_v2 = vsel %vm2125_vm5, %v2139_v42, %v2143_v48  ;;  %v2155_v59 = vrot.slane %v2153_v21, 3  ;;  %v4878_v61 = vsel %vm2331_vm1, %v4770_v16, %v4792_v56  ;;  %v4098_v42 = vld [vmem:[%s5617_s4 + $0xd0] sm:$0xff]   ;;  %v4100_v26 = vld [vmem:[%s5617_s4 + $0xc0] sm:$0xff]  }
 0x140   : > { %3622 = vmatmul.mubr.bf16.gmra.mxu0 %v1182_v47  ;;  %3550 = vmatmul.mubr.bf16.gmra.mxu1 %v871_v12  ;;  %v4882_v52 = vsel %vm2331_vm1, %v4792_v56, %v2738_v35  ;;  %v1183_v13 = vrot.slane %v4653_v30, 1  ;;  %v4889_v0 = vsel %vm2125_vm5, %v2143_v48, %v2147_v18  ;;  %v4892_v15 = vsel %vm2331_vm1, %v2738_v35, %v2740_v19  ;;  %v4092_v56 = vld [vmem:[%s5617_s4 + $0x118] sm:$0xff]   ;;  %v4103_v45 = vld [vmem:[%s5617_s4 + $0x1b0] sm:$0xff]  }
 0x141   : > { %3566 = vmatpush3.bf16.msra.mxu1 %v4083_v10  ;;  %3625 = vmatprep.mubr.msk.bf16.mxu0 %vm4213_vm0, %v4212_v22  ;;  %v4895_v16 = vsel %vm2331_vm1, %v2740_v19, %v2742_v28  ;;  %v4900_v7 = vor.u32 %v2155_v59, %v2152_v20  ;;  %v4903_v47 = vsel %vm2331_vm1, %v2742_v28, %v2744_v39  ;;  %v4085_v19 = vld [vmem:[%s5617_s4 + $0xf8] sm:$0xff]   ;;  %v1187_v5 = vrot.slane %v4744_v4, 1  ;;  %v4109_v48 = vld [vmem:[%s5617_s4 + $0x190] sm:$0xff]  }
 0x142   : > { %3567 = vmatprep.subr.bf16.mxu1 %v4212_v22  ;;  %3569 = vmatprep.mubr.msk.bf16.mxu1 %vm4213_vm0, %v4212_v22  ;;  %v4906_v63 = vsel %vm2331_vm1, %v2744_v39, %v2746_v9  ;;  %v4909_v3 = vsel %vm2331_vm1, %v2746_v9, %v2748_v37  ;;  %v4915_v35 = vsel %vm2331_vm1, %v2748_v37, %v2750_v34  ;;  %v4088_v9 = vld [vmem:[%s5617_s4 + $0xf0] sm:$0xff]   ;;  %v4094_v37 = vld [vmem:[%s5617_s4 + $0xe0] sm:$0xff]   ;;  %v4096_v12 = vld [vmem:[%s5617_s4 + $0xd8] sm:$0xff]   ;;  %v1364_v21 = vrot.slane %v4560_v55, 5 }
 0x143   : > { %3692 = vmatpush3.bf16.msra.mxu0 %v4090_v46  ;;  %v4922_v28 = vsel %vm2125_vm5, %v2147_v18, %v4900_v7  ;;  %v1184_v39 = vsel %vm1175_vm4, %v1181_v23, %v1183_v13  ;;  %v1185_v23 = vrot.slane %v4690_v11, 1  ;;  %v4106_v46 = vld [vmem:[%s5617_s4 + $0x1a0] sm:$0xff]   ;;  %v4101_v18 = vld [vmem:[%s5617_s4 + $0x178] sm:$0xff]   ;;  %v4104_v59 = vld [vmem:[%s5617_s4 + $0x170] sm:$0xff]  }
 0x144   : > { %3693 = vmatprep.subr.bf16.mxu0 %v4212_v22 }
 0x145   : > { %3568 = vmatpush3.bf16.msra.mxu1 %v4084_v49  ;;  %v1186_v27 = vsel %vm1175_vm4, %v1183_v13, %v1185_v23  ;;  %v1188_v10 = vsel %vm1175_vm4, %v1185_v23, %v1187_v5  ;;  %v4111_v49 = vld [vmem:[%s5617_s4 + $0x188] sm:$0xff]   ;;  %v1366_v13 = vrot.slane %v4585_v25, 5  ;;  %v4114_v23 = vld [vmem:[%s5617_s4 + $0x150] sm:$0xff]  }
 0x146   : > { %3641 = vmatprep.subr.bf16.mxu1 %v4212_v22 }
 0x147   : > { %3694 = vmatpush3.bf16.msra.mxu0 %v4092_v56  ;;  %v4107_v56 = vld [vmem:[%s5617_s4 + $0x168] sm:$0xff]  }
 0x148   : > { %3626 = vmatmul.mubr.bf16.gmra.mxu0 %v1184_v39  ;;  %3570 = vmatmul.mubr.bf16.vlgmr.msra.gmra.mxu1 %v4544_v29  ;;  %v4110_v39 = vld [vmem:[%s5617_s4 + $0x160] sm:$0xff]  }
 0x149   : > { %3642 = vmatpush3.bf16.msra.mxu1 %v4085_v19  ;;  %3629 = vmatprep.mubr.msk.bf16.mxu0 %vm4213_vm0, %v4212_v22  ;;  %v1367_v19 = vsel %vm1362_vm6, %v1364_v21, %v1366_v13 }
 0x14a   : > { %3643 = vmatprep.subr.bf16.mxu1 %v4212_v22  ;;  %3573 = vmatprep.mubr.msk.bf16.mxu1 %vm4213_vm0, %v4212_v22 }
 0x14b   : > { %3695 = vmatprep.subr.bf16.mxu0 %v4212_v22 }
 0x14c   : > { %3696 = vmatpush3.bf16.msra.mxu0 %v4093_v1  ;;  %v1368_v1 = vrot.slane %v4619_v57, 5 }
 0x14d   : > { %3644 = vmatpush3.bf16.msra.mxu1 %v4088_v9  ;;  %3697 = vmatprep.subr.bf16.mxu0 %v4212_v22 }
 0x14e   : > { %3645 = vmatprep.subr.bf16.mxu1 %v4212_v22  ;;  %v1369_v9 = vsel %vm1362_vm6, %v1366_v13, %v1368_v1 }
 0x150   : > { %3630 = vmatmul.mubr.bf16.gmra.mxu0 %v1186_v27  ;;  %3574 = vmatmul.mubr.bf16.gmra.mxu1 %v4560_v55 }
 0x151   : > { %3633 = vmatprep.mubr.msk.bf16.mxu0 %vm4213_vm0, %v4212_v22  ;;  %3646 = vmatpush3.bf16.msra.mxu1 %v4091_v24  ;;  %v1370_v24 = vrot.slane %v4653_v30, 5 }
 0x152   : > { %3577 = vmatprep.mubr.msk.bf16.mxu1 %vm4213_vm0, %v4212_v22  ;;  %3647 = vmatprep.subr.bf16.mxu1 %v4212_v22 }
 0x153   : > { %3698 = vmatpush3.bf16.msra.mxu0 %v4095_v36  ;;  %v1371_v27 = vsel %vm1362_vm6, %v1368_v1, %v1370_v24  ;;  %v4116_v36 = vld [vmem:[%s5617_s4 + $0x140] sm:$0xff]  }
 0x154   : > { %3699 = vmatprep.subr.bf16.mxu0 %v4212_v22  ;;  %v4129_v1 = vld [vmem:[%s5617_s4 + $0x200] sm:$0xff]  }
 0x155   : > { %3648 = vmatpush3.bf16.msra.mxu1 %v4094_v37  ;;  %v1940_v37 = vrot.slane %v4585_v25, 2 }
 0x156   : > { %3649 = vmatprep.subr.bf16.mxu1 %v4212_v22 }
 0x157   : > { %3700 = vmatpush3.bf16.msra.mxu0 %v4097_v38  ;;  %v4118_v38 = vld [vmem:[%s5617_s4 + $0x238] sm:$0xff]  }
 0x158   : > { %3634 = vmatmul.mubr.bf16.gmra.mxu0 %v1188_v10  ;;  %3578 = vmatmul.mubr.bf16.gmra.mxu1 %v4585_v25 }
 0x159   : > { %3637 = vmatprep.mubr.msk.bf16.mxu0 %vm4213_vm0, %v4212_v22  ;;  %3581 = vmatprep.mubr.msk.bf16.mxu1 %vm4213_vm0, %v4212_v22 }
 0x15a   : > { %3650 = vmatpush3.bf16.msra.mxu1 %v4096_v12  ;;  %3773 = vmatprep.subr.bf16.mxu0 %v4212_v22 }
 0x15b   : > { %3651 = vmatprep.subr.bf16.mxu1 %v4212_v22 }
 0x15e   : > { %3652 = vmatpush3.bf16.msra.mxu1 %v4098_v42  ;;  %v4119_v42 = vld [vmem:[%s5617_s4 + $0x230] sm:$0xff]  }
 0x15f   : > { %3653 = vmatprep.subr.bf16.mxu1 %v4212_v22 }
 0x160   : > { %3638 = vmatmul.mubr.bf16.gmra.mxu0 %v1187_v5  ;;  %3582 = vmatmul.mubr.bf16.gmra.mxu1 %v4619_v57  ;;  %v1372_v5 = vrot.slane %v4690_v11, 5 }
 0x161   : > { %3701 = vmatprep.mubr.msk.bf16.mxu0 %vm4213_vm0, %v4212_v22  ;;  %3585 = vmatprep.mubr.msk.bf16.mxu1 %vm4213_vm0, %v4212_v22 }
 0x162   : > { %3654 = vmatpush3.bf16.msra.mxu1 %v4099_v43  ;;  %v1373_v10 = vsel %vm1362_vm6, %v1370_v24, %v1372_v5  ;;  %v1942_v43 = vrot.slane %v4619_v57, 2  ;;  %v4126_v24 = vld [vmem:[%s5617_s4 + $0x1e0] sm:$0xff]  }
 0x163   : > { %3655 = vmatprep.subr.bf16.mxu1 %v4212_v22 }
 0x166   : > { %3656 = vmatpush3.bf16.msra.mxu1 %v4100_v26  ;;  %v1374_v26 = vrot.slane %v4744_v4, 5 }
 0x167   : > { %3729 = vmatprep.subr.bf16.mxu1 %v4212_v22 }
 0x168   : > { %3702 = vmatmul.mubr.bf16.vlgmr.msra.gmra.mxu0 %v4595_v33  ;;  %3586 = vmatmul.mubr.bf16.gmra.mxu1 %v4653_v30  ;;  %v4105_v33 = vld [vmem:[%s5617_s4 + $0x1a8] sm:$0xff]  }
 0x169   : > { %3705 = vmatprep.mubr.msk.bf16.mxu0 %vm4213_vm0, %v4212_v22  ;;  %3589 = vmatprep.mubr.msk.bf16.mxu1 %vm4213_vm0, %v4212_v22 }
 0x16a   : > { %3774 = vmatpush3.bf16.msra.mxu0 %v4102_v31  ;;  %v4121_v31 = vld [vmem:[%s5617_s4 + $0x228] sm:$0xff]  }
 0x16b   : > { %3775 = vmatprep.subr.bf16.mxu0 %v4212_v22 }
 0x16e   : > { %3776 = vmatpush3.bf16.msra.mxu0 %v4103_v45  ;;  %v1943_v45 = vsel %vm1938_vm7, %v1940_v37, %v1942_v43 }
 0x16f   : > { %3777 = vmatprep.subr.bf16.mxu0 %v4212_v22 }
 0x170   : > { %3706 = vmatmul.mubr.bf16.gmra.mxu0 %v4629_v6  ;;  %3590 = vmatmul.mubr.bf16.gmra.mxu1 %v4690_v11  ;;  %v4108_v6 = vld [vmem:[%s5617_s4 + $0x198] sm:$0xff]  }
 0x171   : > { %3709 = vmatprep.mubr.msk.bf16.mxu0 %vm4213_vm0, %v4212_v22  ;;  %3593 = vmatprep.mubr.msk.bf16.mxu1 %vm4213_vm0, %v4212_v22 }
 0x172   : > { %3778 = vmatpush3.bf16.msra.mxu0 %v4105_v33  ;;  %v1375_v33 = vsel %vm1362_vm6, %v1372_v5, %v1374_v26 }
 0x173   : > { %3779 = vmatprep.subr.bf16.mxu0 %v4212_v22 }
 0x176   : > { %3780 = vmatpush3.bf16.msra.mxu0 %v4106_v46  ;;  %v4122_v46 = vld [vmem:[%s5617_s4 + $0x220] sm:$0xff]  }
 0x177   : > { %3781 = vmatprep.subr.bf16.mxu0 %v4212_v22 }
 0x178   : > { %3710 = vmatmul.mubr.bf16.gmra.mxu0 %v4663_v8  ;;  %3594 = vmatmul.mubr.bf16.gmra.mxu1 %v4744_v4  ;;  %v1363_v8 = vrot.slane %v4544_v29, 5 }
 0x179   : > { %3713 = vmatprep.mubr.msk.bf16.mxu0 %vm4213_vm0, %v4212_v22  ;;  %3657 = vmatprep.mubr.msk.bf16.mxu1 %vm4213_vm0, %v4212_v22 }
 0x17a   : > { %3782 = vmatpush3.bf16.msra.mxu0 %v4108_v6  ;;  %v1365_v20 = vsel %vm1362_vm6, %v1363_v8, %v1364_v21  ;;  %v1944_v6 = vrot.slane %v4653_v30, 2  ;;  %v4125_v8 = vld [vmem:[%s5617_s4 + $0x210] sm:$0xff]  }
 0x17b   : > { %3783 = vmatprep.subr.bf16.mxu0 %v4212_v22 }
 0x17c   : > { %v1945_v21 = vsel %vm1938_vm7, %v1942_v43, %v1944_v6 }
 0x17e   : > { %3784 = vmatpush3.bf16.msra.mxu0 %v4109_v48  ;;  %v4124_v48 = vld [vmem:[%s5617_s4 + $0x218] sm:$0xff]  }
 0x17f   : > { %3785 = vmatprep.subr.bf16.mxu0 %v4212_v22 }
 0x180   : > { %3714 = vmatmul.mubr.bf16.gmra.mxu0 %v4702_v17  ;;  %3658 = vmatmul.mubr.bf16.vlgmr.msra.gmra.mxu1 %v1365_v20  ;;  %v4113_v17 = vld [vmem:[%s5617_s4 + $0x180] sm:$0xff]   ;;  %v1752_v20 = vrot.slane %v4560_v55, 6 }
 0x181   : > { %3730 = vmatpush3.bf16.msra.mxu1 %v4101_v18  ;;  %3717 = vmatprep.mubr.msk.bf16.mxu0 %vm4213_vm0, %v4212_v22  ;;  %v1946_v18 = vrot.slane %v4690_v11, 2 }
 0x182   : > { %3731 = vmatprep.subr.bf16.mxu1 %v4212_v22  ;;  %3661 = vmatprep.mubr.msk.bf16.mxu1 %vm4213_vm0, %v4212_v22 }
 0x183   : > { %3786 = vmatpush3.bf16.msra.mxu0 %v4111_v49  ;;  %v1751_v49 = vrot.slane %v4544_v29, 6  ;;  %v1947_v13 = vsel %vm1938_vm7, %v1944_v6, %v1946_v18  ;;  %v4120_v29 = vld [vmem:[%s5617_s4 + $0x1f0] sm:$0xff]  }
 0x184   : > { %3787 = vmatprep.subr.bf16.mxu0 %v4212_v22 }
 0x185   : > { %3732 = vmatpush3.bf16.msra.mxu1 %v4104_v59  ;;  %v4117_v59 = vld [vmem:[%s5617_s4 + $0x1f8] sm:$0xff]  }
 0x186   : > { %3733 = vmatprep.subr.bf16.mxu1 %v4212_v22 }
 0x187   : > { %3788 = vmatpush3.bf16.msra.mxu0 %v4113_v17  ;;  %v1753_v17 = vsel %vm1750_vm8, %v1751_v49, %v1752_v20 }
 0x188   : > { %3718 = vmatmul.mubr.bf16.gmra.mxu0 %v4757_v32  ;;  %3662 = vmatmul.mubr.bf16.gmra.mxu1 %v1367_v19  ;;  %v4112_v32 = vld [vmem:[%s5617_s4 + $0x158] sm:$0xff]   ;;  %v1948_v19 = vrot.slane %v4744_v4, 2 }
 0x189   : > { %3721 = vmatprep.mubr.msk.bf16.mxu0 %vm4213_vm0, %v4212_v22  ;;  %3734 = vmatpush3.bf16.msra.mxu1 %v4107_v56  ;;  %v4127_v56 = vld [vmem:[%s5617_s4 + $0x208] sm:$0xff]  }
 0x18a   : > { %3665 = vmatprep.mubr.msk.bf16.mxu1 %vm4213_vm0, %v4212_v22  ;;  %3735 = vmatprep.subr.bf16.mxu1 %v4212_v22 }
 0x18b   : > { %3861 = vmatprep.subr.bf16.mxu0 %v4212_v22 }
 0x18d   : > { %3736 = vmatpush3.bf16.msra.mxu1 %v4110_v39  ;;  %v1754_v39 = vrot.slane %v4585_v25, 6 }
 0x18e   : > { %3737 = vmatprep.subr.bf16.mxu1 %v4212_v22 }
 0x190   : > { %3722 = vmatmul.mubr.bf16.gmra.mxu0 %v4805_v14  ;;  %3666 = vmatmul.mubr.bf16.gmra.mxu1 %v1369_v9  ;;  %v4115_v14 = vld [vmem:[%s5617_s4 + $0x148] sm:$0xff]   ;;  %v1949_v9 = vsel %vm1938_vm7, %v1946_v18, %v1948_v19  ;;  %v1762_v18 = vrot.slane %v4744_v4, 6 }
 0x191   : > { %3725 = vmatprep.mubr.msk.bf16.mxu0 %vm4213_vm0, %v4212_v22  ;;  %3669 = vmatprep.mubr.msk.bf16.mxu1 %vm4213_vm0, %v4212_v22 }
 0x192   : > { %3738 = vmatpush3.bf16.msra.mxu1 %v4112_v32  ;;  %v4123_v32 = vld [vmem:[%s5617_s4 + $0x1e8] sm:$0xff]  }
 0x193   : > { %3739 = vmatprep.subr.bf16.mxu1 %v4212_v22 }
 0x196   : > { %3740 = vmatpush3.bf16.msra.mxu1 %v4114_v23  ;;  %v1755_v23 = vsel %vm1750_vm8, %v1752_v20, %v1754_v39 }
 0x197   : > { %3741 = vmatprep.subr.bf16.mxu1 %v4212_v22 }
 0x198   : > { %3726 = vmatmul.mubr.bf16.gmra.mxu0 %v4790_v54  ;;  %3670 = vmatmul.mubr.bf16.gmra.mxu1 %v1371_v27  ;;  %v1939_v54 = vrot.slane %v4560_v55, 2  ;;  %v1756_v27 = vrot.slane %v4619_v57, 6 }
 0x199   : > { %3789 = vmatprep.mubr.msk.bf16.mxu0 %vm4213_vm0, %v4212_v22  ;;  %3673 = vmatprep.mubr.msk.bf16.mxu1 %vm4213_vm0, %v4212_v22 }
 0x19a   : > { %3742 = vmatpush3.bf16.msra.mxu1 %v4115_v14  ;;  %v1941_v12 = vsel %vm1938_vm7, %v1939_v54, %v1940_v37  ;;  %v1950_v14 = vrot.slane %v4798_v60, 2  ;;  %v1757_v5 = vsel %vm1750_vm8, %v1754_v39, %v1756_v27  ;;  %v4130_v54 = vld [vmem:[%s5617_s4 + $0x1d0] sm:$0xff]  }
 0x19b   : > { %3743 = vmatprep.subr.bf16.mxu1 %v4212_v22 }
 0x19c   : > { %v1951_v37 = vsel %vm1938_vm7, %v1948_v19, %v1950_v14 }
 0x19e   : > { %3744 = vmatpush3.bf16.msra.mxu1 %v4116_v36  ;;  %v4128_v36 = vld [vmem:[%s5617_s4 + $0x1d8] sm:$0xff]  }
 0x19f   : > { %3817 = vmatprep.subr.bf16.mxu1 %v4212_v22 }
 0x1a0   : > { %3790 = vmatmul.mubr.bf16.vlgmr.msra.gmra.mxu0 %v1941_v12  ;;  %3674 = vmatmul.mubr.bf16.gmra.mxu1 %v1373_v10  ;;  %v4131_v12 = vld [vmem:[%s5617_s4 + $0x1c8] sm:$0xff]  }
 0x1a1   : > { %3793 = vmatprep.mubr.msk.bf16.mxu0 %vm4213_vm0, %v4212_v22  ;;  %3677 = vmatprep.mubr.msk.bf16.mxu1 %vm4213_vm0, %v4212_v22 }
 0x1a2   : > { %3862 = vmatpush3.bf16.msra.mxu0 %v4118_v38  ;;  %v1758_v38 = vrot.slane %v4653_v30, 6 }
 0x1a3   : > { %3863 = vmatprep.subr.bf16.mxu0 %v4212_v22 }
 0x1a4   : > { %v1759_v10 = vsel %vm1750_vm8, %v1756_v27, %v1758_v38 }
 0x1a6   : > { %3864 = vmatpush3.bf16.msra.mxu0 %v4119_v42 }
 0x1a7   : > { %3865 = vmatprep.subr.bf16.mxu0 %v4212_v22 }
 0x1a8   : > { %3794 = vmatmul.mubr.bf16.gmra.mxu0 %v1943_v45  ;;  %3678 = vmatmul.mubr.bf16.gmra.mxu1 %v1375_v33  ;;  %v1760_v45 = vrot.slane %v4690_v11, 6 }
 0x1a9   : > { %3797 = vmatprep.mubr.msk.bf16.mxu0 %vm4213_vm0, %v4212_v22  ;;  %3681 = vmatprep.mubr.msk.bf16.mxu1 %vm4213_vm0, %v4212_v22 }
 0x1aa   : > { %3866 = vmatpush3.bf16.msra.mxu0 %v4121_v31  ;;  %v2333_v31 = vrot.slane %v4585_v25, 3 }
 0x1ab   : > { %3867 = vmatprep.subr.bf16.mxu0 %v4212_v22 }
 0x1ae   : > { %3868 = vmatpush3.bf16.msra.mxu0 %v4122_v46  ;;  %v2332_v46 = vrot.slane %v4560_v55, 3  ;;  %v2335_v55 = vrot.slane %v4619_v57, 3 }
 0x1af   : > { %3869 = vmatprep.subr.bf16.mxu0 %v4212_v22 }
 0x1b0   : > { %3798 = vmatmul.mubr.bf16.gmra.mxu0 %v1945_v21  ;;  %3682 = vmatmul.mubr.bf16.gmra.mxu1 %v1374_v26  ;;  %v4132_v26 = vld [vmem:[%s5617_s4 + $0x1c0] sm:$0xff]   ;;  %v1761_v21 = vsel %vm1750_vm8, %v1758_v38, %v1760_v45 }
 0x1b1   : > { %3801 = vmatprep.mubr.msk.bf16.mxu0 %vm4213_vm0, %v4212_v22  ;;  %3745 = vmatprep.mubr.msk.bf16.mxu1 %vm4213_vm0, %v4212_v22 }
 0x1b2   : > { %3870 = vmatpush3.bf16.msra.mxu0 %v4124_v48  ;;  %v2334_v48 = vsel %vm2331_vm1, %v2332_v46, %v2333_v31 }
 0x1b3   : > { %3871 = vmatprep.subr.bf16.mxu0 %v4212_v22 }
 0x1b6   : > { %3872 = vmatpush3.bf16.msra.mxu0 %v4125_v8 }
 0x1b7   : > { %3873 = vmatprep.subr.bf16.mxu0 %v4212_v22 }
 0x1b8   : > { %3802 = vmatmul.mubr.bf16.gmra.mxu0 %v1947_v13  ;;  %3746 = vmatmul.mubr.bf16.vlgmr.msra.gmra.mxu1 %v1753_v17  ;;  %v1763_v13 = vsel %vm1750_vm8, %v1760_v45, %v1762_v18 }
 0x1b9   : > { %3818 = vmatpush3.bf16.msra.mxu1 %v4117_v59  ;;  %3805 = vmatprep.mubr.msk.bf16.mxu0 %vm4213_vm0, %v4212_v22  ;;  %v2336_v59 = vsel %vm2331_vm1, %v2333_v31, %v2335_v55  ;;  %v2343_v31 = vrot.slane %v4798_v60, 3 }
 0x1ba   : > { %3819 = vmatprep.subr.bf16.mxu1 %v4212_v22  ;;  %3749 = vmatprep.mubr.msk.bf16.mxu1 %vm4213_vm0, %v4212_v22 }
 0x1bb   : > { %3874 = vmatpush3.bf16.msra.mxu0 %v4127_v56  ;;  %v2337_v56 = vrot.slane %v4653_v30, 3 }
 0x1bc   : > { %3875 = vmatprep.subr.bf16.mxu0 %v4212_v22 }
 0x1bd   : > { %3820 = vmatpush3.bf16.msra.mxu1 %v4120_v29  ;;  %v2338_v39 = vsel %vm2331_vm1, %v2335_v55, %v2337_v56 }
 0x1be   : > { %3821 = vmatprep.subr.bf16.mxu1 %v4212_v22 }
 0x1bf   : > { %3876 = vmatpush3.bf16.msra.mxu0 %v4129_v1 }
 0x1c0   : > { %3806 = vmatmul.mubr.bf16.gmra.mxu0 %v1949_v9  ;;  %3750 = vmatmul.mubr.bf16.gmra.mxu1 %v1755_v23  ;;  %v2339_v9 = vrot.slane %v4690_v11, 3  ;;  %v2341_v11 = vrot.slane %v4744_v4, 3 }
 0x1c1   : > { %3809 = vmatprep.mubr.msk.bf16.mxu0 %vm4213_vm0, %v4212_v22  ;;  %3822 = vmatpush3.bf16.msra.mxu1 %v4123_v32 }
 0x1c2   : > { %3753 = vmatprep.mubr.msk.bf16.mxu1 %vm4213_vm0, %v4212_v22  ;;  %3823 = vmatprep.subr.bf16.mxu1 %v4212_v22 }
 0x1c5   : > { %3824 = vmatpush3.bf16.msra.mxu1 %v4126_v24  ;;  %v2340_v24 = vsel %vm2331_vm1, %v2337_v56, %v2339_v9 }
 0x1c6   : > { %3825 = vmatprep.subr.bf16.mxu1 %v4212_v22 }
 0x1c8   : > { %3810 = vmatmul.mubr.bf16.gmra.mxu0 %v1951_v37  ;;  %3754 = vmatmul.mubr.bf16.gmra.mxu1 %v1757_v5 }
 0x1c9   : > { %3813 = vmatprep.mubr.msk.bf16.mxu0 %vm4213_vm0, %v4212_v22  ;;  %3757 = vmatprep.mubr.msk.bf16.mxu1 %vm4213_vm0, %v4212_v22 }
 0x1ca   : > { %3826 = vmatpush3.bf16.msra.mxu1 %v4128_v36 }
 0x1cb   : > { %3827 = vmatprep.subr.bf16.mxu1 %v4212_v22 }
 0x1ce   : > { %3828 = vmatpush3.bf16.msra.mxu1 %v4130_v54 }
 0x1cf   : > { %3829 = vmatprep.subr.bf16.mxu1 %v4212_v22 }
 0x1d0   : > { %3814 = vmatmul.mubr.bf16.gmra.mxu0 %v1950_v14  ;;  %v5213_v42 = vpop.f32.mrf.mxu0  ;;  %3758 = vmatmul.mubr.bf16.gmra.mxu1 %v1759_v10  ;;  %v2342_v10 = vsel %vm2331_vm1, %v2339_v9, %v2341_v11 }
 0x1d1   : > { %3877 = vmatprep.mubr.msk.bf16.mxu0 %vm4213_vm0, %v4212_v22  ;;  %3761 = vmatprep.mubr.msk.bf16.mxu1 %vm4213_vm0, %v4212_v22 }
 0x1d2   : > { %v3527_v43 = vpop.f32.mrf.mxu0  ;;  %3830 = vmatpush3.bf16.msra.mxu1 %v4131_v12 }
 0x1d3   : > { %3831 = vmatprep.subr.bf16.mxu1 %v4212_v22 }
 0x1d4   : > { %v5225_v33 = vpop.f32.mrf.mxu0 }
 0x1d6   : > { %v3528_v6 = vpop.f32.mrf.mxu0  ;;  %3832 = vmatpush3.bf16.msra.mxu1 %v4132_v26 }
 0x1d7   : > { %3905 = vmatprep.subr.bf16.mxu1 %v4212_v22 }
 0x1d8   : > { %3878 = vmatmul.mubr.bf16.vlgmr.msra.gmra.mxu0 %v2334_v48  ;;  %v5231_v8 = vpop.f32.mrf.mxu0  ;;  %3762 = vmatmul.mubr.bf16.gmra.mxu1 %v1761_v21  ;;  %v2344_v21 = vsel %vm2331_vm1, %v2341_v11, %v2343_v31 }
 0x1d9   : > { %3881 = vmatprep.mubr.msk.bf16.mxu0 %vm4213_vm0, %v4212_v22  ;;  %3765 = vmatprep.mubr.msk.bf16.mxu1 %vm4213_vm0, %v4212_v22 }
 0x1da   : > { %v3531_v25 = vpop.f32.mrf.mxu0 }
 0x1dc   : > { %v5239_v20 = vpop.f32.mrf.mxu0 }
 0x1de   : > { %v3532_v49 = vpop.f32.mrf.mxu0 }
 0x1e0   : > { %3882 = vmatmul.mubr.bf16.gmra.mxu0 %v2336_v59  ;;  %v5243_v17 = vpop.f32.mrf.mxu0  ;;  %3766 = vmatmul.mubr.bf16.gmra.mxu1 %v1763_v13 }
 0x1e1   : > { %3885 = vmatprep.mubr.msk.bf16.mxu0 %vm4213_vm0, %v4212_v22  ;;  %3769 = vmatprep.mubr.msk.bf16.mxu1 %vm4213_vm0, %v4212_v22 }
 0x1e2   : > { %v3535_v57 = vpop.f32.mrf.mxu0 }
 0x1e4   : > { %v5250_v29 = vpop.f32.mrf.mxu0 }
 0x1e6   : > { %v3536_v19 = vpop.f32.mrf.mxu0 }
 0x1e8   : > { %3886 = vmatmul.mubr.bf16.gmra.mxu0 %v2338_v39  ;;  %v5253_v1 = vpop.f32.mrf.mxu1  ;;  %3770 = vmatmul.mubr.bf16.gmra.mxu1 %v1762_v18 }
 0x1e9   : > { %3889 = vmatprep.mubr.msk.bf16.mxu0 %vm4213_vm0, %v4212_v22  ;;  %3833 = vmatprep.mubr.msk.bf16.mxu1 %vm4213_vm0, %v4212_v22 }
 0x1ea   : > { %v3539_v32 = vpop.f32.mrf.mxu1 }
 0x1ec   : > { %v5260_v23 = vpop.f32.mrf.mxu1 }
 0x1ee   : > { %v3540_v30 = vpop.f32.mrf.mxu1 }
 0x1f0   : > { %v1278_v14 = vpop.f32.mrf.mxu0  ;;  %3890 = vmatmul.mubr.bf16.gmra.mxu0 %v2340_v24  ;;  %v5263_v27 = vpop.f32.mrf.mxu1  ;;  %3834 = vmatmul.mubr.bf16.vlgmr.msra.gmra.mxu1 %v4835_v44 }
 0x1f1   : > { %3893 = vmatprep.mubr.msk.bf16.mxu0 %vm4213_vm0, %v4212_v22  ;;  %3837 = vmatprep.mubr.msk.bf16.mxu1 %vm4213_vm0, %v4212_v22 }
 0x1f2   : > { %v3615_v36 = vpop.f32.mrf.mxu0  ;;  %v3543_v37 = vpop.f32.mrf.mxu1 }
 0x1f4   : > { %v1281_v5 = vpop.f32.mrf.mxu0  ;;  %v5271_v54 = vpop.f32.mrf.mxu1 }
 0x1f6   : > { %v3616_v38 = vpop.f32.mrf.mxu0  ;;  %v3544_v12 = vpop.f32.mrf.mxu1 }
 0x1f8   : > { %v1286_v43 = vpop.f32.mrf.mxu0  ;;  %3894 = vmatmul.mubr.bf16.gmra.mxu0 %v2342_v10  ;;  %v5274_v44 = vpop.f32.mrf.mxu1  ;;  %3838 = vmatmul.mubr.bf16.gmra.mxu1 %v4840_v41 }
 0x1f9   : > { %3897 = vmatprep.mubr.msk.bf16.mxu0 %vm4213_vm0, %v4212_v22  ;;  %3841 = vmatprep.mubr.msk.bf16.mxu1 %vm4213_vm0, %v4212_v22 }
 0x1fa   : > { %v3619_v4 = vpop.f32.mrf.mxu0  ;;  %v3547_v26 = vpop.f32.mrf.mxu1 }
 0x1fc   : > { %v1289_v45 = vpop.f32.mrf.mxu0  ;;  %v5282_v46 = vpop.f32.mrf.mxu1 }
 0x1fe   : > { %v3620_v6 = vpop.f32.mrf.mxu0  ;;  %v3548_v48 = vpop.f32.mrf.mxu1 }
 0x200   : > { %v1294_v25 = vpop.f32.mrf.mxu0  ;;  %3898 = vmatmul.mubr.bf16.gmra.mxu0 %v2344_v21  ;;  %v5285_v41 = vpop.f32.mrf.mxu1  ;;  %3842 = vmatmul.mubr.bf16.gmra.mxu1 %v4849_v62  ;;  %v4133_v62 = vld [vmem:[%s5619_s6 + $0x38] sm:$0xff]  }
 0x201   : > { %3901 = vmatprep.mubr.msk.bf16.mxu0 %vm4213_vm0, %v4212_v22  ;;  %3845 = vmatprep.mubr.msk.bf16.mxu1 %vm4213_vm0, %v4212_v22 }
 0x202   : > { %v3623_v60 = vpop.f32.mrf.mxu0  ;;  %v3551_v55 = vpop.f32.mrf.mxu1  ;;  %3906 = vmatpush3.bf16.msra.mxu1 %v4133_v62 }
 0x203   : > { %3907 = vmatprep.subr.bf16.mxu1 %v4212_v22 }
 0x204   : > { %v1297_v18 = vpop.f32.mrf.mxu0  ;;  %v1012_v49 = vpop.f32.mrf.mxu1 }
 0x206   : > { %v3624_v59 = vpop.f32.mrf.mxu0  ;;  %v3552_v13 = vpop.f32.mrf.mxu1 }
 0x208   : > { %v1302_v57 = vpop.f32.mrf.mxu0  ;;  %3902 = vmatmul.mubr.bf16.gmra.mxu0 %v2343_v31  ;;  %v1097_v56 = vpop.f32.mrf.mxu1  ;;  %3846 = vmatmul.mubr.bf16.gmra.mxu1 %v4873_v2 }
 0x209   : > { %v1098_v19 = vadd.f32 %v1097_v56, %v5213_v42  ;;  %3849 = vmatprep.mubr.msk.bf16.mxu1 %vm4213_vm0, %v4212_v22  ;;  %v4134_v42 = vld [vmem:[%s5619_s6 + $0x30] sm:$0xff]  }
 0x20a   : > { %v3627_v39 = vpop.f32.mrf.mxu0  ;;  %v3571_v32 = vpop.f32.mrf.mxu1  ;;  %3908 = vmatpush3.bf16.msra.mxu1 %v4134_v42 }
 0x20b   : > { %v5299_v9 = vadd.f32 %v1278_v14, %v1098_v19  ;;  %3909 = vmatprep.subr.bf16.mxu1 %v4212_v22 }
 0x20c   : > { %v1305_v30 = vpop.f32.mrf.mxu0  ;;  %v1100_v24 = vpop.f32.mrf.mxu1 }
 0x20d   : > { %v1101_v2 = vadd.f32 %v1100_v24, %v5225_v33 }
 0x20e   : > { %v3628_v36 = vpop.f32.mrf.mxu0  ;;  %v3572_v37 = vpop.f32.mrf.mxu1 }
 0x20f   : > { %v5306_v11 = vadd.f32 %v1281_v5, %v1101_v2 }
 0x210   : > { %v1310_v38 = vpop.f32.mrf.mxu0  ;;  %v1105_v12 = vpop.f32.mrf.mxu1  ;;  %3850 = vmatmul.mubr.bf16.gmra.mxu1 %v4889_v0  ;;  %v4135_v0 = vld [vmem:[%s5619_s6 + $0x28] sm:$0xff]  }
 0x211   : > { %v1106_v14 = vadd.f32 %v1105_v12, %v5231_v8  ;;  %3853 = vmatprep.mubr.msk.bf16.mxu1 %vm4213_vm0, %v4212_v22  ;;  %3910 = vmatpush3.bf16.msra.mxu1 %v4135_v0 }
 0x212   : > { %v3631_v10 = vpop.f32.mrf.mxu0  ;;  %v3575_v33 = vpop.f32.mrf.mxu1  ;;  %3911 = vmatprep.subr.bf16.mxu1 %v4212_v22 }
 0x213   : > { %v5313_v4 = vadd.f32 %v1286_v43, %v1106_v14 }
 0x214   : > { %v1313_v26 = vpop.f32.mrf.mxu0  ;;  %v1108_v31 = vpop.f32.mrf.mxu1 }
 0x215   : > { %v1109_v5 = vadd.f32 %v1108_v31, %v5239_v20  ;;  %v4138_v31 = vld [vmem:[%s5619_s6 + $0x10] sm:$0xff]  }
 0x216   : > { %v3632_v6 = vpop.f32.mrf.mxu0  ;;  %v3576_v48 = vpop.f32.mrf.mxu1 }
 0x217   : > { %v5319_v8 = vadd.f32 %v1289_v45, %v1109_v5 }
 0x218   : > { %v1318_v21 = vpop.f32.mrf.mxu0  ;;  %v1113_v60 = vpop.f32.mrf.mxu1  ;;  %3854 = vmatmul.mubr.bf16.gmra.mxu1 %v4922_v28  ;;  %v4136_v28 = vld [vmem:[%s5619_s6 + $0x20] sm:$0xff]  }
 0x219   : > { %v1114_v55 = vadd.f32 %v1113_v60, %v5243_v17  ;;  %3857 = vmatprep.mubr.msk.bf16.mxu1 %vm4213_vm0, %v4212_v22  ;;  %3912 = vmatpush3.bf16.msra.mxu1 %v4136_v28 }
 0x21a   : > { %v3635_v43 = vpop.f32.mrf.mxu0  ;;  %v3579_v20 = vpop.f32.mrf.mxu1  ;;  %3913 = vmatprep.subr.bf16.mxu1 %v4212_v22 }
 0x21b   : > { %v5326_v49 = vadd.f32 %v1294_v25, %v1114_v55 }
 0x21c   : > { %v1321_v59 = vpop.f32.mrf.mxu0  ;;  %v1116_v13 = vpop.f32.mrf.mxu1 }
 0x21d   : > { %v1117_v45 = vadd.f32 %v1116_v13, %v5250_v29 }
 0x21e   : > { %v3636_v56 = vpop.f32.mrf.mxu0  ;;  %v3580_v17 = vpop.f32.mrf.mxu1 }
 0x21f   : > { %v5332_v62 = vadd.f32 %v1297_v18, %v1117_v45  ;;  %v4137_v18 = vld [vmem:[%s5619_s6 + $0x18] sm:$0xff]  }
 0x220   : > { %v1326_v19 = vpop.f32.mrf.mxu0  ;;  %v1121_v39 = vpop.f32.mrf.mxu1  ;;  %3858 = vmatmul.mubr.bf16.gmra.mxu1 %v4900_v7 }
 0x221   : > { %v1122_v25 = vadd.f32 %v1121_v39, %v5253_v1  ;;  %3921 = vmatprep.mubr.msk.bf16.mxu1 %vm4213_vm0, %v4212_v22  ;;  %3914 = vmatpush3.bf16.msra.mxu1 %v4137_v18 }
 0x222   : > { %v3639_v29 = vpop.f32.mrf.mxu0  ;;  %v3583_v32 = vpop.f32.mrf.mxu1  ;;  %3915 = vmatprep.subr.bf16.mxu1 %v4212_v22 }
 0x223   : > { %v5339_v24 = vadd.f32 %v1302_v57, %v1122_v25 }
 0x224   : > { %v1329_v2 = vpop.f32.mrf.mxu0  ;;  %v1124_v36 = vpop.f32.mrf.mxu1 }
 0x225   : > { %v1125_v37 = vadd.f32 %v1124_v36, %v5260_v23  ;;  %3916 = vmatpush3.bf16.msra.mxu1 %v4138_v31 }
 0x226   : > { %v3640_v7 = vpop.f32.mrf.mxu0  ;;  %v3584_v42 = vpop.f32.mrf.mxu1  ;;  %3917 = vmatprep.subr.bf16.mxu1 %v4212_v22 }
 0x227   : > { %v5345_v12 = vadd.f32 %v1305_v30, %v1125_v37  ;;  %v4140_v37 = vld [vmem:[%s5619_s6] sm:$0xff]  }
 0x228   : > { %v1666_v1 = vpop.f32.mrf.mxu0  ;;  %v1129_v14 = vpop.f32.mrf.mxu1 }
 0x229   : > { %v1130_v57 = vadd.f32 %v1129_v14, %v5263_v27 }
 0x22a   : > { %v3703_v10 = vpop.f32.mrf.mxu0  ;;  %v3587_v33 = vpop.f32.mrf.mxu1 }
 0x22b   : > { %v5352_v5 = vadd.f32 %v1310_v38, %v1130_v57 }
 0x22c   : > { %v1669_v23 = vpop.f32.mrf.mxu0  ;;  %v1132_v6 = vpop.f32.mrf.mxu1 }
 0x22d   : > { %v1133_v30 = vadd.f32 %v1132_v6, %v5271_v54 }
 0x22e   : > { %v3704_v48 = vpop.f32.mrf.mxu0  ;;  %v3588_v0 = vpop.f32.mrf.mxu1 }
 0x22f   : > { %v5356_v60 = vadd.f32 %v1313_v26, %v1133_v30  ;;  %v4139_v26 = vld [vmem:[%s5619_s6 + $0x8] sm:$0xff]  }
 0x230   : > { %v1674_v27 = vpop.f32.mrf.mxu0  ;;  %v1137_v55 = vpop.f32.mrf.mxu1  ;;  %3918 = vmatpush3.bf16.msra.mxu1 %v4139_v26 }
 0x231   : > { %v1138_v43 = vadd.f32 %v1137_v55, %v5274_v44  ;;  %3919 = vmatprep.subr.bf16.mxu1 %v4212_v22 }
 0x232   : > { %v3707_v20 = vpop.f32.mrf.mxu0  ;;  %v3591_v13 = vpop.f32.mrf.mxu1 }
 0x233   : > { %v5359_v45 = vadd.f32 %v1318_v21, %v1138_v43 }
 0x234   : > { %v1677_v38 = vpop.f32.mrf.mxu0  ;;  %v1140_v28 = vpop.f32.mrf.mxu1  ;;  %3920 = vmatpush3.bf16.msra.mxu1 %v4140_v37 }
 0x235   : > { %v1141_v56 = vadd.f32 %v1140_v28, %v5282_v46  ;;  %3949 = vmatprep.subr.bf16.mxu1 %v4212_v22 }
 0x236   : > { %v3708_v17 = vpop.f32.mrf.mxu0  ;;  %v3592_v54 = vpop.f32.mrf.mxu1 }
 0x237   : > { %v5362_v39 = vadd.f32 %v1321_v59, %v1141_v56 }
 0x238   : > { %v1682_v25 = vpop.f32.mrf.mxu0  ;;  %v1145_v29 = vpop.f32.mrf.mxu1 }
 0x239   : > { %v1146_v44 = vadd.f32 %v1145_v29, %v5285_v41 }
 0x23a   : > { %v3711_v32 = vpop.f32.mrf.mxu0  ;;  %v3595_v21 = vpop.f32.mrf.mxu1 }
 0x23b   : > { %v5369_v2 = vadd.f32 %v1326_v19, %v1146_v44 }
 0x23c   : > { %v1685_v46 = vpop.f32.mrf.mxu0  ;;  %v1148_v36 = vpop.f32.mrf.mxu1 }
 0x23e   : > { %v3712_v18 = vpop.f32.mrf.mxu0  ;;  %v3596_v59 = vpop.f32.mrf.mxu1 }
 0x240   : > { %v1690_v7 = vpop.f32.mrf.mxu0  ;;  %v1465_v42 = vpop.f32.mrf.mxu1 }
 0x241   : > { %v1519_v14 = vadd.f32 %v1465_v42, %v5299_v9 }
 0x242   : > { %v3715_v41 = vpop.f32.mrf.mxu0  ;;  %v3659_v57 = vpop.f32.mrf.mxu1 }
 0x243   : > { %v5376_v10 = vadd.f32 %v1666_v1, %v1519_v14 }
 0x244   : > { %v1693_v19 = vpop.f32.mrf.mxu0  ;;  %v1468_v33 = vpop.f32.mrf.mxu1 }
 0x245   : > { %v1520_v31 = vadd.f32 %v1468_v33, %v5306_v11 }
 0x246   : > { %v3716_v6 = vpop.f32.mrf.mxu0  ;;  %v3660_v30 = vpop.f32.mrf.mxu1 }
 0x247   : > { %v5379_v48 = vadd.f32 %v1669_v23, %v1520_v31 }
 0x248   : > { %v1698_v0 = vpop.f32.mrf.mxu0  ;;  %v1473_v55 = vpop.f32.mrf.mxu1 }
 0x249   : > { %v1521_v43 = vadd.f32 %v1473_v55, %v5313_v4 }
 0x24a   : > { %v3719_v9 = vpop.f32.mrf.mxu0  ;;  %v3663_v20 = vpop.f32.mrf.mxu1 }
 0x24b   : > { %v5382_v13 = vadd.f32 %v1674_v27, %v1521_v43 }
 0x24c   : > { %v1701_v28 = vpop.f32.mrf.mxu0  ;;  %v1476_v56 = vpop.f32.mrf.mxu1 }
 0x24d   : > { %v1522_v1 = vadd.f32 %v1476_v56, %v5319_v8 }
 0x24e   : > { %v3720_v17 = vpop.f32.mrf.mxu0  ;;  %v3664_v54 = vpop.f32.mrf.mxu1 }
 0x24f   : > { %v5385_v26 = vadd.f32 %v1677_v38, %v1522_v1 }
 0x250   : > { %v1706_v11 = vpop.f32.mrf.mxu0  ;;  %v1481_v29 = vpop.f32.mrf.mxu1 }
 0x251   : > { %v1523_v23 = vadd.f32 %v1481_v29, %v5326_v49 }
 0x252   : > { %v3723_v44 = vpop.f32.mrf.mxu0  ;;  %v3667_v32 = vpop.f32.mrf.mxu1 }
 0x253   : > { %v5388_v21 = vadd.f32 %v1682_v25, %v1523_v23 }
 0x254   : > { %v1709_v4 = vpop.f32.mrf.mxu0  ;;  %v1484_v36 = vpop.f32.mrf.mxu1 }
 0x255   : > { %v1524_v27 = vadd.f32 %v1484_v36, %v5332_v62 }
 0x256   : > { %v3724_v18 = vpop.f32.mrf.mxu0  ;;  %v3668_v59 = vpop.f32.mrf.mxu1 }
 0x257   : > { %v5391_v37 = vadd.f32 %v1685_v46, %v1524_v27 }
 0x258   : > { %v1714_v8 = vpop.f32.mrf.mxu0  ;;  %v1489_v42 = vpop.f32.mrf.mxu1 }
 0x259   : > { %v1525_v38 = vadd.f32 %v1489_v42, %v5339_v24 }
 0x25a   : > { %v3727_v14 = vpop.f32.mrf.mxu0  ;;  %v3671_v41 = vpop.f32.mrf.mxu1 }
 0x25b   : > { %v5394_v57 = vadd.f32 %v1690_v7, %v1525_v38 }
 0x25c   : > { %v1717_v49 = vpop.f32.mrf.mxu0  ;;  %v1492_v33 = vpop.f32.mrf.mxu1 }
 0x25d   : > { %v1526_v25 = vadd.f32 %v1492_v33, %v5345_v12 }
 0x25e   : > { %v3728_v31 = vpop.f32.mrf.mxu0  ;;  %v3672_v6 = vpop.f32.mrf.mxu1 }
 0x25f   : > { %v5397_v30 = vadd.f32 %v1693_v19, %v1526_v25 }
 0x260   : > { %v2041_v62 = vpop.f32.mrf.mxu0  ;;  %v1497_v55 = vpop.f32.mrf.mxu1 }
 0x261   : > { %v1527_v46 = vadd.f32 %v1497_v55, %v5352_v5 }
 0x262   : > { %v3791_v43 = vpop.f32.mrf.mxu0  ;;  %v3675_v9 = vpop.f32.mrf.mxu1 }
 0x263   : > { %v5400_v20 = vadd.f32 %v1698_v0, %v1527_v46 }
 0x264   : > { %v2044_v24 = vpop.f32.mrf.mxu0  ;;  %v1500_v56 = vpop.f32.mrf.mxu1 }
 0x265   : > { %v1528_v7 = vadd.f32 %v1500_v56, %v5356_v60 }
 0x266   : > { %v3792_v1 = vpop.f32.mrf.mxu0  ;;  %v3676_v17 = vpop.f32.mrf.mxu1 }
 0x267   : > { %v5403_v54 = vadd.f32 %v1701_v28, %v1528_v7 }
 0x268   : > { %v2049_v12 = vpop.f32.mrf.mxu0  ;;  %v1505_v29 = vpop.f32.mrf.mxu1 }
 0x269   : > { %v1529_v19 = vadd.f32 %v1505_v29, %v5359_v45 }
 0x26a   : > { %v3795_v23 = vpop.f32.mrf.mxu0  ;;  %v3679_v44 = vpop.f32.mrf.mxu1 }
 0x26b   : > { %v5406_v32 = vadd.f32 %v1706_v11, %v1529_v19 }
 0x26c   : > { %v2052_v5 = vpop.f32.mrf.mxu0  ;;  %v1508_v36 = vpop.f32.mrf.mxu1 }
 0x26d   : > { %v1530_v0 = vadd.f32 %v1508_v36, %v5362_v39 }
 0x26e   : > { %v3796_v27 = vpop.f32.mrf.mxu0  ;;  %v3680_v18 = vpop.f32.mrf.mxu1 }
 0x26f   : > { %v5409_v59 = vadd.f32 %v1709_v4, %v1530_v0 }
 0x270   : > { %v2057_v60 = vpop.f32.mrf.mxu0  ;;  %v1513_v42 = vpop.f32.mrf.mxu1 }
 0x271   : > { %v1531_v28 = vadd.f32 %v1513_v42, %v5369_v2 }
 0x272   : > { %v3799_v38 = vpop.f32.mrf.mxu0  ;;  %v3683_v14 = vpop.f32.mrf.mxu1 }
 0x273   : > { %v5412_v41 = vadd.f32 %v1714_v8, %v1531_v28 }
 0x274   : > { %v2060_v45 = vpop.f32.mrf.mxu0  ;;  %v1516_v49 = vpop.f32.mrf.mxu1 }
 0x276   : > { %v3800_v11 = vpop.f32.mrf.mxu0  ;;  %v3684_v33 = vpop.f32.mrf.mxu1 }
 0x278   : > { %v2065_v25 = vpop.f32.mrf.mxu0  ;;  %v1853_v31 = vpop.f32.mrf.mxu1 }
 0x279   : > { %v1907_v39 = vadd.f32 %v1853_v31, %v5376_v10 }
 0x27a   : > { %v3803_v6 = vpop.f32.mrf.mxu0  ;;  %v3747_v55 = vpop.f32.mrf.mxu1 }
 0x27b   : > { %v5415_v4 = vadd.f32 %v2041_v62, %v1907_v39 }
 0x27c   : > { %v2068_v46 = vpop.f32.mrf.mxu0  ;;  %v1856_v43 = vpop.f32.mrf.mxu1 }
 0x27d   : > { %v1908_v2 = vadd.f32 %v1856_v43, %v5379_v48 }
 0x27e   : > { %v3804_v9 = vpop.f32.mrf.mxu0  ;;  %v3748_v56 = vpop.f32.mrf.mxu1 }
 0x27f   : > { %v5418_v8 = vadd.f32 %v2044_v24, %v1908_v2 }
 0x280   : > { %v2073_v7 = vpop.f32.mrf.mxu0  ;;  %v1861_v1 = vpop.f32.mrf.mxu1 }
 0x281   : > { %v1909_v17 = vadd.f32 %v1861_v1, %v5382_v13 }
 0x282   : > { %v3807_v29 = vpop.f32.mrf.mxu0  ;;  %v3751_v19 = vpop.f32.mrf.mxu1 }
 0x283   : > { %v5421_v23 = vadd.f32 %v2049_v12, %v1909_v17 }
 0x284   : > { %v2076_v10 = vpop.f32.mrf.mxu0  ;;  %v1864_v44 = vpop.f32.mrf.mxu1 }
 0x285   : > { %v1910_v62 = vadd.f32 %v1864_v44, %v5385_v26 }
 0x286   : > { %v3808_v36 = vpop.f32.mrf.mxu0  ;;  %v3752_v0 = vpop.f32.mrf.mxu1 }
 0x287   : > { %v5424_v27 = vadd.f32 %v2052_v5, %v1910_v62 }
 0x288   : > { %v2081_v48 = vpop.f32.mrf.mxu0  ;;  %v1869_v18 = vpop.f32.mrf.mxu1 }
 0x289   : > { %v1911_v24 = vadd.f32 %v1869_v18, %v5388_v21 }
 0x28a   : > { %v3811_v42 = vpop.f32.mrf.mxu0  ;;  %v3755_v28 = vpop.f32.mrf.mxu1 }
 0x28b   : > { %v5427_v38 = vadd.f32 %v2057_v60, %v1911_v24 }
 0x28c   : > { %v2084_v13 = vpop.f32.mrf.mxu0  ;;  %v1872_v14 = vpop.f32.mrf.mxu1 }
 0x28d   : > { %v1912_v12 = vadd.f32 %v1872_v14, %v5391_v37 }
 0x28e   : > { %v3812_v49 = vpop.f32.mrf.mxu0  ;;  %v3756_v11 = vpop.f32.mrf.mxu1 }
 0x28f   : > { %v5430_v33 = vadd.f32 %v2060_v45, %v1912_v12 }
 0x290   : > { %v2089_v26 = vpop.f32.mrf.mxu0  ;;  %v1877_v31 = vpop.f32.mrf.mxu1 }
 0x291   : > { %v1913_v5 = vadd.f32 %v1877_v31, %v5394_v57 }
 0x292   : > { %v3815_v39 = vpop.f32.mrf.mxu0  ;;  %v3759_v6 = vpop.f32.mrf.mxu1 }
 0x293   : > { %v5433_v55 = vadd.f32 %v2065_v25, %v1913_v5 }
 0x294   : > { %v2092_v21 = vpop.f32.mrf.mxu0  ;;  %v1880_v43 = vpop.f32.mrf.mxu1 }
 0x295   : > { %v1914_v60 = vadd.f32 %v1880_v43, %v5397_v30 }
 0x296   : > { %v3816_v2 = vpop.f32.mrf.mxu0  ;;  %v3760_v9 = vpop.f32.mrf.mxu1 }
 0x297   : > { %v5436_v56 = vadd.f32 %v2068_v46, %v1914_v60 }
 0x298   : > { %v2434_v37 = vpop.f32.mrf.mxu0  ;;  %v1885_v1 = vpop.f32.mrf.mxu1 }
 0x299   : > { %v1915_v45 = vadd.f32 %v1885_v1, %v5400_v20 }
 0x29a   : > { %v3879_v17 = vpop.f32.mrf.mxu0  ;;  %v3763_v29 = vpop.f32.mrf.mxu1 }
 0x29b   : > { %v5439_v19 = vadd.f32 %v2073_v7, %v1915_v45  ;;  %v5457_v45 = vld [vmem:[%s5618_s5] ss:$0 sm:$0xff] }
 0x29c   : > { %v2437_v57 = vpop.f32.mrf.mxu0  ;;  %v1888_v44 = vpop.f32.mrf.mxu1 }
 0x29d   : > { %v1916_v25 = vadd.f32 %v1888_v44, %v5403_v54 }
 0x29e   : > { %v3880_v62 = vpop.f32.mrf.mxu0  ;;  %v3764_v36 = vpop.f32.mrf.mxu1 }
 0x29f   : > { %v5442_v0 = vadd.f32 %v2076_v10, %v1916_v25 }
 0x2a0   : > { %v2442_v30 = vpop.f32.mrf.mxu0  ;;  %v1893_v18 = vpop.f32.mrf.mxu1 }
 0x2a1   : > { %v1917_v46 = vadd.f32 %v1893_v18, %v5406_v32 }
 0x2a2   : > { %v3883_v24 = vpop.f32.mrf.mxu0  ;;  %v3767_v42 = vpop.f32.mrf.mxu1 }
 0x2a3   : > { %v5445_v28 = vadd.f32 %v2081_v48, %v1917_v46 }
 0x2a4   : > { %v2445_v20 = vpop.f32.mrf.mxu0  ;;  %v1896_v14 = vpop.f32.mrf.mxu1 }
 0x2a5   : > { %v1918_v7 = vadd.f32 %v1896_v14, %v5409_v59 }
 0x2a6   : > { %v3884_v12 = vpop.f32.mrf.mxu0  ;;  %v3768_v49 = vpop.f32.mrf.mxu1 }
 0x2a7   : > { %v5448_v11 = vadd.f32 %v2084_v13, %v1918_v7 }
 0x2a8   : > { %v2450_v54 = vpop.f32.mrf.mxu0  ;;  %v1901_v31 = vpop.f32.mrf.mxu1 }
 0x2a9   : > { %v1919_v10 = vadd.f32 %v1901_v31, %v5412_v41 }
 0x2aa   : > { %v3887_v5 = vpop.f32.mrf.mxu0  ;;  %v3771_v39 = vpop.f32.mrf.mxu1 }
 0x2ab   : > { %v5451_v6 = vadd.f32 %v2089_v26, %v1919_v10 }
 0x2ac   : > { %v2453_v32 = vpop.f32.mrf.mxu0  ;;  %v1904_v21 = vpop.f32.mrf.mxu1 }
 0x2ae   : > { %v3888_v48 = vpop.f32.mrf.mxu0  ;;  %v3772_v43 = vpop.f32.mrf.mxu1 }
 0x2b0   : > { %v2458_v60 = vpop.f32.mrf.mxu0  ;;  %v2247_v2 = vpop.f32.mrf.mxu1 }
 0x2b1   : > { %v2301_v59 = vadd.f32 %v2247_v2, %v5415_v4 }
 0x2b2   : > { %v3891_v9 = vpop.f32.mrf.mxu0  ;;  %v3835_v1 = vpop.f32.mrf.mxu1 }
 0x2b3   : > { %v2488_v13 = vadd.f32 %v2434_v37, %v2301_v59 }
 0x2b4   : > { %v2461_v41 = vpop.f32.mrf.mxu0  ;;  %v2250_v17 = vpop.f32.mrf.mxu1 }
 0x2b5   : > { %v2302_v26 = vadd.f32 %v2250_v17, %v5418_v8  ;;  %v2508_v25 = vadd.f32 %v5457_v45, %v2488_v13 }
 0x2b6   : > { %v3892_v29 = vpop.f32.mrf.mxu0  ;;  %v3836_v44 = vpop.f32.mrf.mxu1 }
 0x2b7   : > { %v2489_v62 = vadd.f32 %v2437_v57, %v2302_v26  ;;  %v2521_v42 = vmax.f32 %v2508_v25, 0.0 }
 0x2b8   : > { %v5461_v36 = vpop.f32.mrf.mxu0  ;;  %v2255_v4 = vpop.f32.mrf.mxu1 }
 0x2b9   : > { %v2509_v18 = vadd.f32 %v5457_v45, %v2489_v62  ;;  %v2303_v37 = vadd.f32 %v2255_v4, %v5421_v23 }
 0x2ba   : > { %v3895_v46 = vpop.f32.mrf.mxu0  ;;  %v3839_v24 = vpop.f32.mrf.mxu1 }
 0x2bb   : > { %v2522_v14 = vmax.f32 %v2509_v18, 0.0  ;;  %v2490_v7 = vadd.f32 %v2442_v30, %v2303_v37 }
 0x2bc   : > { %v2469_v12 = vpop.f32.mrf.mxu0  ;;  %v2258_v49 = vpop.f32.mrf.mxu1 }
 0x2bd   : > { %v2534_v8 = vpack.c.bf16 %v2522_v14, %v2521_v42  ;;  %v2304_v31 = vadd.f32 %v2258_v49, %v5424_v27  ;;  %v2510_v57 = vadd.f32 %v5457_v45, %v2490_v7 }
 0x2be   : > { %v3896_v10 = vpop.f32.mrf.mxu0  ;;  %v3840_v5 = vpop.f32.mrf.mxu1 }
 0x2bf   : > { %v2491_v39 = vadd.f32 %v2445_v20, %v2304_v31  ;;  %3922 = vmatmul.mubr.bf16.vlgmr.msra.gmra.mxu1 %v2534_v8  ;;  %v2523_v59 = vmax.f32 %v2510_v57, 0.0 }
 0x2c0   : > { %v2474_v21 = vpop.f32.mrf.mxu0  ;;  %v2263_v48 = vpop.f32.mrf.mxu1  ;;  %3925 = vmatprep.mubr.msk.bf16.mxu1 %vm4213_vm0, %v4212_v22 }
 0x2c1   : > { %v2511_v23 = vadd.f32 %v5457_v45, %v2491_v39  ;;  %v2305_v30 = vadd.f32 %v2263_v48, %v5427_v38 }
 0x2c2   : > { %v3899_v43 = vpop.f32.mrf.mxu0  ;;  %v3843_v2 = vpop.f32.mrf.mxu1 }
 0x2c3   : > { %v2524_v9 = vmax.f32 %v2511_v23, 0.0  ;;  %v2492_v27 = vadd.f32 %v2450_v54, %v2305_v30 }
 0x2c4   : > { %v2477_v1 = vpop.f32.mrf.mxu0  ;;  %v2266_v13 = vpop.f32.mrf.mxu1 }
 0x2c5   : > { %v2535_v17 = vpack.c.bf16 %v2524_v9, %v2523_v59  ;;  %v2306_v20 = vadd.f32 %v2266_v13, %v5430_v33  ;;  %v2512_v44 = vadd.f32 %v5457_v45, %v2492_v27 }
 0x2c6   : > { %v3900_v26 = vpop.f32.mrf.mxu0  ;;  %v3844_v29 = vpop.f32.mrf.mxu1 }
 0x2c7   : > { %v2493_v25 = vadd.f32 %v2453_v32, %v2306_v20  ;;  %3926 = vmatmul.mubr.bf16.gmra.mxu1 %v2535_v17  ;;  %v2525_v46 = vmax.f32 %v2512_v44, 0.0 }
 0x2c8   : > { %v2482_v62 = vpop.f32.mrf.mxu0  ;;  %v2271_v4 = vpop.f32.mrf.mxu1  ;;  %3929 = vmatprep.mubr.msk.bf16.mxu1 %vm4213_vm0, %v4212_v22 }
 0x2c9   : > { %v2513_v38 = vadd.f32 %v5457_v45, %v2493_v25  ;;  %v2307_v54 = vadd.f32 %v2271_v4, %v5433_v55 }
 0x2ca   : > { %v3903_v18 = vpop.f32.mrf.mxu0  ;;  %v3847_v37 = vpop.f32.mrf.mxu1 }
 0x2cb   : > { %v2526_v24 = vmax.f32 %v2513_v38, 0.0  ;;  %v2494_v33 = vadd.f32 %v2458_v60, %v2307_v54 }
 0x2cc   : > { %v2485_v42 = vpop.f32.mrf.mxu0  ;;  %v2274_v14 = vpop.f32.mrf.mxu1 }
 0x2cd   : > { %v2536_v7 = vpack.c.bf16 %v2526_v24, %v2525_v46  ;;  %v2308_v32 = vadd.f32 %v2274_v14, %v5436_v56  ;;  %v2514_v31 = vadd.f32 %v5457_v45, %v2494_v33  ;;  %v4144_v14 = vld [vmem:[%s5621_s8 + $0x20] sm:$0xff]  }
 0x2ce   : > { %v3904_v49 = vpop.f32.mrf.mxu0  ;;  %v3848_v8 = vpop.f32.mrf.mxu1 }
 0x2cf   : > { %v2495_v10 = vadd.f32 %v2461_v41, %v2308_v32  ;;  %3930 = vmatmul.mubr.bf16.gmra.mxu1 %v2536_v7  ;;  %v2527_v39 = vmax.f32 %v2514_v31, 0.0  ;;  %v4145_v7 = vld [vmem:[%s5621_s8 + $0x18] sm:$0xff]   ;;  %v4146_v32 = vld [vmem:[%s5621_s8 + $0x10] sm:$0xff]   ;;  %v4147_v49 = vld [vmem:[%s5621_s8 + $0x8] sm:$0xff]  }
 0x2d0   : > { %v2279_v5 = vpop.f32.mrf.mxu1  ;;  %3933 = vmatprep.mubr.msk.bf16.mxu1 %vm4213_vm0, %v4212_v22  ;;  %v4148_v8 = vld [vmem:[%s5621_s8] sm:$0xff]  }
 0x2d1   : > { %v2515_v55 = vadd.f32 %v5457_v45, %v2495_v10  ;;  %v2309_v57 = vadd.f32 %v2279_v5, %v5439_v19  ;;  %v5535_v31 = vld [vmem:[%s5620_s7] ss:$0 sm:$0xff] }
 0x2d2   : > { %v3851_v60 = vpop.f32.mrf.mxu1 }
 0x2d3   : > { %v2528_v48 = vmax.f32 %v2515_v55, 0.0  ;;  %v2496_v23 = vadd.f32 %v5461_v36, %v2309_v57 }
 0x2d4   : > { %v2282_v56 = vpop.f32.mrf.mxu1 }
 0x2d5   : > { %v2537_v30 = vpack.c.bf16 %v2528_v48, %v2527_v39  ;;  %v2310_v43 = vadd.f32 %v2282_v56, %v5442_v0  ;;  %v2516_v41 = vadd.f32 %v5457_v45, %v2496_v23 }
 0x2d6   : > { %v3852_v2 = vpop.f32.mrf.mxu1 }
 0x2d7   : > { %v2497_v59 = vadd.f32 %v2469_v12, %v2310_v43  ;;  %3934 = vmatmul.mubr.bf16.gmra.mxu1 %v2537_v30  ;;  %v2529_v17 = vmax.f32 %v2516_v41, 0.0 }
 0x2d8   : > { %v2287_v9 = vpop.f32.mrf.mxu1  ;;  %3937 = vmatprep.mubr.msk.bf16.mxu1 %vm4213_vm0, %v4212_v22 }
 0x2d9   : > { %v2517_v19 = vadd.f32 %v5457_v45, %v2497_v59  ;;  %v2311_v27 = vadd.f32 %v2287_v9, %v5445_v28 }
 0x2da   : > { %v3855_v13 = vpop.f32.mrf.mxu1 }
 0x2db   : > { %v2530_v36 = vmax.f32 %v2517_v19, 0.0  ;;  %v2498_v20 = vadd.f32 %v2474_v21, %v2311_v27 }
 0x2dc   : > { %v2290_v26 = vpop.f32.mrf.mxu1 }
 0x2dd   : > { %v2538_v29 = vpack.c.bf16 %v2530_v36, %v2529_v17  ;;  %v2312_v0 = vadd.f32 %v2290_v26, %v5448_v11  ;;  %v2518_v12 = vadd.f32 %v5457_v45, %v2498_v20  ;;  %v2827_v36 = vpop.permute.xlu0 %2826 }
 0x2de   : > { %v3856_v44 = vpop.f32.mrf.mxu1 }
 0x2df   : > { %v2499_v25 = vadd.f32 %v2477_v1, %v2312_v0  ;;  %3938 = vmatmul.mubr.bf16.gmra.mxu1 %v2538_v29  ;;  %v2531_v18 = vmax.f32 %v2518_v12, 0.0  ;;  %v2832_v0 = vpop.permute.xlu1 %2831 }
 0x2e0   : > { %v2295_v4 = vpop.f32.mrf.mxu1  ;;  %3941 = vmatprep.mubr.msk.bf16.mxu1 %vm4213_vm0, %v4212_v22 }
 0x2e1   : > { %v2519_v38 = vadd.f32 %v5457_v45, %v2499_v25  ;;  %v2313_v28 = vadd.f32 %v2295_v4, %v5451_v6  ;;  %v4141_v6 = vld [vmem:[%s5621_s8 + $0x38] sm:$0xff]  }
 0x2e2   : > { %v3859_v54 = vpop.f32.mrf.mxu1  ;;  %3950 = vmatpush3.bf16.msra.mxu1 %v4141_v6 }
 0x2e3   : > { %v2532_v21 = vmax.f32 %v2519_v38, 0.0  ;;  %v2500_v37 = vadd.f32 %v2482_v62, %v2313_v28  ;;  %3951 = vmatprep.subr.bf16.mxu1 %v4212_v22  ;;  %v4143_v62 = vld [vmem:[%s5621_s8 + $0x28] sm:$0xff]  }
 0x2e4   : > { %v2298_v46 = vpop.f32.mrf.mxu1 }
 0x2e5   : > { %v2539_v24 = vpack.c.bf16 %v2532_v21, %v2531_v18  ;;  %v2520_v11 = vadd.f32 %v5457_v45, %v2500_v37  ;;  %v4142_v45 = vld [vmem:[%s5621_s8 + $0x30] sm:$0xff]   ;;  %v2837_v21 = vpop.permute.xlu0 %2836 }
 0x2e6   : > { %v3860_v33 = vpop.f32.mrf.mxu1  ;;  %3952 = vmatpush3.bf16.msra.mxu1 %v4142_v45 }
 0x2e7   : > { %3942 = vmatmul.mubr.bf16.gmra.mxu1 %v2539_v24  ;;  %v2533_v1 = vmax.f32 %v2520_v11, 0.0  ;;  %3953 = vmatprep.subr.bf16.mxu1 %v4212_v22  ;;  %v2842_v11 = vpop.permute.xlu1 %2841 }
 0x2e8   : > { %3945 = vmatprep.mubr.msk.bf16.mxu1 %vm4213_vm0, %v4212_v22 }
 0x2e9   : > { %v2540_v42 = vpack.c.bf16 %v2533_v1, %v2533_v1 }
 0x2ea   : > { %3954 = vmatpush3.bf16.msra.mxu1 %v4143_v62 }
 0x2eb   : > { %3955 = vmatprep.subr.bf16.mxu1 %v4212_v22 }
 0x2ee   : > { %3956 = vmatpush3.bf16.msra.mxu1 %v4144_v14 }
 0x2ef   : > { %3946 = vmatmul.mubr.bf16.gmra.mxu1 %v2540_v42  ;;  %3957 = vmatprep.subr.bf16.mxu1 %v4212_v22 }
 0x2f0   : > { %3965 = vmatprep.mubr.msk.bf16.mxu1 %vm4213_vm0, %v4212_v22 }
 0x2f2   : > { %3958 = vmatpush3.bf16.msra.mxu1 %v4145_v7 }
 0x2f3   : > { %3959 = vmatprep.subr.bf16.mxu1 %v4212_v22 }
 0x2f6   : > { %3960 = vmatpush3.bf16.msra.mxu1 %v4146_v32 }
 0x2f7   : > { %3961 = vmatprep.subr.bf16.mxu1 %v4212_v22 }
 0x2fa   : > { %3962 = vmatpush3.bf16.msra.mxu1 %v4147_v49 }
 0x2fb   : > { %3963 = vmatprep.subr.bf16.mxu1 %v4212_v22 }
 0x2fe   : > { %3964 = vmatpush3.bf16.msra.mxu1 %v4148_v8 }
 0x37f   : > { %v2646_v10 = vpop.f32.mrf.mxu1 }
 0x380   : > { %v2647_v5 = vadd.f32 %v5535_v31, %v2646_v10 }
 0x381   : > { %v3923_v55 = vpop.f32.mrf.mxu1 }
 0x382   : > { %v2765_v60 = vadd.f32 %v4566_v58, %v2647_v5  ;;  %v2847_v55 = vpop.permute.xlu0 %2846 }
 0x383   : > { %v2649_v57 = vpop.f32.mrf.mxu1 }
 0x384   : > { %v2650_v39 = vadd.f32 %v5535_v31, %v2649_v57  ;;  %v2778_v22 = vmax.f32 %v2765_v60, 0.0 }
 0x385   : > { %v3924_v48 = vpop.f32.mrf.mxu1 }
 0x386   : > { %v2766_v23 = vadd.f32 %v4855_v51, %v2650_v39  ;;  %v2852_v39 = vpop.permute.xlu1 %2851 }
 0x387   : > { %v2654_v56 = vpop.f32.mrf.mxu1 }
 0x388   : > { %v2779_v30 = vmax.f32 %v2766_v23, 0.0  ;;  %v2655_v43 = vadd.f32 %v5535_v31, %v2654_v56 }
 0x389   : > { %v3927_v2 = vpop.f32.mrf.mxu1 }
 0x38a   : > { %v2791_v41 = vpack.c.bf16 %v2779_v30, %v2778_v22  ;;  %v2767_v9 = vadd.f32 %v4860_v50, %v2655_v43 }
 0x38b   : > { %v2657_v59 = vpop.f32.mrf.mxu1 }
 0x38c   : > { %v2658_v19 = vadd.f32 %v5535_v31, %v2657_v59  ;;  %v2811_v13 = vunpack.c.l.bf16 %v2791_v41  ;;  %v2812_v58 = vunpack.c.h.bf16 %v2791_v41  ;;  %v2780_v51 = vmax.f32 %v2767_v9, 0.0 }
 0x38d   : > { %v3928_v27 = vpop.f32.mrf.mxu1 }
 0x38e   : > { %v2768_v17 = vadd.f32 %v4865_v53, %v2658_v19  ;;  %v2889_v12 = vmul.f32 %v2827_v36, %v2811_v13  ;;  %v2890_v25 = vmul.f32 %v2832_v0, %v2812_v58  ;;  %v2857_v58 = vpop.permute.xlu0 %2856 }
 0x38f   : > { %v2662_v20 = vpop.f32.mrf.mxu1 }
 0x390   : > { %v2781_v26 = vmax.f32 %v2768_v17, 0.0  ;;  %v2663_v29 = vadd.f32 %v5535_v31, %v2662_v20  ;;  %v2902_v37 = vadd.f32 %v2890_v25, %v2889_v12  ;;  %v2862_v20 = vpop.permute.xlu1 %2861 }
 0x391   : > { %v3931_v44 = vpop.f32.mrf.mxu1 }
 0x392   : > { %v2792_v4 = vpack.c.bf16 %v2781_v26, %v2780_v51  ;;  %v2769_v50 = vadd.f32 %v4878_v61, %v2663_v29 }
 0x393   : > { %v2665_v38 = vpop.f32.mrf.mxu1 }
 0x394   : > { %v2813_v28 = vunpack.c.l.bf16 %v2792_v4  ;;  %v2814_v54 = vunpack.c.h.bf16 %v2792_v4  ;;  %v2666_v18 = vadd.f32 %v5535_v31, %v2665_v38  ;;  %v2782_v33 = vmax.f32 %v2769_v50, 0.0 }
 0x395   : > { %v3932_v53 = vpop.f32.mrf.mxu1 }
 0x396   : > { %v2891_v46 = vmul.f32 %v2837_v21, %v2813_v28  ;;  %v2770_v24 = vadd.f32 %v4882_v52, %v2666_v18  ;;  %v2892_v42 = vmul.f32 %v2842_v11, %v2814_v54  ;;  %v2867_v21 = vpop.permute.xlu0 %2866 }
 0x397   : > { %v2670_v1 = vpop.f32.mrf.mxu1 }
 0x398   : > { %v2903_v6 = vadd.f32 %v2902_v37, %v2891_v46  ;;  %v2783_v45 = vmax.f32 %v2770_v24, 0.0  ;;  %v2671_v62 = vadd.f32 %v5535_v31, %v2670_v1  ;;  %v2872_v46 = vpop.permute.xlu1 %2871 }
 0x399   : > { %v3935_v61 = vpop.f32.mrf.mxu1 }
 0x39a   : > { %v2904_v14 = vadd.f32 %v2903_v6, %v2892_v42  ;;  %v2793_v7 = vpack.c.bf16 %v2783_v45, %v2782_v33  ;;  %v2771_v32 = vadd.f32 %v4892_v15, %v2671_v62 }
 0x39b   : > { %v2673_v49 = vpop.f32.mrf.mxu1 }
 0x39c   : > { %v2815_v8 = vunpack.c.l.bf16 %v2793_v7  ;;  %v2816_v10 = vunpack.c.h.bf16 %v2793_v7  ;;  %v2674_v5 = vadd.f32 %v5535_v31, %v2673_v49  ;;  %v2784_v48 = vmax.f32 %v2771_v32, 0.0 }
 0x39d   : > { %v3936_v52 = vpop.f32.mrf.mxu1 }
 0x39e   : > { %v2893_v57 = vmul.f32 %v2847_v55, %v2815_v8  ;;  %v2772_v60 = vadd.f32 %v4895_v16, %v2674_v5  ;;  %v2894_v56 = vmul.f32 %v2852_v39, %v2816_v10  ;;  %v2882_v55 = vpop.permute.xlu1 %2881 }
 0x39f   : > { %v2678_v23 = vpop.f32.mrf.mxu1 }
 0x3a0   : > { %v2905_v22 = vadd.f32 %v2904_v14, %v2893_v57  ;;  %v2785_v30 = vmax.f32 %v2772_v60, 0.0  ;;  %v2679_v43 = vadd.f32 %v5535_v31, %v2678_v23  ;;  %v2877_v14 = vpop.permute.xlu0 %2876 }
 0x3a1   : > { %v3939_v2 = vpop.f32.mrf.mxu1 }
 0x3a2   : > { %v2906_v15 = vadd.f32 %v2905_v22, %v2894_v56  ;;  %v2794_v41 = vpack.c.bf16 %v2785_v30, %v2784_v48  ;;  %v2773_v59 = vadd.f32 %v4903_v47, %v2679_v43 }
 0x3a3   : > { %v2681_v9 = vpop.f32.mrf.mxu1 }
 0x3a4   : > { %v2817_v19 = vunpack.c.l.bf16 %v2794_v41  ;;  %v2818_v27 = vunpack.c.h.bf16 %v2794_v41  ;;  %v2682_v13 = vadd.f32 %v5535_v31, %v2681_v9  ;;  %v2786_v51 = vmax.f32 %v2773_v59, 0.0  ;;  %v2940_v59 = vld [vmem:[%s5622_s9] sm:$0x1] }
 0x3a5   : > { %v3940_v16 = vpop.f32.mrf.mxu1 }
 0x3a6   : > { %v2895_v17 = vmul.f32 %v2857_v58, %v2817_v19  ;;  %v2774_v36 = vadd.f32 %v4906_v63, %v2682_v13  ;;  %v2896_v29 = vmul.f32 %v2862_v20, %v2818_v27 }
 0x3a7   : > { %v2686_v26 = vpop.f32.mrf.mxu1 }
 0x3a8   : > { %v2907_v0 = vadd.f32 %v2906_v15, %v2895_v17  ;;  %v2787_v44 = vmax.f32 %v2774_v36, 0.0  ;;  %v2687_v12 = vadd.f32 %v5535_v31, %v2686_v26 }
 0x3a9   : > { %v3943_v25 = vpop.f32.mrf.mxu1 }
 0x3aa   : > { %v2908_v47 = vadd.f32 %v2907_v0, %v2896_v29  ;;  %v2795_v4 = vpack.c.bf16 %v2787_v44, %v2786_v51  ;;  %v2775_v50 = vadd.f32 %v4909_v3, %v2687_v12 }
 0x3ab   : > { %v2689_v38 = vpop.f32.mrf.mxu1 }
 0x3ac   : > { %v2819_v28 = vunpack.c.l.bf16 %v2795_v4  ;;  %v2820_v54 = vunpack.c.h.bf16 %v2795_v4  ;;  %v2690_v18 = vadd.f32 %v5535_v31, %v2689_v38  ;;  %v2788_v24 = vmax.f32 %v2775_v50, 0.0 }
 0x3ad   : > { %v3944_v63 = vpop.f32.mrf.mxu1 }
 0x3ae   : > { %v2897_v53 = vmul.f32 %v2867_v21, %v2819_v28  ;;  %v2776_v37 = vadd.f32 %v4915_v35, %v2690_v18  ;;  %v2898_v33 = vmul.f32 %v2872_v46, %v2820_v54 }
 0x3af   : > { %v2694_v11 = vpop.f32.mrf.mxu1 }
 0x3b0   : > { %v2909_v1 = vadd.f32 %v2908_v47, %v2897_v53  ;;  %v2789_v42 = vmax.f32 %v2776_v37, 0.0  ;;  %v2695_v6 = vadd.f32 %v5535_v31, %v2694_v11  ;;  %v2887_v31 = vpop.permute.xlu0 %2886 }
 0x3b1   : > { %v3947_v45 = vpop.f32.mrf.mxu1 }
 0x3b2   : > { %v2910_v3 = vadd.f32 %v2909_v1, %v2898_v33  ;;  %v2796_v62 = vpack.c.bf16 %v2789_v42, %v2788_v24  ;;  %v2777_v61 = vadd.f32 %v2750_v34, %v2695_v6 }
 0x3b3   : > { %v2697_v7 = vpop.f32.mrf.mxu1 }
 0x3b4   : > { %v2821_v32 = vunpack.c.l.bf16 %v2796_v62  ;;  %v2822_v49 = vunpack.c.h.bf16 %v2796_v62  ;;  %v2790_v8 = vmax.f32 %v2777_v61, 0.0 }
 0x3b5   : > { %v3948_v35 = vpop.f32.mrf.mxu1 }
 0x3b6   : > { %v2899_v10 = vmul.f32 %v2877_v14, %v2821_v32  ;;  %v2797_v5 = vpack.c.bf16 %v2790_v8, %v2790_v8  ;;  %v2900_v52 = vmul.f32 %v2882_v55, %v2822_v49 }
 0x3b8   : > { %v2911_v57 = vadd.f32 %v2910_v3, %v2899_v10  ;;  %v2823_v60 = vunpack.c.l.bf16 %v2797_v5 }
 0x3ba   : > { %v2901_v39 = vmul.f32 %v2887_v31, %v2823_v60  ;;  %v2912_v48 = vadd.f32 %v2911_v57, %v2900_v52 }
 0x3bc   : > { %v2914_v40 = vsel %vm2913_vm9, %v2901_v39, 0.0 }
 0x3bd   : > { %v2915_v34 = vadd.f32 %v2914_v40, %v2912_v48 }
 0x3bf   : > { %v2916_v23 = vrot.slane %v2915_v34, 4 }
 0x3c1   : > { %v2917_v56 = vadd.f32 %v2916_v23, %v2915_v34 }
 0x3c3   : > { %v2918_v22 = vrot.slane %v2917_v56, 2 }
 0x3c5   : > { %v2919_v30 = vadd.f32 %v2918_v22, %v2917_v56 }
 0x3c7   : > { %v2920_v43 = vrot.slane %v2919_v30, 1 }
 0x3c9   : > { %v2921_v2 = vadd.f32 %v2920_v43, %v2919_v30 }
 0x3cb   : > { %v2922_v15 = vmul.f32 0.015625, %v2921_v2 }
 0x3cd   : > { %v2923_v41 = vpack.c.bf16 %v2922_v15, %v2922_v15 }
 0x3cf   : > { %3966 = vmatmul.mubr.bf16.vlgmr.msra.gmra.mxu1 %v2923_v41 }
 0x48f   : > { %v3023_v9 = vpop.f32.mrf.mxu1 }
 0x490   : > { %v3024_v19 = vadd.f32 %v3023_v9, %v2940_v59 }
 0x491   : > { %v3967_v27 = vpop.f32.mrf.mxu1 }
 0x492   : > { %3029 = vst [vmem:[%s351_s27] sm:$0x1] %v3024_v19 }
 0x493   : > { %v3026_v13 = vpop.f32.mrf.mxu1 }
 0x494   : > { %4162 = shalt.err (!%p4159_p3)
}
 0x495   : > { %s4163_s21 = scalar_lea.hbm %s5572_s25, 16  ;;  %s4167_s27 = scalar_lea.hbm %s5623_s10, 32 }
 0x496   : > { %p4164_p4 = scmp.ne.s32.totalorder %s5572_s25, %s4163_s21  ;;  %p4168_p9 = scmp.lt.s32.totalorder %s5572_s25, %s5623_s10 }
 0x497   : > { %p4169_p10 = scmp.lt.s32.totalorder %s4167_s27, %s4163_s21 }
 0x498   : > { %p4165_p7 = pnand %p4164_p4, %p4308_p5 }
 0x499   : > { %p4170_p11 = por %p4169_p10, %p4168_p9 }
 0x49a   : > { %p4166_p8 = pneg %p4165_p7 }
 0x49c   : > { %p4171_p12 = pnand %p4170_p11, %p4166_p8 }
 0x49e   : > { %4174 = shalt.err (!%p4171_p12)
}
 0x49f   : > { %3985 = dma.vmem_to_hbm [thread:$0]  (%p4308_p5), %s5574_s28, 16, %s5572_s25, %s3031_s29   ;;  %v3968_v58 = vpop.f32.mrf.mxu1 }
 0x4a0 PF: > { %p3991_p13 = scmp.ge.s32.totalorder %s4209_s16, 2  ;;  %s3055_s30 = sand.u32 1, %s4197_s13  }
 0x4a1   : > { %s3056_s17 = scalar_lea.sflag [#allocation3], %s3055_s30 }
 0x4a2   : > { %p3988_p0 = pnand %p3991_p13, %p4312_p6 }
 0x4a4   : > { %p3989_p1 = pneg %p3988_p0 }
 0x4a6   : > { %4192 = dma.done.wait (%p3989_p1), %s3056_s17, 16  }
 0x4a7   : > { %4194 = vsyncadd (%p3989_p1), %s3056_s17, 4294967280  ;;  %s5627_s23 = sld [smem:[#allocation5_spill]]  ;;  %p20_p2 = scmp.ge.s32.totalorder %s4295_s19, 4  }
 0x4a8   : > { %s5628_s13 = smov %s4201_s14  ;;  %s5629_s14 = smov %s4205_s15 }
 0x4a9   : > { %s5631_s16 = smov %s4295_s19  ;;  %22 = sbr.rel (!%p20_p2) target bundleno = 3 (0x3), region = 103 }
 0x4ad   : > { %s5630_s15 = smov %s5627_s23 }
 0x4ae   :  { %3060 = vsyncpa [#allocation3], 1 }
 0x4af   :  { %3062 = vsyncpa [#allocation3 + $0x1], 1 }

</bundles_post_ra>
